<compile_context>
chip_gen: v7x
topology: tpu7x:2x2x1
jax: 0.10.0
libtpu: 0.0.40
codegen_flags: <defaults>
</compile_context>

<pallas_src>
import functools
from dataclasses import dataclass, field
from typing import Any, Dict, List

import jax
import jax.numpy as jnp
from jax.experimental import pallas as pl
from jax.experimental.pallas import tpu as pltpu


# ----------------------------- configs -----------------------------
@dataclass
class FeatureConfig:
    sample_rate: int = 1000
    audio_length_sec: float = 0.16
    window_size_ms: float = 30.0
    window_step_ms: float = 10.0
    method: str = "mfcc"
    n_mfcc: int = 16
    n_mels: int = 16


@dataclass
class ModelConfig:
    layers: List[Dict[str, Any]] = field(default_factory=lambda: [
        {"type": "conv2d", "filters": 8, "kernel_size": [3, 3], "activation": "relu"},
        {"type": "maxpool2d", "pool_size": [2, 2]},
        {"type": "conv2d", "filters": 16, "kernel_size": [3, 3], "activation": "relu"},
        {"type": "maxpool2d", "pool_size": [2, 2]},
        {"type": "flatten"},
        {"type": "dense", "units": 32, "activation": "relu"},
        {"type": "dense", "units": 1, "activation": "sigmoid"},
    ])


def compute_input_shape(fc: FeatureConfig):
    """Mirror SnoreDetectionModel._compute_input_shape."""
    if fc.method == "mfcc":
        n_features = fc.n_mfcc
    elif fc.method == "mel_spectrogram":
        n_features = fc.n_mels
    else:
        raise ValueError(f"Unsupported feature extraction method: {fc.method}")
    ms = 1000
    window_size_samples = int(fc.sample_rate * fc.window_size_ms / ms)
    window_step_samples = int(fc.sample_rate * fc.window_step_ms / ms)
    clip_length_samples = int(fc.sample_rate * fc.audio_length_sec)
    num_frames = (clip_length_samples - window_size_samples) // window_step_samples + 3
    return (1, n_features, num_frames)  # (C, H, W) = (1, 16, 16) with defaults


# ----------------------------- fused Pallas kernel -----------------------------
def _fused_forward_kernel(x_ref, w1_ref, b1_ref, w2_ref, b2_ref,
                          wd1_ref, bd1_ref, wd2_ref, bd2_ref,
                          o_ref,
                          cols1_ref, c1_ref, p1pad_ref, cols2_ref, c2_ref,
                          flat_ref,
                          *, dims):
    B, H, W, C1, C2, DH = dims      # B here is the per-grid-step batch tile
    H1, W1 = H // 2, W // 2         # after pool1
    H2, W2 = H1 // 2, W1 // 2       # after pool2
    f32 = jnp.float32
    taps = [(ki, kj) for ki in range(3) for kj in range(3)]

    # ---------- conv1 (Cin=1, 3x3, pad=1): im2col + ONE MXU matmul ----------
    # x_ref is already zero-padded on the host: (B, H+2, W+2, 1).
    for t, (ki, kj) in enumerate(taps):
        cols1_ref[:, :, :, t:t + 1] = x_ref[:, ki:ki + H, kj:kj + W, :]
    cols1 = cols1_ref[...].reshape(B * H * W, 9)
    a1 = jnp.dot(cols1, w1_ref[...], preferred_element_type=f32) + b1_ref[...]
    c1_ref[...] = a1.reshape(B, H, W, C1)

    # ---------- maxpool1 2x2 (+ deferred ReLU; relu commutes with max) ----------
    p00 = c1_ref[:, pl.ds(0, H1, 2), pl.ds(0, W1, 2), :]
    p01 = c1_ref[:, pl.ds(0, H1, 2), pl.ds(1, W1, 2), :]
    p10 = c1_ref[:, pl.ds(1, H1, 2), pl.ds(0, W1, 2), :]
    p11 = c1_ref[:, pl.ds(1, H1, 2), pl.ds(1, W1, 2), :]
    p1 = jnp.maximum(jnp.maximum(p00, p01), jnp.maximum(p10, p11))
    p1 = jnp.maximum(p1, 0.0)                                    # (B, H1, W1, C1)
    p1pad_ref[...] = jnp.zeros(p1pad_ref.shape, f32)
    p1pad_ref[:, 1:H1 + 1, 1:W1 + 1, :] = p1

    # ---------- conv2 (3x3, pad=1): im2col + ONE MXU matmul (K = 9*C1 = 72) ----------
    for t, (ki, kj) in enumerate(taps):
        cols2_ref[:, :, :, t * C1:(t + 1) * C1] = p1pad_ref[:, ki:ki + H1, kj:kj + W1, :]
    cols2 = cols2_ref[...].reshape(B * H1 * W1, 9 * C1)
    a2 = jnp.dot(cols2, w2_ref[...], preferred_element_type=f32) + b2_ref[...]
    c2_ref[...] = a2.reshape(B, H1, W1, C2)

    # ---------- maxpool2 + ReLU + flatten (h, w, c order) into flat_ref ----------
    for h in range(H2):
        for w in range(W2):
            v = jnp.maximum(
                jnp.maximum(c2_ref[:, 2 * h, 2 * w, :],
                            c2_ref[:, 2 * h, 2 * w + 1, :]),
                jnp.maximum(c2_ref[:, 2 * h + 1, 2 * w, :],
                            c2_ref[:, 2 * h + 1, 2 * w + 1, :]))
            idx = h * W2 + w
            flat_ref[:, idx * C2:(idx + 1) * C2] = jnp.maximum(v, 0.0)

    # ---------- dense1: ONE (B, H2*W2*C2) x (H2*W2*C2, DH) matmul ----------
    h1 = jnp.maximum(
        jnp.dot(flat_ref[...], wd1_ref[...], preferred_element_type=f32) + bd1_ref[...],
        0.0)                                                      # (B, DH)

    # ---------- dense2 (units=1): lane reduction + sigmoid ----------
    logits = jnp.sum(h1 * wd2_ref[...], axis=-1, keepdims=True) + bd2_ref[...]
    o_ref[...] = 1.0 / (1.0 + jnp.exp(-logits))


def _replicated_spec(shape):
    rank = len(shape)
    return pl.BlockSpec(shape, lambda i, _r=rank: (0,) * _r)


def fused_forward(kp, x_pad, *, batch_tile=None):
    B, Hp, Wp, _ = x_pad.shape
    H, W = Hp - 2, Wp - 2
    C1 = kp["b1"].shape[-1]
    C2 = kp["b2"].shape[-1]
    DH = kp["bd1"].shape[-1]
    H1, W1 = H // 2, W // 2
    H2, W2 = H1 // 2, W1 // 2

    # Optional batch tiling: only split when the tile divides B and satisfies
    # the sublane constraint; otherwise run the whole batch in one grid step.
    bt = B if batch_tile is None else int(batch_tile)
    if bt >= B or B % bt != 0 or bt % 8 != 0:
        bt = B
    grid = (B // bt,)

    dims = (bt, H, W, C1, C2, DH)
    weights = (kp["w1"], kp["b1"], kp["w2"], kp["b2"],
               kp["wd1"], kp["bd1"], kp["wd2"], kp["bd2"])
    in_specs = ([pl.BlockSpec((bt, Hp, Wp, 1), lambda i: (i, 0, 0, 0))]
                + [_replicated_spec(w.shape) for w in weights])

    return pl.pallas_call(
        functools.partial(_fused_forward_kernel, dims=dims),
        out_shape=jax.ShapeDtypeStruct((B, 1), jnp.float32),
        grid=grid,
        in_specs=in_specs,
        out_specs=pl.BlockSpec((bt, 1), lambda i: (i, 0)),
        scratch_shapes=[
            pltpu.VMEM((bt, H, W, 9), jnp.float32),               # conv1 im2col
            pltpu.VMEM((bt, H, W, C1), jnp.float32),              # conv1 pre-pool
            pltpu.VMEM((bt, H1 + 2, W1 + 2, C1), jnp.float32),    # pooled1, padded
            pltpu.VMEM((bt, H1, W1, 9 * C1), jnp.float32),        # conv2 im2col
            pltpu.VMEM((bt, H1, W1, C2), jnp.float32),            # conv2 pre-pool
            pltpu.VMEM((bt, H2 * W2 * C2), jnp.float32),          # pooled2, flattened
        ],
        compiler_params=pltpu.CompilerParams(
            dimension_semantics=("parallel",)),
    )(x_pad, *weights)


@jax.jit
def forward(kp, x):
    B, C, H, W = x.shape
    # C == 1, so NCHW -> NHWC is a pure metadata reshape (no data movement).
    x_nhwc = x.reshape(B, H, W, 1).astype(jnp.float32)
    # Zero-pad on the host/XLA side (review item): removes an in-kernel scratch
    # zero-fill + 1-lane-wide interior store; extra HBM traffic is negligible.
    x_pad = jnp.pad(x_nhwc, ((0, 0), (1, 1), (1, 1), (0, 0)))
    return fused_forward(kp, x_pad)


# ----------------------------- params -----------------------------
def init_params(model_config: ModelConfig, input_shape, key):
    """Deterministic init (uniform +-1/sqrt(fan_in), like torch defaults); torch layouts."""
    params = []
    C, H, W = input_shape
    in_channels = C
    in_features = None
    for layer in model_config.layers:
        if layer["type"] == "conv2d":
            cout = layer["filters"]
            kh, kw = layer["kernel_size"]
            key, k1, k2 = jax.random.split(key, 3)
            bound = 1.0 / float(jnp.sqrt(in_channels * kh * kw))
            w = jax.random.uniform(k1, (cout, in_channels, kh, kw), jnp.float32, -bound, bound)
            b = jax.random.uniform(k2, (cout,), jnp.float32, -bound, bound)
            params.append({"type": "conv2d", "w": w, "b": b,
                           "act": layer.get("activation", "none")})
            in_channels = cout
            H = H + 2 - kh + 1
            W = W + 2 - kw + 1
        elif layer["type"] == "maxpool2d":
            ph, pw = layer["pool_size"]
            params.append({"type": "maxpool2d"})
            H //= ph
            W //= pw
        elif layer["type"] == "flatten":
            in_features = in_channels * H * W
            params.append({"type": "flatten"})
        elif layer["type"] == "dense":
            units = layer["units"]
            key, k1, k2 = jax.random.split(key, 3)
            bound = 1.0 / float(jnp.sqrt(in_features))
            w = jax.random.uniform(k1, (units, in_features), jnp.float32, -bound, bound)
            b = jax.random.uniform(k2, (units,), jnp.float32, -bound, bound)
            params.append({"type": "dense", "w": w, "b": b,
                           "act": layer.get("activation", "none")})
            in_features = units
    return params


def prepare_kernel_params(params):
    """One-time conversion of torch-layout params into kernel matmul layouts
    (hoisted out of the hot path)."""
    convs = [p for p in params if p["type"] == "conv2d"]
    denses = [p for p in params if p["type"] == "dense"]
    assert len(convs) == 2 and len(denses) == 2, "kernel expects conv-pool-conv-pool-flatten-dense-dense"
    c1, c2 = convs
    d1, d2 = denses
    assert c1["act"] == "relu" and c2["act"] == "relu"
    assert d1["act"] == "relu" and d2["act"] == "sigmoid"
    cout1, cin1, kh1, kw1 = c1["w"].shape
    cout2, cin2, kh2, kw2 = c2["w"].shape
    assert (cin1, kh1, kw1) == (1, 3, 3) and (kh2, kw2) == (3, 3) and cin2 == cout1
    units1, feat = d1["w"].shape
    h2 = w2 = int(round((feat // cout2) ** 0.5))
    assert cout2 * h2 * w2 == feat
    kp = {
        # conv1: (Cout,1,3,3) -> (9, Cout)      [rows = tap ki*3+kj]
        "w1": jnp.transpose(c1["w"], (2, 3, 1, 0)).reshape(kh1 * kw1, cout1),
        "b1": c1["b"].reshape(1, cout1),
        # conv2: (Cout,Cin,3,3) -> (9*Cin, Cout) [rows = tap*Cin + cin]
        "w2": jnp.transpose(c2["w"], (2, 3, 1, 0)).reshape(kh2 * kw2 * cin2, cout2),
        "b2": c2["b"].reshape(1, cout2),
        # dense1: (units, C*H*W) torch-flatten order -> (H*W*C, units)
        #         [rows = h*W2*C2 + w*C2 + c, matching the kernel's flatten order]
        "wd1": jnp.transpose(d1["w"].reshape(units1, cout2, h2, w2),
                             (2, 3, 1, 0)).reshape(h2 * w2 * cout2, units1),
        "bd1": d1["b"].reshape(1, units1),
        # dense2: (1, units) kept as a row for a lane-reduction matvec
        "wd2": d2["w"].reshape(1, units1),
        "bd2": d2["b"].reshape(1, 1),
    }
    return jax.tree_util.tree_map(lambda a: a.astype(jnp.float32), kp)


# ----------------------------- pure-JAX reference -----------------------------
def reference_forward(params, x):
    y = x.astype(jnp.float32)
    for p in params:
        if p["type"] == "conv2d":
            y = jax.lax.conv_general_dilated(
                y, p["w"], window_strides=(1, 1), padding=((1, 1), (1, 1)),
                dimension_numbers=("NCHW", "OIHW", "NCHW"),
                precision=jax.lax.Precision.HIGHEST)
            y = y + p["b"].reshape(1, -1, 1, 1)
            if p["act"] == "relu":
                y = jnp.maximum(y, 0.0)
        elif p["type"] == "maxpool2d":
            y = jax.lax.reduce_window(y, -jnp.inf, jax.lax.max,
                                      (1, 1, 2, 2), (1, 1, 2, 2), "VALID")
        elif p["type"] == "flatten":
            y = y.reshape(y.shape[0], -1)
        elif p["type"] == "dense":
            y = jnp.dot(y, p["w"].T, precision=jax.lax.Precision.HIGHEST) + p["b"]
            if p["act"] == "relu":
                y = jnp.maximum(y, 0.0)
            elif p["act"] == "sigmoid":
                y = jax.nn.sigmoid(y)
    return y


if __name__ == "__main__":
    feature_config = FeatureConfig()
    model_config = ModelConfig()
    input_shape = compute_input_shape(feature_config)      # (1, 16, 16)

    key = jax.random.PRNGKey(0)
    key, xkey = jax.random.split(key)
    B = 2
    x = jax.random.normal(xkey, (B,) + input_shape, dtype=jnp.float32)  # (2, 1, 16, 16)

    params = init_params(model_config, input_shape, key)
    kparams = prepare_kernel_params(params)

    out = forward(kparams, x)
    out = jax.block_until_ready(out)
    assert out.shape == (B, 1), out.shape
    assert bool(jnp.all((out >= 0.0) & (out <= 1.0)))       # sigmoid output range

    # correctness vs. a pure-JAX/XLA reference of the same PyTorch semantics
    ref = jax.block_until_ready(reference_forward(params, x))
    assert jnp.allclose(out, ref, atol=2e-3, rtol=2e-3), (out, ref)

    print("KERNEL_OK")
</pallas_src>

<mosaic_0001>
module attributes {stable_mosaic.version = 11 : i64} {
  func.func @_fused_forward_kernel(%arg0: i32, %arg1: memref<2x18x18x1xf32, #tpu.memory_space<vmem>>, %arg2: memref<9x8xf32, #tpu.memory_space<vmem>>, %arg3: memref<1x8xf32, #tpu.memory_space<vmem>>, %arg4: memref<72x16xf32, #tpu.memory_space<vmem>>, %arg5: memref<1x16xf32, #tpu.memory_space<vmem>>, %arg6: memref<256x32xf32, #tpu.memory_space<vmem>>, %arg7: memref<1x32xf32, #tpu.memory_space<vmem>>, %arg8: memref<1x32xf32, #tpu.memory_space<vmem>>, %arg9: memref<1x1xf32, #tpu.memory_space<vmem>>, %arg10: memref<2x1xf32, #tpu.memory_space<vmem>>, %arg11: memref<2x16x16x9xf32, #tpu.memory_space<vmem>>, %arg12: memref<2x16x16x8xf32, #tpu.memory_space<vmem>>, %arg13: memref<2x10x10x8xf32, #tpu.memory_space<vmem>>, %arg14: memref<2x8x8x72xf32, #tpu.memory_space<vmem>>, %arg15: memref<2x8x8x16xf32, #tpu.memory_space<vmem>>, %arg16: memref<2x256xf32, #tpu.memory_space<vmem>>) attributes {dimension_semantics = [#tpu.dimension_semantics<parallel>], iteration_bounds = array<i64: 1>, scalar_prefetch = 0 : i64, scratch_operands = 6 : i64, tpu.core_type = #tpu.core_type<tc>, window_params = [{transform_indices = @transform_0, window_bounds = array<i64: 2, 18, 18, 1>}, {pipeline_mode = #tpu.pipeline_mode<synchronous>, transform_indices = @transform_1, window_bounds = array<i64: 9, 8>}, {pipeline_mode = #tpu.pipeline_mode<synchronous>, transform_indices = @transform_2, window_bounds = array<i64: 1, 8>}, {pipeline_mode = #tpu.pipeline_mode<synchronous>, transform_indices = @transform_3, window_bounds = array<i64: 72, 16>}, {pipeline_mode = #tpu.pipeline_mode<synchronous>, transform_indices = @transform_4, window_bounds = array<i64: 1, 16>}, {pipeline_mode = #tpu.pipeline_mode<synchronous>, transform_indices = @transform_5, window_bounds = array<i64: 256, 32>}, {pipeline_mode = #tpu.pipeline_mode<synchronous>, transform_indices = @transform_6, window_bounds = array<i64: 1, 32>}, {pipeline_mode = #tpu.pipeline_mode<synchronous>, transform_indices = @transform_7, window_bounds = array<i64: 1, 32>}, {pipeline_mode = #tpu.pipeline_mode<synchronous>, transform_indices = @transform_8, window_bounds = array<i64: 1, 1>}, {transform_indices = @transform_9, window_bounds = array<i64: 2, 1>}]} {
    %c0 = arith.constant 0 : index
    %c0_0 = arith.constant 0 : index
    %c0_1 = arith.constant 0 : index
    %c0_2 = arith.constant 0 : index
    %0 = vector.load %arg1[%c0, %c0_0, %c0_1, %c0_2] : memref<2x18x18x1xf32, #tpu.memory_space<vmem>>, vector<2x16x16x1xf32>
    %c0_3 = arith.constant 0 : index
    %c0_4 = arith.constant 0 : index
    %c0_5 = arith.constant 0 : index
    %c0_6 = arith.constant 0 : index
    %1 = vector.load %arg11[%c0_3, %c0_4, %c0_5, %c0_6] : memref<2x16x16x9xf32, #tpu.memory_space<vmem>>, vector<2x16x16x1xf32>
    tpu.vector_store %arg11[%c0_3, %c0_4, %c0_5, %c0_6], %0 {strides = array<i32>} : memref<2x16x16x9xf32, #tpu.memory_space<vmem>>, vector<2x16x16x1xf32>,
    %c0_7 = arith.constant 0 : index
    %c0_8 = arith.constant 0 : index
    %c1 = arith.constant 1 : index
    %c0_9 = arith.constant 0 : index
    %2 = vector.load %arg1[%c0_7, %c0_8, %c1, %c0_9] : memref<2x18x18x1xf32, #tpu.memory_space<vmem>>, vector<2x16x16x1xf32>
    %c0_10 = arith.constant 0 : index
    %c0_11 = arith.constant 0 : index
    %c0_12 = arith.constant 0 : index
    %c1_13 = arith.constant 1 : index
    %3 = vector.load %arg11[%c0_10, %c0_11, %c0_12, %c1_13] : memref<2x16x16x9xf32, #tpu.memory_space<vmem>>, vector<2x16x16x1xf32>
    tpu.vector_store %arg11[%c0_10, %c0_11, %c0_12, %c1_13], %2 {strides = array<i32>} : memref<2x16x16x9xf32, #tpu.memory_space<vmem>>, vector<2x16x16x1xf32>,
    %c0_14 = arith.constant 0 : index
    %c0_15 = arith.constant 0 : index
    %c2 = arith.constant 2 : index
    %c0_16 = arith.constant 0 : index
    %4 = vector.load %arg1[%c0_14, %c0_15, %c2, %c0_16] : memref<2x18x18x1xf32, #tpu.memory_space<vmem>>, vector<2x16x16x1xf32>
    %c0_17 = arith.constant 0 : index
    %c0_18 = arith.constant 0 : index
    %c0_19 = arith.constant 0 : index
    %c2_20 = arith.constant 2 : index
    %5 = vector.load %arg11[%c0_17, %c0_18, %c0_19, %c2_20] : memref<2x16x16x9xf32, #tpu.memory_space<vmem>>, vector<2x16x16x1xf32>
    tpu.vector_store %arg11[%c0_17, %c0_18, %c0_19, %c2_20], %4 {strides = array<i32>} : memref<2x16x16x9xf32, #tpu.memory_space<vmem>>, vector<2x16x16x1xf32>,
    %c0_21 = arith.constant 0 : index
    %c1_22 = arith.constant 1 : index
    %c0_23 = arith.constant 0 : index
    %c0_24 = arith.constant 0 : index
    %6 = vector.load %arg1[%c0_21, %c1_22, %c0_23, %c0_24] : memref<2x18x18x1xf32, #tpu.memory_space<vmem>>, vector<2x16x16x1xf32>
    %c0_25 = arith.constant 0 : index
    %c0_26 = arith.constant 0 : index
    %c0_27 = arith.constant 0 : index
    %c3 = arith.constant 3 : index
    %7 = vector.load %arg11[%c0_25, %c0_26, %c0_27, %c3] : memref<2x16x16x9xf32, #tpu.memory_space<vmem>>, vector<2x16x16x1xf32>
    tpu.vector_store %arg11[%c0_25, %c0_26, %c0_27, %c3], %6 {strides = array<i32>} : memref<2x16x16x9xf32, #tpu.memory_space<vmem>>, vector<2x16x16x1xf32>,
    %c0_28 = arith.constant 0 : index
    %c1_29 = arith.constant 1 : index
    %c1_30 = arith.constant 1 : index
    %c0_31 = arith.constant 0 : index
    %8 = vector.load %arg1[%c0_28, %c1_29, %c1_30, %c0_31] : memref<2x18x18x1xf32, #tpu.memory_space<vmem>>, vector<2x16x16x1xf32>
    %c0_32 = arith.constant 0 : index
    %c0_33 = arith.constant 0 : index
    %c0_34 = arith.constant 0 : index
    %c4 = arith.constant 4 : index
    %9 = vector.load %arg11[%c0_32, %c0_33, %c0_34, %c4] : memref<2x16x16x9xf32, #tpu.memory_space<vmem>>, vector<2x16x16x1xf32>
    tpu.vector_store %arg11[%c0_32, %c0_33, %c0_34, %c4], %8 {strides = array<i32>} : memref<2x16x16x9xf32, #tpu.memory_space<vmem>>, vector<2x16x16x1xf32>,
    %c0_35 = arith.constant 0 : index
    %c1_36 = arith.constant 1 : index
    %c2_37 = arith.constant 2 : index
    %c0_38 = arith.constant 0 : index
    %10 = vector.load %arg1[%c0_35, %c1_36, %c2_37, %c0_38] : memref<2x18x18x1xf32, #tpu.memory_space<vmem>>, vector<2x16x16x1xf32>
    %c0_39 = arith.constant 0 : index
    %c0_40 = arith.constant 0 : index
    %c0_41 = arith.constant 0 : index
    %c5 = arith.constant 5 : index
    %11 = vector.load %arg11[%c0_39, %c0_40, %c0_41, %c5] : memref<2x16x16x9xf32, #tpu.memory_space<vmem>>, vector<2x16x16x1xf32>
    tpu.vector_store %arg11[%c0_39, %c0_40, %c0_41, %c5], %10 {strides = array<i32>} : memref<2x16x16x9xf32, #tpu.memory_space<vmem>>, vector<2x16x16x1xf32>,
    %c0_42 = arith.constant 0 : index
    %c2_43 = arith.constant 2 : index
    %c0_44 = arith.constant 0 : index
    %c0_45 = arith.constant 0 : index
    %12 = vector.load %arg1[%c0_42, %c2_43, %c0_44, %c0_45] : memref<2x18x18x1xf32, #tpu.memory_space<vmem>>, vector<2x16x16x1xf32>
    %c0_46 = arith.constant 0 : index
    %c0_47 = arith.constant 0 : index
    %c0_48 = arith.constant 0 : index
    %c6 = arith.constant 6 : index
    %13 = vector.load %arg11[%c0_46, %c0_47, %c0_48, %c6] : memref<2x16x16x9xf32, #tpu.memory_space<vmem>>, vector<2x16x16x1xf32>
    tpu.vector_store %arg11[%c0_46, %c0_47, %c0_48, %c6], %12 {strides = array<i32>} : memref<2x16x16x9xf32, #tpu.memory_space<vmem>>, vector<2x16x16x1xf32>,
    %c0_49 = arith.constant 0 : index
    %c2_50 = arith.constant 2 : index
    %c1_51 = arith.constant 1 : index
    %c0_52 = arith.constant 0 : index
    %14 = vector.load %arg1[%c0_49, %c2_50, %c1_51, %c0_52] : memref<2x18x18x1xf32, #tpu.memory_space<vmem>>, vector<2x16x16x1xf32>
    %c0_53 = arith.constant 0 : index
    %c0_54 = arith.constant 0 : index
    %c0_55 = arith.constant 0 : index
    %c7 = arith.constant 7 : index
    %15 = vector.load %arg11[%c0_53, %c0_54, %c0_55, %c7] : memref<2x16x16x9xf32, #tpu.memory_space<vmem>>, vector<2x16x16x1xf32>
    tpu.vector_store %arg11[%c0_53, %c0_54, %c0_55, %c7], %14 {strides = array<i32>} : memref<2x16x16x9xf32, #tpu.memory_space<vmem>>, vector<2x16x16x1xf32>,
    %c0_56 = arith.constant 0 : index
    %c2_57 = arith.constant 2 : index
    %c2_58 = arith.constant 2 : index
    %c0_59 = arith.constant 0 : index
    %16 = vector.load %arg1[%c0_56, %c2_57, %c2_58, %c0_59] : memref<2x18x18x1xf32, #tpu.memory_space<vmem>>, vector<2x16x16x1xf32>
    %c0_60 = arith.constant 0 : index
    %c0_61 = arith.constant 0 : index
    %c0_62 = arith.constant 0 : index
    %c8 = arith.constant 8 : index
    %17 = vector.load %arg11[%c0_60, %c0_61, %c0_62, %c8] : memref<2x16x16x9xf32, #tpu.memory_space<vmem>>, vector<2x16x16x1xf32>
    tpu.vector_store %arg11[%c0_60, %c0_61, %c0_62, %c8], %16 {strides = array<i32>} : memref<2x16x16x9xf32, #tpu.memory_space<vmem>>, vector<2x16x16x1xf32>,
    %c0_63 = arith.constant 0 : index
    %c0_64 = arith.constant 0 : index
    %c0_65 = arith.constant 0 : index
    %c0_66 = arith.constant 0 : index
    %18 = vector.load %arg11[%c0_63, %c0_64, %c0_65, %c0_66] : memref<2x16x16x9xf32, #tpu.memory_space<vmem>>, vector<2x16x16x9xf32>
    %19 = vector.shape_cast %18 : vector<2x16x16x9xf32> to vector<512x9xf32>
    %c0_67 = arith.constant 0 : index
    %c0_68 = arith.constant 0 : index
    %20 = vector.load %arg2[%c0_67, %c0_68] : memref<9x8xf32, #tpu.memory_space<vmem>>, vector<9x8xf32>
    %cst = arith.constant dense<0.000000e+00> : vector<512x8xf32>
    %21 = tpu.matmul %19, %20, %cst {dimension_numbers = #tpu.dot_dimension_numbers<[1], [0], [0], [1], [0, 0, 1, 1], [], []>} : vector<512x9xf32>, vector<9x8xf32>, vector<512x8xf32> -> vector<512x8xf32>
    %c0_69 = arith.constant 0 : index
    %c0_70 = arith.constant 0 : index
    %22 = vector.load %arg3[%c0_69, %c0_70] : memref<1x8xf32, #tpu.memory_space<vmem>>, vector<1x8xf32>
    %23 = vector.broadcast %22 : vector<1x8xf32> to vector<512x8xf32>
    %24 = arith.addf %21, %23 : vector<512x8xf32>
    %25 = vector.shape_cast %24 : vector<512x8xf32> to vector<2x16x16x8xf32>
    %c0_71 = arith.constant 0 : index
    %c0_72 = arith.constant 0 : index
    %c0_73 = arith.constant 0 : index
    %c0_74 = arith.constant 0 : index
    %26 = vector.load %arg12[%c0_71, %c0_72, %c0_73, %c0_74] : memref<2x16x16x8xf32, #tpu.memory_space<vmem>>, vector<2x16x16x8xf32>
    tpu.vector_store %arg12[%c0_71, %c0_72, %c0_73, %c0_74], %25 {strides = array<i32>} : memref<2x16x16x8xf32, #tpu.memory_space<vmem>>, vector<2x16x16x8xf32>,
    %c0_75 = arith.constant 0 : index
    %c0_76 = arith.constant 0 : index
    %c0_77 = arith.constant 0 : index
    %c0_78 = arith.constant 0 : index
    %27 = tpu.strided_load %arg12[%c0_75, %c0_76, %c0_77, %c0_78] {strides = array<i32: 1, 2, 2, 1>} : memref<2x16x16x8xf32, #tpu.memory_space<vmem>>, vector<2x8x8x8xf32>
    %c0_79 = arith.constant 0 : index
    %c0_80 = arith.constant 0 : index
    %c1_81 = arith.constant 1 : index
    %c0_82 = arith.constant 0 : index
    %28 = tpu.strided_load %arg12[%c0_79, %c0_80, %c1_81, %c0_82] {strides = array<i32: 1, 2, 2, 1>} : memref<2x16x16x8xf32, #tpu.memory_space<vmem>>, vector<2x8x8x8xf32>
    %c0_83 = arith.constant 0 : index
    %c1_84 = arith.constant 1 : index
    %c0_85 = arith.constant 0 : index
    %c0_86 = arith.constant 0 : index
    %29 = tpu.strided_load %arg12[%c0_83, %c1_84, %c0_85, %c0_86] {strides = array<i32: 1, 2, 2, 1>} : memref<2x16x16x8xf32, #tpu.memory_space<vmem>>, vector<2x8x8x8xf32>
    %c0_87 = arith.constant 0 : index
    %c1_88 = arith.constant 1 : index
    %c1_89 = arith.constant 1 : index
    %c0_90 = arith.constant 0 : index
    %30 = tpu.strided_load %arg12[%c0_87, %c1_88, %c1_89, %c0_90] {strides = array<i32: 1, 2, 2, 1>} : memref<2x16x16x8xf32, #tpu.memory_space<vmem>>, vector<2x8x8x8xf32>
    %31 = arith.maximumf %27, %28 : vector<2x8x8x8xf32>
    %32 = arith.maximumf %29, %30 : vector<2x8x8x8xf32>
    %33 = arith.maximumf %31, %32 : vector<2x8x8x8xf32>
    %cst_91 = arith.constant 0.000000e+00 : f32
    %34 = vector.broadcast %cst_91 : f32 to vector<2x8x8x8xf32>
    %35 = arith.maximumf %33, %34 : vector<2x8x8x8xf32>
    %cst_92 = arith.constant 0.000000e+00 : f32
    %36 = vector.broadcast %cst_92 : f32 to vector<2x10x10x8xf32>
    %c0_93 = arith.constant 0 : index
    %c0_94 = arith.constant 0 : index
    %c0_95 = arith.constant 0 : index
    %c0_96 = arith.constant 0 : index
    %37 = vector.load %arg13[%c0_93, %c0_94, %c0_95, %c0_96] : memref<2x10x10x8xf32, #tpu.memory_space<vmem>>, vector<2x10x10x8xf32>
    tpu.vector_store %arg13[%c0_93, %c0_94, %c0_95, %c0_96], %36 {strides = array<i32>} : memref<2x10x10x8xf32, #tpu.memory_space<vmem>>, vector<2x10x10x8xf32>,
    %c0_97 = arith.constant 0 : index
    %c1_98 = arith.constant 1 : index
    %c1_99 = arith.constant 1 : index
    %c0_100 = arith.constant 0 : index
    %38 = vector.load %arg13[%c0_97, %c1_98, %c1_99, %c0_100] : memref<2x10x10x8xf32, #tpu.memory_space<vmem>>, vector<2x8x8x8xf32>
    tpu.vector_store %arg13[%c0_97, %c1_98, %c1_99, %c0_100], %35 {strides = array<i32>} : memref<2x10x10x8xf32, #tpu.memory_space<vmem>>, vector<2x8x8x8xf32>,
    %c0_101 = arith.constant 0 : index
    %c0_102 = arith.constant 0 : index
    %c0_103 = arith.constant 0 : index
    %c0_104 = arith.constant 0 : index
    %39 = vector.load %arg13[%c0_101, %c0_102, %c0_103, %c0_104] : memref<2x10x10x8xf32, #tpu.memory_space<vmem>>, vector<2x8x8x8xf32>
    %c0_105 = arith.constant 0 : index
    %c0_106 = arith.constant 0 : index
    %c0_107 = arith.constant 0 : index
    %c0_108 = arith.constant 0 : index
    %40 = vector.load %arg14[%c0_105, %c0_106, %c0_107, %c0_108] : memref<2x8x8x72xf32, #tpu.memory_space<vmem>>, vector<2x8x8x8xf32>
    tpu.vector_store %arg14[%c0_105, %c0_106, %c0_107, %c0_108], %39 {strides = array<i32>} : memref<2x8x8x72xf32, #tpu.memory_space<vmem>>, vector<2x8x8x8xf32>,
    %c0_109 = arith.constant 0 : index
    %c0_110 = arith.constant 0 : index
    %c1_111 = arith.constant 1 : index
    %c0_112 = arith.constant 0 : index
    %41 = vector.load %arg13[%c0_109, %c0_110, %c1_111, %c0_112] : memref<2x10x10x8xf32, #tpu.memory_space<vmem>>, vector<2x8x8x8xf32>
    %c0_113 = arith.constant 0 : index
    %c0_114 = arith.constant 0 : index
    %c0_115 = arith.constant 0 : index
    %c8_116 = arith.constant 8 : index
    %42 = vector.load %arg14[%c0_113, %c0_114, %c0_115, %c8_116] : memref<2x8x8x72xf32, #tpu.memory_space<vmem>>, vector<2x8x8x8xf32>
    tpu.vector_store %arg14[%c0_113, %c0_114, %c0_115, %c8_116], %41 {strides = array<i32>} : memref<2x8x8x72xf32, #tpu.memory_space<vmem>>, vector<2x8x8x8xf32>,
    %c0_117 = arith.constant 0 : index
    %c0_118 = arith.constant 0 : index
    %c2_119 = arith.constant 2 : index
    %c0_120 = arith.constant 0 : index
    %43 = vector.load %arg13[%c0_117, %c0_118, %c2_119, %c0_120] : memref<2x10x10x8xf32, #tpu.memory_space<vmem>>, vector<2x8x8x8xf32>
    %c0_121 = arith.constant 0 : index
    %c0_122 = arith.constant 0 : index
    %c0_123 = arith.constant 0 : index
    %c16 = arith.constant 16 : index
    %44 = vector.load %arg14[%c0_121, %c0_122, %c0_123, %c16] : memref<2x8x8x72xf32, #tpu.memory_space<vmem>>, vector<2x8x8x8xf32>
    tpu.vector_store %arg14[%c0_121, %c0_122, %c0_123, %c16], %43 {strides = array<i32>} : memref<2x8x8x72xf32, #tpu.memory_space<vmem>>, vector<2x8x8x8xf32>,
    %c0_124 = arith.constant 0 : index
    %c1_125 = arith.constant 1 : index
    %c0_126 = arith.constant 0 : index
    %c0_127 = arith.constant 0 : index
    %45 = vector.load %arg13[%c0_124, %c1_125, %c0_126, %c0_127] : memref<2x10x10x8xf32, #tpu.memory_space<vmem>>, vector<2x8x8x8xf32>
    %c0_128 = arith.constant 0 : index
    %c0_129 = arith.constant 0 : index
    %c0_130 = arith.constant 0 : index
    %c24 = arith.constant 24 : index
    %46 = vector.load %arg14[%c0_128, %c0_129, %c0_130, %c24] : memref<2x8x8x72xf32, #tpu.memory_space<vmem>>, vector<2x8x8x8xf32>
    tpu.vector_store %arg14[%c0_128, %c0_129, %c0_130, %c24], %45 {strides = array<i32>} : memref<2x8x8x72xf32, #tpu.memory_space<vmem>>, vector<2x8x8x8xf32>,
    %c0_131 = arith.constant 0 : index
    %c1_132 = arith.constant 1 : index
    %c1_133 = arith.constant 1 : index
    %c0_134 = arith.constant 0 : index
    %47 = vector.load %arg13[%c0_131, %c1_132, %c1_133, %c0_134] : memref<2x10x10x8xf32, #tpu.memory_space<vmem>>, vector<2x8x8x8xf32>
    %c0_135 = arith.constant 0 : index
    %c0_136 = arith.constant 0 : index
    %c0_137 = arith.constant 0 : index
    %c32 = arith.constant 32 : index
    %48 = vector.load %arg14[%c0_135, %c0_136, %c0_137, %c32] : memref<2x8x8x72xf32, #tpu.memory_space<vmem>>, vector<2x8x8x8xf32>
    tpu.vector_store %arg14[%c0_135, %c0_136, %c0_137, %c32], %47 {strides = array<i32>} : memref<2x8x8x72xf32, #tpu.memory_space<vmem>>, vector<2x8x8x8xf32>,
    %c0_138 = arith.constant 0 : index
    %c1_139 = arith.constant 1 : index
    %c2_140 = arith.constant 2 : index
    %c0_141 = arith.constant 0 : index
    %49 = vector.load %arg13[%c0_138, %c1_139, %c2_140, %c0_141] : memref<2x10x10x8xf32, #tpu.memory_space<vmem>>, vector<2x8x8x8xf32>
    %c0_142 = arith.constant 0 : index
    %c0_143 = arith.constant 0 : index
    %c0_144 = arith.constant 0 : index
    %c40 = arith.constant 40 : index
    %50 = vector.load %arg14[%c0_142, %c0_143, %c0_144, %c40] : memref<2x8x8x72xf32, #tpu.memory_space<vmem>>, vector<2x8x8x8xf32>
    tpu.vector_store %arg14[%c0_142, %c0_143, %c0_144, %c40], %49 {strides = array<i32>} : memref<2x8x8x72xf32, #tpu.memory_space<vmem>>, vector<2x8x8x8xf32>,
    %c0_145 = arith.constant 0 : index
    %c2_146 = arith.constant 2 : index
    %c0_147 = arith.constant 0 : index
    %c0_148 = arith.constant 0 : index
    %51 = vector.load %arg13[%c0_145, %c2_146, %c0_147, %c0_148] : memref<2x10x10x8xf32, #tpu.memory_space<vmem>>, vector<2x8x8x8xf32>
    %c0_149 = arith.constant 0 : index
    %c0_150 = arith.constant 0 : index
    %c0_151 = arith.constant 0 : index
    %c48 = arith.constant 48 : index
    %52 = vector.load %arg14[%c0_149, %c0_150, %c0_151, %c48] : memref<2x8x8x72xf32, #tpu.memory_space<vmem>>, vector<2x8x8x8xf32>
    tpu.vector_store %arg14[%c0_149, %c0_150, %c0_151, %c48], %51 {strides = array<i32>} : memref<2x8x8x72xf32, #tpu.memory_space<vmem>>, vector<2x8x8x8xf32>,
    %c0_152 = arith.constant 0 : index
    %c2_153 = arith.constant 2 : index
    %c1_154 = arith.constant 1 : index
    %c0_155 = arith.constant 0 : index
    %53 = vector.load %arg13[%c0_152, %c2_153, %c1_154, %c0_155] : memref<2x10x10x8xf32, #tpu.memory_space<vmem>>, vector<2x8x8x8xf32>
    %c0_156 = arith.constant 0 : index
    %c0_157 = arith.constant 0 : index
    %c0_158 = arith.constant 0 : index
    %c56 = arith.constant 56 : index
    %54 = vector.load %arg14[%c0_156, %c0_157, %c0_158, %c56] : memref<2x8x8x72xf32, #tpu.memory_space<vmem>>, vector<2x8x8x8xf32>
    tpu.vector_store %arg14[%c0_156, %c0_157, %c0_158, %c56], %53 {strides = array<i32>} : memref<2x8x8x72xf32, #tpu.memory_space<vmem>>, vector<2x8x8x8xf32>,
    %c0_159 = arith.constant 0 : index
    %c2_160 = arith.constant 2 : index
    %c2_161 = arith.constant 2 : index
    %c0_162 = arith.constant 0 : index
    %55 = vector.load %arg13[%c0_159, %c2_160, %c2_161, %c0_162] : memref<2x10x10x8xf32, #tpu.memory_space<vmem>>, vector<2x8x8x8xf32>
    %c0_163 = arith.constant 0 : index
    %c0_164 = arith.constant 0 : index
    %c0_165 = arith.constant 0 : index
    %c64 = arith.constant 64 : index
    %56 = vector.load %arg14[%c0_163, %c0_164, %c0_165, %c64] : memref<2x8x8x72xf32, #tpu.memory_space<vmem>>, vector<2x8x8x8xf32>
    tpu.vector_store %arg14[%c0_163, %c0_164, %c0_165, %c64], %55 {strides = array<i32>} : memref<2x8x8x72xf32, #tpu.memory_space<vmem>>, vector<2x8x8x8xf32>,
    %c0_166 = arith.constant 0 : index
    %c0_167 = arith.constant 0 : index
    %c0_168 = arith.constant 0 : index
    %c0_169 = arith.constant 0 : index
    %57 = vector.load %arg14[%c0_166, %c0_167, %c0_168, %c0_169] : memref<2x8x8x72xf32, #tpu.memory_space<vmem>>, vector<2x8x8x72xf32>
    %58 = vector.shape_cast %57 : vector<2x8x8x72xf32> to vector<128x72xf32>
    %c0_170 = arith.constant 0 : index
    %c0_171 = arith.constant 0 : index
    %59 = vector.load %arg4[%c0_170, %c0_171] : memref<72x16xf32, #tpu.memory_space<vmem>>, vector<72x16xf32>
    %cst_172 = arith.constant dense<0.000000e+00> : vector<128x16xf32>
    %60 = tpu.matmul %58, %59, %cst_172 {dimension_numbers = #tpu.dot_dimension_numbers<[1], [0], [0], [1], [0, 0, 1, 1], [], []>} : vector<128x72xf32>, vector<72x16xf32>, vector<128x16xf32> -> vector<128x16xf32>
    %c0_173 = arith.constant 0 : index
    %c0_174 = arith.constant 0 : index
    %61 = vector.load %arg5[%c0_173, %c0_174] : memref<1x16xf32, #tpu.memory_space<vmem>>, vector<1x16xf32>
    %62 = vector.broadcast %61 : vector<1x16xf32> to vector<128x16xf32>
    %63 = arith.addf %60, %62 : vector<128x16xf32>
    %64 = vector.shape_cast %63 : vector<128x16xf32> to vector<2x8x8x16xf32>
    %c0_175 = arith.constant 0 : index
    %c0_176 = arith.constant 0 : index
    %c0_177 = arith.constant 0 : index
    %c0_178 = arith.constant 0 : index
    %65 = vector.load %arg15[%c0_175, %c0_176, %c0_177, %c0_178] : memref<2x8x8x16xf32, #tpu.memory_space<vmem>>, vector<2x8x8x16xf32>
    tpu.vector_store %arg15[%c0_175, %c0_176, %c0_177, %c0_178], %64 {strides = array<i32>} : memref<2x8x8x16xf32, #tpu.memory_space<vmem>>, vector<2x8x8x16xf32>,
    %c0_179 = arith.constant 0 : index
    %c0_180 = arith.constant 0 : index
    %c0_181 = arith.constant 0 : index
    %c0_182 = arith.constant 0 : index
    %66 = vector.load %arg15[%c0_179, %c0_180, %c0_181, %c0_182] : memref<2x8x8x16xf32, #tpu.memory_space<vmem>>, vector<2x1x1x16xf32>
    %67 = vector.shape_cast %66 : vector<2x1x1x16xf32> to vector<2x16xf32>
    %c0_183 = arith.constant 0 : index
    %c0_184 = arith.constant 0 : index
    %c1_185 = arith.constant 1 : index
    %c0_186 = arith.constant 0 : index
    %68 = vector.load %arg15[%c0_183, %c0_184, %c1_185, %c0_186] : memref<2x8x8x16xf32, #tpu.memory_space<vmem>>, vector<2x1x1x16xf32>
    %69 = vector.shape_cast %68 : vector<2x1x1x16xf32> to vector<2x16xf32>
    %70 = arith.maximumf %67, %69 : vector<2x16xf32>
    %c0_187 = arith.constant 0 : index
    %c1_188 = arith.constant 1 : index
    %c0_189 = arith.constant 0 : index
    %c0_190 = arith.constant 0 : index
    %71 = vector.load %arg15[%c0_187, %c1_188, %c0_189, %c0_190] : memref<2x8x8x16xf32, #tpu.memory_space<vmem>>, vector<2x1x1x16xf32>
    %72 = vector.shape_cast %71 : vector<2x1x1x16xf32> to vector<2x16xf32>
    %c0_191 = arith.constant 0 : index
    %c1_192 = arith.constant 1 : index
    %c1_193 = arith.constant 1 : index
    %c0_194 = arith.constant 0 : index
    %73 = vector.load %arg15[%c0_191, %c1_192, %c1_193, %c0_194] : memref<2x8x8x16xf32, #tpu.memory_space<vmem>>, vector<2x1x1x16xf32>
    %74 = vector.shape_cast %73 : vector<2x1x1x16xf32> to vector<2x16xf32>
    %75 = arith.maximumf %72, %74 : vector<2x16xf32>
    %76 = arith.maximumf %70, %75 : vector<2x16xf32>
    %cst_195 = arith.constant 0.000000e+00 : f32
    %77 = vector.broadcast %cst_195 : f32 to vector<2x16xf32>
    %78 = arith.maximumf %76, %77 : vector<2x16xf32>
    %c0_196 = arith.constant 0 : index
    %c0_197 = arith.constant 0 : index
    %79 = vector.load %arg16[%c0_196, %c0_197] : memref<2x256xf32, #tpu.memory_space<vmem>>, vector<2x16xf32>
    tpu.vector_store %arg16[%c0_196, %c0_197], %78 {strides = array<i32>} : memref<2x256xf32, #tpu.memory_space<vmem>>, vector<2x16xf32>,
    %c0_198 = arith.constant 0 : index
    %c0_199 = arith.constant 0 : index
    %c2_200 = arith.constant 2 : index
    %c0_201 = arith.constant 0 : index
    %80 = vector.load %arg15[%c0_198, %c0_199, %c2_200, %c0_201] : memref<2x8x8x16xf32, #tpu.memory_space<vmem>>, vector<2x1x1x16xf32>
    %81 = vector.shape_cast %80 : vector<2x1x1x16xf32> to vector<2x16xf32>
    %c0_202 = arith.constant 0 : index
    %c0_203 = arith.constant 0 : index
    %c3_204 = arith.constant 3 : index
    %c0_205 = arith.constant 0 : index
    %82 = vector.load %arg15[%c0_202, %c0_203, %c3_204, %c0_205] : memref<2x8x8x16xf32, #tpu.memory_space<vmem>>, vector<2x1x1x16xf32>
    %83 = vector.shape_cast %82 : vector<2x1x1x16xf32> to vector<2x16xf32>
    %84 = arith.maximumf %81, %83 : vector<2x16xf32>
    %c0_206 = arith.constant 0 : index
    %c1_207 = arith.constant 1 : index
    %c2_208 = arith.constant 2 : index
    %c0_209 = arith.constant 0 : index
    %85 = vector.load %arg15[%c0_206, %c1_207, %c2_208, %c0_209] : memref<2x8x8x16xf32, #tpu.memory_space<vmem>>, vector<2x1x1x16xf32>
    %86 = vector.shape_cast %85 : vector<2x1x1x16xf32> to vector<2x16xf32>
    %c0_210 = arith.constant 0 : index
    %c1_211 = arith.constant 1 : index
    %c3_212 = arith.constant 3 : index
    %c0_213 = arith.constant 0 : index
    %87 = vector.load %arg15[%c0_210, %c1_211, %c3_212, %c0_213] : memref<2x8x8x16xf32, #tpu.memory_space<vmem>>, vector<2x1x1x16xf32>
    %88 = vector.shape_cast %87 : vector<2x1x1x16xf32> to vector<2x16xf32>
    %89 = arith.maximumf %86, %88 : vector<2x16xf32>
    %90 = arith.maximumf %84, %89 : vector<2x16xf32>
    %cst_214 = arith.constant 0.000000e+00 : f32
    %91 = vector.broadcast %cst_214 : f32 to vector<2x16xf32>
    %92 = arith.maximumf %90, %91 : vector<2x16xf32>
    %c0_215 = arith.constant 0 : index
    %c16_216 = arith.constant 16 : index
    %93 = vector.load %arg16[%c0_215, %c16_216] : memref<2x256xf32, #tpu.memory_space<vmem>>, vector<2x16xf32>
    tpu.vector_store %arg16[%c0_215, %c16_216], %92 {strides = array<i32>} : memref<2x256xf32, #tpu.memory_space<vmem>>, vector<2x16xf32>,
    %c0_217 = arith.constant 0 : index
    %c0_218 = arith.constant 0 : index
    %c4_219 = arith.constant 4 : index
    %c0_220 = arith.constant 0 : index
    %94 = vector.load %arg15[%c0_217, %c0_218, %c4_219, %c0_220] : memref<2x8x8x16xf32, #tpu.memory_space<vmem>>, vector<2x1x1x16xf32>
    %95 = vector.shape_cast %94 : vector<2x1x1x16xf32> to vector<2x16xf32>
    %c0_221 = arith.constant 0 : index
    %c0_222 = arith.constant 0 : index
    %c5_223 = arith.constant 5 : index
    %c0_224 = arith.constant 0 : index
    %96 = vector.load %arg15[%c0_221, %c0_222, %c5_223, %c0_224] : memref<2x8x8x16xf32, #tpu.memory_space<vmem>>, vector<2x1x1x16xf32>
    %97 = vector.shape_cast %96 : vector<2x1x1x16xf32> to vector<2x16xf32>
    %98 = arith.maximumf %95, %97 : vector<2x16xf32>
    %c0_225 = arith.constant 0 : index
    %c1_226 = arith.constant 1 : index
    %c4_227 = arith.constant 4 : index
    %c0_228 = arith.constant 0 : index
    %99 = vector.load %arg15[%c0_225, %c1_226, %c4_227, %c0_228] : memref<2x8x8x16xf32, #tpu.memory_space<vmem>>, vector<2x1x1x16xf32>
    %100 = vector.shape_cast %99 : vector<2x1x1x16xf32> to vector<2x16xf32>
    %c0_229 = arith.constant 0 : index
    %c1_230 = arith.constant 1 : index
    %c5_231 = arith.constant 5 : index
    %c0_232 = arith.constant 0 : index
    %101 = vector.load %arg15[%c0_229, %c1_230, %c5_231, %c0_232] : memref<2x8x8x16xf32, #tpu.memory_space<vmem>>, vector<2x1x1x16xf32>
    %102 = vector.shape_cast %101 : vector<2x1x1x16xf32> to vector<2x16xf32>
    %103 = arith.maximumf %100, %102 : vector<2x16xf32>
    %104 = arith.maximumf %98, %103 : vector<2x16xf32>
    %cst_233 = arith.constant 0.000000e+00 : f32
    %105 = vector.broadcast %cst_233 : f32 to vector<2x16xf32>
    %106 = arith.maximumf %104, %105 : vector<2x16xf32>
    %c0_234 = arith.constant 0 : index
    %c32_235 = arith.constant 32 : index
    %107 = vector.load %arg16[%c0_234, %c32_235] : memref<2x256xf32, #tpu.memory_space<vmem>>, vector<2x16xf32>
    tpu.vector_store %arg16[%c0_234, %c32_235], %106 {strides = array<i32>} : memref<2x256xf32, #tpu.memory_space<vmem>>, vector<2x16xf32>,
    %c0_236 = arith.constant 0 : index
    %c0_237 = arith.constant 0 : index
    %c6_238 = arith.constant 6 : index
    %c0_239 = arith.constant 0 : index
    %108 = vector.load %arg15[%c0_236, %c0_237, %c6_238, %c0_239] : memref<2x8x8x16xf32, #tpu.memory_space<vmem>>, vector<2x1x1x16xf32>
    %109 = vector.shape_cast %108 : vector<2x1x1x16xf32> to vector<2x16xf32>
    %c0_240 = arith.constant 0 : index
    %c0_241 = arith.constant 0 : index
    %c7_242 = arith.constant 7 : index
    %c0_243 = arith.constant 0 : index
    %110 = vector.load %arg15[%c0_240, %c0_241, %c7_242, %c0_243] : memref<2x8x8x16xf32, #tpu.memory_space<vmem>>, vector<2x1x1x16xf32>
    %111 = vector.shape_cast %110 : vector<2x1x1x16xf32> to vector<2x16xf32>
    %112 = arith.maximumf %109, %111 : vector<2x16xf32>
    %c0_244 = arith.constant 0 : index
    %c1_245 = arith.constant 1 : index
    %c6_246 = arith.constant 6 : index
    %c0_247 = arith.constant 0 : index
    %113 = vector.load %arg15[%c0_244, %c1_245, %c6_246, %c0_247] : memref<2x8x8x16xf32, #tpu.memory_space<vmem>>, vector<2x1x1x16xf32>
    %114 = vector.shape_cast %113 : vector<2x1x1x16xf32> to vector<2x16xf32>
    %c0_248 = arith.constant 0 : index
    %c1_249 = arith.constant 1 : index
    %c7_250 = arith.constant 7 : index
    %c0_251 = arith.constant 0 : index
    %115 = vector.load %arg15[%c0_248, %c1_249, %c7_250, %c0_251] : memref<2x8x8x16xf32, #tpu.memory_space<vmem>>, vector<2x1x1x16xf32>
    %116 = vector.shape_cast %115 : vector<2x1x1x16xf32> to vector<2x16xf32>
    %117 = arith.maximumf %114, %116 : vector<2x16xf32>
    %118 = arith.maximumf %112, %117 : vector<2x16xf32>
    %cst_252 = arith.constant 0.000000e+00 : f32
    %119 = vector.broadcast %cst_252 : f32 to vector<2x16xf32>
    %120 = arith.maximumf %118, %119 : vector<2x16xf32>
    %c0_253 = arith.constant 0 : index
    %c48_254 = arith.constant 48 : index
    %121 = vector.load %arg16[%c0_253, %c48_254] : memref<2x256xf32, #tpu.memory_space<vmem>>, vector<2x16xf32>
    tpu.vector_store %arg16[%c0_253, %c48_254], %120 {strides = array<i32>} : memref<2x256xf32, #tpu.memory_space<vmem>>, vector<2x16xf32>,
    %c0_255 = arith.constant 0 : index
    %c2_256 = arith.constant 2 : index
    %c0_257 = arith.constant 0 : index
    %c0_258 = arith.constant 0 : index
    %122 = vector.load %arg15[%c0_255, %c2_256, %c0_257, %c0_258] : memref<2x8x8x16xf32, #tpu.memory_space<vmem>>, vector<2x1x1x16xf32>
    %123 = vector.shape_cast %122 : vector<2x1x1x16xf32> to vector<2x16xf32>
    %c0_259 = arith.constant 0 : index
    %c2_260 = arith.constant 2 : index
    %c1_261 = arith.constant 1 : index
    %c0_262 = arith.constant 0 : index
    %124 = vector.load %arg15[%c0_259, %c2_260, %c1_261, %c0_262] : memref<2x8x8x16xf32, #tpu.memory_space<vmem>>, vector<2x1x1x16xf32>
    %125 = vector.shape_cast %124 : vector<2x1x1x16xf32> to vector<2x16xf32>
    %126 = arith.maximumf %123, %125 : vector<2x16xf32>
    %c0_263 = arith.constant 0 : index
    %c3_264 = arith.constant 3 : index
    %c0_265 = arith.constant 0 : index
    %c0_266 = arith.constant 0 : index
    %127 = vector.load %arg15[%c0_263, %c3_264, %c0_265, %c0_266] : memref<2x8x8x16xf32, #tpu.memory_space<vmem>>, vector<2x1x1x16xf32>
    %128 = vector.shape_cast %127 : vector<2x1x1x16xf32> to vector<2x16xf32>
    %c0_267 = arith.constant 0 : index
    %c3_268 = arith.constant 3 : index
    %c1_269 = arith.constant 1 : index
    %c0_270 = arith.constant 0 : index
    %129 = vector.load %arg15[%c0_267, %c3_268, %c1_269, %c0_270] : memref<2x8x8x16xf32, #tpu.memory_space<vmem>>, vector<2x1x1x16xf32>
    %130 = vector.shape_cast %129 : vector<2x1x1x16xf32> to vector<2x16xf32>
    %131 = arith.maximumf %128, %130 : vector<2x16xf32>
    %132 = arith.maximumf %126, %131 : vector<2x16xf32>
    %cst_271 = arith.constant 0.000000e+00 : f32
    %133 = vector.broadcast %cst_271 : f32 to vector<2x16xf32>
    %134 = arith.maximumf %132, %133 : vector<2x16xf32>
    %c0_272 = arith.constant 0 : index
    %c64_273 = arith.constant 64 : index
    %135 = vector.load %arg16[%c0_272, %c64_273] : memref<2x256xf32, #tpu.memory_space<vmem>>, vector<2x16xf32>
    tpu.vector_store %arg16[%c0_272, %c64_273], %134 {strides = array<i32>} : memref<2x256xf32, #tpu.memory_space<vmem>>, vector<2x16xf32>,
    %c0_274 = arith.constant 0 : index
    %c2_275 = arith.constant 2 : index
    %c2_276 = arith.constant 2 : index
    %c0_277 = arith.constant 0 : index
    %136 = vector.load %arg15[%c0_274, %c2_275, %c2_276, %c0_277] : memref<2x8x8x16xf32, #tpu.memory_space<vmem>>, vector<2x1x1x16xf32>
    %137 = vector.shape_cast %136 : vector<2x1x1x16xf32> to vector<2x16xf32>
    %c0_278 = arith.constant 0 : index
    %c2_279 = arith.constant 2 : index
    %c3_280 = arith.constant 3 : index
    %c0_281 = arith.constant 0 : index
    %138 = vector.load %arg15[%c0_278, %c2_279, %c3_280, %c0_281] : memref<2x8x8x16xf32, #tpu.memory_space<vmem>>, vector<2x1x1x16xf32>
    %139 = vector.shape_cast %138 : vector<2x1x1x16xf32> to vector<2x16xf32>
    %140 = arith.maximumf %137, %139 : vector<2x16xf32>
    %c0_282 = arith.constant 0 : index
    %c3_283 = arith.constant 3 : index
    %c2_284 = arith.constant 2 : index
    %c0_285 = arith.constant 0 : index
    %141 = vector.load %arg15[%c0_282, %c3_283, %c2_284, %c0_285] : memref<2x8x8x16xf32, #tpu.memory_space<vmem>>, vector<2x1x1x16xf32>
    %142 = vector.shape_cast %141 : vector<2x1x1x16xf32> to vector<2x16xf32>
    %c0_286 = arith.constant 0 : index
    %c3_287 = arith.constant 3 : index
    %c3_288 = arith.constant 3 : index
    %c0_289 = arith.constant 0 : index
    %143 = vector.load %arg15[%c0_286, %c3_287, %c3_288, %c0_289] : memref<2x8x8x16xf32, #tpu.memory_space<vmem>>, vector<2x1x1x16xf32>
    %144 = vector.shape_cast %143 : vector<2x1x1x16xf32> to vector<2x16xf32>
    %145 = arith.maximumf %142, %144 : vector<2x16xf32>
    %146 = arith.maximumf %140, %145 : vector<2x16xf32>
    %cst_290 = arith.constant 0.000000e+00 : f32
    %147 = vector.broadcast %cst_290 : f32 to vector<2x16xf32>
    %148 = arith.maximumf %146, %147 : vector<2x16xf32>
    %c0_291 = arith.constant 0 : index
    %c80 = arith.constant 80 : index
    %149 = vector.load %arg16[%c0_291, %c80] : memref<2x256xf32, #tpu.memory_space<vmem>>, vector<2x16xf32>
    tpu.vector_store %arg16[%c0_291, %c80], %148 {strides = array<i32>} : memref<2x256xf32, #tpu.memory_space<vmem>>, vector<2x16xf32>,
    %c0_292 = arith.constant 0 : index
    %c2_293 = arith.constant 2 : index
    %c4_294 = arith.constant 4 : index
    %c0_295 = arith.constant 0 : index
    %150 = vector.load %arg15[%c0_292, %c2_293, %c4_294, %c0_295] : memref<2x8x8x16xf32, #tpu.memory_space<vmem>>, vector<2x1x1x16xf32>
    %151 = vector.shape_cast %150 : vector<2x1x1x16xf32> to vector<2x16xf32>
    %c0_296 = arith.constant 0 : index
    %c2_297 = arith.constant 2 : index
    %c5_298 = arith.constant 5 : index
    %c0_299 = arith.constant 0 : index
    %152 = vector.load %arg15[%c0_296, %c2_297, %c5_298, %c0_299] : memref<2x8x8x16xf32, #tpu.memory_space<vmem>>, vector<2x1x1x16xf32>
    %153 = vector.shape_cast %152 : vector<2x1x1x16xf32> to vector<2x16xf32>
    %154 = arith.maximumf %151, %153 : vector<2x16xf32>
    %c0_300 = arith.constant 0 : index
    %c3_301 = arith.constant 3 : index
    %c4_302 = arith.constant 4 : index
    %c0_303 = arith.constant 0 : index
    %155 = vector.load %arg15[%c0_300, %c3_301, %c4_302, %c0_303] : memref<2x8x8x16xf32, #tpu.memory_space<vmem>>, vector<2x1x1x16xf32>
    %156 = vector.shape_cast %155 : vector<2x1x1x16xf32> to vector<2x16xf32>
    %c0_304 = arith.constant 0 : index
    %c3_305 = arith.constant 3 : index
    %c5_306 = arith.constant 5 : index
    %c0_307 = arith.constant 0 : index
    %157 = vector.load %arg15[%c0_304, %c3_305, %c5_306, %c0_307] : memref<2x8x8x16xf32, #tpu.memory_space<vmem>>, vector<2x1x1x16xf32>
    %158 = vector.shape_cast %157 : vector<2x1x1x16xf32> to vector<2x16xf32>
    %159 = arith.maximumf %156, %158 : vector<2x16xf32>
    %160 = arith.maximumf %154, %159 : vector<2x16xf32>
    %cst_308 = arith.constant 0.000000e+00 : f32
    %161 = vector.broadcast %cst_308 : f32 to vector<2x16xf32>
    %162 = arith.maximumf %160, %161 : vector<2x16xf32>
    %c0_309 = arith.constant 0 : index
    %c96 = arith.constant 96 : index
    %163 = vector.load %arg16[%c0_309, %c96] : memref<2x256xf32, #tpu.memory_space<vmem>>, vector<2x16xf32>
    tpu.vector_store %arg16[%c0_309, %c96], %162 {strides = array<i32>} : memref<2x256xf32, #tpu.memory_space<vmem>>, vector<2x16xf32>,
    %c0_310 = arith.constant 0 : index
    %c2_311 = arith.constant 2 : index
    %c6_312 = arith.constant 6 : index
    %c0_313 = arith.constant 0 : index
    %164 = vector.load %arg15[%c0_310, %c2_311, %c6_312, %c0_313] : memref<2x8x8x16xf32, #tpu.memory_space<vmem>>, vector<2x1x1x16xf32>
    %165 = vector.shape_cast %164 : vector<2x1x1x16xf32> to vector<2x16xf32>
    %c0_314 = arith.constant 0 : index
    %c2_315 = arith.constant 2 : index
    %c7_316 = arith.constant 7 : index
    %c0_317 = arith.constant 0 : index
    %166 = vector.load %arg15[%c0_314, %c2_315, %c7_316, %c0_317] : memref<2x8x8x16xf32, #tpu.memory_space<vmem>>, vector<2x1x1x16xf32>
    %167 = vector.shape_cast %166 : vector<2x1x1x16xf32> to vector<2x16xf32>
    %168 = arith.maximumf %165, %167 : vector<2x16xf32>
    %c0_318 = arith.constant 0 : index
    %c3_319 = arith.constant 3 : index
    %c6_320 = arith.constant 6 : index
    %c0_321 = arith.constant 0 : index
    %169 = vector.load %arg15[%c0_318, %c3_319, %c6_320, %c0_321] : memref<2x8x8x16xf32, #tpu.memory_space<vmem>>, vector<2x1x1x16xf32>
    %170 = vector.shape_cast %169 : vector<2x1x1x16xf32> to vector<2x16xf32>
    %c0_322 = arith.constant 0 : index
    %c3_323 = arith.constant 3 : index
    %c7_324 = arith.constant 7 : index
    %c0_325 = arith.constant 0 : index
    %171 = vector.load %arg15[%c0_322, %c3_323, %c7_324, %c0_325] : memref<2x8x8x16xf32, #tpu.memory_space<vmem>>, vector<2x1x1x16xf32>
    %172 = vector.shape_cast %171 : vector<2x1x1x16xf32> to vector<2x16xf32>
    %173 = arith.maximumf %170, %172 : vector<2x16xf32>
    %174 = arith.maximumf %168, %173 : vector<2x16xf32>
    %cst_326 = arith.constant 0.000000e+00 : f32
    %175 = vector.broadcast %cst_326 : f32 to vector<2x16xf32>
    %176 = arith.maximumf %174, %175 : vector<2x16xf32>
    %c0_327 = arith.constant 0 : index
    %c112 = arith.constant 112 : index
    %177 = vector.load %arg16[%c0_327, %c112] : memref<2x256xf32, #tpu.memory_space<vmem>>, vector<2x16xf32>
    tpu.vector_store %arg16[%c0_327, %c112], %176 {strides = array<i32>} : memref<2x256xf32, #tpu.memory_space<vmem>>, vector<2x16xf32>,
    %c0_328 = arith.constant 0 : index
    %c4_329 = arith.constant 4 : index
    %c0_330 = arith.constant 0 : index
    %c0_331 = arith.constant 0 : index
    %178 = vector.load %arg15[%c0_328, %c4_329, %c0_330, %c0_331] : memref<2x8x8x16xf32, #tpu.memory_space<vmem>>, vector<2x1x1x16xf32>
    %179 = vector.shape_cast %178 : vector<2x1x1x16xf32> to vector<2x16xf32>
    %c0_332 = arith.constant 0 : index
    %c4_333 = arith.constant 4 : index
    %c1_334 = arith.constant 1 : index
    %c0_335 = arith.constant 0 : index
    %180 = vector.load %arg15[%c0_332, %c4_333, %c1_334, %c0_335] : memref<2x8x8x16xf32, #tpu.memory_space<vmem>>, vector<2x1x1x16xf32>
    %181 = vector.shape_cast %180 : vector<2x1x1x16xf32> to vector<2x16xf32>
    %182 = arith.maximumf %179, %181 : vector<2x16xf32>
    %c0_336 = arith.constant 0 : index
    %c5_337 = arith.constant 5 : index
    %c0_338 = arith.constant 0 : index
    %c0_339 = arith.constant 0 : index
    %183 = vector.load %arg15[%c0_336, %c5_337, %c0_338, %c0_339] : memref<2x8x8x16xf32, #tpu.memory_space<vmem>>, vector<2x1x1x16xf32>
    %184 = vector.shape_cast %183 : vector<2x1x1x16xf32> to vector<2x16xf32>
    %c0_340 = arith.constant 0 : index
    %c5_341 = arith.constant 5 : index
    %c1_342 = arith.constant 1 : index
    %c0_343 = arith.constant 0 : index
    %185 = vector.load %arg15[%c0_340, %c5_341, %c1_342, %c0_343] : memref<2x8x8x16xf32, #tpu.memory_space<vmem>>, vector<2x1x1x16xf32>
    %186 = vector.shape_cast %185 : vector<2x1x1x16xf32> to vector<2x16xf32>
    %187 = arith.maximumf %184, %186 : vector<2x16xf32>
    %188 = arith.maximumf %182, %187 : vector<2x16xf32>
    %cst_344 = arith.constant 0.000000e+00 : f32
    %189 = vector.broadcast %cst_344 : f32 to vector<2x16xf32>
    %190 = arith.maximumf %188, %189 : vector<2x16xf32>
    %c0_345 = arith.constant 0 : index
    %c128 = arith.constant 128 : index
    %191 = vector.load %arg16[%c0_345, %c128] : memref<2x256xf32, #tpu.memory_space<vmem>>, vector<2x16xf32>
    tpu.vector_store %arg16[%c0_345, %c128], %190 {strides = array<i32>} : memref<2x256xf32, #tpu.memory_space<vmem>>, vector<2x16xf32>,
    %c0_346 = arith.constant 0 : index
    %c4_347 = arith.constant 4 : index
    %c2_348 = arith.constant 2 : index
    %c0_349 = arith.constant 0 : index
    %192 = vector.load %arg15[%c0_346, %c4_347, %c2_348, %c0_349] : memref<2x8x8x16xf32, #tpu.memory_space<vmem>>, vector<2x1x1x16xf32>
    %193 = vector.shape_cast %192 : vector<2x1x1x16xf32> to vector<2x16xf32>
    %c0_350 = arith.constant 0 : index
    %c4_351 = arith.constant 4 : index
    %c3_352 = arith.constant 3 : index
    %c0_353 = arith.constant 0 : index
    %194 = vector.load %arg15[%c0_350, %c4_351, %c3_352, %c0_353] : memref<2x8x8x16xf32, #tpu.memory_space<vmem>>, vector<2x1x1x16xf32>
    %195 = vector.shape_cast %194 : vector<2x1x1x16xf32> to vector<2x16xf32>
    %196 = arith.maximumf %193, %195 : vector<2x16xf32>
    %c0_354 = arith.constant 0 : index
    %c5_355 = arith.constant 5 : index
    %c2_356 = arith.constant 2 : index
    %c0_357 = arith.constant 0 : index
    %197 = vector.load %arg15[%c0_354, %c5_355, %c2_356, %c0_357] : memref<2x8x8x16xf32, #tpu.memory_space<vmem>>, vector<2x1x1x16xf32>
    %198 = vector.shape_cast %197 : vector<2x1x1x16xf32> to vector<2x16xf32>
    %c0_358 = arith.constant 0 : index
    %c5_359 = arith.constant 5 : index
    %c3_360 = arith.constant 3 : index
    %c0_361 = arith.constant 0 : index
    %199 = vector.load %arg15[%c0_358, %c5_359, %c3_360, %c0_361] : memref<2x8x8x16xf32, #tpu.memory_space<vmem>>, vector<2x1x1x16xf32>
    %200 = vector.shape_cast %199 : vector<2x1x1x16xf32> to vector<2x16xf32>
    %201 = arith.maximumf %198, %200 : vector<2x16xf32>
    %202 = arith.maximumf %196, %201 : vector<2x16xf32>
    %cst_362 = arith.constant 0.000000e+00 : f32
    %203 = vector.broadcast %cst_362 : f32 to vector<2x16xf32>
    %204 = arith.maximumf %202, %203 : vector<2x16xf32>
    %c0_363 = arith.constant 0 : index
    %c144 = arith.constant 144 : index
    %205 = vector.load %arg16[%c0_363, %c144] : memref<2x256xf32, #tpu.memory_space<vmem>>, vector<2x16xf32>
    tpu.vector_store %arg16[%c0_363, %c144], %204 {strides = array<i32>} : memref<2x256xf32, #tpu.memory_space<vmem>>, vector<2x16xf32>,
    %c0_364 = arith.constant 0 : index
    %c4_365 = arith.constant 4 : index
    %c4_366 = arith.constant 4 : index
    %c0_367 = arith.constant 0 : index
    %206 = vector.load %arg15[%c0_364, %c4_365, %c4_366, %c0_367] : memref<2x8x8x16xf32, #tpu.memory_space<vmem>>, vector<2x1x1x16xf32>
    %207 = vector.shape_cast %206 : vector<2x1x1x16xf32> to vector<2x16xf32>
    %c0_368 = arith.constant 0 : index
    %c4_369 = arith.constant 4 : index
    %c5_370 = arith.constant 5 : index
    %c0_371 = arith.constant 0 : index
    %208 = vector.load %arg15[%c0_368, %c4_369, %c5_370, %c0_371] : memref<2x8x8x16xf32, #tpu.memory_space<vmem>>, vector<2x1x1x16xf32>
    %209 = vector.shape_cast %208 : vector<2x1x1x16xf32> to vector<2x16xf32>
    %210 = arith.maximumf %207, %209 : vector<2x16xf32>
    %c0_372 = arith.constant 0 : index
    %c5_373 = arith.constant 5 : index
    %c4_374 = arith.constant 4 : index
    %c0_375 = arith.constant 0 : index
    %211 = vector.load %arg15[%c0_372, %c5_373, %c4_374, %c0_375] : memref<2x8x8x16xf32, #tpu.memory_space<vmem>>, vector<2x1x1x16xf32>
    %212 = vector.shape_cast %211 : vector<2x1x1x16xf32> to vector<2x16xf32>
    %c0_376 = arith.constant 0 : index
    %c5_377 = arith.constant 5 : index
    %c5_378 = arith.constant 5 : index
    %c0_379 = arith.constant 0 : index
    %213 = vector.load %arg15[%c0_376, %c5_377, %c5_378, %c0_379] : memref<2x8x8x16xf32, #tpu.memory_space<vmem>>, vector<2x1x1x16xf32>
    %214 = vector.shape_cast %213 : vector<2x1x1x16xf32> to vector<2x16xf32>
    %215 = arith.maximumf %212, %214 : vector<2x16xf32>
    %216 = arith.maximumf %210, %215 : vector<2x16xf32>
    %cst_380 = arith.constant 0.000000e+00 : f32
    %217 = vector.broadcast %cst_380 : f32 to vector<2x16xf32>
    %218 = arith.maximumf %216, %217 : vector<2x16xf32>
    %c0_381 = arith.constant 0 : index
    %c160 = arith.constant 160 : index
    %219 = vector.load %arg16[%c0_381, %c160] : memref<2x256xf32, #tpu.memory_space<vmem>>, vector<2x16xf32>
    tpu.vector_store %arg16[%c0_381, %c160], %218 {strides = array<i32>} : memref<2x256xf32, #tpu.memory_space<vmem>>, vector<2x16xf32>,
    %c0_382 = arith.constant 0 : index
    %c4_383 = arith.constant 4 : index
    %c6_384 = arith.constant 6 : index
    %c0_385 = arith.constant 0 : index
    %220 = vector.load %arg15[%c0_382, %c4_383, %c6_384, %c0_385] : memref<2x8x8x16xf32, #tpu.memory_space<vmem>>, vector<2x1x1x16xf32>
    %221 = vector.shape_cast %220 : vector<2x1x1x16xf32> to vector<2x16xf32>
    %c0_386 = arith.constant 0 : index
    %c4_387 = arith.constant 4 : index
    %c7_388 = arith.constant 7 : index
    %c0_389 = arith.constant 0 : index
    %222 = vector.load %arg15[%c0_386, %c4_387, %c7_388, %c0_389] : memref<2x8x8x16xf32, #tpu.memory_space<vmem>>, vector<2x1x1x16xf32>
    %223 = vector.shape_cast %222 : vector<2x1x1x16xf32> to vector<2x16xf32>
    %224 = arith.maximumf %221, %223 : vector<2x16xf32>
    %c0_390 = arith.constant 0 : index
    %c5_391 = arith.constant 5 : index
    %c6_392 = arith.constant 6 : index
    %c0_393 = arith.constant 0 : index
    %225 = vector.load %arg15[%c0_390, %c5_391, %c6_392, %c0_393] : memref<2x8x8x16xf32, #tpu.memory_space<vmem>>, vector<2x1x1x16xf32>
    %226 = vector.shape_cast %225 : vector<2x1x1x16xf32> to vector<2x16xf32>
    %c0_394 = arith.constant 0 : index
    %c5_395 = arith.constant 5 : index
    %c7_396 = arith.constant 7 : index
    %c0_397 = arith.constant 0 : index
    %227 = vector.load %arg15[%c0_394, %c5_395, %c7_396, %c0_397] : memref<2x8x8x16xf32, #tpu.memory_space<vmem>>, vector<2x1x1x16xf32>
    %228 = vector.shape_cast %227 : vector<2x1x1x16xf32> to vector<2x16xf32>
    %229 = arith.maximumf %226, %228 : vector<2x16xf32>
    %230 = arith.maximumf %224, %229 : vector<2x16xf32>
    %cst_398 = arith.constant 0.000000e+00 : f32
    %231 = vector.broadcast %cst_398 : f32 to vector<2x16xf32>
    %232 = arith.maximumf %230, %231 : vector<2x16xf32>
    %c0_399 = arith.constant 0 : index
    %c176 = arith.constant 176 : index
    %233 = vector.load %arg16[%c0_399, %c176] : memref<2x256xf32, #tpu.memory_space<vmem>>, vector<2x16xf32>
    tpu.vector_store %arg16[%c0_399, %c176], %232 {strides = array<i32>} : memref<2x256xf32, #tpu.memory_space<vmem>>, vector<2x16xf32>,
    %c0_400 = arith.constant 0 : index
    %c6_401 = arith.constant 6 : index
    %c0_402 = arith.constant 0 : index
    %c0_403 = arith.constant 0 : index
    %234 = vector.load %arg15[%c0_400, %c6_401, %c0_402, %c0_403] : memref<2x8x8x16xf32, #tpu.memory_space<vmem>>, vector<2x1x1x16xf32>
    %235 = vector.shape_cast %234 : vector<2x1x1x16xf32> to vector<2x16xf32>
    %c0_404 = arith.constant 0 : index
    %c6_405 = arith.constant 6 : index
    %c1_406 = arith.constant 1 : index
    %c0_407 = arith.constant 0 : index
    %236 = vector.load %arg15[%c0_404, %c6_405, %c1_406, %c0_407] : memref<2x8x8x16xf32, #tpu.memory_space<vmem>>, vector<2x1x1x16xf32>
    %237 = vector.shape_cast %236 : vector<2x1x1x16xf32> to vector<2x16xf32>
    %238 = arith.maximumf %235, %237 : vector<2x16xf32>
    %c0_408 = arith.constant 0 : index
    %c7_409 = arith.constant 7 : index
    %c0_410 = arith.constant 0 : index
    %c0_411 = arith.constant 0 : index
    %239 = vector.load %arg15[%c0_408, %c7_409, %c0_410, %c0_411] : memref<2x8x8x16xf32, #tpu.memory_space<vmem>>, vector<2x1x1x16xf32>
    %240 = vector.shape_cast %239 : vector<2x1x1x16xf32> to vector<2x16xf32>
    %c0_412 = arith.constant 0 : index
    %c7_413 = arith.constant 7 : index
    %c1_414 = arith.constant 1 : index
    %c0_415 = arith.constant 0 : index
    %241 = vector.load %arg15[%c0_412, %c7_413, %c1_414, %c0_415] : memref<2x8x8x16xf32, #tpu.memory_space<vmem>>, vector<2x1x1x16xf32>
    %242 = vector.shape_cast %241 : vector<2x1x1x16xf32> to vector<2x16xf32>
    %243 = arith.maximumf %240, %242 : vector<2x16xf32>
    %244 = arith.maximumf %238, %243 : vector<2x16xf32>
    %cst_416 = arith.constant 0.000000e+00 : f32
    %245 = vector.broadcast %cst_416 : f32 to vector<2x16xf32>
    %246 = arith.maximumf %244, %245 : vector<2x16xf32>
    %c0_417 = arith.constant 0 : index
    %c192 = arith.constant 192 : index
    %247 = vector.load %arg16[%c0_417, %c192] : memref<2x256xf32, #tpu.memory_space<vmem>>, vector<2x16xf32>
    tpu.vector_store %arg16[%c0_417, %c192], %246 {strides = array<i32>} : memref<2x256xf32, #tpu.memory_space<vmem>>, vector<2x16xf32>,
    %c0_418 = arith.constant 0 : index
    %c6_419 = arith.constant 6 : index
    %c2_420 = arith.constant 2 : index
    %c0_421 = arith.constant 0 : index
    %248 = vector.load %arg15[%c0_418, %c6_419, %c2_420, %c0_421] : memref<2x8x8x16xf32, #tpu.memory_space<vmem>>, vector<2x1x1x16xf32>
    %249 = vector.shape_cast %248 : vector<2x1x1x16xf32> to vector<2x16xf32>
    %c0_422 = arith.constant 0 : index
    %c6_423 = arith.constant 6 : index
    %c3_424 = arith.constant 3 : index
    %c0_425 = arith.constant 0 : index
    %250 = vector.load %arg15[%c0_422, %c6_423, %c3_424, %c0_425] : memref<2x8x8x16xf32, #tpu.memory_space<vmem>>, vector<2x1x1x16xf32>
    %251 = vector.shape_cast %250 : vector<2x1x1x16xf32> to vector<2x16xf32>
    %252 = arith.maximumf %249, %251 : vector<2x16xf32>
    %c0_426 = arith.constant 0 : index
    %c7_427 = arith.constant 7 : index
    %c2_428 = arith.constant 2 : index
    %c0_429 = arith.constant 0 : index
    %253 = vector.load %arg15[%c0_426, %c7_427, %c2_428, %c0_429] : memref<2x8x8x16xf32, #tpu.memory_space<vmem>>, vector<2x1x1x16xf32>
    %254 = vector.shape_cast %253 : vector<2x1x1x16xf32> to vector<2x16xf32>
    %c0_430 = arith.constant 0 : index
    %c7_431 = arith.constant 7 : index
    %c3_432 = arith.constant 3 : index
    %c0_433 = arith.constant 0 : index
    %255 = vector.load %arg15[%c0_430, %c7_431, %c3_432, %c0_433] : memref<2x8x8x16xf32, #tpu.memory_space<vmem>>, vector<2x1x1x16xf32>
    %256 = vector.shape_cast %255 : vector<2x1x1x16xf32> to vector<2x16xf32>
    %257 = arith.maximumf %254, %256 : vector<2x16xf32>
    %258 = arith.maximumf %252, %257 : vector<2x16xf32>
    %cst_434 = arith.constant 0.000000e+00 : f32
    %259 = vector.broadcast %cst_434 : f32 to vector<2x16xf32>
    %260 = arith.maximumf %258, %259 : vector<2x16xf32>
    %c0_435 = arith.constant 0 : index
    %c208 = arith.constant 208 : index
    %261 = vector.load %arg16[%c0_435, %c208] : memref<2x256xf32, #tpu.memory_space<vmem>>, vector<2x16xf32>
    tpu.vector_store %arg16[%c0_435, %c208], %260 {strides = array<i32>} : memref<2x256xf32, #tpu.memory_space<vmem>>, vector<2x16xf32>,
    %c0_436 = arith.constant 0 : index
    %c6_437 = arith.constant 6 : index
    %c4_438 = arith.constant 4 : index
    %c0_439 = arith.constant 0 : index
    %262 = vector.load %arg15[%c0_436, %c6_437, %c4_438, %c0_439] : memref<2x8x8x16xf32, #tpu.memory_space<vmem>>, vector<2x1x1x16xf32>
    %263 = vector.shape_cast %262 : vector<2x1x1x16xf32> to vector<2x16xf32>
    %c0_440 = arith.constant 0 : index
    %c6_441 = arith.constant 6 : index
    %c5_442 = arith.constant 5 : index
    %c0_443 = arith.constant 0 : index
    %264 = vector.load %arg15[%c0_440, %c6_441, %c5_442, %c0_443] : memref<2x8x8x16xf32, #tpu.memory_space<vmem>>, vector<2x1x1x16xf32>
    %265 = vector.shape_cast %264 : vector<2x1x1x16xf32> to vector<2x16xf32>
    %266 = arith.maximumf %263, %265 : vector<2x16xf32>
    %c0_444 = arith.constant 0 : index
    %c7_445 = arith.constant 7 : index
    %c4_446 = arith.constant 4 : index
    %c0_447 = arith.constant 0 : index
    %267 = vector.load %arg15[%c0_444, %c7_445, %c4_446, %c0_447] : memref<2x8x8x16xf32, #tpu.memory_space<vmem>>, vector<2x1x1x16xf32>
    %268 = vector.shape_cast %267 : vector<2x1x1x16xf32> to vector<2x16xf32>
    %c0_448 = arith.constant 0 : index
    %c7_449 = arith.constant 7 : index
    %c5_450 = arith.constant 5 : index
    %c0_451 = arith.constant 0 : index
    %269 = vector.load %arg15[%c0_448, %c7_449, %c5_450, %c0_451] : memref<2x8x8x16xf32, #tpu.memory_space<vmem>>, vector<2x1x1x16xf32>
    %270 = vector.shape_cast %269 : vector<2x1x1x16xf32> to vector<2x16xf32>
    %271 = arith.maximumf %268, %270 : vector<2x16xf32>
    %272 = arith.maximumf %266, %271 : vector<2x16xf32>
    %cst_452 = arith.constant 0.000000e+00 : f32
    %273 = vector.broadcast %cst_452 : f32 to vector<2x16xf32>
    %274 = arith.maximumf %272, %273 : vector<2x16xf32>
    %c0_453 = arith.constant 0 : index
    %c224 = arith.constant 224 : index
    %275 = vector.load %arg16[%c0_453, %c224] : memref<2x256xf32, #tpu.memory_space<vmem>>, vector<2x16xf32>
    tpu.vector_store %arg16[%c0_453, %c224], %274 {strides = array<i32>} : memref<2x256xf32, #tpu.memory_space<vmem>>, vector<2x16xf32>,
    %c0_454 = arith.constant 0 : index
    %c6_455 = arith.constant 6 : index
    %c6_456 = arith.constant 6 : index
    %c0_457 = arith.constant 0 : index
    %276 = vector.load %arg15[%c0_454, %c6_455, %c6_456, %c0_457] : memref<2x8x8x16xf32, #tpu.memory_space<vmem>>, vector<2x1x1x16xf32>
    %277 = vector.shape_cast %276 : vector<2x1x1x16xf32> to vector<2x16xf32>
    %c0_458 = arith.constant 0 : index
    %c6_459 = arith.constant 6 : index
    %c7_460 = arith.constant 7 : index
    %c0_461 = arith.constant 0 : index
    %278 = vector.load %arg15[%c0_458, %c6_459, %c7_460, %c0_461] : memref<2x8x8x16xf32, #tpu.memory_space<vmem>>, vector<2x1x1x16xf32>
    %279 = vector.shape_cast %278 : vector<2x1x1x16xf32> to vector<2x16xf32>
    %280 = arith.maximumf %277, %279 : vector<2x16xf32>
    %c0_462 = arith.constant 0 : index
    %c7_463 = arith.constant 7 : index
    %c6_464 = arith.constant 6 : index
    %c0_465 = arith.constant 0 : index
    %281 = vector.load %arg15[%c0_462, %c7_463, %c6_464, %c0_465] : memref<2x8x8x16xf32, #tpu.memory_space<vmem>>, vector<2x1x1x16xf32>
    %282 = vector.shape_cast %281 : vector<2x1x1x16xf32> to vector<2x16xf32>
    %c0_466 = arith.constant 0 : index
    %c7_467 = arith.constant 7 : index
    %c7_468 = arith.constant 7 : index
    %c0_469 = arith.constant 0 : index
    %283 = vector.load %arg15[%c0_466, %c7_467, %c7_468, %c0_469] : memref<2x8x8x16xf32, #tpu.memory_space<vmem>>, vector<2x1x1x16xf32>
    %284 = vector.shape_cast %283 : vector<2x1x1x16xf32> to vector<2x16xf32>
    %285 = arith.maximumf %282, %284 : vector<2x16xf32>
    %286 = arith.maximumf %280, %285 : vector<2x16xf32>
    %cst_470 = arith.constant 0.000000e+00 : f32
    %287 = vector.broadcast %cst_470 : f32 to vector<2x16xf32>
    %288 = arith.maximumf %286, %287 : vector<2x16xf32>
    %c0_471 = arith.constant 0 : index
    %c240 = arith.constant 240 : index
    %289 = vector.load %arg16[%c0_471, %c240] : memref<2x256xf32, #tpu.memory_space<vmem>>, vector<2x16xf32>
    tpu.vector_store %arg16[%c0_471, %c240], %288 {strides = array<i32>} : memref<2x256xf32, #tpu.memory_space<vmem>>, vector<2x16xf32>,
    %c0_472 = arith.constant 0 : index
    %c0_473 = arith.constant 0 : index
    %290 = vector.load %arg16[%c0_472, %c0_473] : memref<2x256xf32, #tpu.memory_space<vmem>>, vector<2x256xf32>
    %c0_474 = arith.constant 0 : index
    %c0_475 = arith.constant 0 : index
    %291 = vector.load %arg6[%c0_474, %c0_475] : memref<256x32xf32, #tpu.memory_space<vmem>>, vector<256x32xf32>
    %cst_476 = arith.constant dense<0.000000e+00> : vector<2x32xf32>
    %292 = tpu.matmul %290, %291, %cst_476 {dimension_numbers = #tpu.dot_dimension_numbers<[1], [0], [0], [1], [0, 0, 1, 1], [], []>} : vector<2x256xf32>, vector<256x32xf32>, vector<2x32xf32> -> vector<2x32xf32>
    %c0_477 = arith.constant 0 : index
    %c0_478 = arith.constant 0 : index
    %293 = vector.load %arg7[%c0_477, %c0_478] : memref<1x32xf32, #tpu.memory_space<vmem>>, vector<1x32xf32>
    %294 = vector.broadcast %293 : vector<1x32xf32> to vector<2x32xf32>
    %295 = arith.addf %292, %294 : vector<2x32xf32>
    %cst_479 = arith.constant 0.000000e+00 : f32
    %296 = vector.broadcast %cst_479 : f32 to vector<2x32xf32>
    %297 = arith.maximumf %295, %296 : vector<2x32xf32>
    %c0_480 = arith.constant 0 : index
    %c0_481 = arith.constant 0 : index
    %298 = vector.load %arg8[%c0_480, %c0_481] : memref<1x32xf32, #tpu.memory_space<vmem>>, vector<1x32xf32>
    %299 = vector.broadcast %298 : vector<1x32xf32> to vector<2x32xf32>
    %300 = arith.mulf %297, %299 : vector<2x32xf32>
    %cst_482 = arith.constant dense<0.000000e+00> : vector<2xf32>
    %301 = vector.multi_reduction <add>, %300, %cst_482 [1] : vector<2x32xf32> to vector<2xf32>
    %302 = vector.shape_cast %301 : vector<2xf32> to vector<2x1xf32>
    %c0_483 = arith.constant 0 : index
    %c0_484 = arith.constant 0 : index
    %303 = vector.load %arg9[%c0_483, %c0_484] : memref<1x1xf32, #tpu.memory_space<vmem>>, vector<1x1xf32>
    %304 = vector.broadcast %303 : vector<1x1xf32> to vector<2x1xf32>
    %305 = arith.addf %302, %304 : vector<2x1xf32>
    %cst_485 = arith.constant 0.000000e+00 : f32
    %306 = vector.broadcast %cst_485 : f32 to vector<2x1xf32>
    %307 = arith.subf %306, %305 : vector<2x1xf32>
    %308 = math.exp %307 : vector<2x1xf32>
    %cst_486 = arith.constant 1.000000e+00 : f32
    %309 = vector.broadcast %cst_486 : f32 to vector<2x1xf32>
    %310 = arith.addf %309, %308 : vector<2x1xf32>
    %cst_487 = arith.constant 1.000000e+00 : f32
    %311 = vector.broadcast %cst_487 : f32 to vector<2x1xf32>
    %312 = arith.divf %311, %310 : vector<2x1xf32>
    %c0_488 = arith.constant 0 : index
    %c0_489 = arith.constant 0 : index
    %313 = vector.load %arg10[%c0_488, %c0_489] : memref<2x1xf32, #tpu.memory_space<vmem>>, vector<2x1xf32>
    tpu.vector_store %arg10[%c0_488, %c0_489], %312 {strides = array<i32>} : memref<2x1xf32, #tpu.memory_space<vmem>>, vector<2x1xf32>,
    return
  }
  func.func @transform_0(%arg0: i32) -> (i32, i32, i32, i32) {
    %c0_i32 = arith.constant 0 : i32
    %c0_i32_0 = arith.constant 0 : i32
    %c0_i32_1 = arith.constant 0 : i32
    %c0_i32_2 = arith.constant 0 : i32
    return %arg0, %c0_i32, %c0_i32_0, %c0_i32_1 : i32, i32, i32, i32
  }
  func.func @transform_1(%arg0: i32) -> (i32, i32) {
    %c0_i32 = arith.constant 0 : i32
    %c0_i32_0 = arith.constant 0 : i32
    %c0_i32_1 = arith.constant 0 : i32
    return %c0_i32, %c0_i32_0 : i32, i32
  }
  func.func @transform_2(%arg0: i32) -> (i32, i32) {
    %c0_i32 = arith.constant 0 : i32
    %c0_i32_0 = arith.constant 0 : i32
    %c0_i32_1 = arith.constant 0 : i32
    return %c0_i32, %c0_i32_0 : i32, i32
  }
  func.func @transform_3(%arg0: i32) -> (i32, i32) {
    %c0_i32 = arith.constant 0 : i32
    %c0_i32_0 = arith.constant 0 : i32
    %c0_i32_1 = arith.constant 0 : i32
    return %c0_i32, %c0_i32_0 : i32, i32
  }
  func.func @transform_4(%arg0: i32) -> (i32, i32) {
    %c0_i32 = arith.constant 0 : i32
    %c0_i32_0 = arith.constant 0 : i32
    %c0_i32_1 = arith.constant 0 : i32
    return %c0_i32, %c0_i32_0 : i32, i32
  }
  func.func @transform_5(%arg0: i32) -> (i32, i32) {
    %c0_i32 = arith.constant 0 : i32
    %c0_i32_0 = arith.constant 0 : i32
    %c0_i32_1 = arith.constant 0 : i32
    return %c0_i32, %c0_i32_0 : i32, i32
  }
  func.func @transform_6(%arg0: i32) -> (i32, i32) {
    %c0_i32 = arith.constant 0 : i32
    %c0_i32_0 = arith.constant 0 : i32
    %c0_i32_1 = arith.constant 0 : i32
    return %c0_i32, %c0_i32_0 : i32, i32
  }
  func.func @transform_7(%arg0: i32) -> (i32, i32) {
    %c0_i32 = arith.constant 0 : i32
    %c0_i32_0 = arith.constant 0 : i32
    %c0_i32_1 = arith.constant 0 : i32
    return %c0_i32, %c0_i32_0 : i32, i32
  }
  func.func @transform_8(%arg0: i32) -> (i32, i32) {
    %c0_i32 = arith.constant 0 : i32
    %c0_i32_0 = arith.constant 0 : i32
    %c0_i32_1 = arith.constant 0 : i32
    return %c0_i32, %c0_i32_0 : i32, i32
  }
  func.func @transform_9(%arg0: i32) -> (i32, i32) {
    %c0_i32 = arith.constant 0 : i32
    %c0_i32_0 = arith.constant 0 : i32
    return %arg0, %c0_i32 : i32, i32
  }
}

</mosaic_0001>

<bundles_post_ra>
// kernel: forward.1
= control target key start
LH: loop header
LB: loop body
LE: loop exit
PB: predicated region body
PF: predicated region fallthrough
CT: control target
= control target key end

     0   :  { %s6979_s13 = smov 1   ;;  %vm98_vm0 = vcmask 7168   ;;  %vm483_vm1 = vcmask 15368   ;;  %s6980_s30 = smov 2   ;;  %vm868_vm2 = vcmask 23568   ;;  %vm3511_vm3 = vcmask 1040384   ;;  %s10334_s0 = inlined_call_operand.vmem [shape: f32[2,18,18,1], index: 0, kind: input, shape index: {}]   ;;  %s10335_s1 = inlined_call_operand.vmem [shape: f32[9,8], index: 1, kind: input, shape index: {}]   ;;  %s10336_s2 = inlined_call_operand.vmem [shape: f32[1,8], index: 2, kind: input, shape index: {}]   ;;  %s10337_s3 = inlined_call_operand.vmem [shape: f32[72,16], index: 3, kind: input, shape index: {}]   ;;  %s10338_s4 = inlined_call_operand.vmem [shape: f32[1,16], index: 4, kind: input, shape index: {}]   ;;  %s10339_s5 = inlined_call_operand.vmem [shape: f32[256,32], index: 5, kind: input, shape index: {}]   ;;  %s10340_s8 = inlined_call_operand.<no memory space> [shape: f32[1,1], index: 8, kind: input, shape index: {}]   ;;  %s10341_s6 = inlined_call_operand.vmem [shape: f32[1,32], index: 6, kind: input, shape index: {}]   ;;  %s10342_s7 = inlined_call_operand.vmem [shape: f32[1,32], index: 7, kind: input, shape index: {}]   ;;  %s10343_s9 = inlined_call_operand.vmem [shape: f32[2,1], index: 9, kind: output, shape index: {}]  }
   0x1   :  { %v7053_v0 = vld [vmem:[%s10334_s0 + $0x19] sm:$0xff]  ;;  %v163_v1 = vld [vmem:[%s10334_s0 + $0x1] sm:$0xff]  ;;  %v164_v3 = vld [vmem:[%s10334_s0 + $0x9] sm:$0xff]  ;;  %s6981_s20 = smov 3   ;;  %s6982_s21 = smov 4   ;;  %vm6986_vm4 = vmmov 1  }
   0x2   :  { %295 = vrot.lane.b32.xlu1 %v7053_v0, %s6979_s13  ;;  %291 = vrot.lane.b32.xlu0 %v163_v1, %s6979_s13  ;;  %v7064_v2 = vld [vmem:[%s10334_s0 + $0x21] sm:$0xff]  ;;  %v7075_v4 = vld [vmem:[%s10334_s0 + $0x39] sm:$0xff]  ;;  %s6983_s22 = smov 5   ;;  %s6984_s23 = smov 6   ;;  %vm6896_vm5 = vmpackc.low %vm3511_vm3, %vm6986_vm4  ;;  %vm1254_vm6 = vcmask 31768   ;;  %vm1639_vm7 = vcmask 39968  }
   0x3   :  { %v7080_v5 = vld [vmem:[%s10334_s0 + $0x31] sm:$0xff]  ;;  %v169_v7 = vld [vmem:[%s10334_s0 + $0x49] sm:$0xff]  ;;  %v171_v9 = vld [vmem:[%s10334_s0 + $0x61] sm:$0xff]  ;;  %s6985_s24 = smov 7   ;;  %vm2024_vm8 = vcmask 48168   ;;  %vm2410_vm9 = vcmask 56368  }
   0x4   :  { %v170_v6 = vld [vmem:[%s10334_s0 + $0x51] sm:$0xff]  ;;  %v172_v8 = vld [vmem:[%s10334_s0 + $0x69] sm:$0xff]  ;;  %v174_v10 = vld [vmem:[%s10334_s0 + $0x81] sm:$0xff]  ;;  %vm2795_vm10 = vcmask 64568   ;;  %vm3180_vm11 = vcmask 72768   ;;  %vm3318_vm12 = vcmask 72704  }
   0x5   :  { %v173_v11 = vld [vmem:[%s10334_s0 + $0x79] sm:$0xff]  ;;  %v175_v15 = vld [vmem:[%s10334_s0 + $0x91] sm:$0xff]  ;;  %v35_v17 = vld [vmem:[%s10334_s0 + $0x8] sm:$0xff]  ;;  %vm3900_vm13 = vcmask 64512   ;;  %vm4157_vm14 = vcmask 58368   ;;  %s6991_s14 = smov 32  }
   0x6   :  { %297 = vrot.lane.b32.xlu1 %v7064_v2, %s6979_s13  ;;  %293 = vrot.lane.b32.xlu0 %v164_v3, %s6979_s13  ;;  %v7113_v12 = vld [vmem:[%s10334_s0 + $0x18] sm:$0xff]  ;;  %v34_v13 = vld [vmem:[%s10334_s0] sm:$0xff]  ;;  %100 = vst.msk [vmem:[#allocation2 + $0x8] sm:$0xff] %vm98_vm0, %v35_v17  ;;  %s6992_s15 = smov 40   ;;  %s6994_s28 = smov 56   ;;  %vm4326_vm15 = vcmask 130112  }
   0x7   :  { %v176_v14 = vld [vmem:[%s10334_s0 + $0x99] sm:$0xff]  ;;  %101 = vst.msk [vmem:[#allocation2 + $0x10] sm:$0xff] %vm98_vm0, %v7113_v12  ;;  %99 = vst.msk [vmem:[#allocation2] sm:$0xff] %vm98_vm0, %v34_v13  ;;  %v7146_v19 = vld [vmem:[%s10334_s0 + $0x30] sm:$0xff]  ;;  %s6995_s18 = smov 64   ;;  %vm4714_vm3 = vcmask 392512  }
   0x8   :  { %v7130_v16 = vld [vmem:[%s10334_s0 + $0x20] sm:$0xff]  ;;  %v7141_v18 = vld [vmem:[%s10334_s0 + $0x38] sm:$0xff]  ;;  %103 = vst.msk [vmem:[#allocation2 + $0x20] sm:$0xff] %vm98_vm0, %v7146_v19  ;;  %v7157_v20 = vld [vmem:[%s10334_s0 + $0x50] sm:$0xff]  ;;  %vm4812_vm4 = vcmask 458112  }
   0x9   :  { %102 = vst.msk [vmem:[#allocation2 + $0x18] sm:$0xff] %vm98_vm0, %v7130_v16  ;;  %104 = vst.msk [vmem:[#allocation2 + $0x28] sm:$0xff] %vm98_vm0, %v7141_v18  ;;  %v178_v21 = vld [vmem:[%s10334_s0 + $0xb1] sm:$0xff]  ;;  %v177_v22 = vld [vmem:[%s10334_s0 + $0xa9] sm:$0xff] }
   0xa   :  { %301 = vrot.lane.b32.xlu1 %v7075_v4, %s6979_s13  ;;  %299 = vrot.lane.b32.xlu0 %v7080_v5, %s6979_s13  ;;  %106 = vst.msk [vmem:[#allocation2 + $0x38] sm:$0xff] %vm98_vm0, %v7157_v20  ;;  %v7170_v23 = vld [vmem:[%s10334_s0 + $0x48] sm:$0xff]  ;;  %v7182_v25 = vld [vmem:[%s10334_s0 + $0x60] sm:$0xff] }
   0xb   :  { %105 = vst.msk [vmem:[#allocation2 + $0x30] sm:$0xff] %vm98_vm0, %v7170_v23  ;;  %v7177_v24 = vld [vmem:[%s10334_s0 + $0x68] sm:$0xff]  ;;  %107 = vst.msk [vmem:[#allocation2 + $0x40] sm:$0xff] %vm98_vm0, %v7182_v25  ;;  %v7191_v26 = vld [vmem:[%s10334_s0 + $0x80] sm:$0xff] }
   0xc   :  { %108 = vst.msk [vmem:[#allocation2 + $0x48] sm:$0xff] %vm98_vm0, %v7177_v24  ;;  %v7196_v27 = vld [vmem:[%s10334_s0 + $0x78] sm:$0xff]  ;;  %v180_v28 = vld [vmem:[%s10334_s0 + $0xc9] sm:$0xff]  ;;  %110 = vst.msk [vmem:[#allocation2 + $0x58] sm:$0xff] %vm98_vm0, %v7191_v26 }
   0xd   :  { %109 = vst.msk [vmem:[#allocation2 + $0x50] sm:$0xff] %vm98_vm0, %v7196_v27  ;;  %v179_v29 = vld [vmem:[%s10334_s0 + $0xc1] sm:$0xff]  ;;  %v7213_v30 = vld [vmem:[%s10334_s0 + $0x98] sm:$0xff]  ;;  %v7218_v31 = vld [vmem:[%s10334_s0 + $0x90] sm:$0xff] }
   0xe   :  { %305 = vrot.lane.b32.xlu1 %v170_v6, %s6979_s13  ;;  %303 = vrot.lane.b32.xlu0 %v169_v7, %s6979_s13  ;;  %112 = vst.msk [vmem:[#allocation2 + $0x68] sm:$0xff] %vm98_vm0, %v7213_v30  ;;  %111 = vst.msk [vmem:[#allocation2 + $0x60] sm:$0xff] %vm98_vm0, %v7218_v31  ;;  %v49_v32 = vld [vmem:[%s10334_s0 + $0xb0] sm:$0xff]  ;;  %v48_v33 = vld [vmem:[%s10334_s0 + $0xa8] sm:$0xff] }
   0xf   :  { %114 = vst.msk [vmem:[#allocation2 + $0x78] sm:$0xff] %vm98_vm0, %v49_v32  ;;  %113 = vst.msk [vmem:[#allocation2 + $0x70] sm:$0xff] %vm98_vm0, %v48_v33  ;;  %v51_v34 = vld [vmem:[%s10334_s0 + $0xc8] sm:$0xff]  ;;  %v50_v36 = vld [vmem:[%s10334_s0 + $0xc0] sm:$0xff] }
  0x10   :  { %v182_v35 = vld [vmem:[%s10334_s0 + $0xe1] sm:$0xff]  ;;  %116 = vst.msk [vmem:[#allocation2 + $0x88] sm:$0xff] %vm98_vm0, %v51_v34  ;;  %v181_v37 = vld [vmem:[%s10334_s0 + $0xd9] sm:$0xff]  ;;  %115 = vst.msk [vmem:[#allocation2 + $0x80] sm:$0xff] %vm98_vm0, %v50_v36 }
  0x11   :  { %v53_v38 = vld [vmem:[%s10334_s0 + $0xe0] sm:$0xff]  ;;  %v52_v39 = vld [vmem:[%s10334_s0 + $0xd8] sm:$0xff]  ;;  %v54_v41 = vld [vmem:[%s10334_s0 + $0xf0] sm:$0xff] }
  0x12   :  { %309 = vrot.lane.b32.xlu1 %v172_v8, %s6979_s13  ;;  %307 = vrot.lane.b32.xlu0 %v171_v9, %s6979_s13  ;;  %118 = vst.msk [vmem:[#allocation2 + $0x98] sm:$0xff] %vm98_vm0, %v53_v38  ;;  %117 = vst.msk [vmem:[#allocation2 + $0x90] sm:$0xff] %vm98_vm0, %v52_v39  ;;  %v55_v40 = vld [vmem:[%s10334_s0 + $0xf8] sm:$0xff]  ;;  %v57_v42 = vld [vmem:[%s10334_s0 + $0x110] sm:$0xff] }
  0x13   :  { %120 = vst.msk [vmem:[#allocation2 + $0xa8] sm:$0xff] %vm98_vm0, %v55_v40  ;;  %119 = vst.msk [vmem:[#allocation2 + $0xa0] sm:$0xff] %vm98_vm0, %v54_v41  ;;  %v56_v43 = vld [vmem:[%s10334_s0 + $0x108] sm:$0xff]  ;;  %v184_v44 = vld [vmem:[%s10334_s0 + $0xf9] sm:$0xff] }
  0x14   :  { %v183_v45 = vld [vmem:[%s10334_s0 + $0xf1] sm:$0xff]  ;;  %122 = vst.msk [vmem:[#allocation2 + $0xb8] sm:$0xff] %vm98_vm0, %v57_v42  ;;  %121 = vst.msk [vmem:[#allocation2 + $0xb0] sm:$0xff] %vm98_vm0, %v56_v43  ;;  %v59_v46 = vld [vmem:[%s10334_s0 + $0x128] sm:$0xff] }
  0x15   :  { %124 = vst.msk [vmem:[#allocation2 + $0xc8] sm:$0xff] %vm98_vm0, %v59_v46  ;;  %v58_v47 = vld [vmem:[%s10334_s0 + $0x120] sm:$0xff]  ;;  %v60_v49 = vld [vmem:[%s10334_s0 + $0x138] sm:$0xff]  ;;  %v185_v51 = vld [vmem:[%s10334_s0 + $0x109] sm:$0xff] }
  0x16   :  { %313 = vrot.lane.b32.xlu1 %v174_v10, %s6979_s13  ;;  %311 = vrot.lane.b32.xlu0 %v173_v11, %s6979_s13  ;;  %123 = vst.msk [vmem:[#allocation2 + $0xc0] sm:$0xff] %vm98_vm0, %v58_v47  ;;  %v61_v48 = vld [vmem:[%s10334_s0 + $0x140] sm:$0xff]  ;;  %125 = vst.msk [vmem:[#allocation2 + $0xd0] sm:$0xff] %vm98_vm0, %v60_v49  ;;  %v186_v50 = vld [vmem:[%s10334_s0 + $0x111] sm:$0xff] }
  0x17   :  { %126 = vst.msk [vmem:[#allocation2 + $0xd8] sm:$0xff] %vm98_vm0, %v61_v48  ;;  %v63_v52 = vld [vmem:[%s10334_s0 + $0x158] sm:$0xff]  ;;  %v62_v53 = vld [vmem:[%s10334_s0 + $0x150] sm:$0xff]  ;;  %v187_v55 = vld [vmem:[%s10334_s0 + $0x121] sm:$0xff] }
  0x18   :  { %128 = vst.msk [vmem:[#allocation2 + $0xe8] sm:$0xff] %vm98_vm0, %v63_v52  ;;  %127 = vst.msk [vmem:[#allocation2 + $0xe0] sm:$0xff] %vm98_vm0, %v62_v53  ;;  %v188_v54 = vld [vmem:[%s10334_s0 + $0x129] sm:$0xff]  ;;  %v190_v58 = vld [vmem:[%s10334_s0 + $0x141] sm:$0xff] }
  0x19   :  { %v65_v56 = vld [vmem:[%s10334_s0 + $0x170] sm:$0xff]  ;;  %v64_v57 = vld [vmem:[%s10334_s0 + $0x168] sm:$0xff]  ;;  %v189_v59 = vld [vmem:[%s10334_s0 + $0x139] sm:$0xff] }
  0x1a   :  { %317 = vrot.lane.b32.xlu1 %v176_v14, %s6979_s13  ;;  %315 = vrot.lane.b32.xlu0 %v175_v15, %s6979_s13  ;;  %130 = vst.msk [vmem:[#allocation2 + $0xf8] sm:$0xff] %vm98_vm0, %v65_v56  ;;  %129 = vst.msk [vmem:[#allocation2 + $0xf0] sm:$0xff] %vm98_vm0, %v64_v57  ;;  %v67_v60 = vld [vmem:[%s10334_s0 + $0x1b8] sm:$0xff]  ;;  %v66_v61 = vld [vmem:[%s10334_s0 + $0x1b0] sm:$0xff] }
  0x1b   :  { %132 = vst.msk [vmem:[#allocation2 + $0x108] sm:$0xff] %vm98_vm0, %v67_v60  ;;  %131 = vst.msk [vmem:[#allocation2 + $0x100] sm:$0xff] %vm98_vm0, %v66_v61  ;;  %v192_v62 = vld [vmem:[%s10334_s0 + $0x159] sm:$0xff]  ;;  %v191_v63 = vld [vmem:[%s10334_s0 + $0x151] sm:$0xff] }
  0x1c   :  { %v69_v1 = vld [vmem:[%s10334_s0 + $0x1d0] sm:$0xff]  ;;  %v68_v3 = vld [vmem:[%s10334_s0 + $0x1c8] sm:$0xff]  ;;  %v70_v9 = vld [vmem:[%s10334_s0 + $0x1e0] sm:$0xff] }
  0x1d   :  { %134 = vst.msk [vmem:[#allocation2 + $0x118] sm:$0xff] %vm98_vm0, %v69_v1  ;;  %133 = vst.msk [vmem:[#allocation2 + $0x110] sm:$0xff] %vm98_vm0, %v68_v3  ;;  %v194_v6 = vld [vmem:[%s10334_s0 + $0x171] sm:$0xff]  ;;  %v193_v7 = vld [vmem:[%s10334_s0 + $0x169] sm:$0xff] }
  0x1e   :  { %321 = vrot.lane.b32.xlu1 %v178_v21, %s6979_s13  ;;  %319 = vrot.lane.b32.xlu0 %v177_v22, %s6979_s13  ;;  %v71_v8 = vld [vmem:[%s10334_s0 + $0x1e8] sm:$0xff]  ;;  %135 = vst.msk [vmem:[#allocation2 + $0x120] sm:$0xff] %vm98_vm0, %v70_v9  ;;  %v196_v10 = vld [vmem:[%s10334_s0 + $0x1b9] sm:$0xff] }
  0x1f   :  { %136 = vst.msk [vmem:[#allocation2 + $0x128] sm:$0xff] %vm98_vm0, %v71_v8  ;;  %v195_v11 = vld [vmem:[%s10334_s0 + $0x1b1] sm:$0xff]  ;;  %v73_v13 = vld [vmem:[%s10334_s0 + $0x200] sm:$0xff]  ;;  %v197_v17 = vld [vmem:[%s10334_s0 + $0x1c9] sm:$0xff] }
  0x20   :  { %138 = vst.msk [vmem:[#allocation2 + $0x138] sm:$0xff] %vm98_vm0, %v73_v13  ;;  %v72_v14 = vld [vmem:[%s10334_s0 + $0x1f8] sm:$0xff]  ;;  %v74_v22 = vld [vmem:[%s10334_s0 + $0x210] sm:$0xff]  ;;  %v76_v33 = vld [vmem:[%s10334_s0 + $0x228] sm:$0xff] }
  0x21   :  { %137 = vst.msk [vmem:[#allocation2 + $0x130] sm:$0xff] %vm98_vm0, %v72_v14  ;;  %v198_v15 = vld [vmem:[%s10334_s0 + $0x1d1] sm:$0xff]  ;;  %139 = vst.msk [vmem:[#allocation2 + $0x140] sm:$0xff] %vm98_vm0, %v74_v22  ;;  %v202_v34 = vld [vmem:[%s10334_s0 + $0x201] sm:$0xff] }
  0x22   :  { %325 = vrot.lane.b32.xlu1 %v180_v28, %s6979_s13  ;;  %323 = vrot.lane.b32.xlu0 %v179_v29, %s6979_s13  ;;  %v75_v21 = vld [vmem:[%s10334_s0 + $0x218] sm:$0xff]  ;;  %v200_v28 = vld [vmem:[%s10334_s0 + $0x1e9] sm:$0xff]  ;;  %141 = vst.msk [vmem:[#allocation2 + $0x150] sm:$0xff] %vm98_vm0, %v76_v33 }
  0x23   :  { %140 = vst.msk [vmem:[#allocation2 + $0x148] sm:$0xff] %vm98_vm0, %v75_v21  ;;  %v199_v29 = vld [vmem:[%s10334_s0 + $0x1e1] sm:$0xff]  ;;  %v77_v32 = vld [vmem:[%s10334_s0 + $0x230] sm:$0xff]  ;;  %v204_v38 = vld [vmem:[%s10334_s0 + $0x219] sm:$0xff] }
  0x24   :  { %142 = vst.msk [vmem:[#allocation2 + $0x158] sm:$0xff] %vm98_vm0, %v77_v32  ;;  %v79_v36 = vld [vmem:[%s10334_s0 + $0x248] sm:$0xff]  ;;  %v203_v39 = vld [vmem:[%s10334_s0 + $0x211] sm:$0xff]  ;;  %v81_v40 = vld [vmem:[%s10334_s0 + $0x260] sm:$0xff] }
  0x25   :  { %144 = vst.msk [vmem:[#allocation2 + $0x168] sm:$0xff] %vm98_vm0, %v79_v36  ;;  %146 = vst.msk [vmem:[#allocation2 + $0x178] sm:$0xff] %vm98_vm0, %v81_v40  ;;  %v80_v41 = vld [vmem:[%s10334_s0 + $0x258] sm:$0xff]  ;;  %v205_v43 = vld [vmem:[%s10334_s0 + $0x229] sm:$0xff] }
  0x26   :  { %329 = vrot.lane.b32.xlu1 %v182_v35, %s6979_s13  ;;  %327 = vrot.lane.b32.xlu0 %v181_v37, %s6979_s13  ;;  %v201_v35 = vld [vmem:[%s10334_s0 + $0x1f9] sm:$0xff]  ;;  %145 = vst.msk [vmem:[#allocation2 + $0x170] sm:$0xff] %vm98_vm0, %v80_v41  ;;  %v206_v42 = vld [vmem:[%s10334_s0 + $0x231] sm:$0xff] }
  0x27   :  { %v78_v37 = vld [vmem:[%s10334_s0 + $0x240] sm:$0xff]  ;;  %v208_v46 = vld [vmem:[%s10334_s0 + $0x249] sm:$0xff]  ;;  %v88_v57 = vld [vmem:[%s10334_s0 + $0x2b8] sm:$0xff] }
  0x28   :  { %143 = vst.msk [vmem:[#allocation2 + $0x160] sm:$0xff] %vm98_vm0, %v78_v37  ;;  %v207_v47 = vld [vmem:[%s10334_s0 + $0x241] sm:$0xff]  ;;  %v85_v48 = vld [vmem:[%s10334_s0 + $0x290] sm:$0xff]  ;;  %153 = vst.msk [vmem:[#allocation2 + $0x1b0] sm:$0xff] %vm98_vm0, %v88_v57 }
  0x29   :  { %150 = vst.msk [vmem:[#allocation2 + $0x198] sm:$0xff] %vm98_vm0, %v85_v48  ;;  %v84_v49 = vld [vmem:[%s10334_s0 + $0x288] sm:$0xff]  ;;  %v86_v53 = vld [vmem:[%s10334_s0 + $0x2a0] sm:$0xff]  ;;  %v91_v60 = vld [vmem:[%s10334_s0 + $0x2d8] sm:$0xff] }
  0x2a   :  { %333 = vrot.lane.b32.xlu1 %v184_v44, %s6979_s13  ;;  %331 = vrot.lane.b32.xlu0 %v183_v45, %s6979_s13  ;;  %v83_v44 = vld [vmem:[%s10334_s0 + $0x278] sm:$0xff]  ;;  %v82_v45 = vld [vmem:[%s10334_s0 + $0x270] sm:$0xff]  ;;  %149 = vst.msk [vmem:[#allocation2 + $0x190] sm:$0xff] %vm98_vm0, %v84_v49  ;;  %151 = vst.msk [vmem:[#allocation2 + $0x1a0] sm:$0xff] %vm98_vm0, %v86_v53 }
  0x2b   :  { %148 = vst.msk [vmem:[#allocation2 + $0x188] sm:$0xff] %vm98_vm0, %v83_v44  ;;  %147 = vst.msk [vmem:[#allocation2 + $0x180] sm:$0xff] %vm98_vm0, %v82_v45  ;;  %v87_v52 = vld [vmem:[%s10334_s0 + $0x2a8] sm:$0xff]  ;;  %v89_v56 = vld [vmem:[%s10334_s0 + $0x2c0] sm:$0xff] }
  0x2c   :  { %152 = vst.msk [vmem:[#allocation2 + $0x1a8] sm:$0xff] %vm98_vm0, %v87_v52  ;;  %154 = vst.msk [vmem:[#allocation2 + $0x1b8] sm:$0xff] %vm98_vm0, %v89_v56  ;;  %v90_v61 = vld [vmem:[%s10334_s0 + $0x2d0] sm:$0xff]  ;;  %v92_v3 = vld [vmem:[%s10334_s0 + $0x2e8] sm:$0xff] }
  0x2d   :  { %156 = vst.msk [vmem:[#allocation2 + $0x1c8] sm:$0xff] %vm98_vm0, %v91_v60  ;;  %155 = vst.msk [vmem:[#allocation2 + $0x1c0] sm:$0xff] %vm98_vm0, %v90_v61  ;;  %v93_v1 = vld [vmem:[%s10334_s0 + $0x2f0] sm:$0xff]  ;;  %v95_v8 = vld [vmem:[%s10334_s0 + $0x308] sm:$0xff] }
  0x2e   :  { %337 = vrot.lane.b32.xlu1 %v186_v50, %s6979_s13  ;;  %335 = vrot.lane.b32.xlu0 %v185_v51, %s6979_s13  ;;  %v210_v50 = vld [vmem:[%s10334_s0 + $0x261] sm:$0xff]  ;;  %v209_v51 = vld [vmem:[%s10334_s0 + $0x259] sm:$0xff]  ;;  %158 = vst.msk [vmem:[#allocation2 + $0x1d8] sm:$0xff] %vm98_vm0, %v93_v1  ;;  %157 = vst.msk [vmem:[#allocation2 + $0x1d0] sm:$0xff] %vm98_vm0, %v92_v3 }
  0x2f   :  { %160 = vst.msk [vmem:[#allocation2 + $0x1e8] sm:$0xff] %vm98_vm0, %v95_v8  ;;  %v94_v9 = vld [vmem:[%s10334_s0 + $0x300] sm:$0xff]  ;;  %v96_v14 = vld [vmem:[%s10334_s0 + $0x318] sm:$0xff] }
  0x30   :  { %159 = vst.msk [vmem:[#allocation2 + $0x1e0] sm:$0xff] %vm98_vm0, %v94_v9  ;;  %v97_v13 = vld [vmem:[%s10334_s0 + $0x320] sm:$0xff]  ;;  %161 = vst.msk [vmem:[#allocation2 + $0x1f0] sm:$0xff] %vm98_vm0, %v96_v14 }
  0x31   :  { %162 = vst.msk [vmem:[#allocation2 + $0x1f8] sm:$0xff] %vm98_vm0, %v97_v13  ;;  %vm4423_vm0 = vcmask 195712  }
  0x32   :  { %341 = vrot.lane.b32.xlu1 %v188_v54, %s6979_s13  ;;  %339 = vrot.lane.b32.xlu0 %v187_v55, %s6979_s13  ;;  %v212_v54 = vld [vmem:[%s10334_s0 + $0x279] sm:$0xff]  ;;  %v211_v55 = vld [vmem:[%s10334_s0 + $0x271] sm:$0xff] }
  0x36   :  { %345 = vrot.lane.b32.xlu1 %v190_v58, %s6979_s13  ;;  %343 = vrot.lane.b32.xlu0 %v189_v59, %s6979_s13  ;;  %v214_v58 = vld [vmem:[%s10334_s0 + $0x291] sm:$0xff]  ;;  %v213_v59 = vld [vmem:[%s10334_s0 + $0x289] sm:$0xff] }
  0x3a   :  { %349 = vrot.lane.b32.xlu1 %v192_v62, %s6979_s13  ;;  %347 = vrot.lane.b32.xlu0 %v191_v63, %s6979_s13  ;;  %v216_v62 = vld [vmem:[%s10334_s0 + $0x2a9] sm:$0xff]  ;;  %v215_v63 = vld [vmem:[%s10334_s0 + $0x2a1] sm:$0xff] }
  0x3e   :  { %353 = vrot.lane.b32.xlu1 %v194_v6, %s6979_s13  ;;  %351 = vrot.lane.b32.xlu0 %v193_v7, %s6979_s13  ;;  %v218_v6 = vld [vmem:[%s10334_s0 + $0x2c1] sm:$0xff]  ;;  %v217_v7 = vld [vmem:[%s10334_s0 + $0x2b9] sm:$0xff] }
  0x42   :  { %357 = vrot.lane.b32.xlu1 %v196_v10, %s6979_s13  ;;  %355 = vrot.lane.b32.xlu0 %v195_v11, %s6979_s13  ;;  %v220_v10 = vld [vmem:[%s10334_s0 + $0x2d9] sm:$0xff]  ;;  %v219_v11 = vld [vmem:[%s10334_s0 + $0x2d1] sm:$0xff] }
  0x46   :  { %361 = vrot.lane.b32.xlu1 %v198_v15, %s6979_s13  ;;  %359 = vrot.lane.b32.xlu0 %v197_v17, %s6979_s13  ;;  %v222_v15 = vld [vmem:[%s10334_s0 + $0x2f1] sm:$0xff]  ;;  %v221_v17 = vld [vmem:[%s10334_s0 + $0x2e9] sm:$0xff] }
  0x4a   :  { %365 = vrot.lane.b32.xlu1 %v200_v28, %s6979_s13  ;;  %363 = vrot.lane.b32.xlu0 %v199_v29, %s6979_s13  ;;  %v224_v28 = vld [vmem:[%s10334_s0 + $0x309] sm:$0xff]  ;;  %v223_v29 = vld [vmem:[%s10334_s0 + $0x301] sm:$0xff] }
  0x4e   :  { %369 = vrot.lane.b32.xlu1 %v202_v34, %s6979_s13  ;;  %367 = vrot.lane.b32.xlu0 %v201_v35, %s6979_s13  ;;  %v226_v34 = vld [vmem:[%s10334_s0 + $0x321] sm:$0xff]  ;;  %v225_v35 = vld [vmem:[%s10334_s0 + $0x319] sm:$0xff] }
  0x52   :  { %373 = vrot.lane.b32.xlu1 %v204_v38, %s6979_s13  ;;  %371 = vrot.lane.b32.xlu0 %v203_v39, %s6979_s13  ;;  %v549_v38 = vld [vmem:[%s10334_s0 + $0xa] sm:$0xff]  ;;  %v548_v39 = vld [vmem:[%s10334_s0 + $0x2] sm:$0xff] }
  0x56   :  { %377 = vrot.lane.b32.xlu1 %v206_v42, %s6979_s13  ;;  %375 = vrot.lane.b32.xlu0 %v205_v43, %s6979_s13  ;;  %v7629_v42 = vld [vmem:[%s10334_s0 + $0x22] sm:$0xff]  ;;  %v7634_v43 = vld [vmem:[%s10334_s0 + $0x1a] sm:$0xff] }
  0x5a   :  { %381 = vrot.lane.b32.xlu1 %v208_v46, %s6979_s13  ;;  %379 = vrot.lane.b32.xlu0 %v207_v47, %s6979_s13  ;;  %v7645_v46 = vld [vmem:[%s10334_s0 + $0x3a] sm:$0xff]  ;;  %v7650_v47 = vld [vmem:[%s10334_s0 + $0x32] sm:$0xff] }
  0x5e   :  { %385 = vrot.lane.b32.xlu1 %v210_v50, %s6979_s13  ;;  %383 = vrot.lane.b32.xlu0 %v209_v51, %s6979_s13  ;;  %v7661_v50 = vld [vmem:[%s10334_s0 + $0x52] sm:$0xff]  ;;  %v7666_v51 = vld [vmem:[%s10334_s0 + $0x4a] sm:$0xff] }
  0x62   :  { %389 = vrot.lane.b32.xlu1 %v212_v54, %s6979_s13  ;;  %387 = vrot.lane.b32.xlu0 %v211_v55, %s6979_s13  ;;  %v7677_v54 = vld [vmem:[%s10334_s0 + $0x6a] sm:$0xff]  ;;  %v7682_v55 = vld [vmem:[%s10334_s0 + $0x62] sm:$0xff] }
  0x66   :  { %393 = vrot.lane.b32.xlu1 %v214_v58, %s6979_s13  ;;  %391 = vrot.lane.b32.xlu0 %v213_v59, %s6979_s13  ;;  %v7693_v58 = vld [vmem:[%s10334_s0 + $0x82] sm:$0xff]  ;;  %v7698_v59 = vld [vmem:[%s10334_s0 + $0x7a] sm:$0xff] }
  0x6a   :  { %397 = vrot.lane.b32.xlu1 %v216_v62, %s6979_s13  ;;  %395 = vrot.lane.b32.xlu0 %v215_v63, %s6979_s13  ;;  %v7709_v62 = vld [vmem:[%s10334_s0 + $0x9a] sm:$0xff]  ;;  %v7714_v63 = vld [vmem:[%s10334_s0 + $0x92] sm:$0xff] }
  0x6e   :  { %401 = vrot.lane.b32.xlu1 %v218_v6, %s6979_s13  ;;  %399 = vrot.lane.b32.xlu0 %v217_v7, %s6979_s13  ;;  %v563_v6 = vld [vmem:[%s10334_s0 + $0xb2] sm:$0xff]  ;;  %v562_v7 = vld [vmem:[%s10334_s0 + $0xaa] sm:$0xff] }
  0x72   :  { %405 = vrot.lane.b32.xlu1 %v220_v10, %s6979_s13  ;;  %403 = vrot.lane.b32.xlu0 %v219_v11, %s6979_s13  ;;  %v565_v10 = vld [vmem:[%s10334_s0 + $0xca] sm:$0xff]  ;;  %v564_v11 = vld [vmem:[%s10334_s0 + $0xc2] sm:$0xff] }
  0x74   :  { %v296_v21 = vpop.permute.xlu1 %295  ;;  %v292_v22 = vpop.permute.xlu0 %291 }
  0x75   :  { %486 = vst.msk [vmem:[#allocation2 + $0x10] sm:$0xff] %vm483_vm1, %v296_v21  ;;  %484 = vst.msk [vmem:[#allocation2] sm:$0xff] %vm483_vm1, %v292_v22 }
  0x76   :  { %409 = vrot.lane.b32.xlu1 %v222_v15, %s6979_s13  ;;  %407 = vrot.lane.b32.xlu0 %v221_v17, %s6979_s13  ;;  %v567_v15 = vld [vmem:[%s10334_s0 + $0xe2] sm:$0xff]  ;;  %v566_v17 = vld [vmem:[%s10334_s0 + $0xda] sm:$0xff] }
  0x78   :  { %v298_v32 = vpop.permute.xlu1 %297  ;;  %v294_v33 = vpop.permute.xlu0 %293 }
  0x79   :  { %487 = vst.msk [vmem:[#allocation2 + $0x18] sm:$0xff] %vm483_vm1, %v298_v32  ;;  %485 = vst.msk [vmem:[#allocation2 + $0x8] sm:$0xff] %vm483_vm1, %v294_v33 }
  0x7a   :  { %413 = vrot.lane.b32.xlu1 %v224_v28, %s6979_s13  ;;  %411 = vrot.lane.b32.xlu0 %v223_v29, %s6979_s13  ;;  %v569_v28 = vld [vmem:[%s10334_s0 + $0xfa] sm:$0xff]  ;;  %v568_v29 = vld [vmem:[%s10334_s0 + $0xf2] sm:$0xff] }
  0x7c   :  { %v302_v36 = vpop.permute.xlu1 %301  ;;  %v300_v37 = vpop.permute.xlu0 %299 }
  0x7d   :  { %489 = vst.msk [vmem:[#allocation2 + $0x28] sm:$0xff] %vm483_vm1, %v302_v36  ;;  %488 = vst.msk [vmem:[#allocation2 + $0x20] sm:$0xff] %vm483_vm1, %v300_v37 }
  0x7e   :  { %417 = vrot.lane.b32.xlu1 %v226_v34, %s6979_s13  ;;  %415 = vrot.lane.b32.xlu0 %v225_v35, %s6979_s13  ;;  %v571_v34 = vld [vmem:[%s10334_s0 + $0x112] sm:$0xff]  ;;  %v570_v35 = vld [vmem:[%s10334_s0 + $0x10a] sm:$0xff]  ;;  %s6987_s13 = smov 8  }
  0x80   :  { %v306_v40 = vpop.permute.xlu1 %305  ;;  %v304_v41 = vpop.permute.xlu0 %303 }
  0x81   :  { %491 = vst.msk [vmem:[#allocation2 + $0x38] sm:$0xff] %vm483_vm1, %v306_v40  ;;  %490 = vst.msk [vmem:[#allocation2 + $0x30] sm:$0xff] %vm483_vm1, %v304_v41 }
  0x82   :  { %678 = vrot.lane.b32.xlu1 %v549_v38, %s6980_s30  ;;  %676 = vrot.lane.b32.xlu0 %v548_v39, %s6980_s30  ;;  %v573_v38 = vld [vmem:[%s10334_s0 + $0x12a] sm:$0xff]  ;;  %v572_v39 = vld [vmem:[%s10334_s0 + $0x122] sm:$0xff] }
  0x84   :  { %v310_v44 = vpop.permute.xlu1 %309  ;;  %v308_v45 = vpop.permute.xlu0 %307 }
  0x85   :  { %493 = vst.msk [vmem:[#allocation2 + $0x48] sm:$0xff] %vm483_vm1, %v310_v44  ;;  %492 = vst.msk [vmem:[#allocation2 + $0x40] sm:$0xff] %vm483_vm1, %v308_v45  ;;  %v575_v44 = vld [vmem:[%s10334_s0 + $0x142] sm:$0xff]  ;;  %v574_v45 = vld [vmem:[%s10334_s0 + $0x13a] sm:$0xff] }
  0x86   :  { %682 = vrot.lane.b32.xlu1 %v7629_v42, %s6980_s30  ;;  %680 = vrot.lane.b32.xlu0 %v7634_v43, %s6980_s30 }
  0x88   :  { %v314_v48 = vpop.permute.xlu1 %313  ;;  %v312_v49 = vpop.permute.xlu0 %311 }
  0x89   :  { %495 = vst.msk [vmem:[#allocation2 + $0x58] sm:$0xff] %vm483_vm1, %v314_v48  ;;  %494 = vst.msk [vmem:[#allocation2 + $0x50] sm:$0xff] %vm483_vm1, %v312_v49 }
  0x8a   :  { %686 = vrot.lane.b32.xlu1 %v7645_v46, %s6980_s30  ;;  %684 = vrot.lane.b32.xlu0 %v7650_v47, %s6980_s30 }
  0x8c   :  { %v318_v52 = vpop.permute.xlu1 %317  ;;  %v316_v53 = vpop.permute.xlu0 %315 }
  0x8d   :  { %497 = vst.msk [vmem:[#allocation2 + $0x68] sm:$0xff] %vm483_vm1, %v318_v52  ;;  %496 = vst.msk [vmem:[#allocation2 + $0x60] sm:$0xff] %vm483_vm1, %v316_v53  ;;  %v577_v52 = vld [vmem:[%s10334_s0 + $0x15a] sm:$0xff]  ;;  %v576_v53 = vld [vmem:[%s10334_s0 + $0x152] sm:$0xff] }
  0x8e   :  { %690 = vrot.lane.b32.xlu1 %v7661_v50, %s6980_s30  ;;  %688 = vrot.lane.b32.xlu0 %v7666_v51, %s6980_s30 }
  0x90   :  { %v322_v56 = vpop.permute.xlu1 %321  ;;  %v320_v57 = vpop.permute.xlu0 %319 }
  0x91   :  { %499 = vst.msk [vmem:[#allocation2 + $0x78] sm:$0xff] %vm483_vm1, %v322_v56  ;;  %498 = vst.msk [vmem:[#allocation2 + $0x70] sm:$0xff] %vm483_vm1, %v320_v57 }
  0x92   :  { %694 = vrot.lane.b32.xlu1 %v7677_v54, %s6980_s30  ;;  %692 = vrot.lane.b32.xlu0 %v7682_v55, %s6980_s30 }
  0x94   :  { %v326_v60 = vpop.permute.xlu1 %325  ;;  %v324_v61 = vpop.permute.xlu0 %323 }
  0x95   :  { %501 = vst.msk [vmem:[#allocation2 + $0x88] sm:$0xff] %vm483_vm1, %v326_v60  ;;  %500 = vst.msk [vmem:[#allocation2 + $0x80] sm:$0xff] %vm483_vm1, %v324_v61  ;;  %v579_v60 = vld [vmem:[%s10334_s0 + $0x172] sm:$0xff]  ;;  %v578_v61 = vld [vmem:[%s10334_s0 + $0x16a] sm:$0xff] }
  0x96   :  { %698 = vrot.lane.b32.xlu1 %v7693_v58, %s6980_s30  ;;  %696 = vrot.lane.b32.xlu0 %v7698_v59, %s6980_s30 }
  0x98   :  { %v330_v1 = vpop.permute.xlu1 %329  ;;  %v328_v3 = vpop.permute.xlu0 %327 }
  0x99   :  { %503 = vst.msk [vmem:[#allocation2 + $0x98] sm:$0xff] %vm483_vm1, %v330_v1  ;;  %502 = vst.msk [vmem:[#allocation2 + $0x90] sm:$0xff] %vm483_vm1, %v328_v3 }
  0x9a   :  { %702 = vrot.lane.b32.xlu1 %v7709_v62, %s6980_s30  ;;  %700 = vrot.lane.b32.xlu0 %v7714_v63, %s6980_s30 }
  0x9c   :  { %v334_v8 = vpop.permute.xlu1 %333  ;;  %v332_v9 = vpop.permute.xlu0 %331 }
  0x9d   :  { %505 = vst.msk [vmem:[#allocation2 + $0xa8] sm:$0xff] %vm483_vm1, %v334_v8  ;;  %504 = vst.msk [vmem:[#allocation2 + $0xa0] sm:$0xff] %vm483_vm1, %v332_v9 }
  0x9e   :  { %706 = vrot.lane.b32.xlu1 %v563_v6, %s6980_s30  ;;  %704 = vrot.lane.b32.xlu0 %v562_v7, %s6980_s30  ;;  %v581_v6 = vld [vmem:[%s10334_s0 + $0x1ba] sm:$0xff]  ;;  %v580_v7 = vld [vmem:[%s10334_s0 + $0x1b2] sm:$0xff] }
  0xa0   :  { %v338_v13 = vpop.permute.xlu1 %337  ;;  %v336_v14 = vpop.permute.xlu0 %335 }
  0xa1   :  { %507 = vst.msk [vmem:[#allocation2 + $0xb8] sm:$0xff] %vm483_vm1, %v338_v13  ;;  %506 = vst.msk [vmem:[#allocation2 + $0xb0] sm:$0xff] %vm483_vm1, %v336_v14 }
  0xa2   :  { %710 = vrot.lane.b32.xlu1 %v565_v10, %s6980_s30  ;;  %708 = vrot.lane.b32.xlu0 %v564_v11, %s6980_s30  ;;  %v583_v10 = vld [vmem:[%s10334_s0 + $0x1d2] sm:$0xff]  ;;  %v582_v11 = vld [vmem:[%s10334_s0 + $0x1ca] sm:$0xff] }
  0xa4   :  { %v342_v21 = vpop.permute.xlu1 %341  ;;  %v340_v22 = vpop.permute.xlu0 %339 }
  0xa5   :  { %509 = vst.msk [vmem:[#allocation2 + $0xc8] sm:$0xff] %vm483_vm1, %v342_v21  ;;  %508 = vst.msk [vmem:[#allocation2 + $0xc0] sm:$0xff] %vm483_vm1, %v340_v22 }
  0xa6   :  { %714 = vrot.lane.b32.xlu1 %v567_v15, %s6980_s30  ;;  %712 = vrot.lane.b32.xlu0 %v566_v17, %s6980_s30  ;;  %v585_v15 = vld [vmem:[%s10334_s0 + $0x1ea] sm:$0xff]  ;;  %v584_v17 = vld [vmem:[%s10334_s0 + $0x1e2] sm:$0xff] }
  0xa8   :  { %v346_v32 = vpop.permute.xlu1 %345  ;;  %v344_v33 = vpop.permute.xlu0 %343 }
  0xa9   :  { %511 = vst.msk [vmem:[#allocation2 + $0xd8] sm:$0xff] %vm483_vm1, %v346_v32  ;;  %510 = vst.msk [vmem:[#allocation2 + $0xd0] sm:$0xff] %vm483_vm1, %v344_v33 }
  0xaa   :  { %718 = vrot.lane.b32.xlu1 %v569_v28, %s6980_s30  ;;  %716 = vrot.lane.b32.xlu0 %v568_v29, %s6980_s30  ;;  %v587_v28 = vld [vmem:[%s10334_s0 + $0x202] sm:$0xff]  ;;  %v586_v29 = vld [vmem:[%s10334_s0 + $0x1fa] sm:$0xff] }
  0xac   :  { %v350_v36 = vpop.permute.xlu1 %349  ;;  %v348_v37 = vpop.permute.xlu0 %347 }
  0xad   :  { %513 = vst.msk [vmem:[#allocation2 + $0xe8] sm:$0xff] %vm483_vm1, %v350_v36  ;;  %512 = vst.msk [vmem:[#allocation2 + $0xe0] sm:$0xff] %vm483_vm1, %v348_v37 }
  0xae   :  { %722 = vrot.lane.b32.xlu1 %v571_v34, %s6980_s30  ;;  %720 = vrot.lane.b32.xlu0 %v570_v35, %s6980_s30  ;;  %v589_v34 = vld [vmem:[%s10334_s0 + $0x21a] sm:$0xff]  ;;  %v588_v35 = vld [vmem:[%s10334_s0 + $0x212] sm:$0xff] }
  0xb0   :  { %v354_v40 = vpop.permute.xlu1 %353  ;;  %v352_v41 = vpop.permute.xlu0 %351 }
  0xb1   :  { %515 = vst.msk [vmem:[#allocation2 + $0xf8] sm:$0xff] %vm483_vm1, %v354_v40  ;;  %514 = vst.msk [vmem:[#allocation2 + $0xf0] sm:$0xff] %vm483_vm1, %v352_v41 }
  0xb2   :  { %726 = vrot.lane.b32.xlu1 %v573_v38, %s6980_s30  ;;  %724 = vrot.lane.b32.xlu0 %v572_v39, %s6980_s30  ;;  %v591_v38 = vld [vmem:[%s10334_s0 + $0x232] sm:$0xff]  ;;  %v590_v39 = vld [vmem:[%s10334_s0 + $0x22a] sm:$0xff] }
  0xb4   :  { %v358_v48 = vpop.permute.xlu1 %357  ;;  %v356_v49 = vpop.permute.xlu0 %355 }
  0xb5   :  { %517 = vst.msk [vmem:[#allocation2 + $0x108] sm:$0xff] %vm483_vm1, %v358_v48  ;;  %516 = vst.msk [vmem:[#allocation2 + $0x100] sm:$0xff] %vm483_vm1, %v356_v49 }
  0xb6   :  { %730 = vrot.lane.b32.xlu1 %v575_v44, %s6980_s30  ;;  %728 = vrot.lane.b32.xlu0 %v574_v45, %s6980_s30  ;;  %v593_v44 = vld [vmem:[%s10334_s0 + $0x24a] sm:$0xff]  ;;  %v592_v45 = vld [vmem:[%s10334_s0 + $0x242] sm:$0xff] }
  0xb8   :  { %v362_v56 = vpop.permute.xlu1 %361  ;;  %v360_v57 = vpop.permute.xlu0 %359 }
  0xb9   :  { %519 = vst.msk [vmem:[#allocation2 + $0x118] sm:$0xff] %vm483_vm1, %v362_v56  ;;  %518 = vst.msk [vmem:[#allocation2 + $0x110] sm:$0xff] %vm483_vm1, %v360_v57 }
  0xba   :  { %734 = vrot.lane.b32.xlu1 %v577_v52, %s6980_s30  ;;  %732 = vrot.lane.b32.xlu0 %v576_v53, %s6980_s30  ;;  %v594_v52 = vld [vmem:[%s10334_s0 + $0x25a] sm:$0xff] }
  0xbc   :  { %v366_v1 = vpop.permute.xlu1 %365  ;;  %v364_v3 = vpop.permute.xlu0 %363 }
  0xbd   :  { %521 = vst.msk [vmem:[#allocation2 + $0x128] sm:$0xff] %vm483_vm1, %v366_v1  ;;  %520 = vst.msk [vmem:[#allocation2 + $0x120] sm:$0xff] %vm483_vm1, %v364_v3 }
  0xbe   :  { %738 = vrot.lane.b32.xlu1 %v579_v60, %s6980_s30  ;;  %736 = vrot.lane.b32.xlu0 %v578_v61, %s6980_s30 }
  0xc0   :  { %v370_v8 = vpop.permute.xlu1 %369  ;;  %v368_v9 = vpop.permute.xlu0 %367 }
  0xc1   :  { %523 = vst.msk [vmem:[#allocation2 + $0x138] sm:$0xff] %vm483_vm1, %v370_v8  ;;  %522 = vst.msk [vmem:[#allocation2 + $0x130] sm:$0xff] %vm483_vm1, %v368_v9 }
  0xc2   :  { %742 = vrot.lane.b32.xlu1 %v581_v6, %s6980_s30  ;;  %740 = vrot.lane.b32.xlu0 %v580_v7, %s6980_s30 }
  0xc4   :  { %v374_v13 = vpop.permute.xlu1 %373  ;;  %v372_v14 = vpop.permute.xlu0 %371 }
  0xc5   :  { %525 = vst.msk [vmem:[#allocation2 + $0x148] sm:$0xff] %vm483_vm1, %v374_v13  ;;  %524 = vst.msk [vmem:[#allocation2 + $0x140] sm:$0xff] %vm483_vm1, %v372_v14 }
  0xc6   :  { %746 = vrot.lane.b32.xlu1 %v583_v10, %s6980_s30  ;;  %744 = vrot.lane.b32.xlu0 %v582_v11, %s6980_s30 }
  0xc8   :  { %v378_v21 = vpop.permute.xlu1 %377  ;;  %v376_v22 = vpop.permute.xlu0 %375 }
  0xc9   :  { %527 = vst.msk [vmem:[#allocation2 + $0x158] sm:$0xff] %vm483_vm1, %v378_v21  ;;  %526 = vst.msk [vmem:[#allocation2 + $0x150] sm:$0xff] %vm483_vm1, %v376_v22 }
  0xca   :  { %750 = vrot.lane.b32.xlu1 %v585_v15, %s6980_s30  ;;  %748 = vrot.lane.b32.xlu0 %v584_v17, %s6980_s30 }
  0xcc   :  { %v382_v32 = vpop.permute.xlu1 %381  ;;  %v380_v33 = vpop.permute.xlu0 %379 }
  0xcd   :  { %529 = vst.msk [vmem:[#allocation2 + $0x168] sm:$0xff] %vm483_vm1, %v382_v32  ;;  %528 = vst.msk [vmem:[#allocation2 + $0x160] sm:$0xff] %vm483_vm1, %v380_v33 }
  0xce   :  { %754 = vrot.lane.b32.xlu1 %v587_v28, %s6980_s30  ;;  %752 = vrot.lane.b32.xlu0 %v586_v29, %s6980_s30 }
  0xd0   :  { %v386_v36 = vpop.permute.xlu1 %385  ;;  %v384_v37 = vpop.permute.xlu0 %383 }
  0xd1   :  { %531 = vst.msk [vmem:[#allocation2 + $0x178] sm:$0xff] %vm483_vm1, %v386_v36  ;;  %530 = vst.msk [vmem:[#allocation2 + $0x170] sm:$0xff] %vm483_vm1, %v384_v37 }
  0xd2   :  { %758 = vrot.lane.b32.xlu1 %v589_v34, %s6980_s30  ;;  %756 = vrot.lane.b32.xlu0 %v588_v35, %s6980_s30 }
  0xd4   :  { %v390_v40 = vpop.permute.xlu1 %389  ;;  %v388_v41 = vpop.permute.xlu0 %387 }
  0xd5   :  { %533 = vst.msk [vmem:[#allocation2 + $0x188] sm:$0xff] %vm483_vm1, %v390_v40  ;;  %532 = vst.msk [vmem:[#allocation2 + $0x180] sm:$0xff] %vm483_vm1, %v388_v41 }
  0xd6   :  { %762 = vrot.lane.b32.xlu1 %v591_v38, %s6980_s30  ;;  %760 = vrot.lane.b32.xlu0 %v590_v39, %s6980_s30 }
  0xd8   :  { %v394_v48 = vpop.permute.xlu1 %393  ;;  %v392_v49 = vpop.permute.xlu0 %391 }
  0xd9   :  { %535 = vst.msk [vmem:[#allocation2 + $0x198] sm:$0xff] %vm483_vm1, %v394_v48  ;;  %534 = vst.msk [vmem:[#allocation2 + $0x190] sm:$0xff] %vm483_vm1, %v392_v49 }
  0xda   :  { %766 = vrot.lane.b32.xlu1 %v593_v44, %s6980_s30  ;;  %764 = vrot.lane.b32.xlu0 %v592_v45, %s6980_s30 }
  0xdc   :  { %v398_v53 = vpop.permute.xlu1 %397  ;;  %v396_v56 = vpop.permute.xlu0 %395 }
  0xdd   :  { %537 = vst.msk [vmem:[#allocation2 + $0x1a8] sm:$0xff] %vm483_vm1, %v398_v53  ;;  %536 = vst.msk [vmem:[#allocation2 + $0x1a0] sm:$0xff] %vm483_vm1, %v396_v56 }
  0xde   :  { %1062 = vrot.lane.b32.xlu1 %v7113_v12, %s6981_s20  ;;  %768 = vrot.lane.b32.xlu0 %v594_v52, %s6980_s30 }
  0xe0   :  { %v402_v57 = vpop.permute.xlu1 %401  ;;  %v400_v60 = vpop.permute.xlu0 %399 }
  0xe1   :  { %539 = vst.msk [vmem:[#allocation2 + $0x1b8] sm:$0xff] %vm483_vm1, %v402_v57  ;;  %538 = vst.msk [vmem:[#allocation2 + $0x1b0] sm:$0xff] %vm483_vm1, %v400_v60 }
  0xe2   :  { %1447 = vrot.lane.b32.xlu1 %v7053_v0, %s6982_s21  ;;  %1064 = vrot.lane.b32.xlu0 %v7130_v16, %s6981_s20 }
  0xe4   :  { %v406_v61 = vpop.permute.xlu1 %405  ;;  %v404_v1 = vpop.permute.xlu0 %403 }
  0xe5   :  { %541 = vst.msk [vmem:[#allocation2 + $0x1c8] sm:$0xff] %vm483_vm1, %v406_v61  ;;  %540 = vst.msk [vmem:[#allocation2 + $0x1c0] sm:$0xff] %vm483_vm1, %v404_v1 }
  0xe6   :  { %1832 = vrot.lane.b32.xlu1 %v7634_v43, %s6983_s22  ;;  %1449 = vrot.lane.b32.xlu0 %v7064_v2, %s6982_s21 }
  0xe8   :  { %v410_v12 = vpop.permute.xlu1 %409  ;;  %v408_v3 = vpop.permute.xlu0 %407 }
  0xe9   :  { %543 = vst.msk [vmem:[#allocation2 + $0x1d8] sm:$0xff] %vm483_vm1, %v410_v12  ;;  %542 = vst.msk [vmem:[#allocation2 + $0x1d0] sm:$0xff] %vm483_vm1, %v408_v3 }
  0xea   :  { %2218 = vrot.lane.b32.xlu1 %v7146_v19, %s6984_s23  ;;  %1834 = vrot.lane.b32.xlu0 %v7629_v42, %s6983_s22  ;;  %v3309_v42 = vld [vmem:[%s10335_s1] sm:$0xff] }
  0xec   :  { %v414_v0 = vpop.permute.xlu1 %413  ;;  %v412_v16 = vpop.permute.xlu0 %411 }
  0xed   :  { %545 = vst.msk [vmem:[#allocation2 + $0x1e8] sm:$0xff] %vm483_vm1, %v414_v0  ;;  %544 = vst.msk [vmem:[#allocation2 + $0x1e0] sm:$0xff] %vm483_vm1, %v412_v16 }
  0xee   :  { %2220 = vrot.lane.b32.xlu1 %v7141_v18, %s6984_s23  ;;  %1066 = vrot.lane.b32.xlu0 %v7146_v19, %s6981_s20  ;;  %v3310_v19 = vld [vmem:[%s10335_s1 + $0x8] sm:$0x1] }
  0xef   :  { %v6895_v6 = vpack.c.bf16 %v3310_v19, %v3309_v42 }
  0xf0   :  { %v418_v2 = vpop.permute.xlu1 %417  ;;  %v416_v43 = vpop.permute.xlu0 %415 }
  0xf1   :  { %547 = vst.msk [vmem:[#allocation2 + $0x1f8] sm:$0xff] %vm483_vm1, %v418_v2  ;;  %546 = vst.msk [vmem:[#allocation2 + $0x1f0] sm:$0xff] %vm483_vm1, %v416_v43  ;;  %6897 = vmatprep.subr.msk.bf16.mxu0 %vm6896_vm5, %v6895_v6  ;;  %6949 = vmatprep.subr.msk.bf16.mxu1 %vm6896_vm5, %v6895_v6  ;;  %vm4520_vm1 = vcmask 261312  }
  0xf2   :  { %1068 = vrot.lane.b32.xlu1 %v7141_v18, %s6981_s20  ;;  %2603 = vrot.lane.b32.xlu0 %v7080_v5, %s6985_s24  ;;  %v6223_v18 = vld [vmem:[%s10334_s0 + $0x39] sm:$0xff] }
  0xf3   :  { %6900 = vmatpush3.bf16.msk.msra.mxu0 %vm6896_vm5, %v6895_v6  ;;  %6950 = vmatpush3.bf16.msk.msra.mxu1 %vm6896_vm5, %v6895_v6  ;;  %vm4909_vm5 = vcmask 523712  }
  0xf4   :  { %v679_v7 = vpop.permute.xlu1 %678  ;;  %v677_v8 = vpop.permute.xlu0 %676 }
  0xf5   :  { %870 = vst.msk [vmem:[#allocation2 + $0x8] sm:$0xff] %vm868_vm2, %v679_v7  ;;  %869 = vst.msk [vmem:[#allocation2] sm:$0xff] %vm868_vm2, %v677_v8  ;;  %v6358_v8 = vld [vmem:[%s10334_s0 + $0xa8] sm:$0xff] }
  0xf6   :  { %2605 = vrot.lane.b32.xlu1 %v7075_v4, %s6985_s24  ;;  %1451 = vrot.lane.b32.xlu0 %v7080_v5, %s6982_s21 }
  0xf8   :  { %v683_v9 = vpop.permute.xlu1 %682  ;;  %v681_v10 = vpop.permute.xlu0 %680 }
  0xf9   :  { %872 = vst.msk [vmem:[#allocation2 + $0x18] sm:$0xff] %vm868_vm2, %v683_v9  ;;  %871 = vst.msk [vmem:[#allocation2 + $0x10] sm:$0xff] %vm868_vm2, %v681_v10  ;;  %v6359_v10 = vld [vmem:[%s10334_s0 + $0xb0] sm:$0xff] }
  0xfa   :  { %1453 = vrot.lane.b32.xlu1 %v6223_v18, %s6982_s21  ;;  %2988 = vrot.lane.b32.xlu0 %v7650_v47, %s6987_s13 }
  0xfc   :  { %v687_v4 = vpop.permute.xlu1 %686  ;;  %v685_v5 = vpop.permute.xlu0 %684 }
  0xfd   :  { %874 = vst.msk [vmem:[#allocation2 + $0x28] sm:$0xff] %vm868_vm2, %v687_v4  ;;  %873 = vst.msk [vmem:[#allocation2 + $0x20] sm:$0xff] %vm868_vm2, %v685_v5  ;;  %v6422_v5 = vld [vmem:[%s10334_s0 + $0xa9] sm:$0xff] }
  0xfe   :  { %2990 = vrot.lane.b32.xlu1 %v7645_v46, %s6987_s13  ;;  %1836 = vrot.lane.b32.xlu0 %v7650_v47, %s6983_s22  ;;  %v6414_v47 = vld [vmem:[%s10334_s0 + $0x49] sm:$0xff] }
 0x100   :  { %v691_v11 = vpop.permute.xlu1 %690  ;;  %v689_v13 = vpop.permute.xlu0 %688 }
 0x101   :  { %876 = vst.msk [vmem:[#allocation2 + $0x38] sm:$0xff] %vm868_vm2, %v691_v11  ;;  %875 = vst.msk [vmem:[#allocation2 + $0x30] sm:$0xff] %vm868_vm2, %v689_v13  ;;  %v6423_v13 = vld [vmem:[%s10334_s0 + $0xb1] sm:$0xff] }
 0x102   :  { %2222 = vrot.lane.b32.xlu1 %v7170_v23, %s6984_s23  ;;  %1838 = vrot.lane.b32.xlu0 %v7645_v46, %s6983_s22  ;;  %v6415_v46 = vld [vmem:[%s10334_s0 + $0x51] sm:$0xff] }
 0x104   :  { %v695_v14 = vpop.permute.xlu1 %694  ;;  %v693_v15 = vpop.permute.xlu0 %692 }
 0x105   :  { %878 = vst.msk [vmem:[#allocation2 + $0x48] sm:$0xff] %vm868_vm2, %v695_v14  ;;  %877 = vst.msk [vmem:[#allocation2 + $0x40] sm:$0xff] %vm868_vm2, %v693_v15 }
 0x106   :  { %2224 = vrot.lane.b32.xlu1 %v7157_v20, %s6984_s23  ;;  %1070 = vrot.lane.b32.xlu0 %v7170_v23, %s6981_s20 }
 0x108   :  { %v699_v17 = vpop.permute.xlu1 %698  ;;  %v697_v21 = vpop.permute.xlu0 %696 }
 0x109   :  { %880 = vst.msk [vmem:[#allocation2 + $0x58] sm:$0xff] %vm868_vm2, %v699_v17  ;;  %879 = vst.msk [vmem:[#allocation2 + $0x50] sm:$0xff] %vm868_vm2, %v697_v21 }
 0x10a   :  { %1072 = vrot.lane.b32.xlu1 %v7157_v20, %s6981_s20  ;;  %2607 = vrot.lane.b32.xlu0 %v6414_v47, %s6985_s24 }
 0x10c   :  { %v703_v23 = vpop.permute.xlu1 %702  ;;  %v701_v22 = vpop.permute.xlu0 %700 }
 0x10d   :  { %882 = vst.msk [vmem:[#allocation2 + $0x68] sm:$0xff] %vm868_vm2, %v703_v23  ;;  %881 = vst.msk [vmem:[#allocation2 + $0x60] sm:$0xff] %vm868_vm2, %v701_v22 }
 0x10e   :  { %2609 = vrot.lane.b32.xlu1 %v6415_v46, %s6985_s24  ;;  %1455 = vrot.lane.b32.xlu0 %v6414_v47, %s6982_s21  ;;  %v6486_v47 = vld [vmem:[%s10334_s0 + $0xaa] sm:$0xff] }
 0x110   :  { %v707_v28 = vpop.permute.xlu1 %706  ;;  %v705_v29 = vpop.permute.xlu0 %704 }
 0x111   :  { %884 = vst.msk [vmem:[#allocation2 + $0x78] sm:$0xff] %vm868_vm2, %v707_v28  ;;  %883 = vst.msk [vmem:[#allocation2 + $0x70] sm:$0xff] %vm868_vm2, %v705_v29  ;;  %v6360_v29 = vld [vmem:[%s10334_s0 + $0xc0] sm:$0xff] }
 0x112   :  { %1457 = vrot.lane.b32.xlu1 %v6415_v46, %s6982_s21  ;;  %2992 = vrot.lane.b32.xlu0 %v7666_v51, %s6987_s13  ;;  %v6487_v46 = vld [vmem:[%s10334_s0 + $0xb2] sm:$0xff] }
 0x114   :  { %v711_v20 = vpop.permute.xlu1 %710  ;;  %v709_v32 = vpop.permute.xlu0 %708 }
 0x115   :  { %886 = vst.msk [vmem:[#allocation2 + $0x88] sm:$0xff] %vm868_vm2, %v711_v20  ;;  %885 = vst.msk [vmem:[#allocation2 + $0x80] sm:$0xff] %vm868_vm2, %v709_v32 }
 0x116   :  { %2994 = vrot.lane.b32.xlu1 %v7661_v50, %s6987_s13  ;;  %1840 = vrot.lane.b32.xlu0 %v7666_v51, %s6983_s22  ;;  %v6416_v51 = vld [vmem:[%s10334_s0 + $0x61] sm:$0xff] }
 0x118   :  { %v715_v33 = vpop.permute.xlu1 %714  ;;  %v713_v34 = vpop.permute.xlu0 %712 }
 0x119   :  { %888 = vst.msk [vmem:[#allocation2 + $0x98] sm:$0xff] %vm868_vm2, %v715_v33  ;;  %887 = vst.msk [vmem:[#allocation2 + $0x90] sm:$0xff] %vm868_vm2, %v713_v34  ;;  %v6361_v34 = vld [vmem:[%s10334_s0 + $0xc8] sm:$0xff] }
 0x11a   :  { %2226 = vrot.lane.b32.xlu1 %v7182_v25, %s6984_s23  ;;  %1842 = vrot.lane.b32.xlu0 %v7661_v50, %s6983_s22  ;;  %v6417_v50 = vld [vmem:[%s10334_s0 + $0x69] sm:$0xff] }
 0x11c   :  { %v719_v35 = vpop.permute.xlu1 %718  ;;  %v717_v36 = vpop.permute.xlu0 %716 }
 0x11d   :  { %890 = vst.msk [vmem:[#allocation2 + $0xa8] sm:$0xff] %vm868_vm2, %v719_v35  ;;  %889 = vst.msk [vmem:[#allocation2 + $0xa0] sm:$0xff] %vm868_vm2, %v717_v36 }
 0x11e   :  { %2228 = vrot.lane.b32.xlu1 %v7177_v24, %s6984_s23  ;;  %1074 = vrot.lane.b32.xlu0 %v7182_v25, %s6981_s20 }
 0x120   :  { %v723_v37 = vpop.permute.xlu1 %722  ;;  %v721_v38 = vpop.permute.xlu0 %720 }
 0x121   :  { %892 = vst.msk [vmem:[#allocation2 + $0xb8] sm:$0xff] %vm868_vm2, %v723_v37  ;;  %891 = vst.msk [vmem:[#allocation2 + $0xb0] sm:$0xff] %vm868_vm2, %v721_v38 }
 0x122   :  { %1076 = vrot.lane.b32.xlu1 %v7177_v24, %s6981_s20  ;;  %2611 = vrot.lane.b32.xlu0 %v6416_v51, %s6985_s24 }
 0x124   :  { %v727_v25 = vpop.permute.xlu1 %726  ;;  %v725_v39 = vpop.permute.xlu0 %724 }
 0x125   :  { %894 = vst.msk [vmem:[#allocation2 + $0xc8] sm:$0xff] %vm868_vm2, %v727_v25  ;;  %893 = vst.msk [vmem:[#allocation2 + $0xc0] sm:$0xff] %vm868_vm2, %v725_v39 }
 0x126   :  { %2613 = vrot.lane.b32.xlu1 %v6417_v50, %s6985_s24  ;;  %1459 = vrot.lane.b32.xlu0 %v6416_v51, %s6982_s21  ;;  %v6424_v51 = vld [vmem:[%s10334_s0 + $0xc1] sm:$0xff] }
 0x128   :  { %v731_v40 = vpop.permute.xlu1 %730  ;;  %v729_v41 = vpop.permute.xlu0 %728 }
 0x129   :  { %896 = vst.msk [vmem:[#allocation2 + $0xd8] sm:$0xff] %vm868_vm2, %v731_v40  ;;  %895 = vst.msk [vmem:[#allocation2 + $0xd0] sm:$0xff] %vm868_vm2, %v729_v41  ;;  %v6488_v40 = vld [vmem:[%s10334_s0 + $0xc2] sm:$0xff] }
 0x12a   :  { %1461 = vrot.lane.b32.xlu1 %v6417_v50, %s6982_s21  ;;  %2996 = vrot.lane.b32.xlu0 %v7682_v55, %s6987_s13  ;;  %v6425_v50 = vld [vmem:[%s10334_s0 + $0xc9] sm:$0xff] }
 0x12c   :  { %v735_v24 = vpop.permute.xlu1 %734  ;;  %v733_v44 = vpop.permute.xlu0 %732 }
 0x12d   :  { %898 = vst.msk [vmem:[#allocation2 + $0xe8] sm:$0xff] %vm868_vm2, %v735_v24  ;;  %897 = vst.msk [vmem:[#allocation2 + $0xe0] sm:$0xff] %vm868_vm2, %v733_v44  ;;  %v6489_v44 = vld [vmem:[%s10334_s0 + $0xca] sm:$0xff] }
 0x12e   :  { %2998 = vrot.lane.b32.xlu1 %v7677_v54, %s6987_s13  ;;  %1844 = vrot.lane.b32.xlu0 %v7682_v55, %s6983_s22  ;;  %v6418_v55 = vld [vmem:[%s10334_s0 + $0x79] sm:$0xff] }
 0x130   :  { %v739_v45 = vpop.permute.xlu1 %738  ;;  %v737_v48 = vpop.permute.xlu0 %736 }
 0x131   :  { %900 = vst.msk [vmem:[#allocation2 + $0xf8] sm:$0xff] %vm868_vm2, %v739_v45  ;;  %899 = vst.msk [vmem:[#allocation2 + $0xf0] sm:$0xff] %vm868_vm2, %v737_v48 }
 0x132   :  { %2230 = vrot.lane.b32.xlu1 %v7196_v27, %s6984_s23  ;;  %1846 = vrot.lane.b32.xlu0 %v7677_v54, %s6983_s22  ;;  %v6419_v54 = vld [vmem:[%s10334_s0 + $0x81] sm:$0xff] }
 0x134   :  { %v743_v49 = vpop.permute.xlu1 %742  ;;  %v741_v52 = vpop.permute.xlu0 %740 }
 0x135   :  { %902 = vst.msk [vmem:[#allocation2 + $0x108] sm:$0xff] %vm868_vm2, %v743_v49  ;;  %901 = vst.msk [vmem:[#allocation2 + $0x100] sm:$0xff] %vm868_vm2, %v741_v52  ;;  %v6362_v52 = vld [vmem:[%s10334_s0 + $0xd8] sm:$0xff] }
 0x136   :  { %2232 = vrot.lane.b32.xlu1 %v7191_v26, %s6984_s23  ;;  %1078 = vrot.lane.b32.xlu0 %v7196_v27, %s6981_s20 }
 0x138   :  { %v747_v53 = vpop.permute.xlu1 %746  ;;  %v745_v56 = vpop.permute.xlu0 %744 }
 0x139   :  { %904 = vst.msk [vmem:[#allocation2 + $0x118] sm:$0xff] %vm868_vm2, %v747_v53  ;;  %903 = vst.msk [vmem:[#allocation2 + $0x110] sm:$0xff] %vm868_vm2, %v745_v56 }
 0x13a   :  { %1080 = vrot.lane.b32.xlu1 %v7191_v26, %s6981_s20  ;;  %2615 = vrot.lane.b32.xlu0 %v6418_v55, %s6985_s24 }
 0x13c   :  { %v751_v27 = vpop.permute.xlu1 %750  ;;  %v749_v57 = vpop.permute.xlu0 %748 }
 0x13d   :  { %906 = vst.msk [vmem:[#allocation2 + $0x128] sm:$0xff] %vm868_vm2, %v751_v27  ;;  %905 = vst.msk [vmem:[#allocation2 + $0x120] sm:$0xff] %vm868_vm2, %v749_v57 }
 0x13e   :  { %2617 = vrot.lane.b32.xlu1 %v6419_v54, %s6985_s24  ;;  %1463 = vrot.lane.b32.xlu0 %v6418_v55, %s6982_s21 }
 0x140   :  { %v755_v60 = vpop.permute.xlu1 %754  ;;  %v753_v61 = vpop.permute.xlu0 %752 }
 0x141   :  { %908 = vst.msk [vmem:[#allocation2 + $0x138] sm:$0xff] %vm868_vm2, %v755_v60  ;;  %907 = vst.msk [vmem:[#allocation2 + $0x130] sm:$0xff] %vm868_vm2, %v753_v61  ;;  %v6426_v60 = vld [vmem:[%s10334_s0 + $0xd9] sm:$0xff] }
 0x142   :  { %1465 = vrot.lane.b32.xlu1 %v6419_v54, %s6982_s21  ;;  %3000 = vrot.lane.b32.xlu0 %v7698_v59, %s6987_s13  ;;  %v6363_v54 = vld [vmem:[%s10334_s0 + $0xe0] sm:$0xff] }
 0x144   :  { %v759_v26 = vpop.permute.xlu1 %758  ;;  %v757_v1 = vpop.permute.xlu0 %756 }
 0x145   :  { %910 = vst.msk [vmem:[#allocation2 + $0x148] sm:$0xff] %vm868_vm2, %v759_v26  ;;  %909 = vst.msk [vmem:[#allocation2 + $0x140] sm:$0xff] %vm868_vm2, %v757_v1  ;;  %v6427_v1 = vld [vmem:[%s10334_s0 + $0xe1] sm:$0xff] }
 0x146   :  { %3002 = vrot.lane.b32.xlu1 %v7693_v58, %s6987_s13  ;;  %1848 = vrot.lane.b32.xlu0 %v7698_v59, %s6983_s22  ;;  %v6420_v59 = vld [vmem:[%s10334_s0 + $0x91] sm:$0xff] }
 0x148   :  { %v763_v12 = vpop.permute.xlu1 %762  ;;  %v761_v3 = vpop.permute.xlu0 %760 }
 0x149   :  { %912 = vst.msk [vmem:[#allocation2 + $0x158] sm:$0xff] %vm868_vm2, %v763_v12  ;;  %911 = vst.msk [vmem:[#allocation2 + $0x150] sm:$0xff] %vm868_vm2, %v761_v3 }
 0x14a   :  { %2234 = vrot.lane.b32.xlu1 %v7218_v31, %s6984_s23  ;;  %1850 = vrot.lane.b32.xlu0 %v7693_v58, %s6983_s22 }
 0x14c   :  { %v767_v0 = vpop.permute.xlu1 %766  ;;  %v765_v16 = vpop.permute.xlu0 %764 }
 0x14d   :  { %914 = vst.msk [vmem:[#allocation2 + $0x168] sm:$0xff] %vm868_vm2, %v767_v0  ;;  %913 = vst.msk [vmem:[#allocation2 + $0x160] sm:$0xff] %vm868_vm2, %v765_v16  ;;  %v6490_v0 = vld [vmem:[%s10334_s0 + $0xda] sm:$0xff] }
 0x14e   :  { %2236 = vrot.lane.b32.xlu1 %v7213_v30, %s6984_s23  ;;  %1082 = vrot.lane.b32.xlu0 %v7218_v31, %s6981_s20  ;;  %v6421_v31 = vld [vmem:[%s10334_s0 + $0x99] sm:$0xff] }
 0x150   :  { %v1063_v2 = vpop.permute.xlu1 %1062  ;;  %v769_v43 = vpop.permute.xlu0 %768 }
 0x151   :  { %1255 = vst.msk [vmem:[#allocation2] sm:$0xff] %vm1254_vm6, %v1063_v2  ;;  %v6491_v2 = vld [vmem:[%s10334_s0 + $0xe2] sm:$0xff] }
 0x152   :  { %915 = vst.msk [vmem:[#allocation2 + $0x170] sm:$0xff] %vm868_vm2, %v769_v43  ;;  %1084 = vrot.lane.b32.xlu1 %v7213_v30, %s6981_s20  ;;  %2619 = vrot.lane.b32.xlu0 %v6420_v59, %s6985_s24 }
 0x154   :  { %v1448_v58 = vpop.permute.xlu1 %1447  ;;  %v1065_v42 = vpop.permute.xlu0 %1064 }
 0x155   :  { %1640 = vst.msk [vmem:[#allocation2] sm:$0xff] %vm1639_vm7, %v1448_v58 }
 0x156   :  { %1256 = vst.msk [vmem:[#allocation2 + $0x8] sm:$0xff] %vm1254_vm6, %v1065_v42  ;;  %2621 = vrot.lane.b32.xlu1 %v6421_v31, %s6985_s24  ;;  %1467 = vrot.lane.b32.xlu0 %v6420_v59, %s6982_s21  ;;  %v6364_v42 = vld [vmem:[%s10334_s0 + $0xf0] sm:$0xff] }
 0x158   :  { %v1833_v19 = vpop.permute.xlu1 %1832  ;;  %v1450_v30 = vpop.permute.xlu0 %1449 }
 0x159   :  { %2025 = vst.msk [vmem:[#allocation2] sm:$0xff] %vm2024_vm8, %v1833_v19 }
 0x15a   :  { %1641 = vst.msk [vmem:[#allocation2 + $0x8] sm:$0xff] %vm1639_vm7, %v1450_v30  ;;  %1469 = vrot.lane.b32.xlu1 %v6421_v31, %s6982_s21  ;;  %3004 = vrot.lane.b32.xlu0 %v7714_v63, %s6987_s13 }
 0x15c   :  { %v2219_v6 = vpop.permute.xlu1 %2218  ;;  %v1835_v7 = vpop.permute.xlu0 %1834 }
 0x15d   :  { %2411 = vst.msk [vmem:[#allocation2] sm:$0xff] %vm2410_vm9, %v2219_v6 }
 0x15e   :  { %2026 = vst.msk [vmem:[#allocation2 + $0x8] sm:$0xff] %vm2024_vm8, %v1835_v7  ;;  %3006 = vrot.lane.b32.xlu1 %v7709_v62, %s6987_s13  ;;  %1852 = vrot.lane.b32.xlu0 %v7714_v63, %s6983_s22  ;;  %v6365_v7 = vld [vmem:[%s10334_s0 + $0xf8] sm:$0xff] }
 0x160   :  { %v2221_v18 = vpop.permute.xlu1 %2220  ;;  %v1067_v9 = vpop.permute.xlu0 %1066 }
 0x161   :  { %2412 = vst.msk [vmem:[#allocation2 + $0x8] sm:$0xff] %vm2410_vm9, %v2221_v18 }
 0x162   :  { %1257 = vst.msk [vmem:[#allocation2 + $0x10] sm:$0xff] %vm1254_vm6, %v1067_v9  ;;  %2238 = vrot.lane.b32.xlu1 %v6358_v8, %s6984_s23  ;;  %1854 = vrot.lane.b32.xlu0 %v7709_v62, %s6983_s22  ;;  %v6428_v9 = vld [vmem:[%s10334_s0 + $0xf1] sm:$0xff] }
 0x164   :  { %v1069_v63 = vpop.permute.xlu1 %1068  ;;  %v2604_v4 = vpop.permute.xlu0 %2603 }
 0x165   :  { %1258 = vst.msk [vmem:[#allocation2 + $0x18] sm:$0xff] %vm1254_vm6, %v1069_v63 }
 0x166   :  { %2796 = vst.msk [vmem:[#allocation2] sm:$0xff] %vm2795_vm10, %v2604_v4  ;;  %2240 = vrot.lane.b32.xlu1 %v6359_v10, %s6984_s23  ;;  %1086 = vrot.lane.b32.xlu0 %v6358_v8, %s6981_s20  ;;  %v6429_v4 = vld [vmem:[%s10334_s0 + $0xf9] sm:$0xff] }
 0x168   :  { %v2606_v62 = vpop.permute.xlu1 %2605  ;;  %v1452_v11 = vpop.permute.xlu0 %1451 }
 0x169   :  { %2797 = vst.msk [vmem:[#allocation2 + $0x8] sm:$0xff] %vm2795_vm10, %v2606_v62 }
 0x16a   :  { %1642 = vst.msk [vmem:[#allocation2 + $0x10] sm:$0xff] %vm1639_vm7, %v1452_v11  ;;  %1088 = vrot.lane.b32.xlu1 %v6359_v10, %s6981_s20  ;;  %2623 = vrot.lane.b32.xlu0 %v6422_v5, %s6985_s24  ;;  %v6492_v11 = vld [vmem:[%s10334_s0 + $0xf2] sm:$0xff] }
 0x16c   :  { %v1454_v14 = vpop.permute.xlu1 %1453  ;;  %v2989_v15 = vpop.permute.xlu0 %2988 }
 0x16d   :  { %1643 = vst.msk [vmem:[#allocation2 + $0x18] sm:$0xff] %vm1639_vm7, %v1454_v14 }
 0x16e   :  { %3181 = vst.msk [vmem:[#allocation2] sm:$0xff] %vm3180_vm11, %v2989_v15  ;;  %2625 = vrot.lane.b32.xlu1 %v6423_v13, %s6985_s24  ;;  %1471 = vrot.lane.b32.xlu0 %v6422_v5, %s6982_s21  ;;  %v6493_v15 = vld [vmem:[%s10334_s0 + $0xfa] sm:$0xff] }
 0x170   :  { %v2991_v17 = vpop.permute.xlu1 %2990  ;;  %v1837_v21 = vpop.permute.xlu0 %1836 }
 0x171   :  { %3182 = vst.msk [vmem:[#allocation2 + $0x8] sm:$0xff] %vm3180_vm11, %v2991_v17 }
 0x172   :  { %2027 = vst.msk [vmem:[#allocation2 + $0x10] sm:$0xff] %vm2024_vm8, %v1837_v21  ;;  %1473 = vrot.lane.b32.xlu1 %v6423_v13, %s6982_s21  ;;  %3008 = vrot.lane.b32.xlu0 %v6486_v47, %s6987_s13 }
 0x174   :  { %v2223_v23 = vpop.permute.xlu1 %2222  ;;  %v1839_v22 = vpop.permute.xlu0 %1838 }
 0x175   :  { %v3245_v28 = vld [vmem:[#allocation2] sm:$0xff]  ;;  %2413 = vst.msk [vmem:[#allocation2 + $0x10] sm:$0xff] %vm2410_vm9, %v2223_v23 }
 0x176   :  { %2028 = vst.msk [vmem:[#allocation2 + $0x18] sm:$0xff] %vm2024_vm8, %v1839_v22  ;;  %6757 = vmatprep.mubr.msk.f32.mxu0 %vm3318_vm12, %v3245_v28  ;;  %3010 = vrot.lane.b32.xlu1 %v6487_v46, %s6987_s13 }
 0x177   :  { %1856 = vrot.lane.b32.xlu0 %v6486_v47, %s6983_s22 }
 0x178   :  { %v2225_v20 = vpop.permute.xlu1 %2224  ;;  %v1071_v32 = vpop.permute.xlu0 %1070  ;;  %v3246_v33 = vld [vmem:[#allocation2 + $0x8] sm:$0xff] }
 0x179   :  { %2414 = vst.msk [vmem:[#allocation2 + $0x18] sm:$0xff] %vm2410_vm9, %v2225_v20  ;;  %6758 = vmatmul.mubr.msk.f32.vlgmr.msra.gmra.mrb[0].mxu0 %vm3318_vm12, %v3246_v33  ;;  %v6430_v33 = vld [vmem:[%s10334_s0 + $0x109] sm:$0xff] }
 0x17a   :  { %1259 = vst.msk [vmem:[#allocation2 + $0x20] sm:$0xff] %vm1254_vm6, %v1071_v32  ;;  %2242 = vrot.lane.b32.xlu1 %v6360_v29, %s6984_s23 }
 0x17b   :  { %1858 = vrot.lane.b32.xlu0 %v6487_v46, %s6983_s22  ;;  %v6366_v46 = vld [vmem:[%s10334_s0 + $0x108] sm:$0xff] }
 0x17c   :  { %v1073_v35 = vpop.permute.xlu1 %1072  ;;  %v2608_v36 = vpop.permute.xlu0 %2607 }
 0x17d   :  { %1260 = vst.msk [vmem:[#allocation2 + $0x28] sm:$0xff] %vm1254_vm6, %v1073_v35 }
 0x17e   :  { %2798 = vst.msk [vmem:[#allocation2 + $0x10] sm:$0xff] %vm2795_vm10, %v2608_v36  ;;  %2244 = vrot.lane.b32.xlu1 %v6361_v34, %s6984_s23  ;;  %v6431_v36 = vld [vmem:[%s10334_s0 + $0x111] sm:$0xff] }
 0x17f   :  { %1090 = vrot.lane.b32.xlu0 %v6360_v29, %s6981_s20  ;;  %v6367_v29 = vld [vmem:[%s10334_s0 + $0x110] sm:$0xff] }
 0x180   :  { %v2610_v37 = vpop.permute.xlu1 %2609  ;;  %v1456_v38 = vpop.permute.xlu0 %1455 }
 0x181   :  { %2799 = vst.msk [vmem:[#allocation2 + $0x18] sm:$0xff] %vm2795_vm10, %v2610_v37 }
 0x182   :  { %1644 = vst.msk [vmem:[#allocation2 + $0x20] sm:$0xff] %vm1639_vm7, %v1456_v38  ;;  %1092 = vrot.lane.b32.xlu1 %v6361_v34, %s6981_s20  ;;  %v6494_v38 = vld [vmem:[%s10334_s0 + $0x10a] sm:$0xff] }
 0x183   :  { %2627 = vrot.lane.b32.xlu0 %v6424_v51, %s6985_s24 }
 0x184   :  { %v1458_v25 = vpop.permute.xlu1 %1457  ;;  %v2993_v39 = vpop.permute.xlu0 %2992 }
 0x185   :  { %1645 = vst.msk [vmem:[#allocation2 + $0x28] sm:$0xff] %vm1639_vm7, %v1458_v25 }
 0x186   :  { %3183 = vst.msk [vmem:[#allocation2 + $0x10] sm:$0xff] %vm3180_vm11, %v2993_v39  ;;  %2629 = vrot.lane.b32.xlu1 %v6425_v50, %s6985_s24  ;;  %v6495_v39 = vld [vmem:[%s10334_s0 + $0x112] sm:$0xff] }
 0x187   :  { %1475 = vrot.lane.b32.xlu0 %v6424_v51, %s6982_s21 }
 0x188   :  { %v2995_v41 = vpop.permute.xlu1 %2994  ;;  %v1841_v24 = vpop.permute.xlu0 %1840 }
 0x189   :  { %3184 = vst.msk [vmem:[#allocation2 + $0x18] sm:$0xff] %vm3180_vm11, %v2995_v41 }
 0x18a   :  { %2029 = vst.msk [vmem:[#allocation2 + $0x20] sm:$0xff] %vm2024_vm8, %v1841_v24  ;;  %1477 = vrot.lane.b32.xlu1 %v6425_v50, %s6982_s21 }
 0x18b   :  { %3012 = vrot.lane.b32.xlu0 %v6488_v40, %s6987_s13 }
 0x18c   :  { %v2227_v45 = vpop.permute.xlu1 %2226  ;;  %v1843_v48 = vpop.permute.xlu0 %1842 }
 0x18d   :  { %v3247_v49 = vld [vmem:[#allocation2 + $0x10] sm:$0xff]  ;;  %2415 = vst.msk [vmem:[#allocation2 + $0x20] sm:$0xff] %vm2410_vm9, %v2227_v45 }
 0x18e   :  { %2030 = vst.msk [vmem:[#allocation2 + $0x28] sm:$0xff] %vm2024_vm8, %v1843_v48  ;;  %6760 = vmatprep.mubr.msk.f32.mxu0 %vm3318_vm12, %v3247_v49  ;;  %3014 = vrot.lane.b32.xlu1 %v6489_v44, %s6987_s13 }
 0x18f   :  { %1860 = vrot.lane.b32.xlu0 %v6488_v40, %s6983_s22 }
 0x190   :  { %v2229_v55 = vpop.permute.xlu1 %2228  ;;  %v1075_v53 = vpop.permute.xlu0 %1074  ;;  %v3248_v56 = vld [vmem:[#allocation2 + $0x18] sm:$0xff] }
 0x191   :  { %2416 = vst.msk [vmem:[#allocation2 + $0x28] sm:$0xff] %vm2410_vm9, %v2229_v55  ;;  %6761 = vmatmul.mubr.msk.f32.gmra.mrb[2].mxu0 %vm3318_vm12, %v3248_v56  ;;  %v6432_v56 = vld [vmem:[%s10334_s0 + $0x121] sm:$0xff] }
 0x192   :  { %1261 = vst.msk [vmem:[#allocation2 + $0x30] sm:$0xff] %vm1254_vm6, %v1075_v53  ;;  %2246 = vrot.lane.b32.xlu1 %v6362_v52, %s6984_s23 }
 0x193   :  { %1862 = vrot.lane.b32.xlu0 %v6489_v44, %s6983_s22  ;;  %v6368_v44 = vld [vmem:[%s10334_s0 + $0x120] sm:$0xff] }
 0x194   :  { %v1077_v27 = vpop.permute.xlu1 %1076  ;;  %v2612_v57 = vpop.permute.xlu0 %2611 }
 0x195   :  { %1262 = vst.msk [vmem:[#allocation2 + $0x38] sm:$0xff] %vm1254_vm6, %v1077_v27 }
 0x196   :  { %2800 = vst.msk [vmem:[#allocation2 + $0x20] sm:$0xff] %vm2795_vm10, %v2612_v57  ;;  %2248 = vrot.lane.b32.xlu1 %v6363_v54, %s6984_s23  ;;  %v6433_v57 = vld [vmem:[%s10334_s0 + $0x129] sm:$0xff] }
 0x197   :  { %1094 = vrot.lane.b32.xlu0 %v6362_v52, %s6981_s20  ;;  %v6369_v52 = vld [vmem:[%s10334_s0 + $0x128] sm:$0xff] }
 0x198   :  { %v2614_v61 = vpop.permute.xlu1 %2613  ;;  %v1460_v26 = vpop.permute.xlu0 %1459 }
 0x199   :  { %2801 = vst.msk [vmem:[#allocation2 + $0x28] sm:$0xff] %vm2795_vm10, %v2614_v61 }
 0x19a   :  { %1646 = vst.msk [vmem:[#allocation2 + $0x30] sm:$0xff] %vm1639_vm7, %v1460_v26  ;;  %1096 = vrot.lane.b32.xlu1 %v6363_v54, %s6981_s20  ;;  %v6496_v26 = vld [vmem:[%s10334_s0 + $0x122] sm:$0xff] }
 0x19b   :  { %2631 = vrot.lane.b32.xlu0 %v6426_v60, %s6985_s24 }
 0x19c   :  { %v1462_v12 = vpop.permute.xlu1 %1461  ;;  %v2997_v3 = vpop.permute.xlu0 %2996 }
 0x19d   :  { %1647 = vst.msk [vmem:[#allocation2 + $0x38] sm:$0xff] %vm1639_vm7, %v1462_v12 }
 0x19e   :  { %3185 = vst.msk [vmem:[#allocation2 + $0x20] sm:$0xff] %vm3180_vm11, %v2997_v3  ;;  %2633 = vrot.lane.b32.xlu1 %v6427_v1, %s6985_s24  ;;  %v6497_v3 = vld [vmem:[%s10334_s0 + $0x12a] sm:$0xff] }
 0x19f   :  { %1479 = vrot.lane.b32.xlu0 %v6426_v60, %s6982_s21 }
 0x1a0   :  { %v2999_v16 = vpop.permute.xlu1 %2998  ;;  %v1845_v59 = vpop.permute.xlu0 %1844 }
 0x1a1   :  { %3186 = vst.msk [vmem:[#allocation2 + $0x28] sm:$0xff] %vm3180_vm11, %v2999_v16 }
 0x1a2   :  { %2031 = vst.msk [vmem:[#allocation2 + $0x30] sm:$0xff] %vm2024_vm8, %v1845_v59  ;;  %1481 = vrot.lane.b32.xlu1 %v6427_v1, %s6982_s21 }
 0x1a3   :  { %3016 = vrot.lane.b32.xlu0 %v6490_v0, %s6987_s13 }
 0x1a4   :  { %v2231_v43 = vpop.permute.xlu1 %2230  ;;  %v1847_v31 = vpop.permute.xlu0 %1846 }
 0x1a5   :  { %v3249_v58 = vld [vmem:[#allocation2 + $0x20] sm:$0xff]  ;;  %2417 = vst.msk [vmem:[#allocation2 + $0x30] sm:$0xff] %vm2410_vm9, %v2231_v43 }
 0x1a6   :  { %2032 = vst.msk [vmem:[#allocation2 + $0x38] sm:$0xff] %vm2024_vm8, %v1847_v31  ;;  %6763 = vmatprep.mubr.msk.f32.mxu0 %vm3318_vm12, %v3249_v58  ;;  %3018 = vrot.lane.b32.xlu1 %v6491_v2, %s6987_s13 }
 0x1a7   :  { %1864 = vrot.lane.b32.xlu0 %v6490_v0, %s6983_s22 }
 0x1a8   :  { %v2233_v19 = vpop.permute.xlu1 %2232  ;;  %v1079_v30 = vpop.permute.xlu0 %1078  ;;  %v3250_v6 = vld [vmem:[#allocation2 + $0x28] sm:$0xff] }
 0x1a9   :  { %2418 = vst.msk [vmem:[#allocation2 + $0x38] sm:$0xff] %vm2410_vm9, %v2233_v19  ;;  %6764 = vmatmul.mubr.msk.f32.gmra.mrb[4].mxu0 %vm3318_vm12, %v3250_v6  ;;  %v6988_v6 = vmov 0.0  }
 0x1aa   :  { %1263 = vst.msk [vmem:[#allocation2 + $0x40] sm:$0xff] %vm1254_vm6, %v1079_v30  ;;  %2250 = vrot.lane.b32.xlu1 %v6364_v42, %s6984_s23 }
 0x1ab   :  { %1866 = vrot.lane.b32.xlu0 %v6491_v2, %s6983_s22  ;;  %v6370_v2 = vld [vmem:[%s10334_s0 + $0x138] sm:$0xff]  ;;  %4156 = vst.msk [vmem:[#allocation4] sm:$0xff] %vm3900_vm13, %v6988_v6  ;;  %4159 = vst.msk [vmem:[#allocation4 + $0x10] sm:$0xff] %vm3900_vm13, %v6988_v6 }
 0x1ac   :  { %v1081_v8 = vpop.permute.xlu1 %1080  ;;  %v2616_v18 = vpop.permute.xlu0 %2615  ;;  %4158 = vst.msk [vmem:[#allocation4 + $0x8] sm:$0x3] %vm4157_vm14, %v6988_v6  ;;  %4160 = vst.msk [vmem:[#allocation4 + $0x18] sm:$0x3] %vm4157_vm14, %v6988_v6 }
 0x1ad   :  { %1264 = vst.msk [vmem:[#allocation2 + $0x48] sm:$0xff] %vm1254_vm6, %v1081_v8 }
 0x1ae   :  { %2802 = vst.msk [vmem:[#allocation2 + $0x30] sm:$0xff] %vm2795_vm10, %v2616_v18  ;;  %2252 = vrot.lane.b32.xlu1 %v6365_v7, %s6984_s23 }
 0x1af   :  { %1098 = vrot.lane.b32.xlu0 %v6364_v42, %s6981_s20  ;;  %v6371_v42 = vld [vmem:[%s10334_s0 + $0x140] sm:$0xff]  ;;  %4161 = vst.msk [vmem:[#allocation4 + $0x20] sm:$0xff] %vm3900_vm13, %v6988_v6  ;;  %4163 = vst.msk [vmem:[#allocation4 + $0x30] sm:$0xff] %vm3900_vm13, %v6988_v6 }
 0x1b0   :  { %v2618_v10 = vpop.permute.xlu1 %2617  ;;  %v1464_v63 = vpop.permute.xlu0 %1463  ;;  %4162 = vst.msk [vmem:[#allocation4 + $0x28] sm:$0x3] %vm4157_vm14, %v6988_v6  ;;  %4164 = vst.msk [vmem:[#allocation4 + $0x38] sm:$0x3] %vm4157_vm14, %v6988_v6 }
 0x1b1   :  { %2803 = vst.msk [vmem:[#allocation2 + $0x38] sm:$0xff] %vm2795_vm10, %v2618_v10 }
 0x1b2   :  { %1648 = vst.msk [vmem:[#allocation2 + $0x40] sm:$0xff] %vm1639_vm7, %v1464_v63  ;;  %1100 = vrot.lane.b32.xlu1 %v6365_v7, %s6981_s20  ;;  %v6434_v7 = vld [vmem:[%s10334_s0 + $0x139] sm:$0xff] }
 0x1b3   :  { %2635 = vrot.lane.b32.xlu0 %v6428_v9, %s6985_s24  ;;  %4165 = vst.msk [vmem:[#allocation4 + $0x40] sm:$0xff] %vm3900_vm13, %v6988_v6  ;;  %4167 = vst.msk [vmem:[#allocation4 + $0x50] sm:$0xff] %vm3900_vm13, %v6988_v6 }
 0x1b4   :  { %v1466_v5 = vpop.permute.xlu1 %1465  ;;  %v3001_v62 = vpop.permute.xlu0 %3000  ;;  %4166 = vst.msk [vmem:[#allocation4 + $0x48] sm:$0x3] %vm4157_vm14, %v6988_v6  ;;  %4168 = vst.msk [vmem:[#allocation4 + $0x58] sm:$0x3] %vm4157_vm14, %v6988_v6 }
 0x1b5   :  { %1649 = vst.msk [vmem:[#allocation2 + $0x48] sm:$0xff] %vm1639_vm7, %v1466_v5  ;;  %v6498_v5 = vld [vmem:[%s10334_s0 + $0x13a] sm:$0xff] }
 0x1b6   :  { %3187 = vst.msk [vmem:[#allocation2 + $0x30] sm:$0xff] %vm3180_vm11, %v3001_v62  ;;  %2637 = vrot.lane.b32.xlu1 %v6429_v4, %s6985_s24 }
 0x1b7   :  { %1483 = vrot.lane.b32.xlu0 %v6428_v9, %s6982_s21  ;;  %4169 = vst.msk [vmem:[#allocation4 + $0x60] sm:$0xff] %vm3900_vm13, %v6988_v6  ;;  %4171 = vst.msk [vmem:[#allocation4 + $0x70] sm:$0xff] %vm3900_vm13, %v6988_v6  ;;  %v6435_v9 = vld [vmem:[%s10334_s0 + $0x141] sm:$0xff] }
 0x1b8   :  { %v3003_v13 = vpop.permute.xlu1 %3002  ;;  %v1849_v14 = vpop.permute.xlu0 %1848  ;;  %4170 = vst.msk [vmem:[#allocation4 + $0x68] sm:$0x3] %vm4157_vm14, %v6988_v6  ;;  %4172 = vst.msk [vmem:[#allocation4 + $0x78] sm:$0x3] %vm4157_vm14, %v6988_v6 }
 0x1b9   :  { %3188 = vst.msk [vmem:[#allocation2 + $0x38] sm:$0xff] %vm3180_vm11, %v3003_v13 }
 0x1ba   :  { %2033 = vst.msk [vmem:[#allocation2 + $0x40] sm:$0xff] %vm2024_vm8, %v1849_v14  ;;  %1485 = vrot.lane.b32.xlu1 %v6429_v4, %s6982_s21  ;;  %v6198_v4 = vld [vmem:[%s10334_s0 + $0x240] sm:$0xff] }
 0x1bb   :  { %3020 = vrot.lane.b32.xlu0 %v6492_v11, %s6987_s13  ;;  %4173 = vst.msk [vmem:[#allocation4 + $0x80] sm:$0xff] %vm3900_vm13, %v6988_v6  ;;  %4175 = vst.msk [vmem:[#allocation4 + $0x90] sm:$0xff] %vm3900_vm13, %v6988_v6 }
 0x1bc   :  { %v2235_v47 = vpop.permute.xlu1 %2234  ;;  %v1851_v17 = vpop.permute.xlu0 %1850  ;;  %4174 = vst.msk [vmem:[#allocation4 + $0x88] sm:$0x3] %vm4157_vm14, %v6988_v6  ;;  %4176 = vst.msk [vmem:[#allocation4 + $0x98] sm:$0x3] %vm4157_vm14, %v6988_v6 }
 0x1bd   :  { %v3251_v21 = vld [vmem:[#allocation2 + $0x30] sm:$0xff]  ;;  %2419 = vst.msk [vmem:[#allocation2 + $0x40] sm:$0xff] %vm2410_vm9, %v2235_v47  ;;  %v6199_v47 = vld [vmem:[%s10334_s0 + $0x248] sm:$0xff] }
 0x1be   :  { %2034 = vst.msk [vmem:[#allocation2 + $0x48] sm:$0xff] %vm2024_vm8, %v1851_v17  ;;  %6766 = vmatprep.mubr.msk.f32.mxu0 %vm3318_vm12, %v3251_v21  ;;  %3022 = vrot.lane.b32.xlu1 %v6493_v15, %s6987_s13  ;;  %v6499_v17 = vld [vmem:[%s10334_s0 + $0x142] sm:$0xff] }
 0x1bf   :  { %1868 = vrot.lane.b32.xlu0 %v6492_v11, %s6983_s22  ;;  %4177 = vst.msk [vmem:[#allocation4 + $0xa0] sm:$0xff] %vm3900_vm13, %v6988_v6  ;;  %4179 = vst.msk [vmem:[#allocation4 + $0xb0] sm:$0xff] %vm3900_vm13, %v6988_v6 }
 0x1c0   :  { %v2237_v23 = vpop.permute.xlu1 %2236  ;;  %v1083_v22 = vpop.permute.xlu0 %1082  ;;  %v3252_v28 = vld [vmem:[#allocation2 + $0x38] sm:$0xff]  ;;  %4178 = vst.msk [vmem:[#allocation4 + $0xa8] sm:$0x3] %vm4157_vm14, %v6988_v6  ;;  %4180 = vst.msk [vmem:[#allocation4 + $0xb8] sm:$0x3] %vm4157_vm14, %v6988_v6 }
 0x1c1   :  { %2420 = vst.msk [vmem:[#allocation2 + $0x48] sm:$0xff] %vm2410_vm9, %v2237_v23  ;;  %6767 = vmatmul.mubr.msk.f32.gmra.mrb[6].mxu0 %vm3318_vm12, %v3252_v28 }
 0x1c2   :  { %1265 = vst.msk [vmem:[#allocation2 + $0x50] sm:$0xff] %vm1254_vm6, %v1083_v22  ;;  %2254 = vrot.lane.b32.xlu1 %v6366_v46, %s6984_s23  ;;  %v6262_v22 = vld [vmem:[%s10334_s0 + $0x241] sm:$0xff] }
 0x1c3   :  { %1870 = vrot.lane.b32.xlu0 %v6493_v15, %s6983_s22  ;;  %4181 = vst.msk [vmem:[#allocation4 + $0xc0] sm:$0xff] %vm3900_vm13, %v6988_v6  ;;  %4183 = vst.msk [vmem:[#allocation4 + $0xd0] sm:$0xff] %vm3900_vm13, %v6988_v6 }
 0x1c4   :  { %v1085_v20 = vpop.permute.xlu1 %1084  ;;  %v2620_v32 = vpop.permute.xlu0 %2619  ;;  %4182 = vst.msk [vmem:[#allocation4 + $0xc8] sm:$0x3] %vm4157_vm14, %v6988_v6  ;;  %4184 = vst.msk [vmem:[#allocation4 + $0xd8] sm:$0x3] %vm4157_vm14, %v6988_v6 }
 0x1c5   :  { %1266 = vst.msk [vmem:[#allocation2 + $0x58] sm:$0xff] %vm1254_vm6, %v1085_v20  ;;  %v6182_v20 = vld [vmem:[%s10334_s0 + $0x150] sm:$0xff] }
 0x1c6   :  { %2804 = vst.msk [vmem:[#allocation2 + $0x40] sm:$0xff] %vm2795_vm10, %v2620_v32  ;;  %2256 = vrot.lane.b32.xlu1 %v6367_v29, %s6984_s23 }
 0x1c7   :  { %1102 = vrot.lane.b32.xlu0 %v6366_v46, %s6981_s20  ;;  %4185 = vst.msk [vmem:[#allocation4 + $0xe0] sm:$0xff] %vm3900_vm13, %v6988_v6  ;;  %4187 = vst.msk [vmem:[#allocation4 + $0xf0] sm:$0xff] %vm3900_vm13, %v6988_v6 }
 0x1c8   :  { %v2622_v34 = vpop.permute.xlu1 %2621  ;;  %v1468_v35 = vpop.permute.xlu0 %1467  ;;  %4186 = vst.msk [vmem:[#allocation4 + $0xe8] sm:$0x3] %vm4157_vm14, %v6988_v6  ;;  %4188 = vst.msk [vmem:[#allocation4 + $0xf8] sm:$0x3] %vm4157_vm14, %v6988_v6 }
 0x1c9   :  { %2805 = vst.msk [vmem:[#allocation2 + $0x48] sm:$0xff] %vm2795_vm10, %v2622_v34  ;;  %v6326_v34 = vld [vmem:[%s10334_s0 + $0x242] sm:$0xff] }
 0x1ca   :  { %1650 = vst.msk [vmem:[#allocation2 + $0x50] sm:$0xff] %vm1639_vm7, %v1468_v35  ;;  %1104 = vrot.lane.b32.xlu1 %v6367_v29, %s6981_s20  ;;  %v6263_v35 = vld [vmem:[%s10334_s0 + $0x249] sm:$0xff] }
 0x1cb   :  { %2639 = vrot.lane.b32.xlu0 %v6430_v33, %s6985_s24  ;;  %4189 = vst.msk [vmem:[#allocation4 + $0x100] sm:$0xff] %vm3900_vm13, %v6988_v6  ;;  %4191 = vst.msk [vmem:[#allocation4 + $0x110] sm:$0xff] %vm3900_vm13, %v6988_v6 }
 0x1cc   :  { %v1470_v51 = vpop.permute.xlu1 %1469  ;;  %v3005_v37 = vpop.permute.xlu0 %3004  ;;  %4190 = vst.msk [vmem:[#allocation4 + $0x108] sm:$0x3] %vm4157_vm14, %v6988_v6  ;;  %4192 = vst.msk [vmem:[#allocation4 + $0x118] sm:$0x3] %vm4157_vm14, %v6988_v6 }
 0x1cd   :  { %1651 = vst.msk [vmem:[#allocation2 + $0x58] sm:$0xff] %vm1639_vm7, %v1470_v51 }
 0x1ce   :  { %3189 = vst.msk [vmem:[#allocation2 + $0x40] sm:$0xff] %vm3180_vm11, %v3005_v37  ;;  %2641 = vrot.lane.b32.xlu1 %v6431_v36, %s6985_s24  ;;  %v6436_v37 = vld [vmem:[%s10334_s0 + $0x151] sm:$0xff] }
 0x1cf   :  { %1487 = vrot.lane.b32.xlu0 %v6430_v33, %s6982_s21  ;;  %4193 = vst.msk [vmem:[#allocation4 + $0x120] sm:$0xff] %vm3900_vm13, %v6988_v6  ;;  %4195 = vst.msk [vmem:[#allocation4 + $0x130] sm:$0xff] %vm3900_vm13, %v6988_v6 }
 0x1d0   :  { %v3007_v50 = vpop.permute.xlu1 %3006  ;;  %v1853_v25 = vpop.permute.xlu0 %1852  ;;  %4194 = vst.msk [vmem:[#allocation4 + $0x128] sm:$0x3] %vm4157_vm14, %v6988_v6  ;;  %4196 = vst.msk [vmem:[#allocation4 + $0x138] sm:$0x3] %vm4157_vm14, %v6988_v6  ;;  %vm5357_vm14 = vcmask 255104  }
 0x1d1   :  { %3190 = vst.msk [vmem:[#allocation2 + $0x48] sm:$0xff] %vm3180_vm11, %v3007_v50 }
 0x1d2   :  { %2035 = vst.msk [vmem:[#allocation2 + $0x50] sm:$0xff] %vm2024_vm8, %v1853_v25  ;;  %1489 = vrot.lane.b32.xlu1 %v6431_v36, %s6982_s21 }
 0x1d3   :  { %3024 = vrot.lane.b32.xlu0 %v6494_v38, %s6987_s13 }
 0x1d4   :  { %v2239_v40 = vpop.permute.xlu1 %2238  ;;  %v1855_v41 = vpop.permute.xlu0 %1854 }
 0x1d5   :  { %v3253_v24 = vld [vmem:[#allocation2 + $0x40] sm:$0xff]  ;;  %2421 = vst.msk [vmem:[#allocation2 + $0x50] sm:$0xff] %vm2410_vm9, %v2239_v40 }
 0x1d6   :  { %2036 = vst.msk [vmem:[#allocation2 + $0x58] sm:$0xff] %vm2024_vm8, %v1855_v41  ;;  %6769 = vmatprep.mubr.msk.f32.mxu0 %vm3318_vm12, %v3253_v24  ;;  %3026 = vrot.lane.b32.xlu1 %v6495_v39, %s6987_s13  ;;  %v6390_v24 = vld [vmem:[%s10334_s0 + $0x258] sm:$0xff] }
 0x1d7   :  { %1872 = vrot.lane.b32.xlu0 %v6494_v38, %s6983_s22  ;;  %v6373_v38 = vld [vmem:[%s10334_s0 + $0x158] sm:$0xff] }
 0x1d8   :  { %v2241_v45 = vpop.permute.xlu1 %2240  ;;  %v1087_v48 = vpop.permute.xlu0 %1086  ;;  %v3254_v49 = vld [vmem:[#allocation2 + $0x48] sm:$0xff] }
 0x1d9   :  { %2422 = vst.msk [vmem:[#allocation2 + $0x58] sm:$0xff] %vm2410_vm9, %v2241_v45  ;;  %6770 = vmatmul.mubr.msk.f32.gmra.mrb[8].mxu0 %vm3318_vm12, %v3254_v49 }
 0x1da   :  { %1267 = vst.msk [vmem:[#allocation2 + $0x60] sm:$0xff] %vm1254_vm6, %v1087_v48  ;;  %2258 = vrot.lane.b32.xlu1 %v6368_v44, %s6984_s23 }
 0x1db   :  { %1874 = vrot.lane.b32.xlu0 %v6495_v39, %s6983_s22 }
 0x1dc   :  { %v1089_v55 = vpop.permute.xlu1 %1088  ;;  %v2624_v53 = vpop.permute.xlu0 %2623 }
 0x1dd   :  { %1268 = vst.msk [vmem:[#allocation2 + $0x68] sm:$0xff] %vm1254_vm6, %v1089_v55  ;;  %v6437_v55 = vld [vmem:[%s10334_s0 + $0x159] sm:$0xff] }
 0x1de   :  { %2806 = vst.msk [vmem:[#allocation2 + $0x50] sm:$0xff] %vm2795_vm10, %v2624_v53  ;;  %2260 = vrot.lane.b32.xlu1 %v6369_v52, %s6984_s23 }
 0x1df   :  { %1106 = vrot.lane.b32.xlu0 %v6368_v44, %s6981_s20  ;;  %v6327_v44 = vld [vmem:[%s10334_s0 + $0x24a] sm:$0xff] }
 0x1e0   :  { %v2626_v54 = vpop.permute.xlu1 %2625  ;;  %v1472_v27 = vpop.permute.xlu0 %1471 }
 0x1e1   :  { %2807 = vst.msk [vmem:[#allocation2 + $0x58] sm:$0xff] %vm2795_vm10, %v2626_v54 }
 0x1e2   :  { %1652 = vst.msk [vmem:[#allocation2 + $0x60] sm:$0xff] %vm1639_vm7, %v1472_v27  ;;  %1108 = vrot.lane.b32.xlu1 %v6369_v52, %s6981_s20  ;;  %v6500_v52 = vld [vmem:[%s10334_s0 + $0x152] sm:$0xff] }
 0x1e3   :  { %2643 = vrot.lane.b32.xlu0 %v6432_v56, %s6985_s24 }
 0x1e4   :  { %v1474_v60 = vpop.permute.xlu1 %1473  ;;  %v3009_v61 = vpop.permute.xlu0 %3008 }
 0x1e5   :  { %1653 = vst.msk [vmem:[#allocation2 + $0x68] sm:$0xff] %vm1639_vm7, %v1474_v60 }
 0x1e6   :  { %3191 = vst.msk [vmem:[#allocation2 + $0x50] sm:$0xff] %vm3180_vm11, %v3009_v61  ;;  %2645 = vrot.lane.b32.xlu1 %v6433_v57, %s6985_s24 }
 0x1e7   :  { %1491 = vrot.lane.b32.xlu0 %v6432_v56, %s6982_s21 }
 0x1e8   :  { %v3011_v1 = vpop.permute.xlu1 %3010 }
 0x1e9   :  { %v1857_v12 = vpop.permute.xlu0 %1856  ;;  %3192 = vst.msk [vmem:[#allocation2 + $0x58] sm:$0xff] %vm3180_vm11, %v3011_v1  ;;  %v6454_v1 = vld [vmem:[%s10334_s0 + $0x259] sm:$0xff] }
 0x1ea   :  { %2037 = vst.msk [vmem:[#allocation2 + $0x60] sm:$0xff] %vm2024_vm8, %v1857_v12  ;;  %1493 = vrot.lane.b32.xlu1 %v6433_v57, %s6982_s21  ;;  %v6391_v57 = vld [vmem:[%s10334_s0 + $0x260] sm:$0xff] }
 0x1eb   :  { %3028 = vrot.lane.b32.xlu0 %v6496_v26, %s6987_s13 }
 0x1ec   :  { %v2243_v0 = vpop.permute.xlu1 %2242 }
 0x1ed   :  { %v1859_v16 = vpop.permute.xlu0 %1858  ;;  %v3255_v59 = vld [vmem:[#allocation2 + $0x50] sm:$0xff]  ;;  %2423 = vst.msk [vmem:[#allocation2 + $0x60] sm:$0xff] %vm2410_vm9, %v2243_v0 }
 0x1ee   :  { %2038 = vst.msk [vmem:[#allocation2 + $0x68] sm:$0xff] %vm2024_vm8, %v1859_v16  ;;  %6772 = vmatprep.mubr.msk.f32.mxu0 %vm3318_vm12, %v3255_v59  ;;  %3030 = vrot.lane.b32.xlu1 %v6497_v3, %s6987_s13 }
 0x1ef   :  { %1876 = vrot.lane.b32.xlu0 %v6496_v26, %s6983_s22  ;;  %v6501_v26 = vld [vmem:[%s10334_s0 + $0x15a] sm:$0xff] }
 0x1f0   :  { %v2245_v43 = vpop.permute.xlu1 %2244  ;;  %v3256_v58 = vld [vmem:[#allocation2 + $0x58] sm:$0xff] }
 0x1f1   :  { %v1091_v31 = vpop.permute.xlu0 %1090  ;;  %2424 = vst.msk [vmem:[#allocation2 + $0x68] sm:$0xff] %vm2410_vm9, %v2245_v43  ;;  %6773 = vmatmul.mubr.msk.f32.gmra.mrb[10].mxu0 %vm3318_vm12, %v3256_v58 }
 0x1f2   :  { %1269 = vst.msk [vmem:[#allocation2 + $0x70] sm:$0xff] %vm1254_vm6, %v1091_v31  ;;  %2262 = vrot.lane.b32.xlu1 %v6370_v2, %s6984_s23 }
 0x1f3   :  { %1878 = vrot.lane.b32.xlu0 %v6497_v3, %s6983_s22 }
 0x1f4   :  { %v1093_v19 = vpop.permute.xlu1 %1092 }
 0x1f5   :  { %v2628_v30 = vpop.permute.xlu0 %2627  ;;  %1270 = vst.msk [vmem:[#allocation2 + $0x78] sm:$0xff] %vm1254_vm6, %v1093_v19  ;;  %v6455_v19 = vld [vmem:[%s10334_s0 + $0x261] sm:$0xff] }
 0x1f6   :  { %2808 = vst.msk [vmem:[#allocation2 + $0x60] sm:$0xff] %vm2795_vm10, %v2628_v30  ;;  %2264 = vrot.lane.b32.xlu1 %v6371_v42, %s6984_s23 }
 0x1f7   :  { %1110 = vrot.lane.b32.xlu0 %v6370_v2, %s6981_s20  ;;  %v6374_v2 = vld [vmem:[%s10334_s0 + $0x168] sm:$0xff] }
 0x1f8   :  { %v2630_v8 = vpop.permute.xlu1 %2629 }
 0x1f9   :  { %v1476_v18 = vpop.permute.xlu0 %1475  ;;  %2809 = vst.msk [vmem:[#allocation2 + $0x68] sm:$0xff] %vm2795_vm10, %v2630_v8 }
 0x1fa   :  { %1654 = vst.msk [vmem:[#allocation2 + $0x70] sm:$0xff] %vm1639_vm7, %v1476_v18  ;;  %1112 = vrot.lane.b32.xlu1 %v6371_v42, %s6981_s20  ;;  %v6518_v42 = vld [vmem:[%s10334_s0 + $0x25a] sm:$0xff]  ;;  %v6375_v18 = vld [vmem:[%s10334_s0 + $0x170] sm:$0xff] }
 0x1fb   :  { %2647 = vrot.lane.b32.xlu0 %v6434_v7, %s6985_s24 }
 0x1fc   :  { %v1478_v10 = vpop.permute.xlu1 %1477 }
 0x1fd   :  { %v3013_v63 = vpop.permute.xlu0 %3012  ;;  %1655 = vst.msk [vmem:[#allocation2 + $0x78] sm:$0xff] %vm1639_vm7, %v1478_v10 }
 0x1fe   :  { %3193 = vst.msk [vmem:[#allocation2 + $0x60] sm:$0xff] %vm3180_vm11, %v3013_v63  ;;  %2649 = vrot.lane.b32.xlu1 %v6435_v9, %s6985_s24  ;;  %v6519_v63 = vld [vmem:[%s10334_s0 + $0x262] sm:$0xff] }
 0x1ff   :  { %1495 = vrot.lane.b32.xlu0 %v6434_v7, %s6982_s21 }
 0x200   :  { %v3015_v62 = vpop.permute.xlu1 %3014 }
 0x201   :  { %v1861_v11 = vpop.permute.xlu0 %1860  ;;  %3194 = vst.msk [vmem:[#allocation2 + $0x68] sm:$0xff] %vm3180_vm11, %v3015_v62 }
 0x202   :  { %2039 = vst.msk [vmem:[#allocation2 + $0x70] sm:$0xff] %vm2024_vm8, %v1861_v11  ;;  %1146 = vrot.lane.b32.xlu1 %v6198_v4, %s6981_s20  ;;  %v6438_v4 = vld [vmem:[%s10334_s0 + $0x169] sm:$0xff]  ;;  %v8585_v11 = vld [vmem:[%s10336_s2] ss:$0 sm:$0xff] }
 0x203   :  { %3032 = vrot.lane.b32.xlu0 %v6498_v5, %s6987_s13 }
 0x204   :  { %v2247_v13 = vpop.permute.xlu1 %2246 }
 0x205   :  { %v1863_v14 = vpop.permute.xlu0 %1862  ;;  %v3257_v15 = vld [vmem:[#allocation2 + $0x60] sm:$0xff]  ;;  %2425 = vst.msk [vmem:[#allocation2 + $0x70] sm:$0xff] %vm2410_vm9, %v2247_v13 }
 0x206   :  { %2040 = vst.msk [vmem:[#allocation2 + $0x78] sm:$0xff] %vm2024_vm8, %v1863_v14  ;;  %6775 = vmatprep.mubr.msk.f32.mxu0 %vm3318_vm12, %v3257_v15  ;;  %1880 = vrot.lane.b32.xlu1 %v6498_v5, %s6983_s22 }
 0x207   :  { %1497 = vrot.lane.b32.xlu0 %v6435_v9, %s6982_s21 }
 0x208   :  { %v2249_v21 = vpop.permute.xlu1 %2248  ;;  %v3258_v23 = vld [vmem:[#allocation2 + $0x68] sm:$0xff] }
 0x209   :  { %v1095_v46 = vpop.permute.xlu0 %1094  ;;  %2426 = vst.msk [vmem:[#allocation2 + $0x78] sm:$0xff] %vm2410_vm9, %v2249_v21  ;;  %6776 = vmatmul.mubr.msk.f32.gmra.mrb[12].mxu0 %vm3318_vm12, %v3258_v23  ;;  %v6392_v23 = vld [vmem:[%s10334_s0 + $0x270] sm:$0xff] }
 0x20a   :  { %1271 = vst.msk [vmem:[#allocation2 + $0x80] sm:$0xff] %vm1254_vm6, %v1095_v46  ;;  %1148 = vrot.lane.b32.xlu1 %v6199_v47, %s6981_s20 }
 0x20b   :  { %3034 = vrot.lane.b32.xlu0 %v6499_v17, %s6987_s13 }
 0x20c   :  { %v1097_v28 = vpop.permute.xlu1 %1096 }
 0x20d   :  { %v2632_v29 = vpop.permute.xlu0 %2631  ;;  %1272 = vst.msk [vmem:[#allocation2 + $0x88] sm:$0xff] %vm1254_vm6, %v1097_v28 }
 0x20e   :  { %2810 = vst.msk [vmem:[#allocation2 + $0x70] sm:$0xff] %vm2795_vm10, %v2632_v29  ;;  %1882 = vrot.lane.b32.xlu1 %v6499_v17, %s6983_s22 }
 0x20f   :  { %1531 = vrot.lane.b32.xlu0 %v6262_v22, %s6982_s21 }
 0x210   :  { %v2634_v32 = vpop.permute.xlu1 %2633 }
 0x211   :  { %v1480_v33 = vpop.permute.xlu0 %1479  ;;  %2811 = vst.msk [vmem:[#allocation2 + $0x78] sm:$0xff] %vm2795_vm10, %v2634_v32  ;;  %v6439_v32 = vld [vmem:[%s10334_s0 + $0x171] sm:$0xff] }
 0x212   :  { %1656 = vst.msk [vmem:[#allocation2 + $0x80] sm:$0xff] %vm1639_vm7, %v1480_v33  ;;  %1114 = vrot.lane.b32.xlu1 %v6182_v20, %s6981_s20 }
 0x213   :  { %2266 = vrot.lane.b32.xlu0 %v6182_v20, %s6984_s23  ;;  %v6502_v20 = vld [vmem:[%s10334_s0 + $0x16a] sm:$0xff] }
 0x214   :  { %v1482_v36 = vpop.permute.xlu1 %1481 }
 0x215   :  { %v3017_v51 = vpop.permute.xlu0 %3016  ;;  %1657 = vst.msk [vmem:[#allocation2 + $0x88] sm:$0xff] %vm1639_vm7, %v1482_v36 }
 0x216   :  { %3195 = vst.msk [vmem:[#allocation2 + $0x70] sm:$0xff] %vm3180_vm11, %v3017_v51  ;;  %1916 = vrot.lane.b32.xlu1 %v6326_v34, %s6983_s22 }
 0x217   :  { %1533 = vrot.lane.b32.xlu0 %v6263_v35, %s6982_s21 }
 0x218   :  { %v3019_v50 = vpop.permute.xlu1 %3018 }
 0x219   :  { %v1865_v25 = vpop.permute.xlu0 %1864  ;;  %3196 = vst.msk [vmem:[#allocation2 + $0x78] sm:$0xff] %vm3180_vm11, %v3019_v50  ;;  %v6393_v50 = vld [vmem:[%s10334_s0 + $0x278] sm:$0xff] }
 0x21a   :  { %2041 = vst.msk [vmem:[#allocation2 + $0x80] sm:$0xff] %vm2024_vm8, %v1865_v25  ;;  %2651 = vrot.lane.b32.xlu1 %v6436_v37, %s6985_s24 }
 0x21b   :  { %2268 = vrot.lane.b32.xlu0 %v6373_v38, %s6984_s23 }
 0x21c   :  { %v2251_v39 = vpop.permute.xlu1 %2250 }
 0x21d   :  { %v1867_v40 = vpop.permute.xlu0 %1866  ;;  %v3259_v41 = vld [vmem:[#allocation2 + $0x70] sm:$0xff]  ;;  %2427 = vst.msk [vmem:[#allocation2 + $0x80] sm:$0xff] %vm2410_vm9, %v2251_v39 }
 0x21e   :  { %2042 = vst.msk [vmem:[#allocation2 + $0x88] sm:$0xff] %vm2024_vm8, %v1867_v40  ;;  %6778 = vmatprep.mubr.msk.f32.mxu0 %vm3318_vm12, %v3259_v41  ;;  %1499 = vrot.lane.b32.xlu1 %v6436_v37, %s6982_s21  ;;  %v6503_v40 = vld [vmem:[%s10334_s0 + $0x172] sm:$0xff] }
 0x21f   :  { %1116 = vrot.lane.b32.xlu0 %v6373_v38, %s6981_s20  ;;  %v6456_v38 = vld [vmem:[%s10334_s0 + $0x271] sm:$0xff] }
 0x220   :  { %v2253_v45 = vpop.permute.xlu1 %2252  ;;  %v3260_v49 = vld [vmem:[#allocation2 + $0x78] sm:$0xff] }
 0x221   :  { %v1099_v48 = vpop.permute.xlu0 %1098  ;;  %2428 = vst.msk [vmem:[#allocation2 + $0x88] sm:$0xff] %vm2410_vm9, %v2253_v45  ;;  %6779 = vmatmul.mubr.msk.f32.gmra.mrb[14].mxu0 %vm3318_vm12, %v3260_v49 }
 0x222   :  { %1273 = vst.msk [vmem:[#allocation2 + $0x90] sm:$0xff] %vm1254_vm6, %v1099_v48  ;;  %2302 = vrot.lane.b32.xlu1 %v6390_v24, %s6984_s23 }
 0x223   :  { %1918 = vrot.lane.b32.xlu0 %v6327_v44, %s6983_s22 }
 0x224   :  { %v1101_v53 = vpop.permute.xlu1 %1100 }
 0x225   :  { %v2636_v56 = vpop.permute.xlu0 %2635  ;;  %1274 = vst.msk [vmem:[#allocation2 + $0x98] sm:$0xff] %vm1254_vm6, %v1101_v53 }
 0x226   :  { %2812 = vst.msk [vmem:[#allocation2 + $0x80] sm:$0xff] %vm2795_vm10, %v2636_v56  ;;  %3036 = vrot.lane.b32.xlu1 %v6500_v52, %s6987_s13 }
 0x227   :  { %2653 = vrot.lane.b32.xlu0 %v6437_v55, %s6985_s24 }
 0x228   :  { %v2638_v54 = vpop.permute.xlu1 %2637 }
 0x229   :  { %v1484_v27 = vpop.permute.xlu0 %1483  ;;  %2813 = vst.msk [vmem:[#allocation2 + $0x88] sm:$0xff] %vm2795_vm10, %v2638_v54  ;;  %v6457_v54 = vld [vmem:[%s10334_s0 + $0x279] sm:$0xff] }
 0x22a   :  { %1658 = vst.msk [vmem:[#allocation2 + $0x90] sm:$0xff] %vm1639_vm7, %v1484_v27  ;;  %1501 = vrot.lane.b32.xlu1 %v6437_v55, %s6982_s21  ;;  %v6376_v27 = vld [vmem:[%s10334_s0 + $0x180] sm:$0xff] }
 0x22b   :  { %1150 = vrot.lane.b32.xlu0 %v6390_v24, %s6981_s20 }
 0x22c   :  { %v1486_v60 = vpop.permute.xlu1 %1485 }
 0x22d   :  { %v3021_v61 = vpop.permute.xlu0 %3020  ;;  %1659 = vst.msk [vmem:[#allocation2 + $0x98] sm:$0xff] %vm1639_vm7, %v1486_v60 }
 0x22e   :  { %3197 = vst.msk [vmem:[#allocation2 + $0x80] sm:$0xff] %vm3180_vm11, %v3021_v61  ;;  %2304 = vrot.lane.b32.xlu1 %v6391_v57, %s6984_s23 }
 0x22f   :  { %1884 = vrot.lane.b32.xlu0 %v6500_v52, %s6983_s22 }
 0x230   :  { %v3023_v12 = vpop.permute.xlu1 %3022 }
 0x231   :  { %v1869_v3 = vpop.permute.xlu0 %1868  ;;  %3198 = vst.msk [vmem:[#allocation2 + $0x88] sm:$0xff] %vm3180_vm11, %v3023_v12 }
 0x232   :  { %2043 = vst.msk [vmem:[#allocation2 + $0x90] sm:$0xff] %vm2024_vm8, %v1869_v3  ;;  %3038 = vrot.lane.b32.xlu1 %v6501_v26, %s6987_s13 }
 0x233   :  { %2687 = vrot.lane.b32.xlu0 %v6454_v1, %s6985_s24 }
 0x234   :  { %v2255_v0 = vpop.permute.xlu1 %2254 }
 0x235   :  { %v1871_v16 = vpop.permute.xlu0 %1870  ;;  %v3261_v59 = vld [vmem:[#allocation2 + $0x80] sm:$0xff]  ;;  %2429 = vst.msk [vmem:[#allocation2 + $0x90] sm:$0xff] %vm2410_vm9, %v2255_v0 }
 0x236   :  { %2044 = vst.msk [vmem:[#allocation2 + $0x98] sm:$0xff] %vm2024_vm8, %v1871_v16  ;;  %6781 = vmatprep.mubr.msk.f32.mxu0 %vm3318_vm12, %v3261_v59  ;;  %1535 = vrot.lane.b32.xlu1 %v6454_v1, %s6982_s21  ;;  %v6520_v1 = vld [vmem:[%s10334_s0 + $0x272] sm:$0xff] }
 0x237   :  { %1152 = vrot.lane.b32.xlu0 %v6391_v57, %s6981_s20 }
 0x238   :  { %v2257_v43 = vpop.permute.xlu1 %2256  ;;  %v3262_v58 = vld [vmem:[#allocation2 + $0x88] sm:$0xff] }
 0x239   :  { %v1103_v31 = vpop.permute.xlu0 %1102  ;;  %2430 = vst.msk [vmem:[#allocation2 + $0x98] sm:$0xff] %vm2410_vm9, %v2257_v43  ;;  %6782 = vmatmul.mubr.msk.f32.gmra.mrb[16].mxu0 %vm3318_vm12, %v3262_v58 }
 0x23a   :  { %1275 = vst.msk [vmem:[#allocation2 + $0xa0] sm:$0xff] %vm1254_vm6, %v1103_v31  ;;  %2270 = vrot.lane.b32.xlu1 %v6374_v2, %s6984_s23 }
 0x23b   :  { %1886 = vrot.lane.b32.xlu0 %v6501_v26, %s6983_s22 }
 0x23c   :  { %v1105_v30 = vpop.permute.xlu1 %1104 }
 0x23d   :  { %v2640_v6 = vpop.permute.xlu0 %2639  ;;  %1276 = vst.msk [vmem:[#allocation2 + $0xa8] sm:$0xff] %vm1254_vm6, %v1105_v30  ;;  %v6377_v30 = vld [vmem:[%s10334_s0 + $0x188] sm:$0xff] }
 0x23e   :  { %2814 = vst.msk [vmem:[#allocation2 + $0x90] sm:$0xff] %vm2795_vm10, %v2640_v6  ;;  %3072 = vrot.lane.b32.xlu1 %v6518_v42, %s6987_s13 }
 0x23f   :  { %2689 = vrot.lane.b32.xlu0 %v6455_v19, %s6985_s24 }
 0x240   :  { %v2642_v7 = vpop.permute.xlu1 %2641 }
 0x241   :  { %v1488_v8 = vpop.permute.xlu0 %1487  ;;  %2815 = vst.msk [vmem:[#allocation2 + $0x98] sm:$0xff] %vm2795_vm10, %v2642_v7 }
 0x242   :  { %1660 = vst.msk [vmem:[#allocation2 + $0xa0] sm:$0xff] %vm1639_vm7, %v1488_v8  ;;  %1537 = vrot.lane.b32.xlu1 %v6455_v19, %s6982_s21  ;;  %v6440_v19 = vld [vmem:[%s10334_s0 + $0x181] sm:$0xff] }
 0x243   :  { %1118 = vrot.lane.b32.xlu0 %v6374_v2, %s6981_s20  ;;  %v6521_v8 = vld [vmem:[%s10334_s0 + $0x27a] sm:$0xff] }
 0x244   :  { %v1490_v9 = vpop.permute.xlu1 %1489 }
 0x245   :  { %v3025_v10 = vpop.permute.xlu0 %3024  ;;  %1661 = vst.msk [vmem:[#allocation2 + $0xa8] sm:$0xff] %vm1639_vm7, %v1490_v9 }
 0x246   :  { %3199 = vst.msk [vmem:[#allocation2 + $0x90] sm:$0xff] %vm3180_vm11, %v3025_v10  ;;  %2272 = vrot.lane.b32.xlu1 %v6375_v18, %s6984_s23 }
 0x247   :  { %1920 = vrot.lane.b32.xlu0 %v6518_v42, %s6983_s22 }
 0x248   :  { %v3027_v5 = vpop.permute.xlu1 %3026 }
 0x249   :  { %v1873_v62 = vpop.permute.xlu0 %1872  ;;  %3200 = vst.msk [vmem:[#allocation2 + $0x98] sm:$0xff] %vm3180_vm11, %v3027_v5 }
 0x24a   :  { %2045 = vst.msk [vmem:[#allocation2 + $0xa0] sm:$0xff] %vm2024_vm8, %v1873_v62  ;;  %3074 = vrot.lane.b32.xlu1 %v6519_v63, %s6987_s13 }
 0x24b   :  { %2655 = vrot.lane.b32.xlu0 %v6438_v4, %s6985_s24 }
 0x24c   :  { %v2259_v13 = vpop.permute.xlu1 %2258  ;;  %v6759_v47 = vpop.f32.mrb[0].mxu0 }
 0x24d   :  { %v1875_v14 = vpop.permute.xlu0 %1874  ;;  %v3263_v15 = vld [vmem:[#allocation2 + $0x90] sm:$0xff]  ;;  %2431 = vst.msk [vmem:[#allocation2 + $0xa0] sm:$0xff] %vm2410_vm9, %v2259_v13  ;;  %v3587_v17 = vadd.f32 %v6759_v47, %v8585_v11  ;;  %v3581_v21 = vpop.f32.mrb[1].mxu0  ;;  %v6394_v47 = vld [vmem:[%s10334_s0 + $0x288] sm:$0xff] }
 0x24e   :  { %2046 = vst.msk [vmem:[#allocation2 + $0xa8] sm:$0xff] %vm2024_vm8, %v1875_v14  ;;  %6784 = vmatprep.mubr.msk.f32.mxu0 %vm3318_vm12, %v3263_v15  ;;  %1503 = vrot.lane.b32.xlu1 %v6438_v4, %s6982_s21  ;;  %v3582_v46 = vadd.f32 %v8585_v11, %v3581_v21 }
 0x24f   :  { %1120 = vrot.lane.b32.xlu0 %v6375_v18, %s6981_s20  ;;  %3902 = vst.msk [vmem:[#allocation3 + $0x8] sm:$0xff] %vm3900_vm13, %v3587_v17 }
 0x250   :  { %v2261_v22 = vpop.permute.xlu1 %2260  ;;  %v3264_v29 = vld [vmem:[#allocation2 + $0x98] sm:$0xff]  ;;  %3901 = vst.msk [vmem:[#allocation3] sm:$0xff] %vm3900_vm13, %v3582_v46 }
 0x251   :  { %v1107_v28 = vpop.permute.xlu0 %1106  ;;  %2432 = vst.msk [vmem:[#allocation2 + $0xa8] sm:$0xff] %vm2410_vm9, %v2261_v22  ;;  %6785 = vmatmul.mubr.msk.f32.gmra.mrb[18].mxu0 %vm3318_vm12, %v3264_v29  ;;  %v6441_v22 = vld [vmem:[%s10334_s0 + $0x189] sm:$0xff] }
 0x252   :  { %1277 = vst.msk [vmem:[#allocation2 + $0xb0] sm:$0xff] %vm1254_vm6, %v1107_v28  ;;  %2306 = vrot.lane.b32.xlu1 %v6392_v23, %s6984_s23 }
 0x253   :  { %1922 = vrot.lane.b32.xlu0 %v6519_v63, %s6983_s22 }
 0x254   :  { %v1109_v33 = vpop.permute.xlu1 %1108 }
 0x255   :  { %v2644_v34 = vpop.permute.xlu0 %2643  ;;  %1278 = vst.msk [vmem:[#allocation2 + $0xb8] sm:$0xff] %vm1254_vm6, %v1109_v33 }
 0x256   :  { %2816 = vst.msk [vmem:[#allocation2 + $0xa0] sm:$0xff] %vm2795_vm10, %v2644_v34  ;;  %3040 = vrot.lane.b32.xlu1 %v6502_v20, %s6987_s13 }
 0x257   :  { %2657 = vrot.lane.b32.xlu0 %v6439_v32, %s6985_s24  ;;  %v3965_v61 = vld [vmem:[#allocation3] ss:$2 sm:$0xff]  ;;  %v3997_v26 = vld [vmem:[#allocation3 + $0x1] ss:$2 sm:$0xff] }
 0x258   :  { %v2646_v35 = vpop.permute.xlu1 %2645  ;;  %v4092_v59 = vmax.f32 %v3965_v61, %v3997_v26 }
 0x259   :  { %v1492_v36 = vpop.permute.xlu0 %1491  ;;  %2817 = vst.msk [vmem:[#allocation2 + $0xa8] sm:$0xff] %vm2795_vm10, %v2646_v35  ;;  %v6458_v35 = vld [vmem:[%s10334_s0 + $0x289] sm:$0xff] }
 0x25a   :  { %1662 = vst.msk [vmem:[#allocation2 + $0xb0] sm:$0xff] %vm1639_vm7, %v1492_v36  ;;  %1154 = vrot.lane.b32.xlu1 %v6392_v23, %s6981_s20  ;;  %v6504_v23 = vld [vmem:[%s10334_s0 + $0x182] sm:$0xff]  ;;  %v6395_v36 = vld [vmem:[%s10334_s0 + $0x290] sm:$0xff] }
 0x25b   :  { %770 = vrot.lane.b32.xlu0 %v6519_v63, %s6980_s30 }
 0x25c   :  { %v1494_v51 = vpop.permute.xlu1 %1493 }
 0x25d   :  { %v3029_v37 = vpop.permute.xlu0 %3028  ;;  %1663 = vst.msk [vmem:[#allocation2 + $0xb8] sm:$0xff] %vm1639_vm7, %v1494_v51 }
 0x25e   :  { %3201 = vst.msk [vmem:[#allocation2 + $0xa0] sm:$0xff] %vm3180_vm11, %v3029_v37  ;;  %1888 = vrot.lane.b32.xlu1 %v6502_v20, %s6983_s22 }
 0x25f   :  { %1505 = vrot.lane.b32.xlu0 %v6439_v32, %s6982_s21 }
 0x260   :  { %v3031_v25 = vpop.permute.xlu1 %3030 }
 0x261   :  { %v1877_v39 = vpop.permute.xlu0 %1876  ;;  %3202 = vst.msk [vmem:[#allocation2 + $0xa8] sm:$0xff] %vm3180_vm11, %v3031_v25 }
 0x262   :  { %2047 = vst.msk [vmem:[#allocation2 + $0xb0] sm:$0xff] %vm2024_vm8, %v1877_v39  ;;  %2691 = vrot.lane.b32.xlu1 %v6456_v38, %s6985_s24 }
 0x263   :  { %2308 = vrot.lane.b32.xlu0 %v6393_v50, %s6984_s23 }
 0x264   :  { %v2263_v41 = vpop.permute.xlu1 %2262  ;;  %v6762_v45 = vpop.f32.mrb[2].mxu0 }
 0x265   :  { %v1879_v24 = vpop.permute.xlu0 %1878  ;;  %v3265_v44 = vld [vmem:[#allocation2 + $0xa0] sm:$0xff]  ;;  %2433 = vst.msk [vmem:[#allocation2 + $0xb0] sm:$0xff] %vm2410_vm9, %v2263_v41  ;;  %v3597_v48 = vadd.f32 %v6762_v45, %v8585_v11  ;;  %v3591_v49 = vpop.f32.mrb[3].mxu0 }
 0x266   :  { %2048 = vst.msk [vmem:[#allocation2 + $0xb8] sm:$0xff] %vm2024_vm8, %v1879_v24  ;;  %6787 = vmatprep.mubr.msk.f32.mxu0 %vm3318_vm12, %v3265_v44  ;;  %1156 = vrot.lane.b32.xlu1 %v6393_v50, %s6981_s20  ;;  %v3592_v52 = vadd.f32 %v8585_v11, %v3591_v49 }
 0x267   :  { %3042 = vrot.lane.b32.xlu0 %v6503_v40, %s6987_s13  ;;  %3904 = vst.msk [vmem:[#allocation3 + $0x18] sm:$0xff] %vm3900_vm13, %v3597_v48 }
 0x268   :  { %v2265_v55 = vpop.permute.xlu1 %2264  ;;  %v3266_v56 = vld [vmem:[#allocation2 + $0xa8] sm:$0xff]  ;;  %3903 = vst.msk [vmem:[#allocation3 + $0x10] sm:$0xff] %vm3900_vm13, %v3592_v52  ;;  %v6459_v52 = vld [vmem:[%s10334_s0 + $0x291] sm:$0xff] }
 0x269   :  { %v1111_v53 = vpop.permute.xlu0 %1110  ;;  %2434 = vst.msk [vmem:[#allocation2 + $0xb8] sm:$0xff] %vm2410_vm9, %v2265_v55  ;;  %6788 = vmatmul.mubr.msk.f32.gmra.mrb[20].mxu0 %vm3318_vm12, %v3266_v56  ;;  %v6378_v55 = vld [vmem:[%s10334_s0 + $0x198] sm:$0xff] }
 0x26a   :  { %1279 = vst.msk [vmem:[#allocation2 + $0xc0] sm:$0xff] %vm1254_vm6, %v1111_v53  ;;  %1890 = vrot.lane.b32.xlu1 %v6503_v40, %s6983_s22  ;;  %v6505_v40 = vld [vmem:[%s10334_s0 + $0x18a] sm:$0xff] }
 0x26b   :  { %1539 = vrot.lane.b32.xlu0 %v6456_v38, %s6982_s21 }
 0x26c   :  { %v1113_v57 = vpop.permute.xlu1 %1112 }
 0x26d   :  { %v2648_v60 = vpop.permute.xlu0 %2647  ;;  %1280 = vst.msk [vmem:[#allocation2 + $0xc8] sm:$0xff] %vm1254_vm6, %v1113_v57 }
 0x26e   :  { %2818 = vst.msk [vmem:[#allocation2 + $0xb0] sm:$0xff] %vm2795_vm10, %v2648_v60  ;;  %2693 = vrot.lane.b32.xlu1 %v6457_v54, %s6985_s24 }
 0x26f   :  { %2274 = vrot.lane.b32.xlu0 %v6376_v27, %s6984_s23  ;;  %v4029_v12 = vld [vmem:[#allocation3 + $0x10] ss:$2 sm:$0xff]  ;;  %v4061_v3 = vld [vmem:[#allocation3 + $0x11] ss:$2 sm:$0xff] }
 0x270   :  { %v2650_v0 = vpop.permute.xlu1 %2649  ;;  %v4108_v2 = vmax.f32 %v4029_v12, %v4061_v3  ;;  %v6522_v12 = vld [vmem:[%s10334_s0 + $0x28a] sm:$0xff] }
 0x271   :  { %v1496_v16 = vpop.permute.xlu0 %1495  ;;  %2819 = vst.msk [vmem:[#allocation2 + $0xb8] sm:$0xff] %vm2795_vm10, %v2650_v0 }
 0x272   :  { %1664 = vst.msk [vmem:[#allocation2 + $0xc0] sm:$0xff] %vm1639_vm7, %v1496_v16  ;;  %1122 = vrot.lane.b32.xlu1 %v6376_v27, %s6981_s20  ;;  %v4124_v43 = vmax.f32 %v4092_v59, %v4108_v2 }
 0x273   :  { %3076 = vrot.lane.b32.xlu0 %v6520_v1, %s6987_s13 }
 0x274   :  { %v1147_v31 = vpop.permute.xlu1 %1146  ;;  %v4140_v42 = vmax.f32 %v4124_v43, 0.0  ;;  %v6442_v43 = vld [vmem:[%s10334_s0 + $0x199] sm:$0xff] }
 0x275   :  { %v3033_v58 = vpop.permute.xlu0 %3032  ;;  %1297 = vst.msk [vmem:[#allocation2 + $0x150] sm:$0xff] %vm1254_vm6, %v1147_v31  ;;  %v6379_v31 = vld [vmem:[%s10334_s0 + $0x1a0] sm:$0xff] }
 0x276   :  { %3203 = vst.msk [vmem:[#allocation2 + $0xb0] sm:$0xff] %vm3180_vm11, %v3033_v58  ;;  %1924 = vrot.lane.b32.xlu1 %v6520_v1, %s6983_s22 }
 0x277   :  { %1541 = vrot.lane.b32.xlu0 %v6457_v54, %s6982_s21  ;;  %4198 = vst.msk [vmem:[#allocation4 + $0x11] sm:$0xff] %vm3900_vm13, %v4140_v42 }
 0x278   :  { %v1881_v6 = vpop.permute.xlu1 %1880 }
 0x279   :  { %v1498_v7 = vpop.permute.xlu0 %1497  ;;  %2049 = vst.msk [vmem:[#allocation2 + $0xc0] sm:$0xff] %vm2024_vm8, %v1881_v6 }
 0x27a   :  { %1665 = vst.msk [vmem:[#allocation2 + $0xc8] sm:$0xff] %vm1639_vm7, %v1498_v7  ;;  %2659 = vrot.lane.b32.xlu1 %v6440_v19, %s6985_s24 }
 0x27b   :  { %2276 = vrot.lane.b32.xlu0 %v6377_v30, %s6984_s23 }
 0x27c   :  { %v1149_v18 = vpop.permute.xlu1 %1148  ;;  %v6765_v63 = vpop.f32.mrb[4].mxu0 }
 0x27d   :  { %v3035_v9 = vpop.permute.xlu0 %3034  ;;  %v3267_v10 = vld [vmem:[#allocation2 + $0xb0] sm:$0xff]  ;;  %1298 = vst.msk [vmem:[#allocation2 + $0x158] sm:$0xff] %vm1254_vm6, %v1149_v18  ;;  %v3607_v4 = vadd.f32 %v6765_v63, %v8585_v11  ;;  %v3601_v5 = vpop.f32.mrb[5].mxu0 }
 0x27e   :  { %3204 = vst.msk [vmem:[#allocation2 + $0xb8] sm:$0xff] %vm3180_vm11, %v3035_v9  ;;  %6790 = vmatprep.mubr.msk.f32.mxu0 %vm3318_vm12, %v3267_v10  ;;  %772 = vrot.lane.b32.xlu1 %v6520_v1, %s6980_s30  ;;  %v3602_v62 = vadd.f32 %v8585_v11, %v3601_v5  ;;  %v8691_v13 = vld [vmem:[#allocation4 + $0x10] sm:$0xff]  ;;  %v6188_v1 = vld [vmem:[%s10334_s0 + $0x1c8] sm:$0xff] }
 0x27f   :  { %3078 = vrot.lane.b32.xlu0 %v6521_v8, %s6987_s13  ;;  %3906 = vst.msk [vmem:[#allocation3 + $0x28] sm:$0xff] %vm3900_vm13, %v3607_v4  ;;  %4231 = vst.msk [vmem:[#allocation5 + $0x8] sm:$0xff] %vm3900_vm13, %v8691_v13  ;;  %v6523_v9 = vld [vmem:[%s10334_s0 + $0x292] sm:$0xff]  ;;  %v6252_v4 = vld [vmem:[%s10334_s0 + $0x1c9] sm:$0xff] }
 0x280   :  { %v1883_v14 = vpop.permute.xlu1 %1882  ;;  %3905 = vst.msk [vmem:[#allocation3 + $0x20] sm:$0xff] %vm3900_vm13, %v3602_v62  ;;  %v6189_v5 = vld [vmem:[%s10334_s0 + $0x1d0] sm:$0xff] }
 0x281   :  { %v1532_v15 = vpop.permute.xlu0 %1531  ;;  %2050 = vst.msk [vmem:[#allocation2 + $0xc8] sm:$0xff] %vm2024_vm8, %v1883_v14 }
 0x282   :  { %1682 = vst.msk [vmem:[#allocation2 + $0x150] sm:$0xff] %vm1639_vm7, %v1532_v15  ;;  %1507 = vrot.lane.b32.xlu1 %v6440_v19, %s6982_s21  ;;  %v6396_v15 = vld [vmem:[%s10334_s0 + $0x2a0] sm:$0xff] }
 0x283   :  { %1124 = vrot.lane.b32.xlu0 %v6377_v30, %s6981_s20 }
 0x284   :  { %v1115_v17 = vpop.permute.xlu1 %1114 }
 0x285   :  { %v2267_v21 = vpop.permute.xlu0 %2266  ;;  %v3268_v46 = vld [vmem:[#allocation2 + $0xb8] sm:$0xff]  ;;  %1281 = vst.msk [vmem:[#allocation2 + $0xd0] sm:$0xff] %vm1254_vm6, %v1115_v17 }
 0x286   :  { %2435 = vst.msk [vmem:[#allocation2 + $0xc0] sm:$0xff] %vm2410_vm9, %v2267_v21  ;;  %6791 = vmatmul.mubr.msk.f32.gmra.mrb[22].mxu0 %vm3318_vm12, %v3268_v46  ;;  %2310 = vrot.lane.b32.xlu1 %v6394_v47, %s6984_s23  ;;  %v6506_v46 = vld [vmem:[%s10334_s0 + $0x19a] sm:$0xff] }
 0x287   :  { %1926 = vrot.lane.b32.xlu0 %v6521_v8, %s6983_s22  ;;  %v3967_v48 = vld [vmem:[#allocation3 + $0x20] ss:$2 sm:$0xff]  ;;  %v3999_v49 = vld [vmem:[#allocation3 + $0x21] ss:$2 sm:$0xff] }
 0x288   :  { %v1917_v28 = vpop.permute.xlu1 %1916  ;;  %v4093_v60 = vmax.f32 %v3967_v48, %v3999_v49 }
 0x289   :  { %v1534_v29 = vpop.permute.xlu0 %1533  ;;  %2067 = vst.msk [vmem:[#allocation2 + $0x150] sm:$0xff] %vm2024_vm8, %v1917_v28 }
 0x28a   :  { %1683 = vst.msk [vmem:[#allocation2 + $0x158] sm:$0xff] %vm1639_vm7, %v1534_v29  ;;  %3044 = vrot.lane.b32.xlu1 %v6504_v23, %s6987_s13 }
 0x28b   :  { %2661 = vrot.lane.b32.xlu0 %v6441_v22, %s6985_s24 }
 0x28c   :  { %v2652_v20 = vpop.permute.xlu1 %2651 }
 0x28d   :  { %v2269_v32 = vpop.permute.xlu0 %2268  ;;  %2820 = vst.msk [vmem:[#allocation2 + $0xc0] sm:$0xff] %vm2795_vm10, %v2652_v20 }
 0x28e   :  { %2436 = vst.msk [vmem:[#allocation2 + $0xc8] sm:$0xff] %vm2410_vm9, %v2269_v32  ;;  %1158 = vrot.lane.b32.xlu1 %v6394_v47, %s6981_s20  ;;  %v6316_v32 = vld [vmem:[%s10334_s0 + $0x1ca] sm:$0xff] }
 0x28f   :  { %774 = vrot.lane.b32.xlu0 %v6521_v8, %s6980_s30 }
 0x290   :  { %v1500_v33 = vpop.permute.xlu1 %1499 }
 0x291   :  { %v1117_v34 = vpop.permute.xlu0 %1116  ;;  %1666 = vst.msk [vmem:[#allocation2 + $0xd0] sm:$0xff] %vm1639_vm7, %v1500_v33  ;;  %v6253_v33 = vld [vmem:[%s10334_s0 + $0x1d1] sm:$0xff] }
 0x292   :  { %1282 = vst.msk [vmem:[#allocation2 + $0xd8] sm:$0xff] %vm1254_vm6, %v1117_v34  ;;  %1892 = vrot.lane.b32.xlu1 %v6504_v23, %s6983_s22  ;;  %v6443_v23 = vld [vmem:[%s10334_s0 + $0x1a1] sm:$0xff] }
 0x293   :  { %1509 = vrot.lane.b32.xlu0 %v6441_v22, %s6982_s21 }
 0x294   :  { %v2303_v51 = vpop.permute.xlu1 %2302  ;;  %v6768_v38 = vpop.f32.mrb[6].mxu0 }
 0x295   :  { %v1919_v37 = vpop.permute.xlu0 %1918  ;;  %2453 = vst.msk [vmem:[#allocation2 + $0x150] sm:$0xff] %vm2410_vm9, %v2303_v51  ;;  %v3617_v50 = vadd.f32 %v6768_v38, %v8585_v11  ;;  %v3611_v25 = vpop.f32.mrb[7].mxu0 }
 0x296   :  { %2068 = vst.msk [vmem:[#allocation2 + $0x158] sm:$0xff] %vm2024_vm8, %v1919_v37  ;;  %2695 = vrot.lane.b32.xlu1 %v6458_v35, %s6985_s24  ;;  %v3612_v39 = vadd.f32 %v8585_v11, %v3611_v25  ;;  %v6460_v25 = vld [vmem:[%s10334_s0 + $0x2a1] sm:$0xff] }
 0x297   :  { %2312 = vrot.lane.b32.xlu0 %v6395_v36, %s6984_s23  ;;  %3908 = vst.msk [vmem:[#allocation3 + $0x38] sm:$0xff] %vm3900_vm13, %v3617_v50 }
 0x298   :  { %v3037_v41 = vpop.permute.xlu1 %3036  ;;  %3907 = vst.msk [vmem:[#allocation3 + $0x30] sm:$0xff] %vm3900_vm13, %v3612_v39  ;;  %v6397_v39 = vld [vmem:[%s10334_s0 + $0x2a8] sm:$0xff] }
 0x299   :  { %v2654_v24 = vpop.permute.xlu0 %2653  ;;  %3205 = vst.msk [vmem:[#allocation2 + $0xc0] sm:$0xff] %vm3180_vm11, %v3037_v41 }
 0x29a   :  { %2821 = vst.msk [vmem:[#allocation2 + $0xc8] sm:$0xff] %vm2795_vm10, %v2654_v24  ;;  %1160 = vrot.lane.b32.xlu1 %v6395_v36, %s6981_s20  ;;  %v6507_v24 = vld [vmem:[%s10334_s0 + $0x1a2] sm:$0xff] }
 0x29b   :  { %3046 = vrot.lane.b32.xlu0 %v6505_v40, %s6987_s13 }
 0x29c   :  { %v1502_v44 = vpop.permute.xlu1 %1501 }
 0x29d   :  { %v1151_v45 = vpop.permute.xlu0 %1150  ;;  %1667 = vst.msk [vmem:[#allocation2 + $0xd8] sm:$0xff] %vm1639_vm7, %v1502_v44 }
 0x29e   :  { %1299 = vst.msk [vmem:[#allocation2 + $0x160] sm:$0xff] %vm1254_vm6, %v1151_v45  ;;  %1894 = vrot.lane.b32.xlu1 %v6505_v40, %s6983_s22 }
 0x29f   :  { %1543 = vrot.lane.b32.xlu0 %v6458_v35, %s6982_s21  ;;  %v4031_v53 = vld [vmem:[#allocation3 + $0x30] ss:$2 sm:$0xff]  ;;  %v4063_v56 = vld [vmem:[#allocation3 + $0x31] ss:$2 sm:$0xff] }
 0x2a0   :  { %v2305_v54 = vpop.permute.xlu1 %2304  ;;  %v3269_v57 = vld [vmem:[#allocation2 + $0xc0] sm:$0xff]  ;;  %v4109_v61 = vmax.f32 %v4031_v53, %v4063_v56 }
 0x2a1   :  { %v1885_v27 = vpop.permute.xlu0 %1884  ;;  %2454 = vst.msk [vmem:[#allocation2 + $0x158] sm:$0xff] %vm2410_vm9, %v2305_v54  ;;  %6793 = vmatprep.mubr.msk.f32.mxu0 %vm3318_vm12, %v3269_v57 }
 0x2a2   :  { %2051 = vst.msk [vmem:[#allocation2 + $0xd0] sm:$0xff] %vm2024_vm8, %v1885_v27  ;;  %2697 = vrot.lane.b32.xlu1 %v6459_v52, %s6985_s24  ;;  %v4125_v26 = vmax.f32 %v4093_v60, %v4109_v61 }
 0x2a3   :  { %2278 = vrot.lane.b32.xlu0 %v6378_v55, %s6984_s23 }
 0x2a4   :  { %v3039_v3 = vpop.permute.xlu1 %3038  ;;  %v4141_v16 = vmax.f32 %v4125_v26, 0.0  ;;  %v6461_v26 = vld [vmem:[%s10334_s0 + $0x2a9] sm:$0xff] }
 0x2a5   :  { %v2688_v0 = vpop.permute.xlu0 %2687  ;;  %3206 = vst.msk [vmem:[#allocation2 + $0xc8] sm:$0xff] %vm3180_vm11, %v3039_v3 }
 0x2a6   :  { %2838 = vst.msk [vmem:[#allocation2 + $0x150] sm:$0xff] %vm2795_vm10, %v2688_v0  ;;  %1126 = vrot.lane.b32.xlu1 %v6188_v1, %s6981_s20  ;;  %v6380_v1 = vld [vmem:[%s10334_s0 + $0x1e0] sm:$0xff] }
 0x2a7   :  { %3080 = vrot.lane.b32.xlu0 %v6522_v12, %s6987_s13  ;;  %4199 = vst.msk [vmem:[#allocation4 + $0x21] sm:$0xff] %vm3900_vm13, %v4141_v16  ;;  %v6524_v16 = vld [vmem:[%s10334_s0 + $0x2a2] sm:$0xff] }
 0x2a8   :  { %v1536_v59 = vpop.permute.xlu1 %1535 }
 0x2a9   :  { %v1153_v2 = vpop.permute.xlu0 %1152  ;;  %1684 = vst.msk [vmem:[#allocation2 + $0x160] sm:$0xff] %vm1639_vm7, %v1536_v59 }
 0x2aa   :  { %1300 = vst.msk [vmem:[#allocation2 + $0x168] sm:$0xff] %vm1254_vm6, %v1153_v2  ;;  %1928 = vrot.lane.b32.xlu1 %v6522_v12, %s6983_s22 }
 0x2ab   :  { %1545 = vrot.lane.b32.xlu0 %v6459_v52, %s6982_s21  ;;  %v6317_v52 = vld [vmem:[%s10334_s0 + $0x1d2] sm:$0xff] }
 0x2ac   :  { %v2271_v58 = vpop.permute.xlu1 %2270  ;;  %v3270_v19 = vld [vmem:[#allocation2 + $0xc8] sm:$0xff]  ;;  %v6771_v30 = vpop.f32.mrb[8].mxu0 }
 0x2ad   :  { %v1887_v42 = vpop.permute.xlu0 %1886  ;;  %2437 = vst.msk [vmem:[#allocation2 + $0xd0] sm:$0xff] %vm2410_vm9, %v2271_v58  ;;  %6794 = vmatmul.mubr.msk.f32.gmra.mrb[24].mxu0 %vm3318_vm12, %v3270_v19  ;;  %v3627_v6 = vadd.f32 %v6771_v30, %v8585_v11  ;;  %v3621_v7 = vpop.f32.mrb[9].mxu0 }
 0x2ae   :  { %2052 = vst.msk [vmem:[#allocation2 + $0xd8] sm:$0xff] %vm2024_vm8, %v1887_v42  ;;  %2663 = vrot.lane.b32.xlu1 %v6442_v43, %s6985_s24  ;;  %v8790_v8 = vld [vmem:[#allocation4 + $0x20] sm:$0xff]  ;;  %v3622_v18 = vadd.f32 %v8585_v11, %v3621_v7 }
 0x2af   :  { %2280 = vrot.lane.b32.xlu0 %v6379_v31, %s6984_s23  ;;  %4232 = vst.msk [vmem:[#allocation5 + $0x10] sm:$0xff] %vm3900_vm13, %v8790_v8  ;;  %3910 = vst.msk [vmem:[#allocation3 + $0x48] sm:$0xff] %vm3900_vm13, %v3627_v6  ;;  %v6444_v7 = vld [vmem:[%s10334_s0 + $0x1e1] sm:$0xff] }
 0x2b0   :  { %v3073_v10 = vpop.permute.xlu1 %3072  ;;  %3909 = vst.msk [vmem:[#allocation3 + $0x40] sm:$0xff] %vm3900_vm13, %v3622_v18  ;;  %v6381_v18 = vld [vmem:[%s10334_s0 + $0x1e8] sm:$0xff] }
 0x2b1   :  { %v2690_v63 = vpop.permute.xlu0 %2689  ;;  %3223 = vst.msk [vmem:[#allocation2 + $0x150] sm:$0xff] %vm3180_vm11, %v3073_v10 }
 0x2b2   :  { %2839 = vst.msk [vmem:[#allocation2 + $0x158] sm:$0xff] %vm2795_vm10, %v2690_v63  ;;  %776 = vrot.lane.b32.xlu1 %v6522_v12, %s6980_s30 }
 0x2b3   :  { %3082 = vrot.lane.b32.xlu0 %v6523_v9, %s6987_s13 }
 0x2b4   :  { %v1538_v62 = vpop.permute.xlu1 %1537 }
 0x2b5   :  { %v1119_v14 = vpop.permute.xlu0 %1118  ;;  %1685 = vst.msk [vmem:[#allocation2 + $0x168] sm:$0xff] %vm1639_vm7, %v1538_v62 }
 0x2b6   :  { %1283 = vst.msk [vmem:[#allocation2 + $0xe0] sm:$0xff] %vm1254_vm6, %v1119_v14  ;;  %1511 = vrot.lane.b32.xlu1 %v6252_v4, %s6982_s21  ;;  %v6525_v4 = vld [vmem:[%s10334_s0 + $0x2aa] sm:$0xff] }
 0x2b7   :  { %1128 = vrot.lane.b32.xlu0 %v6189_v5, %s6981_s20  ;;  %v3969_v48 = vld [vmem:[#allocation3 + $0x40] ss:$2 sm:$0xff]  ;;  %v4001_v49 = vld [vmem:[#allocation3 + $0x41] ss:$2 sm:$0xff] }
 0x2b8   :  { %v2273_v47 = vpop.permute.xlu1 %2272  ;;  %v3287_v21 = vld [vmem:[#allocation2 + $0x150] sm:$0xff]  ;;  %v4094_v57 = vmax.f32 %v3969_v48, %v4001_v49 }
 0x2b9   :  { %v1921_v17 = vpop.permute.xlu0 %1920  ;;  %2438 = vst.msk [vmem:[#allocation2 + $0xd8] sm:$0xff] %vm2410_vm9, %v2273_v47  ;;  %6820 = vmatprep.mubr.msk.f32.mxu1 %vm3318_vm12, %v3287_v21  ;;  %v6398_v47 = vld [vmem:[%s10334_s0 + $0x2b8] sm:$0xff] }
 0x2ba   :  { %2069 = vst.msk [vmem:[#allocation2 + $0x160] sm:$0xff] %vm2024_vm8, %v1921_v17  ;;  %2314 = vrot.lane.b32.xlu1 %v6396_v15, %s6984_s23 }
 0x2bb   :  { %1930 = vrot.lane.b32.xlu0 %v6523_v9, %s6983_s22 }
 0x2bc   :  { %v3075_v22 = vpop.permute.xlu1 %3074 }
 0x2bd   :  { %v2656_v28 = vpop.permute.xlu0 %2655  ;;  %3224 = vst.msk [vmem:[#allocation2 + $0x158] sm:$0xff] %vm3180_vm11, %v3075_v22  ;;  %v6445_v22 = vld [vmem:[%s10334_s0 + $0x1e9] sm:$0xff] }
 0x2be   :  { %2822 = vst.msk [vmem:[#allocation2 + $0xd0] sm:$0xff] %vm2795_vm10, %v2656_v28  ;;  %3048 = vrot.lane.b32.xlu1 %v6506_v46, %s6987_s13 }
 0x2bf   :  { %2665 = vrot.lane.b32.xlu0 %v6443_v23, %s6985_s24  ;;  %v6508_v23 = vld [vmem:[%s10334_s0 + $0x1e2] sm:$0xff] }
 0x2c0   :  { %v1504_v29 = vpop.permute.xlu1 %1503 }
 0x2c1   :  { %v1121_v20 = vpop.permute.xlu0 %1120  ;;  %1668 = vst.msk [vmem:[#allocation2 + $0xe0] sm:$0xff] %vm1639_vm7, %v1504_v29 }
 0x2c2   :  { %1284 = vst.msk [vmem:[#allocation2 + $0xe8] sm:$0xff] %vm1254_vm6, %v1121_v20  ;;  %1162 = vrot.lane.b32.xlu1 %v6396_v15, %s6981_s20 }
 0x2c3   :  { %778 = vrot.lane.b32.xlu0 %v6523_v9, %s6980_s30 }
 0x2c4   :  { %v2307_v34 = vpop.permute.xlu1 %2306  ;;  %v3288_v36 = vld [vmem:[#allocation2 + $0x158] sm:$0xff]  ;;  %v6774_v51 = vpop.f32.mrb[10].mxu0 }
 0x2c5   :  { %v1923_v35 = vpop.permute.xlu0 %1922  ;;  %2455 = vst.msk [vmem:[#allocation2 + $0x160] sm:$0xff] %vm2410_vm9, %v2307_v34  ;;  %6821 = vmatmul.mubr.msk.f32.vlgmr.msra.gmra.mrb[0].mxu1 %vm3318_vm12, %v3288_v36  ;;  %v3637_v37 = vadd.f32 %v6774_v51, %v8585_v11  ;;  %v3631_v38 = vpop.f32.mrb[11].mxu0 }
 0x2c6   :  { %2070 = vst.msk [vmem:[#allocation2 + $0x168] sm:$0xff] %vm2024_vm8, %v1923_v35  ;;  %1896 = vrot.lane.b32.xlu1 %v6316_v32, %s6983_s22  ;;  %v3632_v50 = vadd.f32 %v8585_v11, %v3631_v38 }
 0x2c7   :  { %1513 = vrot.lane.b32.xlu0 %v6253_v33, %s6982_s21  ;;  %3912 = vst.msk [vmem:[#allocation3 + $0x58] sm:$0xff] %vm3900_vm13, %v3637_v37 }
 0x2c8   :  { %v3041_v40 = vpop.permute.xlu1 %3040  ;;  %3911 = vst.msk [vmem:[#allocation3 + $0x50] sm:$0xff] %vm3900_vm13, %v3632_v50  ;;  %v6462_v50 = vld [vmem:[%s10334_s0 + $0x2b9] sm:$0xff] }
 0x2c9   :  { %v2658_v41 = vpop.permute.xlu0 %2657  ;;  %3207 = vst.msk [vmem:[#allocation2 + $0xd0] sm:$0xff] %vm3180_vm11, %v3041_v40 }
 0x2ca   :  { %2823 = vst.msk [vmem:[#allocation2 + $0xd8] sm:$0xff] %vm2795_vm10, %v2658_v41  ;;  %2699 = vrot.lane.b32.xlu1 %v6460_v25, %s6985_s24 }
 0x2cb   :  { %2316 = vrot.lane.b32.xlu0 %v6397_v39, %s6984_s23 }
 0x2cc   :  { %v1155_v44 = vpop.permute.xlu1 %1154 }
 0x2cd   :  { %v771_v45 = vpop.permute.xlu0 %770  ;;  %1301 = vst.msk [vmem:[#allocation2 + $0x170] sm:$0xff] %vm1254_vm6, %v1155_v44  ;;  %v6509_v44 = vld [vmem:[%s10334_s0 + $0x1ea] sm:$0xff] }
 0x2ce   :  { %916 = vst.msk [vmem:[#allocation2 + $0x178] sm:$0xff] %vm868_vm2, %v771_v45  ;;  %1164 = vrot.lane.b32.xlu1 %v6397_v39, %s6981_s20 }
 0x2cf   :  { %3050 = vrot.lane.b32.xlu0 %v6507_v24, %s6987_s13  ;;  %v4033_v55 = vld [vmem:[#allocation3 + $0x50] ss:$2 sm:$0xff]  ;;  %v4065_v53 = vld [vmem:[#allocation3 + $0x51] ss:$2 sm:$0xff] }
 0x2d0   :  { %v1889_v56 = vpop.permute.xlu1 %1888  ;;  %v3271_v27 = vld [vmem:[#allocation2 + $0xd0] sm:$0xff]  ;;  %v4110_v60 = vmax.f32 %v4033_v55, %v4065_v53 }
 0x2d1   :  { %v1506_v54 = vpop.permute.xlu0 %1505  ;;  %2053 = vst.msk [vmem:[#allocation2 + $0xe0] sm:$0xff] %vm2024_vm8, %v1889_v56  ;;  %6796 = vmatprep.mubr.msk.f32.mxu0 %vm3318_vm12, %v3271_v27 }
 0x2d2   :  { %1669 = vst.msk [vmem:[#allocation2 + $0xe8] sm:$0xff] %vm1639_vm7, %v1506_v54  ;;  %1898 = vrot.lane.b32.xlu1 %v6317_v52, %s6983_s22  ;;  %v4126_v61 = vmax.f32 %v4094_v57, %v4110_v60 }
 0x2d3   :  { %1547 = vrot.lane.b32.xlu0 %v6460_v25, %s6982_s21  ;;  %v6399_v25 = vld [vmem:[%s10334_s0 + $0x2c0] sm:$0xff] }
 0x2d4   :  { %v2692_v12 = vpop.permute.xlu1 %2691  ;;  %v4142_v0 = vmax.f32 %v4126_v61, 0.0  ;;  %v6463_v61 = vld [vmem:[%s10334_s0 + $0x2c1] sm:$0xff] }
 0x2d5   :  { %v2309_v3 = vpop.permute.xlu0 %2308  ;;  %2840 = vst.msk [vmem:[#allocation2 + $0x160] sm:$0xff] %vm2795_vm10, %v2692_v12 }
 0x2d6   :  { %2456 = vst.msk [vmem:[#allocation2 + $0x168] sm:$0xff] %vm2410_vm9, %v2309_v3  ;;  %2701 = vrot.lane.b32.xlu1 %v6461_v26, %s6985_s24  ;;  %v6526_v3 = vld [vmem:[%s10334_s0 + $0x2ba] sm:$0xff] }
 0x2d7   :  { %2282 = vrot.lane.b32.xlu0 %v6380_v1, %s6984_s23  ;;  %4200 = vst.msk [vmem:[#allocation4 + $0x31] sm:$0xff] %vm3900_vm13, %v4142_v0 }
 0x2d8   :  { %v1157_v59 = vpop.permute.xlu1 %1156 }
 0x2d9   :  { %v3043_v2 = vpop.permute.xlu0 %3042  ;;  %1302 = vst.msk [vmem:[#allocation2 + $0x178] sm:$0xff] %vm1254_vm6, %v1157_v59 }
 0x2da   :  { %3208 = vst.msk [vmem:[#allocation2 + $0xd8] sm:$0xff] %vm3180_vm11, %v3043_v2  ;;  %1130 = vrot.lane.b32.xlu1 %v6380_v1, %s6981_s20 }
 0x2db   :  { %3084 = vrot.lane.b32.xlu0 %v6524_v16, %s6987_s13 }
 0x2dc   :  { %v1891_v43 = vpop.permute.xlu1 %1890  ;;  %v6777_v58 = vpop.f32.mrb[12].mxu0 }
 0x2dd   :  { %v1540_v31 = vpop.permute.xlu0 %1539  ;;  %2054 = vst.msk [vmem:[#allocation2 + $0xe8] sm:$0xff] %vm2024_vm8, %v1891_v43  ;;  %v3647_v42 = vadd.f32 %v6777_v58, %v8585_v11  ;;  %v3641_v19 = vpop.f32.mrb[13].mxu0 }
 0x2de   :  { %1686 = vst.msk [vmem:[#allocation2 + $0x170] sm:$0xff] %vm1639_vm7, %v1540_v31  ;;  %1932 = vrot.lane.b32.xlu1 %v6524_v16, %s6983_s22  ;;  %v8899_v30 = vld [vmem:[#allocation4 + $0x30] sm:$0xff]  ;;  %v3642_v6 = vadd.f32 %v8585_v11, %v3641_v19 }
 0x2df   :  { %1549 = vrot.lane.b32.xlu0 %v6461_v26, %s6982_s21  ;;  %4233 = vst.msk [vmem:[#allocation5 + $0x18] sm:$0xff] %vm3900_vm13, %v8899_v30  ;;  %3914 = vst.msk [vmem:[#allocation3 + $0x68] sm:$0xff] %vm3900_vm13, %v3647_v42  ;;  %v6382_v26 = vld [vmem:[%s10334_s0 + $0x1f8] sm:$0xff] }
 0x2e0   :  { %v2694_v9 = vpop.permute.xlu1 %2693  ;;  %3913 = vst.msk [vmem:[#allocation3 + $0x60] sm:$0xff] %vm3900_vm13, %v3642_v6  ;;  %v6383_v6 = vld [vmem:[%s10334_s0 + $0x200] sm:$0xff] }
 0x2e1   :  { %v2275_v10 = vpop.permute.xlu0 %2274  ;;  %v3272_v63 = vld [vmem:[#allocation2 + $0xd8] sm:$0xff]  ;;  %2841 = vst.msk [vmem:[#allocation2 + $0x168] sm:$0xff] %vm2795_vm10, %v2694_v9 }
 0x2e2   :  { %2439 = vst.msk [vmem:[#allocation2 + $0xe0] sm:$0xff] %vm2410_vm9, %v2275_v10  ;;  %6797 = vmatmul.mubr.msk.f32.gmra.mrb[26].mxu0 %vm3318_vm12, %v3272_v63  ;;  %2667 = vrot.lane.b32.xlu1 %v6444_v7, %s6985_s24  ;;  %v6527_v10 = vld [vmem:[%s10334_s0 + $0x2c2] sm:$0xff] }
 0x2e3   :  { %2284 = vrot.lane.b32.xlu0 %v6381_v18, %s6984_s23 }
 0x2e4   :  { %v1123_v5 = vpop.permute.xlu1 %1122 }
 0x2e5   :  { %v3077_v62 = vpop.permute.xlu0 %3076  ;;  %1285 = vst.msk [vmem:[#allocation2 + $0xf0] sm:$0xff] %vm1254_vm6, %v1123_v5 }
 0x2e6   :  { %3225 = vst.msk [vmem:[#allocation2 + $0x160] sm:$0xff] %vm3180_vm11, %v3077_v62  ;;  %780 = vrot.lane.b32.xlu1 %v6524_v16, %s6980_s30 }
 0x2e7   :  { %3086 = vrot.lane.b32.xlu0 %v6525_v4, %s6987_s13  ;;  %v3971_v41 = vld [vmem:[#allocation3 + $0x60] ss:$2 sm:$0xff]  ;;  %v4003_v24 = vld [vmem:[#allocation3 + $0x61] ss:$2 sm:$0xff] }
 0x2e8   :  { %v1925_v14 = vpop.permute.xlu1 %1924  ;;  %v4095_v55 = vmax.f32 %v3971_v41, %v4003_v24 }
 0x2e9   :  { %v1542_v15 = vpop.permute.xlu0 %1541  ;;  %2071 = vst.msk [vmem:[#allocation2 + $0x170] sm:$0xff] %vm2024_vm8, %v1925_v14  ;;  %v6400_v14 = vld [vmem:[%s10334_s0 + $0x2d0] sm:$0xff] }
 0x2ea   :  { %1687 = vst.msk [vmem:[#allocation2 + $0x178] sm:$0xff] %vm1639_vm7, %v1542_v15  ;;  %1515 = vrot.lane.b32.xlu1 %v6444_v7, %s6982_s21 }
 0x2eb   :  { %1132 = vrot.lane.b32.xlu0 %v6381_v18, %s6981_s20 }
 0x2ec   :  { %v2660_v17 = vpop.permute.xlu1 %2659 }
 0x2ed   :  { %v2277_v21 = vpop.permute.xlu0 %2276  ;;  %v3289_v46 = vld [vmem:[#allocation2 + $0x160] sm:$0xff]  ;;  %2824 = vst.msk [vmem:[#allocation2 + $0xe0] sm:$0xff] %vm2795_vm10, %v2660_v17 }
 0x2ee   :  { %2440 = vst.msk [vmem:[#allocation2 + $0xe8] sm:$0xff] %vm2410_vm9, %v2277_v21  ;;  %6823 = vmatprep.mubr.msk.f32.mxu1 %vm3318_vm12, %v3289_v46  ;;  %2318 = vrot.lane.b32.xlu1 %v6398_v47, %s6984_s23  ;;  %v6510_v21 = vld [vmem:[%s10334_s0 + $0x1fa] sm:$0xff] }
 0x2ef   :  { %1934 = vrot.lane.b32.xlu0 %v6525_v4, %s6983_s22  ;;  %v6447_v46 = vld [vmem:[%s10334_s0 + $0x201] sm:$0xff] }
 0x2f0   :  { %v773_v28 = vpop.permute.xlu1 %772 }
 0x2f1   :  { %v3079_v29 = vpop.permute.xlu0 %3078  ;;  %917 = vst.msk [vmem:[#allocation2 + $0x180] sm:$0xff] %vm868_vm2, %v773_v28 }
 0x2f2   :  { %3226 = vst.msk [vmem:[#allocation2 + $0x168] sm:$0xff] %vm3180_vm11, %v3079_v29  ;;  %3052 = vrot.lane.b32.xlu1 %v6508_v23, %s6987_s13  ;;  %v9052_v29 = vld [vmem:[%s10336_s2] ss:$0 sm:$0xff] }
 0x2f3   :  { %2669 = vrot.lane.b32.xlu0 %v6445_v22, %s6985_s24 }
 0x2f4   :  { %v1508_v20 = vpop.permute.xlu1 %1507  ;;  %v6780_v33 = vpop.f32.mrb[14].mxu0 }
 0x2f5   :  { %v1125_v32 = vpop.permute.xlu0 %1124  ;;  %1670 = vst.msk [vmem:[#allocation2 + $0xf0] sm:$0xff] %vm1639_vm7, %v1508_v20  ;;  %v3657_v34 = vadd.f32 %v6780_v33, %v8585_v11  ;;  %v3651_v35 = vpop.f32.mrb[15].mxu0 }
 0x2f6   :  { %1286 = vst.msk [vmem:[#allocation2 + $0xf8] sm:$0xff] %vm1254_vm6, %v1125_v32  ;;  %1166 = vrot.lane.b32.xlu1 %v6398_v47, %s6981_s20  ;;  %v3652_v36 = vadd.f32 %v8585_v11, %v3651_v35 }
 0x2f7   :  { %782 = vrot.lane.b32.xlu0 %v6525_v4, %s6980_s30  ;;  %3916 = vst.msk [vmem:[#allocation3 + $0x78] sm:$0xff] %vm3900_vm13, %v3657_v34 }
 0x2f8   :  { %v2311_v51 = vpop.permute.xlu1 %2310  ;;  %3915 = vst.msk [vmem:[#allocation3 + $0x70] sm:$0xff] %vm3900_vm13, %v3652_v36 }
 0x2f9   :  { %v1927_v37 = vpop.permute.xlu0 %1926  ;;  %v3290_v38 = vld [vmem:[#allocation2 + $0x168] sm:$0xff]  ;;  %2457 = vst.msk [vmem:[#allocation2 + $0x170] sm:$0xff] %vm2410_vm9, %v2311_v51 }
 0x2fa   :  { %2072 = vst.msk [vmem:[#allocation2 + $0x178] sm:$0xff] %vm2024_vm8, %v1927_v37  ;;  %6824 = vmatmul.mubr.msk.f32.gmra.mrb[2].mxu1 %vm3318_vm12, %v3290_v38  ;;  %1900 = vrot.lane.b32.xlu1 %v6508_v23, %s6983_s22 }
 0x2fb   :  { %1517 = vrot.lane.b32.xlu0 %v6445_v22, %s6982_s21 }
 0x2fc   :  { %v3045_v39 = vpop.permute.xlu1 %3044 }
 0x2fd   :  { %v2662_v40 = vpop.permute.xlu0 %2661  ;;  %3209 = vst.msk [vmem:[#allocation2 + $0xe0] sm:$0xff] %vm3180_vm11, %v3045_v39  ;;  %v6401_v39 = vld [vmem:[%s10334_s0 + $0x2d8] sm:$0xff] }
 0x2fe   :  { %2825 = vst.msk [vmem:[#allocation2 + $0xe8] sm:$0xff] %vm2795_vm10, %v2662_v40  ;;  %2703 = vrot.lane.b32.xlu1 %v6462_v50, %s6985_s24 }
 0x2ff   :  { %2320 = vrot.lane.b32.xlu0 %v6399_v25, %s6984_s23  ;;  %v4035_v45 = vld [vmem:[#allocation3 + $0x70] ss:$2 sm:$0xff]  ;;  %v4067_v48 = vld [vmem:[#allocation3 + $0x71] ss:$2 sm:$0xff] }
 0x300   :  { %v1159_v49 = vpop.permute.xlu1 %1158  ;;  %v4111_v53 = vmax.f32 %v4035_v45, %v4067_v48 }
 0x301   :  { %v775_v52 = vpop.permute.xlu0 %774  ;;  %1303 = vst.msk [vmem:[#allocation2 + $0x180] sm:$0xff] %vm1254_vm6, %v1159_v49 }
 0x302   :  { %918 = vst.msk [vmem:[#allocation2 + $0x188] sm:$0xff] %vm868_vm2, %v775_v52  ;;  %1168 = vrot.lane.b32.xlu1 %v6399_v25, %s6981_s20  ;;  %v4127_v56 = vmax.f32 %v4095_v55, %v4111_v53  ;;  %v6464_v25 = vld [vmem:[%s10334_s0 + $0x2d1] sm:$0xff]  ;;  %v6511_v52 = vld [vmem:[%s10334_s0 + $0x202] sm:$0xff] }
 0x303   :  { %3054 = vrot.lane.b32.xlu0 %v6509_v44, %s6987_s13 }
 0x304   :  { %v1893_v54 = vpop.permute.xlu1 %1892  ;;  %v3273_v57 = vld [vmem:[#allocation2 + $0xe0] sm:$0xff]  ;;  %v4143_v60 = vmax.f32 %v4127_v56, 0.0 }
 0x305   :  { %v1510_v27 = vpop.permute.xlu0 %1509  ;;  %2055 = vst.msk [vmem:[#allocation2 + $0xf0] sm:$0xff] %vm2024_vm8, %v1893_v54  ;;  %6799 = vmatprep.mubr.msk.f32.mxu0 %vm3318_vm12, %v3273_v57 }
 0x306   :  { %1671 = vst.msk [vmem:[#allocation2 + $0xf8] sm:$0xff] %vm1639_vm7, %v1510_v27  ;;  %1902 = vrot.lane.b32.xlu1 %v6509_v44, %s6983_s22 }
 0x307   :  { %1551 = vrot.lane.b32.xlu0 %v6462_v50, %s6982_s21  ;;  %4201 = vst.msk [vmem:[#allocation4 + $0x41] sm:$0xff] %vm3900_vm13, %v4143_v60  ;;  %v6465_v60 = vld [vmem:[%s10334_s0 + $0x2d9] sm:$0xff] }
 0x308   :  { %v2696_v1 = vpop.permute.xlu1 %2695 }
 0x309   :  { %v2313_v12 = vpop.permute.xlu0 %2312  ;;  %2842 = vst.msk [vmem:[#allocation2 + $0x170] sm:$0xff] %vm2795_vm10, %v2696_v1 }
 0x30a   :  { %2458 = vst.msk [vmem:[#allocation2 + $0x178] sm:$0xff] %vm2410_vm9, %v2313_v12  ;;  %2705 = vrot.lane.b32.xlu1 %v6463_v61, %s6985_s24 }
 0x30b   :  { %2286 = vrot.lane.b32.xlu0 %v6382_v26, %s6984_s23 }
 0x30c   :  { %v1161_v0 = vpop.permute.xlu1 %1160  ;;  %v6783_v59 = vpop.f32.mrb[16].mxu0 }
 0x30d   :  { %v3047_v16 = vpop.permute.xlu0 %3046  ;;  %1304 = vst.msk [vmem:[#allocation2 + $0x188] sm:$0xff] %vm1254_vm6, %v1161_v0  ;;  %v3667_v2 = vadd.f32 %v6783_v59, %v8585_v11  ;;  %v3661_v43 = vpop.f32.mrb[17].mxu0  ;;  %v6528_v59 = vld [vmem:[%s10334_s0 + $0x2d2] sm:$0xff] }
 0x30e   :  { %3210 = vst.msk [vmem:[#allocation2 + $0xe8] sm:$0xff] %vm3180_vm11, %v3047_v16  ;;  %1134 = vrot.lane.b32.xlu1 %v6382_v26, %s6981_s20  ;;  %v9000_v31 = vld [vmem:[#allocation4 + $0x40] sm:$0xff]  ;;  %v3662_v58 = vadd.f32 %v8585_v11, %v3661_v43 }
 0x30f   :  { %3088 = vrot.lane.b32.xlu0 %v6526_v3, %s6987_s13  ;;  %4234 = vst.msk [vmem:[#allocation5 + $0x20] sm:$0xff] %vm3900_vm13, %v9000_v31  ;;  %3918 = vst.msk [vmem:[#allocation3 + $0x88] sm:$0xff] %vm3900_vm13, %v3667_v2  ;;  %v6446_v11 = vld [vmem:[%s10334_s0 + $0x1f9] sm:$0xff] }
 0x310   :  { %v1895_v42 = vpop.permute.xlu1 %1894  ;;  %3917 = vst.msk [vmem:[#allocation3 + $0x80] sm:$0xff] %vm3900_vm13, %v3662_v58 }
 0x311   :  { %v1544_v19 = vpop.permute.xlu0 %1543  ;;  %2056 = vst.msk [vmem:[#allocation2 + $0xf8] sm:$0xff] %vm2024_vm8, %v1895_v42 }
 0x312   :  { %1688 = vst.msk [vmem:[#allocation2 + $0x180] sm:$0xff] %vm1639_vm7, %v1544_v19  ;;  %1936 = vrot.lane.b32.xlu1 %v6526_v3, %s6983_s22 }
 0x313   :  { %1553 = vrot.lane.b32.xlu0 %v6463_v61, %s6982_s21  ;;  %v6384_v61 = vld [vmem:[%s10334_s0 + $0x210] sm:$0xff] }
 0x314   :  { %v2698_v7 = vpop.permute.xlu1 %2697 }
 0x315   :  { %v2279_v18 = vpop.permute.xlu0 %2278  ;;  %v3274_v9 = vld [vmem:[#allocation2 + $0xe8] sm:$0xff]  ;;  %2843 = vst.msk [vmem:[#allocation2 + $0x178] sm:$0xff] %vm2795_vm10, %v2698_v7 }
 0x316   :  { %2441 = vst.msk [vmem:[#allocation2 + $0xf0] sm:$0xff] %vm2410_vm9, %v2279_v18  ;;  %6800 = vmatmul.mubr.msk.f32.gmra.mrb[28].mxu0 %vm3318_vm12, %v3274_v9  ;;  %2671 = vrot.lane.b32.xlu1 %v6446_v11, %s6985_s24 }
 0x317   :  { %2288 = vrot.lane.b32.xlu0 %v6383_v6, %s6984_s23  ;;  %v3973_v38 = vld [vmem:[#allocation3 + $0x80] ss:$2 sm:$0xff]  ;;  %v4005_v50 = vld [vmem:[#allocation3 + $0x81] ss:$2 sm:$0xff] }
 0x318   :  { %v1127_v63 = vpop.permute.xlu1 %1126  ;;  %v4096_v45 = vmax.f32 %v3973_v38, %v4005_v50 }
 0x319   :  { %v3081_v4 = vpop.permute.xlu0 %3080  ;;  %1287 = vst.msk [vmem:[#allocation2 + $0x100] sm:$0xff] %vm1254_vm6, %v1127_v63 }
 0x31a   :  { %3227 = vst.msk [vmem:[#allocation2 + $0x170] sm:$0xff] %vm3180_vm11, %v3081_v4  ;;  %784 = vrot.lane.b32.xlu1 %v6526_v3, %s6980_s30 }
 0x31b   :  { %3090 = vrot.lane.b32.xlu0 %v6527_v10, %s6987_s13 }
 0x31c   :  { %v1929_v5 = vpop.permute.xlu1 %1928 }
 0x31d   :  { %v1546_v62 = vpop.permute.xlu0 %1545  ;;  %2073 = vst.msk [vmem:[#allocation2 + $0x180] sm:$0xff] %vm2024_vm8, %v1929_v5 }
 0x31e   :  { %1689 = vst.msk [vmem:[#allocation2 + $0x188] sm:$0xff] %vm1639_vm7, %v1546_v62  ;;  %1519 = vrot.lane.b32.xlu1 %v6446_v11, %s6982_s21  ;;  %v6448_v11 = vld [vmem:[%s10334_s0 + $0x211] sm:$0xff] }
 0x31f   :  { %1136 = vrot.lane.b32.xlu0 %v6383_v6, %s6981_s20  ;;  %v6385_v6 = vld [vmem:[%s10334_s0 + $0x218] sm:$0xff] }
 0x320   :  { %v2664_v15 = vpop.permute.xlu1 %2663 }
 0x321   :  { %v2281_v47 = vpop.permute.xlu0 %2280  ;;  %v3291_v17 = vld [vmem:[#allocation2 + $0x170] sm:$0xff]  ;;  %2826 = vst.msk [vmem:[#allocation2 + $0xf0] sm:$0xff] %vm2795_vm10, %v2664_v15 }
 0x322   :  { %2442 = vst.msk [vmem:[#allocation2 + $0xf8] sm:$0xff] %vm2410_vm9, %v2281_v47  ;;  %6826 = vmatprep.mubr.msk.f32.mxu1 %vm3318_vm12, %v3291_v17  ;;  %2322 = vrot.lane.b32.xlu1 %v6400_v14, %s6984_s23 }
 0x323   :  { %1938 = vrot.lane.b32.xlu0 %v6527_v10, %s6983_s22 }
 0x324   :  { %v777_v23 = vpop.permute.xlu1 %776  ;;  %v6786_v28 = vpop.f32.mrb[18].mxu0 }
 0x325   :  { %v3083_v22 = vpop.permute.xlu0 %3082  ;;  %919 = vst.msk [vmem:[#allocation2 + $0x190] sm:$0xff] %vm868_vm2, %v777_v23  ;;  %v3677_v20 = vadd.f32 %v9052_v29, %v6786_v28  ;;  %v3671_v32 = vpop.f32.mrb[19].mxu0 }
 0x326   :  { %3228 = vst.msk [vmem:[#allocation2 + $0x178] sm:$0xff] %vm3180_vm11, %v3083_v22  ;;  %3056 = vrot.lane.b32.xlu1 %v6510_v21, %s6987_s13  ;;  %v3672_v33 = vadd.f32 %v9052_v29, %v3671_v32 }
 0x327   :  { %2673 = vrot.lane.b32.xlu0 %v6447_v46, %s6985_s24  ;;  %3920 = vst.msk [vmem:[#allocation3 + $0x98] sm:$0xff] %vm3900_vm13, %v3677_v20 }
 0x328   :  { %v1512_v34 = vpop.permute.xlu1 %1511  ;;  %3919 = vst.msk [vmem:[#allocation3 + $0x90] sm:$0xff] %vm3900_vm13, %v3672_v33 }
 0x329   :  { %v1129_v35 = vpop.permute.xlu0 %1128  ;;  %1672 = vst.msk [vmem:[#allocation2 + $0x100] sm:$0xff] %vm1639_vm7, %v1512_v34 }
 0x32a   :  { %1288 = vst.msk [vmem:[#allocation2 + $0x108] sm:$0xff] %vm1254_vm6, %v1129_v35  ;;  %1170 = vrot.lane.b32.xlu1 %v6400_v14, %s6981_s20  ;;  %v6402_v14 = vld [vmem:[%s10334_s0 + $0x2e8] sm:$0xff] }
 0x32b   :  { %786 = vrot.lane.b32.xlu0 %v6527_v10, %s6980_s30  ;;  %v6529_v10 = vld [vmem:[%s10334_s0 + $0x2da] sm:$0xff] }
 0x32c   :  { %v2315_v36 = vpop.permute.xlu1 %2314 }
 0x32d   :  { %v1931_v51 = vpop.permute.xlu0 %1930  ;;  %v3292_v37 = vld [vmem:[#allocation2 + $0x178] sm:$0xff]  ;;  %2459 = vst.msk [vmem:[#allocation2 + $0x180] sm:$0xff] %vm2410_vm9, %v2315_v36 }
 0x32e   :  { %2074 = vst.msk [vmem:[#allocation2 + $0x188] sm:$0xff] %vm2024_vm8, %v1931_v51  ;;  %6827 = vmatmul.mubr.msk.f32.gmra.mrb[4].mxu1 %vm3318_vm12, %v3292_v37  ;;  %1904 = vrot.lane.b32.xlu1 %v6510_v21, %s6983_s22  ;;  %v6512_v21 = vld [vmem:[%s10334_s0 + $0x212] sm:$0xff] }
 0x32f   :  { %1521 = vrot.lane.b32.xlu0 %v6447_v46, %s6982_s21  ;;  %v4037_v40 = vld [vmem:[#allocation3 + $0x90] ss:$2 sm:$0xff]  ;;  %v4069_v41 = vld [vmem:[#allocation3 + $0x91] ss:$2 sm:$0xff] }
 0x330   :  { %v3049_v24 = vpop.permute.xlu1 %3048  ;;  %v4112_v48 = vmax.f32 %v4037_v40, %v4069_v41  ;;  %v6449_v46 = vld [vmem:[%s10334_s0 + $0x219] sm:$0xff] }
 0x331   :  { %v2666_v44 = vpop.permute.xlu0 %2665  ;;  %3211 = vst.msk [vmem:[#allocation2 + $0xf0] sm:$0xff] %vm3180_vm11, %v3049_v24 }
 0x332   :  { %2827 = vst.msk [vmem:[#allocation2 + $0xf8] sm:$0xff] %vm2795_vm10, %v2666_v44  ;;  %2707 = vrot.lane.b32.xlu1 %v6464_v25, %s6985_s24  ;;  %v4128_v49 = vmax.f32 %v4096_v45, %v4112_v48 }
 0x333   :  { %2324 = vrot.lane.b32.xlu0 %v6401_v39, %s6984_s23 }
 0x334   :  { %v1163_v55 = vpop.permute.xlu1 %1162  ;;  %v4144_v56 = vmax.f32 %v4128_v49, 0.0 }
 0x335   :  { %v779_v53 = vpop.permute.xlu0 %778  ;;  %1305 = vst.msk [vmem:[#allocation2 + $0x190] sm:$0xff] %vm1254_vm6, %v1163_v55 }
 0x336   :  { %920 = vst.msk [vmem:[#allocation2 + $0x198] sm:$0xff] %vm868_vm2, %v779_v53  ;;  %1172 = vrot.lane.b32.xlu1 %v6401_v39, %s6981_s20  ;;  %v6403_v39 = vld [vmem:[%s10334_s0 + $0x2f0] sm:$0xff] }
 0x337   :  { %3058 = vrot.lane.b32.xlu0 %v6511_v52, %s6987_s13  ;;  %4202 = vst.msk [vmem:[#allocation4 + $0x51] sm:$0xff] %vm3900_vm13, %v4144_v56 }
 0x338   :  { %v1897_v54 = vpop.permute.xlu1 %1896  ;;  %v3275_v57 = vld [vmem:[#allocation2 + $0xf0] sm:$0xff] }
 0x339   :  { %v1514_v27 = vpop.permute.xlu0 %1513  ;;  %2057 = vst.msk [vmem:[#allocation2 + $0x100] sm:$0xff] %vm2024_vm8, %v1897_v54  ;;  %6802 = vmatprep.mubr.msk.f32.mxu0 %vm3318_vm12, %v3275_v57 }
 0x33a   :  { %1673 = vst.msk [vmem:[#allocation2 + $0x108] sm:$0xff] %vm1639_vm7, %v1514_v27  ;;  %1906 = vrot.lane.b32.xlu1 %v6511_v52, %s6983_s22  ;;  %v6513_v52 = vld [vmem:[%s10334_s0 + $0x21a] sm:$0xff] }
 0x33b   :  { %1555 = vrot.lane.b32.xlu0 %v6464_v25, %s6982_s21  ;;  %v6466_v25 = vld [vmem:[%s10334_s0 + $0x2e9] sm:$0xff] }
 0x33c   :  { %v2700_v26 = vpop.permute.xlu1 %2699  ;;  %v6789_v12 = vpop.f32.mrb[20].mxu0 }
 0x33d   :  { %v2317_v1 = vpop.permute.xlu0 %2316  ;;  %2844 = vst.msk [vmem:[#allocation2 + $0x180] sm:$0xff] %vm2795_vm10, %v2700_v26  ;;  %v3687_v3 = vadd.f32 %v9052_v29, %v6789_v12  ;;  %v3681_v0 = vpop.f32.mrb[21].mxu0 }
 0x33e   :  { %2460 = vst.msk [vmem:[#allocation2 + $0x188] sm:$0xff] %vm2410_vm9, %v2317_v1  ;;  %2709 = vrot.lane.b32.xlu1 %v6465_v60, %s6985_s24  ;;  %v3682_v16 = vadd.f32 %v9052_v29, %v3681_v0  ;;  %v9107_v2 = vld [vmem:[#allocation4 + $0x50] sm:$0xff] }
 0x33f   :  { %2290 = vrot.lane.b32.xlu0 %v6384_v61, %s6984_s23  ;;  %3922 = vst.msk [vmem:[#allocation3 + $0xa8] sm:$0xff] %vm3900_vm13, %v3687_v3  ;;  %4235 = vst.msk [vmem:[#allocation5 + $0x28] sm:$0xff] %vm3900_vm13, %v9107_v2  ;;  %v6530_v3 = vld [vmem:[%s10334_s0 + $0x2ea] sm:$0xff] }
 0x340   :  { %v1165_v43 = vpop.permute.xlu1 %1164  ;;  %3921 = vst.msk [vmem:[#allocation3 + $0xa0] sm:$0xff] %vm3900_vm13, %v3682_v16 }
 0x341   :  { %v3051_v58 = vpop.permute.xlu0 %3050  ;;  %1306 = vst.msk [vmem:[#allocation2 + $0x198] sm:$0xff] %vm1254_vm6, %v1165_v43 }
 0x342   :  { %3212 = vst.msk [vmem:[#allocation2 + $0xf8] sm:$0xff] %vm3180_vm11, %v3051_v58  ;;  %1138 = vrot.lane.b32.xlu1 %v6384_v61, %s6981_s20  ;;  %v6386_v61 = vld [vmem:[%s10334_s0 + $0x228] sm:$0xff] }
 0x343   :  { %3092 = vrot.lane.b32.xlu0 %v6528_v59, %s6987_s13  ;;  %v6450_v58 = vld [vmem:[%s10334_s0 + $0x229] sm:$0xff] }
 0x344   :  { %v1899_v42 = vpop.permute.xlu1 %1898 }
 0x345   :  { %v1548_v19 = vpop.permute.xlu0 %1547  ;;  %2058 = vst.msk [vmem:[#allocation2 + $0x108] sm:$0xff] %vm2024_vm8, %v1899_v42  ;;  %v6387_v42 = vld [vmem:[%s10334_s0 + $0x230] sm:$0xff] }
 0x346   :  { %1690 = vst.msk [vmem:[#allocation2 + $0x190] sm:$0xff] %vm1639_vm7, %v1548_v19  ;;  %1940 = vrot.lane.b32.xlu1 %v6528_v59, %s6983_s22 }
 0x347   :  { %1557 = vrot.lane.b32.xlu0 %v6465_v60, %s6982_s21  ;;  %v3975_v38 = vld [vmem:[#allocation3 + $0xa0] ss:$2 sm:$0xff]  ;;  %v4007_v50 = vld [vmem:[#allocation3 + $0xa1] ss:$2 sm:$0xff]  ;;  %v6467_v60 = vld [vmem:[%s10334_s0 + $0x2f1] sm:$0xff] }
 0x348   :  { %v2702_v7 = vpop.permute.xlu1 %2701  ;;  %v4097_v45 = vmax.f32 %v3975_v38, %v4007_v50 }
 0x349   :  { %v2283_v18 = vpop.permute.xlu0 %2282  ;;  %v3276_v9 = vld [vmem:[#allocation2 + $0xf8] sm:$0xff]  ;;  %2845 = vst.msk [vmem:[#allocation2 + $0x188] sm:$0xff] %vm2795_vm10, %v2702_v7 }
 0x34a   :  { %2443 = vst.msk [vmem:[#allocation2 + $0x100] sm:$0xff] %vm2410_vm9, %v2283_v18  ;;  %6803 = vmatmul.mubr.msk.f32.gmra.mrb[30].mxu0 %vm3318_vm12, %v3276_v9  ;;  %2675 = vrot.lane.b32.xlu1 %v6448_v11, %s6985_s24  ;;  %v6531_v7 = vld [vmem:[%s10334_s0 + $0x2f2] sm:$0xff] }
 0x34b   :  { %2292 = vrot.lane.b32.xlu0 %v6385_v6, %s6984_s23 }
 0x34c   :  { %v1131_v63 = vpop.permute.xlu1 %1130 }
 0x34d   :  { %v3085_v4 = vpop.permute.xlu0 %3084  ;;  %1289 = vst.msk [vmem:[#allocation2 + $0x110] sm:$0xff] %vm1254_vm6, %v1131_v63 }
 0x34e   :  { %3229 = vst.msk [vmem:[#allocation2 + $0x180] sm:$0xff] %vm3180_vm11, %v3085_v4  ;;  %788 = vrot.lane.b32.xlu1 %v6528_v59, %s6980_s30 }
 0x34f   :  { %3094 = vrot.lane.b32.xlu0 %v6529_v10, %s6987_s13 }
 0x350   :  { %v1933_v5 = vpop.permute.xlu1 %1932 }
 0x351   :  { %v1550_v62 = vpop.permute.xlu0 %1549  ;;  %2075 = vst.msk [vmem:[#allocation2 + $0x190] sm:$0xff] %vm2024_vm8, %v1933_v5 }
 0x352   :  { %1691 = vst.msk [vmem:[#allocation2 + $0x198] sm:$0xff] %vm1639_vm7, %v1550_v62  ;;  %1523 = vrot.lane.b32.xlu1 %v6448_v11, %s6982_s21 }
 0x353   :  { %1140 = vrot.lane.b32.xlu0 %v6385_v6, %s6981_s20 }
 0x354   :  { %v2668_v15 = vpop.permute.xlu1 %2667 }
 0x355   :  { %v2285_v47 = vpop.permute.xlu0 %2284  ;;  %v3293_v17 = vld [vmem:[#allocation2 + $0x180] sm:$0xff]  ;;  %2828 = vst.msk [vmem:[#allocation2 + $0x100] sm:$0xff] %vm2795_vm10, %v2668_v15 }
 0x356   :  { %2444 = vst.msk [vmem:[#allocation2 + $0x108] sm:$0xff] %vm2410_vm9, %v2285_v47  ;;  %6829 = vmatprep.mubr.msk.f32.mxu1 %vm3318_vm12, %v3293_v17  ;;  %2326 = vrot.lane.b32.xlu1 %v6402_v14, %s6984_s23  ;;  %v6404_v15 = vld [vmem:[%s10334_s0 + $0x300] sm:$0xff] }
 0x357   :  { %1942 = vrot.lane.b32.xlu0 %v6529_v10, %s6983_s22 }
 0x358   :  { %v781_v23 = vpop.permute.xlu1 %780 }
 0x359   :  { %v3087_v22 = vpop.permute.xlu0 %3086  ;;  %921 = vst.msk [vmem:[#allocation2 + $0x1a0] sm:$0xff] %vm868_vm2, %v781_v23  ;;  %v6792_v28 = vpop.f32.mrb[22].mxu0  ;;  %v6451_v23 = vld [vmem:[%s10334_s0 + $0x231] sm:$0xff] }
 0x35a   :  { %3230 = vst.msk [vmem:[#allocation2 + $0x188] sm:$0xff] %vm3180_vm11, %v3087_v22  ;;  %v3697_v20 = vadd.f32 %v9052_v29, %v6792_v28  ;;  %v3691_v32 = vpop.f32.mrb[23].mxu0  ;;  %3060 = vrot.lane.b32.xlu1 %v6512_v21, %s6987_s13 }
 0x35b   :  { %2677 = vrot.lane.b32.xlu0 %v6449_v46, %s6985_s24  ;;  %v3692_v33 = vadd.f32 %v9052_v29, %v3691_v32 }
 0x35c   :  { %3924 = vst.msk [vmem:[#allocation3 + $0xb8] sm:$0xff] %vm3900_vm13, %v3697_v20  ;;  %v1516_v34 = vpop.permute.xlu1 %1515 }
 0x35d   :  { %v1133_v35 = vpop.permute.xlu0 %1132  ;;  %3923 = vst.msk [vmem:[#allocation3 + $0xb0] sm:$0xff] %vm3900_vm13, %v3692_v33 }
 0x35e   :  { %1674 = vst.msk [vmem:[#allocation2 + $0x110] sm:$0xff] %vm1639_vm7, %v1516_v34  ;;  %1174 = vrot.lane.b32.xlu1 %v6402_v14, %s6981_s20 }
 0x35f   :  { %1290 = vst.msk [vmem:[#allocation2 + $0x118] sm:$0xff] %vm1254_vm6, %v1133_v35  ;;  %790 = vrot.lane.b32.xlu0 %v6529_v10, %s6980_s30 }
 0x360   :  { %v2319_v36 = vpop.permute.xlu1 %2318 }
 0x361   :  { %v1935_v51 = vpop.permute.xlu0 %1934  ;;  %v3294_v37 = vld [vmem:[#allocation2 + $0x188] sm:$0xff]  ;;  %2461 = vst.msk [vmem:[#allocation2 + $0x190] sm:$0xff] %vm2410_vm9, %v2319_v36 }
 0x362   :  { %2076 = vst.msk [vmem:[#allocation2 + $0x198] sm:$0xff] %vm2024_vm8, %v1935_v51  ;;  %6830 = vmatmul.mubr.msk.f32.gmra.mrb[6].mxu1 %vm3318_vm12, %v3294_v37  ;;  %1908 = vrot.lane.b32.xlu1 %v6512_v21, %s6983_s22  ;;  %v6468_v36 = vld [vmem:[%s10334_s0 + $0x301] sm:$0xff] }
 0x363   :  { %1525 = vrot.lane.b32.xlu0 %v6449_v46, %s6982_s21  ;;  %v6514_v46 = vld [vmem:[%s10334_s0 + $0x22a] sm:$0xff] }
 0x364   :  { %v4039_v40 = vld [vmem:[#allocation3 + $0xb0] ss:$2 sm:$0xff]  ;;  %v4071_v41 = vld [vmem:[#allocation3 + $0xb1] ss:$2 sm:$0xff]  ;;  %v3053_v24 = vpop.permute.xlu1 %3052  ;;  %v6405_v51 = vld [vmem:[%s10334_s0 + $0x308] sm:$0xff] }
 0x365   :  { %v2670_v44 = vpop.permute.xlu0 %2669  ;;  %v4113_v48 = vmax.f32 %v4039_v40, %v4071_v41  ;;  %3213 = vst.msk [vmem:[#allocation2 + $0x100] sm:$0xff] %vm3180_vm11, %v3053_v24  ;;  %v6515_v41 = vld [vmem:[%s10334_s0 + $0x232] sm:$0xff] }
 0x366   :  { %2829 = vst.msk [vmem:[#allocation2 + $0x108] sm:$0xff] %vm2795_vm10, %v2670_v44  ;;  %2711 = vrot.lane.b32.xlu1 %v6466_v25, %s6985_s24 }
 0x367   :  { %2328 = vrot.lane.b32.xlu0 %v6403_v39, %s6984_s23  ;;  %v4129_v49 = vmax.f32 %v4097_v45, %v4113_v48 }
 0x368   :  { %v1167_v55 = vpop.permute.xlu1 %1166 }
 0x369   :  { %v783_v53 = vpop.permute.xlu0 %782  ;;  %v4145_v56 = vmax.f32 %v4129_v49, 0.0  ;;  %1307 = vst.msk [vmem:[#allocation2 + $0x1a0] sm:$0xff] %vm1254_vm6, %v1167_v55  ;;  %v6388_v55 = vld [vmem:[%s10334_s0 + $0x240] sm:$0xff] }
 0x36a   :  { %922 = vst.msk [vmem:[#allocation2 + $0x1a8] sm:$0xff] %vm868_vm2, %v783_v53  ;;  %1176 = vrot.lane.b32.xlu1 %v6403_v39, %s6981_s20 }
 0x36b   :  { %3062 = vrot.lane.b32.xlu0 %v6513_v52, %s6987_s13  ;;  %4203 = vst.msk [vmem:[#allocation4 + $0x61] sm:$0xff] %vm3900_vm13, %v4145_v56 }
 0x36c   :  { %v1901_v54 = vpop.permute.xlu1 %1900  ;;  %v3277_v57 = vld [vmem:[#allocation2 + $0x100] sm:$0xff] }
 0x36d   :  { %v1518_v27 = vpop.permute.xlu0 %1517  ;;  %2059 = vst.msk [vmem:[#allocation2 + $0x110] sm:$0xff] %vm2024_vm8, %v1901_v54  ;;  %6805 = vmatprep.mubr.msk.f32.mxu0 %vm3318_vm12, %v3277_v57  ;;  %v6532_v54 = vld [vmem:[%s10334_s0 + $0x302] sm:$0xff] }
 0x36e   :  { %1675 = vst.msk [vmem:[#allocation2 + $0x118] sm:$0xff] %vm1639_vm7, %v1518_v27  ;;  %1910 = vrot.lane.b32.xlu1 %v6513_v52, %s6983_s22  ;;  %v6469_v52 = vld [vmem:[%s10334_s0 + $0x309] sm:$0xff] }
 0x36f   :  { %1559 = vrot.lane.b32.xlu0 %v6466_v25, %s6982_s21 }
 0x370   :  { %v2704_v26 = vpop.permute.xlu1 %2703 }
 0x371   :  { %v2321_v1 = vpop.permute.xlu0 %2320  ;;  %2846 = vst.msk [vmem:[#allocation2 + $0x190] sm:$0xff] %vm2795_vm10, %v2704_v26 }
 0x372   :  { %2462 = vst.msk [vmem:[#allocation2 + $0x198] sm:$0xff] %vm2410_vm9, %v2321_v1  ;;  %2713 = vrot.lane.b32.xlu1 %v6467_v60, %s6985_s24  ;;  %v9207_v12 = vld [vmem:[#allocation4 + $0x60] sm:$0xff]  ;;  %v6533_v1 = vld [vmem:[%s10334_s0 + $0x30a] sm:$0xff] }
 0x373   :  { %2294 = vrot.lane.b32.xlu0 %v6386_v61, %s6984_s23  ;;  %4236 = vst.msk [vmem:[#allocation5 + $0x30] sm:$0xff] %vm3900_vm13, %v9207_v12 }
 0x374   :  { %v1169_v0 = vpop.permute.xlu1 %1168 }
 0x375   :  { %v3055_v16 = vpop.permute.xlu0 %3054  ;;  %1308 = vst.msk [vmem:[#allocation2 + $0x1a8] sm:$0xff] %vm1254_vm6, %v1169_v0 }
 0x376   :  { %3214 = vst.msk [vmem:[#allocation2 + $0x108] sm:$0xff] %vm3180_vm11, %v3055_v16  ;;  %1142 = vrot.lane.b32.xlu1 %v6386_v61, %s6981_s20 }
 0x377   :  { %3096 = vrot.lane.b32.xlu0 %v6530_v3, %s6987_s13 }
 0x378   :  { %v1903_v59 = vpop.permute.xlu1 %1902 }
 0x379   :  { %v1552_v43 = vpop.permute.xlu0 %1551  ;;  %2060 = vst.msk [vmem:[#allocation2 + $0x118] sm:$0xff] %vm2024_vm8, %v1903_v59 }
 0x37a   :  { %1692 = vst.msk [vmem:[#allocation2 + $0x1a0] sm:$0xff] %vm1639_vm7, %v1552_v43  ;;  %1944 = vrot.lane.b32.xlu1 %v6530_v3, %s6983_s22 }
 0x37b   :  { %1561 = vrot.lane.b32.xlu0 %v6467_v60, %s6982_s21  ;;  %v6389_v60 = vld [vmem:[%s10334_s0 + $0x248] sm:$0xff] }
 0x37c   :  { %v2706_v19 = vpop.permute.xlu1 %2705 }
 0x37d   :  { %v2287_v11 = vpop.permute.xlu0 %2286  ;;  %v3278_v6 = vld [vmem:[#allocation2 + $0x108] sm:$0xff]  ;;  %2847 = vst.msk [vmem:[#allocation2 + $0x198] sm:$0xff] %vm2795_vm10, %v2706_v19 }
 0x37e   :  { %2445 = vst.msk [vmem:[#allocation2 + $0x110] sm:$0xff] %vm2410_vm9, %v2287_v11  ;;  %6806 = vmatmul.mubr.msk.f32.gmra.mrb[32].mxu0 %vm3318_vm12, %v3278_v6  ;;  %2679 = vrot.lane.b32.xlu1 %v6450_v58, %s6985_s24 }
 0x37f   :  { %2296 = vrot.lane.b32.xlu0 %v6387_v42, %s6984_s23 }
 0x380   :  { %v1135_v18 = vpop.permute.xlu1 %1134  ;;  %v6795_v10 = vpop.f32.mrb[24].mxu0 }
 0x381   :  { %v3089_v9 = vpop.permute.xlu0 %3088  ;;  %1291 = vst.msk [vmem:[#allocation2 + $0x120] sm:$0xff] %vm1254_vm6, %v1135_v18  ;;  %v3707_v63 = vadd.f32 %v9052_v29, %v6795_v10  ;;  %v3701_v4 = vpop.f32.mrb[25].mxu0  ;;  %v6406_v18 = vld [vmem:[%s10334_s0 + $0x318] sm:$0xff] }
 0x382   :  { %3231 = vst.msk [vmem:[#allocation2 + $0x190] sm:$0xff] %vm3180_vm11, %v3089_v9  ;;  %792 = vrot.lane.b32.xlu1 %v6530_v3, %s6980_s30  ;;  %v3702_v5 = vadd.f32 %v9052_v29, %v3701_v4  ;;  %v6452_v3 = vld [vmem:[%s10334_s0 + $0x241] sm:$0xff] }
 0x383   :  { %3098 = vrot.lane.b32.xlu0 %v6531_v7, %s6987_s13  ;;  %3926 = vst.msk [vmem:[#allocation3 + $0xc8] sm:$0xff] %vm3900_vm13, %v3707_v63  ;;  %v6516_v63 = vld [vmem:[%s10334_s0 + $0x242] sm:$0xff] }
 0x384   :  { %v1937_v62 = vpop.permute.xlu1 %1936  ;;  %3925 = vst.msk [vmem:[#allocation3 + $0xc0] sm:$0xff] %vm3900_vm13, %v3702_v5 }
 0x385   :  { %v1554_v14 = vpop.permute.xlu0 %1553  ;;  %2077 = vst.msk [vmem:[#allocation2 + $0x1a0] sm:$0xff] %vm2024_vm8, %v1937_v62 }
 0x386   :  { %1693 = vst.msk [vmem:[#allocation2 + $0x1a8] sm:$0xff] %vm1639_vm7, %v1554_v14  ;;  %1527 = vrot.lane.b32.xlu1 %v6450_v58, %s6982_s21 }
 0x387   :  { %1144 = vrot.lane.b32.xlu0 %v6387_v42, %s6981_s20 }
 0x388   :  { %v2672_v47 = vpop.permute.xlu1 %2671 }
 0x389   :  { %v2289_v17 = vpop.permute.xlu0 %2288  ;;  %v3295_v21 = vld [vmem:[#allocation2 + $0x190] sm:$0xff]  ;;  %2830 = vst.msk [vmem:[#allocation2 + $0x110] sm:$0xff] %vm2795_vm10, %v2672_v47  ;;  %v6407_v47 = vld [vmem:[%s10334_s0 + $0x320] sm:$0xff] }
 0x38a   :  { %2446 = vst.msk [vmem:[#allocation2 + $0x118] sm:$0xff] %vm2410_vm9, %v2289_v17  ;;  %6832 = vmatprep.mubr.msk.f32.mxu1 %vm3318_vm12, %v3295_v21  ;;  %2330 = vrot.lane.b32.xlu1 %v6404_v15, %s6984_s23 }
 0x38b   :  { %1946 = vrot.lane.b32.xlu0 %v6531_v7, %s6983_s22  ;;  %v3977_v14 = vld [vmem:[#allocation3 + $0xc0] ss:$2 sm:$0xff] }
 0x38c   :  { %v785_v22 = vpop.permute.xlu1 %784 }
 0x38d   :  { %v3091_v28 = vpop.permute.xlu0 %3090  ;;  %923 = vst.msk [vmem:[#allocation2 + $0x1b0] sm:$0xff] %vm868_vm2, %v785_v22 }
 0x38e   :  { %3232 = vst.msk [vmem:[#allocation2 + $0x198] sm:$0xff] %vm3180_vm11, %v3091_v28  ;;  %3064 = vrot.lane.b32.xlu1 %v6514_v46, %s6987_s13 }
 0x38f   :  { %2681 = vrot.lane.b32.xlu0 %v6451_v23, %s6985_s24 }
 0x390   :  { %v1520_v20 = vpop.permute.xlu1 %1519 }
 0x391   :  { %v1137_v32 = vpop.permute.xlu0 %1136  ;;  %1676 = vst.msk [vmem:[#allocation2 + $0x120] sm:$0xff] %vm1639_vm7, %v1520_v20 }
 0x392   :  { %1292 = vst.msk [vmem:[#allocation2 + $0x128] sm:$0xff] %vm1254_vm6, %v1137_v32  ;;  %1178 = vrot.lane.b32.xlu1 %v6404_v15, %s6981_s20  ;;  %v4009_v15 = vld [vmem:[#allocation3 + $0xc1] ss:$2 sm:$0xff] }
 0x393   :  { %794 = vrot.lane.b32.xlu0 %v6531_v7, %s6980_s30  ;;  %v6453_v7 = vld [vmem:[%s10334_s0 + $0x249] sm:$0xff]  ;;  %v4098_v22 = vmax.f32 %v3977_v14, %v4009_v15 }
 0x394   :  { %v2323_v33 = vpop.permute.xlu1 %2322  ;;  %v6517_v32 = vld [vmem:[%s10334_s0 + $0x24a] sm:$0xff] }
 0x395   :  { %v1939_v34 = vpop.permute.xlu0 %1938  ;;  %v3296_v35 = vld [vmem:[#allocation2 + $0x198] sm:$0xff]  ;;  %2463 = vst.msk [vmem:[#allocation2 + $0x1a0] sm:$0xff] %vm2410_vm9, %v2323_v33 }
 0x396   :  { %2078 = vst.msk [vmem:[#allocation2 + $0x1a8] sm:$0xff] %vm2024_vm8, %v1939_v34  ;;  %6833 = vmatmul.mubr.msk.f32.gmra.mrb[8].mxu1 %vm3318_vm12, %v3296_v35  ;;  %1912 = vrot.lane.b32.xlu1 %v6514_v46, %s6983_s22  ;;  %v6470_v33 = vld [vmem:[%s10334_s0 + $0x319] sm:$0xff] }
 0x397   :  { %1529 = vrot.lane.b32.xlu0 %v6451_v23, %s6982_s21 }
 0x398   :  { %v3057_v37 = vpop.permute.xlu1 %3056  ;;  %v6822_v50 = vpop.f32.mrb[0].mxu1 }
 0x399   :  { %v2674_v38 = vpop.permute.xlu0 %2673  ;;  %3215 = vst.msk [vmem:[#allocation2 + $0x110] sm:$0xff] %vm3180_vm11, %v3057_v37  ;;  %v3797_v25 = vadd.f32 %v9052_v29, %v6822_v50  ;;  %v3791_v39 = vpop.f32.mrb[1].mxu1  ;;  %v6534_v50 = vld [vmem:[%s10334_s0 + $0x31a] sm:$0xff] }
 0x39a   :  { %2831 = vst.msk [vmem:[#allocation2 + $0x118] sm:$0xff] %vm2795_vm10, %v2674_v38  ;;  %2715 = vrot.lane.b32.xlu1 %v6468_v36, %s6985_s24  ;;  %v3792_v40 = vadd.f32 %v9052_v29, %v3791_v39 }
 0x39b   :  { %2332 = vrot.lane.b32.xlu0 %v6405_v51, %s6984_s23  ;;  %3944 = vst.msk [vmem:[#allocation3 + $0x158] sm:$0xff] %vm3900_vm13, %v3797_v25  ;;  %v6471_v25 = vld [vmem:[%s10334_s0 + $0x321] sm:$0xff] }
 0x39c   :  { %v1171_v24 = vpop.permute.xlu1 %1170  ;;  %3943 = vst.msk [vmem:[#allocation3 + $0x150] sm:$0xff] %vm3900_vm13, %v3792_v40 }
 0x39d   :  { %v787_v44 = vpop.permute.xlu0 %786  ;;  %1309 = vst.msk [vmem:[#allocation2 + $0x1b0] sm:$0xff] %vm1254_vm6, %v1171_v24 }
 0x39e   :  { %924 = vst.msk [vmem:[#allocation2 + $0x1b8] sm:$0xff] %vm868_vm2, %v787_v44  ;;  %1180 = vrot.lane.b32.xlu1 %v6405_v51, %s6981_s20 }
 0x39f   :  { %3066 = vrot.lane.b32.xlu0 %v6515_v41, %s6987_s13 }
 0x3a0   :  { %v1905_v45 = vpop.permute.xlu1 %1904  ;;  %v3279_v49 = vld [vmem:[#allocation2 + $0x110] sm:$0xff] }
 0x3a1   :  { %v1522_v48 = vpop.permute.xlu0 %1521  ;;  %2061 = vst.msk [vmem:[#allocation2 + $0x120] sm:$0xff] %vm2024_vm8, %v1905_v45  ;;  %6808 = vmatprep.mubr.msk.f32.mxu0 %vm3318_vm12, %v3279_v49 }
 0x3a2   :  { %1677 = vst.msk [vmem:[#allocation2 + $0x128] sm:$0xff] %vm1639_vm7, %v1522_v48  ;;  %1914 = vrot.lane.b32.xlu1 %v6515_v41, %s6983_s22 }
 0x3a3   :  { %1563 = vrot.lane.b32.xlu0 %v6468_v36, %s6982_s21 }
 0x3a4   :  { %v2708_v53 = vpop.permute.xlu1 %2707 }
 0x3a5   :  { %v2325_v56 = vpop.permute.xlu0 %2324  ;;  %2848 = vst.msk [vmem:[#allocation2 + $0x1a0] sm:$0xff] %vm2795_vm10, %v2708_v53 }
 0x3a6   :  { %2464 = vst.msk [vmem:[#allocation2 + $0x1a8] sm:$0xff] %vm2410_vm9, %v2325_v56  ;;  %2717 = vrot.lane.b32.xlu1 %v6469_v52, %s6985_s24 }
 0x3a7   :  { %2298 = vrot.lane.b32.xlu0 %v6388_v55, %s6984_s23  ;;  %v6535_v55 = vld [vmem:[%s10334_s0 + $0x322] sm:$0xff] }
 0x3a8   :  { %v1173_v27 = vpop.permute.xlu1 %1172 }
 0x3a9   :  { %v3059_v57 = vpop.permute.xlu0 %3058  ;;  %1310 = vst.msk [vmem:[#allocation2 + $0x1b8] sm:$0xff] %vm1254_vm6, %v1173_v27  ;;  %v6408_v27 = vld [vmem:[%s10334_s0 + $0x330] sm:$0xff] }
 0x3aa   :  { %3216 = vst.msk [vmem:[#allocation2 + $0x118] sm:$0xff] %vm3180_vm11, %v3059_v57  ;;  %1565 = vrot.lane.b32.xlu1 %v6469_v52, %s6982_s21 }
 0x3ab   :  { %3100 = vrot.lane.b32.xlu0 %v6532_v54, %s6987_s13 }
 0x3ac   :  { %v1907_v61 = vpop.permute.xlu1 %1906 }
 0x3ad   :  { %v1556_v26 = vpop.permute.xlu0 %1555  ;;  %2062 = vst.msk [vmem:[#allocation2 + $0x128] sm:$0xff] %vm2024_vm8, %v1907_v61 }
 0x3ae   :  { %1694 = vst.msk [vmem:[#allocation2 + $0x1b0] sm:$0xff] %vm1639_vm7, %v1556_v26  ;;  %2300 = vrot.lane.b32.xlu1 %v6389_v60, %s6984_s23 }
 0x3af   :  { %1948 = vrot.lane.b32.xlu0 %v6532_v54, %s6983_s22 }
 0x3b0   :  { %v2710_v0 = vpop.permute.xlu1 %2709 }
 0x3b1   :  { %v2291_v16 = vpop.permute.xlu0 %2290  ;;  %v3280_v59 = vld [vmem:[#allocation2 + $0x118] sm:$0xff]  ;;  %2849 = vst.msk [vmem:[#allocation2 + $0x1a8] sm:$0xff] %vm2795_vm10, %v2710_v0 }
 0x3b2   :  { %2447 = vst.msk [vmem:[#allocation2 + $0x120] sm:$0xff] %vm2410_vm9, %v2291_v16  ;;  %6809 = vmatmul.mubr.msk.f32.gmra.mrb[34].mxu0 %vm3318_vm12, %v3280_v59  ;;  %3102 = vrot.lane.b32.xlu1 %v6533_v1, %s6987_s13 }
 0x3b3   :  { %2683 = vrot.lane.b32.xlu0 %v6452_v3, %s6985_s24  ;;  %v6409_v3 = vld [vmem:[%s10334_s0 + $0x338] sm:$0xff] }
 0x3b4   :  { %v1139_v43 = vpop.permute.xlu1 %1138 }
 0x3b5   :  { %v3093_v58 = vpop.permute.xlu0 %3092  ;;  %1293 = vst.msk [vmem:[#allocation2 + $0x130] sm:$0xff] %vm1254_vm6, %v1139_v43  ;;  %v6798_v42 = vpop.f32.mrb[26].mxu0 }
 0x3b6   :  { %3233 = vst.msk [vmem:[#allocation2 + $0x1a0] sm:$0xff] %vm3180_vm11, %v3093_v58  ;;  %v3717_v19 = vadd.f32 %v9052_v29, %v6798_v42  ;;  %v3711_v11 = vpop.f32.mrb[27].mxu0  ;;  %1950 = vrot.lane.b32.xlu1 %v6533_v1, %s6983_s22  ;;  %v6536_v42 = vld [vmem:[%s10334_s0 + $0x332] sm:$0xff] }
 0x3b7   :  { %796 = vrot.lane.b32.xlu0 %v6532_v54, %s6980_s30  ;;  %v3712_v6 = vadd.f32 %v9052_v29, %v3711_v11 }
 0x3b8   :  { %3928 = vst.msk [vmem:[#allocation3 + $0xd8] sm:$0xff] %vm3900_vm13, %v3717_v19  ;;  %v1941_v9 = vpop.permute.xlu1 %1940  ;;  %v6473_v19 = vld [vmem:[%s10334_s0 + $0x339] sm:$0xff] }
 0x3b9   :  { %v1558_v10 = vpop.permute.xlu0 %1557  ;;  %3927 = vst.msk [vmem:[#allocation3 + $0xd0] sm:$0xff] %vm3900_vm13, %v3712_v6 }
 0x3ba   :  { %2079 = vst.msk [vmem:[#allocation2 + $0x1b0] sm:$0xff] %vm2024_vm8, %v1941_v9  ;;  %2685 = vrot.lane.b32.xlu1 %v6453_v7, %s6985_s24 }
 0x3bb   :  { %1695 = vst.msk [vmem:[#allocation2 + $0x1b8] sm:$0xff] %vm1639_vm7, %v1558_v10  ;;  %2334 = vrot.lane.b32.xlu0 %v6406_v18, %s6984_s23 }
 0x3bc   :  { %v2676_v4 = vpop.permute.xlu1 %2675 }
 0x3bd   :  { %v2293_v5 = vpop.permute.xlu0 %2292  ;;  %v3297_v62 = vld [vmem:[#allocation2 + $0x1a0] sm:$0xff]  ;;  %2832 = vst.msk [vmem:[#allocation2 + $0x120] sm:$0xff] %vm2795_vm10, %v2676_v4 }
 0x3be   :  { %2448 = vst.msk [vmem:[#allocation2 + $0x128] sm:$0xff] %vm2410_vm9, %v2293_v5  ;;  %6835 = vmatprep.mubr.msk.f32.mxu1 %vm3318_vm12, %v3297_v62  ;;  %798 = vrot.lane.b32.xlu1 %v6533_v1, %s6980_s30  ;;  %v6472_v1 = vld [vmem:[%s10334_s0 + $0x331] sm:$0xff]  ;;  %v6347_v5 = vld [vmem:[%s10334_s0 + $0x33a] sm:$0xff] }
 0x3bf   :  { %3068 = vrot.lane.b32.xlu0 %v6516_v63, %s6987_s13 }
 0x3c0   :  { %v4041_v17 = vld [vmem:[#allocation3 + $0xd0] ss:$2 sm:$0xff]  ;;  %v4073_v21 = vld [vmem:[#allocation3 + $0xd1] ss:$2 sm:$0xff]  ;;  %v789_v46 = vpop.permute.xlu1 %788 }
 0x3c1   :  { %v3095_v23 = vpop.permute.xlu0 %3094  ;;  %v4114_v28 = vmax.f32 %v4041_v17, %v4073_v21  ;;  %925 = vst.msk [vmem:[#allocation2 + $0x1c0] sm:$0xff] %vm868_vm2, %v789_v46  ;;  %v6410_v17 = vld [vmem:[%s10334_s0 + $0x348] sm:$0xff] }
 0x3c2   :  { %3234 = vst.msk [vmem:[#allocation2 + $0x1a8] sm:$0xff] %vm3180_vm11, %v3095_v23  ;;  %2336 = vrot.lane.b32.xlu1 %v6407_v47, %s6984_s23  ;;  %v6475_v23 = vld [vmem:[%s10334_s0 + $0x351] sm:$0xff] }
 0x3c3   :  { %1182 = vrot.lane.b32.xlu0 %v6406_v18, %s6981_s20  ;;  %v4130_v20 = vmax.f32 %v4098_v22, %v4114_v28  ;;  %v6474_v22 = vld [vmem:[%s10334_s0 + $0x349] sm:$0xff] }
 0x3c4   :  { %v1524_v34 = vpop.permute.xlu1 %1523 }
 0x3c5   :  { %v1141_v35 = vpop.permute.xlu0 %1140  ;;  %v4146_v36 = vmax.f32 %v4130_v20, 0.0  ;;  %1678 = vst.msk [vmem:[#allocation2 + $0x130] sm:$0xff] %vm1639_vm7, %v1524_v34  ;;  %v4214_v34 = vld [vmem:[#allocation4] sm:$0xff] }
 0x3c6   :  { %1294 = vst.msk [vmem:[#allocation2 + $0x138] sm:$0xff] %vm1254_vm6, %v1141_v35  ;;  %3070 = vrot.lane.b32.xlu1 %v6517_v32, %s6987_s13  ;;  %v6539_v32 = vld [vmem:[%s10334_s0 + $0x352] sm:$0xff] }
 0x3c7   :  { %2719 = vrot.lane.b32.xlu0 %v6470_v33, %s6985_s24  ;;  %4204 = vst.msk [vmem:[#allocation4 + $0x71] sm:$0xff] %vm3900_vm13, %v4146_v36  ;;  %4230 = vst.msk [vmem:[#allocation5] sm:$0xff] %vm3900_vm13, %v4214_v34 }
 0x3c8   :  { %v2327_v51 = vpop.permute.xlu1 %2326 }
 0x3c9   :  { %v1943_v37 = vpop.permute.xlu0 %1942  ;;  %v3298_v38 = vld [vmem:[#allocation2 + $0x1a8] sm:$0xff]  ;;  %2465 = vst.msk [vmem:[#allocation2 + $0x1b0] sm:$0xff] %vm2410_vm9, %v2327_v51 }
 0x3ca   :  { %2080 = vst.msk [vmem:[#allocation2 + $0x1b8] sm:$0xff] %vm2024_vm8, %v1943_v37  ;;  %6836 = vmatmul.mubr.msk.f32.gmra.mrb[10].mxu1 %vm3318_vm12, %v3298_v38  ;;  %1567 = vrot.lane.b32.xlu1 %v6470_v33, %s6982_s21  ;;  %v6538_v33 = vld [vmem:[%s10334_s0 + $0x34a] sm:$0xff]  ;;  %v4246_v37 = vld [vmem:[#allocation4 + $0x1] sm:$0xff] }
 0x3cb   :  { %1184 = vrot.lane.b32.xlu0 %v6407_v47, %s6981_s20  ;;  %v6411_v47 = vld [vmem:[%s10334_s0 + $0x350] sm:$0xff]  ;;  %s6989_s0 = smov 16  }
 0x3cc   :  { %v3061_v39 = vpop.permute.xlu1 %3060 }
 0x3cd   :  { %v2678_v40 = vpop.permute.xlu0 %2677  ;;  %3217 = vst.msk [vmem:[#allocation2 + $0x120] sm:$0xff] %vm3180_vm11, %v3061_v39  ;;  %v6825_v41 = vpop.f32.mrb[2].mxu1  ;;  %v4247_v39 = vld [vmem:[#allocation4 + $0x11] sm:$0xff] }
 0x3ce   :  { %2833 = vst.msk [vmem:[#allocation2 + $0x128] sm:$0xff] %vm2795_vm10, %v2678_v40  ;;  %3104 = vrot.lane.b32.xlu1 %v6534_v50, %s6987_s13  ;;  %v3807_v24 = vadd.f32 %v9052_v29, %v6825_v41  ;;  %v3801_v44 = vpop.f32.mrb[3].mxu1  ;;  %v9396_v45 = vld [vmem:[#allocation4 + $0x70] sm:$0xff] }
 0x3cf   :  { %2721 = vrot.lane.b32.xlu0 %v6471_v25, %s6985_s24  ;;  %v3802_v48 = vadd.f32 %v9052_v29, %v3801_v44  ;;  %4237 = vst.msk [vmem:[#allocation5 + $0x38] sm:$0xff] %vm3900_vm13, %v9396_v45  ;;  %v4343_v44 = vld [vmem:[#allocation4 + $0x2] sm:$0xff] }
 0x3d0   :  { %v1175_v49 = vpop.permute.xlu1 %1174  ;;  %3946 = vst.msk [vmem:[#allocation3 + $0x168] sm:$0xff] %vm3900_vm13, %v3807_v24 }
 0x3d1   :  { %v791_v52 = vpop.permute.xlu0 %790  ;;  %1311 = vst.msk [vmem:[#allocation2 + $0x1c0] sm:$0xff] %vm1254_vm6, %v1175_v49 }
 0x3d2   :  { %926 = vst.msk [vmem:[#allocation2 + $0x1c8] sm:$0xff] %vm868_vm2, %v791_v52  ;;  %1952 = vrot.lane.b32.xlu1 %v6534_v50, %s6983_s22  ;;  %v4344_v52 = vld [vmem:[#allocation4 + $0x12] sm:$0xff] }
 0x3d3   :  { %3945 = vst.msk [vmem:[#allocation3 + $0x160] sm:$0xff] %vm3900_vm13, %v3802_v48  ;;  %1569 = vrot.lane.b32.xlu0 %v6471_v25, %s6982_s21 }
 0x3d4   :  { %v1909_v53 = vpop.permute.xlu1 %1908  ;;  %v3281_v54 = vld [vmem:[#allocation2 + $0x120] sm:$0xff] }
 0x3d5   :  { %v1526_v56 = vpop.permute.xlu0 %1525  ;;  %2063 = vst.msk [vmem:[#allocation2 + $0x130] sm:$0xff] %vm2024_vm8, %v1909_v53  ;;  %6811 = vmatprep.mubr.msk.f32.mxu0 %vm3318_vm12, %v3281_v54 }
 0x3d6   :  { %1679 = vst.msk [vmem:[#allocation2 + $0x138] sm:$0xff] %vm1639_vm7, %v1526_v56  ;;  %800 = vrot.lane.b32.xlu1 %v6534_v50, %s6980_s30 }
 0x3d7   :  { %3106 = vrot.lane.b32.xlu0 %v6535_v55, %s6987_s13 }
 0x3d8   :  { %v2712_v57 = vpop.permute.xlu1 %2711 }
 0x3d9   :  { %v2329_v60 = vpop.permute.xlu0 %2328  ;;  %2850 = vst.msk [vmem:[#allocation2 + $0x1b0] sm:$0xff] %vm2795_vm10, %v2712_v57 }
 0x3da   :  { %2466 = vst.msk [vmem:[#allocation2 + $0x1b8] sm:$0xff] %vm2410_vm9, %v2329_v60  ;;  %2338 = vrot.lane.b32.xlu1 %v6408_v27, %s6984_s23  ;;  %v3987_v56 = vld [vmem:[#allocation3 + $0x160] ss:$2 sm:$0xff]  ;;  %v4019_v54 = vld [vmem:[#allocation3 + $0x161] ss:$2 sm:$0xff] }
 0x3db   :  { %1954 = vrot.lane.b32.xlu0 %v6535_v55, %s6983_s22 }
 0x3dc   :  { %v1177_v61 = vpop.permute.xlu1 %1176 }
 0x3dd   :  { %v3063_v26 = vpop.permute.xlu0 %3062  ;;  %1312 = vst.msk [vmem:[#allocation2 + $0x1c8] sm:$0xff] %vm1254_vm6, %v1177_v61 }
 0x3de   :  { %3218 = vst.msk [vmem:[#allocation2 + $0x128] sm:$0xff] %vm3180_vm11, %v3063_v26  ;;  %1186 = vrot.lane.b32.xlu1 %v6408_v27, %s6981_s20  ;;  %v4103_v26 = vmax.f32 %v3987_v56, %v4019_v54  ;;  %v4250_v56 = vld [vmem:[#allocation4 + $0x41] sm:$0xff] }
 0x3df   :  { %802 = vrot.lane.b32.xlu0 %v6535_v55, %s6980_s30  ;;  %s6993_s30 = smov 48  }
 0x3e0   :  { %v1911_v0 = vpop.permute.xlu1 %1910 }
 0x3e1   :  { %v1560_v16 = vpop.permute.xlu0 %1559  ;;  %2064 = vst.msk [vmem:[#allocation2 + $0x138] sm:$0xff] %vm2024_vm8, %v1911_v0 }
 0x3e2   :  { %1696 = vst.msk [vmem:[#allocation2 + $0x1c0] sm:$0xff] %vm1639_vm7, %v1560_v16  ;;  %2723 = vrot.lane.b32.xlu1 %v6472_v1, %s6985_s24 }
 0x3e3   :  { %2340 = vrot.lane.b32.xlu0 %v6409_v3, %s6984_s23 }
 0x3e4   :  { %v2714_v59 = vpop.permute.xlu1 %2713 }
 0x3e5   :  { %v2295_v43 = vpop.permute.xlu0 %2294  ;;  %v3282_v58 = vld [vmem:[#allocation2 + $0x128] sm:$0xff]  ;;  %2851 = vst.msk [vmem:[#allocation2 + $0x1b8] sm:$0xff] %vm2795_vm10, %v2714_v59 }
 0x3e6   :  { %2449 = vst.msk [vmem:[#allocation2 + $0x130] sm:$0xff] %vm2410_vm9, %v2295_v43  ;;  %6812 = vmatmul.mubr.msk.f32.gmra.mrb[36].mxu0 %vm3318_vm12, %v3282_v58  ;;  %1571 = vrot.lane.b32.xlu1 %v6472_v1, %s6982_s21 }
 0x3e7   :  { %1188 = vrot.lane.b32.xlu0 %v6409_v3, %s6981_s20  ;;  %v4248_v3 = vld [vmem:[#allocation4 + $0x21] sm:$0xff] }
 0x3e8   :  { %v1143_v11 = vpop.permute.xlu1 %1142 }
 0x3e9   :  { %v3097_v6 = vpop.permute.xlu0 %3096  ;;  %1295 = vst.msk [vmem:[#allocation2 + $0x140] sm:$0xff] %vm1254_vm6, %v1143_v11  ;;  %v6801_v7 = vpop.f32.mrb[28].mxu0 }
 0x3ea   :  { %3235 = vst.msk [vmem:[#allocation2 + $0x1b0] sm:$0xff] %vm3180_vm11, %v3097_v6  ;;  %3108 = vrot.lane.b32.xlu1 %v6536_v42, %s6987_s13  ;;  %v3727_v18 = vadd.f32 %v9052_v29, %v6801_v7  ;;  %v3721_v9 = vpop.f32.mrb[29].mxu0 }
 0x3eb   :  { %2725 = vrot.lane.b32.xlu0 %v6473_v19, %s6985_s24  ;;  %v3722_v10 = vadd.f32 %v9052_v29, %v3721_v9  ;;  %v5040_v9 = vld [vmem:[%s10337_s3 + $0x8] sm:$0xff] }
 0x3ec   :  { %v1945_v63 = vpop.permute.xlu1 %1944  ;;  %3930 = vst.msk [vmem:[#allocation3 + $0xe8] sm:$0xff] %vm3900_vm13, %v3727_v18  ;;  %v5039_v18 = vld [vmem:[%s10337_s3] sm:$0xff] }
 0x3ed   :  { %v1562_v4 = vpop.permute.xlu0 %1561  ;;  %2081 = vst.msk [vmem:[#allocation2 + $0x1c0] sm:$0xff] %vm2024_vm8, %v1945_v63  ;;  %v6901_v63 = vpack.c.bf16 %v5040_v9, %v5039_v18 }
 0x3ee   :  { %1697 = vst.msk [vmem:[#allocation2 + $0x1c8] sm:$0xff] %vm1639_vm7, %v1562_v4  ;;  %1956 = vrot.lane.b32.xlu1 %v6536_v42, %s6983_s22  ;;  %v9529_v42 = vld [vmem:[#allocation4 + $0x31] sm:$0xff] }
 0x3ef   :  { %3929 = vst.msk [vmem:[#allocation3 + $0xe0] sm:$0xff] %vm3900_vm13, %v3722_v10  ;;  %1573 = vrot.lane.b32.xlu0 %v6473_v19, %s6982_s21  ;;  %v9531_v19 = vld [vmem:[#allocation4 + $0x22] sm:$0xff]  ;;  %6902 = vmatprep.subr.bf16.mxu1 %v6901_v63 }
 0x3f0   :  { %v2680_v62 = vpop.permute.xlu1 %2679  ;;  %6904 = vmatpush3.bf16.msra.mxu1 %v6901_v63 }
 0x3f1   :  { %v2297_v14 = vpop.permute.xlu0 %2296  ;;  %v3299_v15 = vld [vmem:[#allocation2 + $0x1b0] sm:$0xff]  ;;  %2834 = vst.msk [vmem:[#allocation2 + $0x130] sm:$0xff] %vm2795_vm10, %v2680_v62 }
 0x3f2   :  { %2450 = vst.msk [vmem:[#allocation2 + $0x138] sm:$0xff] %vm2410_vm9, %v2297_v14  ;;  %6838 = vmatprep.mubr.msk.f32.mxu1 %vm3318_vm12, %v3299_v15  ;;  %1958 = vrot.lane.b32.xlu1 %v6347_v5, %s6983_s22  ;;  %v9556_v62 = vld [vmem:[#allocation4 + $0x32] sm:$0xff]  ;;  %v9561_v14 = vld [vmem:[%s10336_s2] ss:$0 sm:$0xff] }
 0x3f3   :  { %3110 = vrot.lane.b32.xlu0 %v6347_v5, %s6987_s13 }
 0x3f4   :  { %v793_v21 = vpop.permute.xlu1 %792 }
 0x3f5   :  { %v3099_v46 = vpop.permute.xlu0 %3098  ;;  %927 = vst.msk [vmem:[#allocation2 + $0x1d0] sm:$0xff] %vm868_vm2, %v793_v21  ;;  %v5042_v21 = vld [vmem:[%s10337_s3 + $0x18] sm:$0xff] }
 0x3f6   :  { %3236 = vst.msk [vmem:[#allocation2 + $0x1b8] sm:$0xff] %vm3180_vm11, %v3099_v46  ;;  %2344 = vrot.lane.b32.xlu1 %v6411_v47, %s6984_s23 }
 0x3f7   :  { %2342 = vrot.lane.b32.xlu0 %v6410_v17, %s6984_s23  ;;  %v5041_v17 = vld [vmem:[%s10337_s3 + $0x10] sm:$0xff] }
 0x3f8   :  { %v1528_v28 = vpop.permute.xlu1 %1527 }
 0x3f9   :  { %v1145_v20 = vpop.permute.xlu0 %1144  ;;  %1680 = vst.msk [vmem:[#allocation2 + $0x140] sm:$0xff] %vm1639_vm7, %v1528_v28 }
 0x3fa   :  { %1296 = vst.msk [vmem:[#allocation2 + $0x148] sm:$0xff] %vm1254_vm6, %v1145_v20  ;;  %2729 = vrot.lane.b32.xlu1 %v6475_v23, %s6985_s24  ;;  %v6905_v23 = vpack.c.bf16 %v5042_v21, %v5041_v17  ;;  %v5043_v20 = vld [vmem:[%s10337_s3 + $0x20] sm:$0xff] }
 0x3fb   :  { %2727 = vrot.lane.b32.xlu0 %v6474_v22, %s6985_s24  ;;  %s6990_s24 = smov 24  }
 0x3fc   :  { %v2331_v35 = vpop.permute.xlu1 %2330  ;;  %6906 = vmatprep.subr.bf16.mxu1 %v6905_v23 }
 0x3fd   :  { %v1947_v36 = vpop.permute.xlu0 %1946  ;;  %v3300_v51 = vld [vmem:[#allocation2 + $0x1b8] sm:$0xff]  ;;  %2467 = vst.msk [vmem:[#allocation2 + $0x1c0] sm:$0xff] %vm2410_vm9, %v2331_v35  ;;  %6908 = vmatpush3.bf16.msra.mxu1 %v6905_v23 }
 0x3fe   :  { %2082 = vst.msk [vmem:[#allocation2 + $0x1c8] sm:$0xff] %vm2024_vm8, %v1947_v36  ;;  %6839 = vmatmul.mubr.msk.f32.gmra.mrb[12].mxu1 %vm3318_vm12, %v3300_v51  ;;  %3114 = vrot.lane.b32.xlu1 %v6539_v32, %s6987_s13  ;;  %v5044_v32 = vld [vmem:[%s10337_s3 + $0x28] sm:$0xff] }
 0x3ff   :  { %3112 = vrot.lane.b32.xlu0 %v6538_v33, %s6987_s13  ;;  %v6909_v33 = vpack.c.bf16 %v5044_v32, %v5043_v20  ;;  %v3979_v51 = vld [vmem:[#allocation3 + $0xe0] ss:$2 sm:$0xff]  ;;  %v4253_v20 = vld [vmem:[#allocation4 + $0x71] sm:$0xff] }
 0x400   :  { %v3065_v38 = vpop.permute.xlu1 %3064  ;;  %v4349_v32 = vld [vmem:[#allocation4 + $0x62] sm:$0xff] }
 0x401   :  { %v2682_v50 = vpop.permute.xlu0 %2681  ;;  %3219 = vst.msk [vmem:[#allocation2 + $0x130] sm:$0xff] %vm3180_vm11, %v3065_v38  ;;  %v6828_v25 = vpop.f32.mrb[4].mxu1  ;;  %6910 = vmatprep.subr.bf16.mxu1 %v6909_v33  ;;  %v5046_v38 = vld [vmem:[%s10337_s3 + $0x38] sm:$0xff] }
 0x402   :  { %2835 = vst.msk [vmem:[#allocation2 + $0x138] sm:$0xff] %vm2795_vm10, %v2682_v50  ;;  %v3817_v40 = vadd.f32 %v9052_v29, %v6828_v25  ;;  %v3811_v41 = vpop.f32.mrb[5].mxu1  ;;  %4280 = vrot.lane.b32.xlu1 %v4247_v39, %s6987_s13  ;;  %6912 = vmatpush3.bf16.msra.mxu1 %v6909_v33 }
 0x403   :  { %4278 = vrot.lane.b32.xlu0 %v4246_v37, %s6987_s13  ;;  %v3812_v24 = vadd.f32 %v9052_v29, %v3811_v41  ;;  %v5045_v37 = vld [vmem:[%s10337_s3 + $0x30] sm:$0xff] }
 0x404   :  { %3948 = vst.msk [vmem:[#allocation3 + $0x178] sm:$0xff] %vm3900_vm13, %v3817_v40  ;;  %v1179_v48 = vpop.permute.xlu1 %1178  ;;  %v6913_v50 = vpack.c.bf16 %v5046_v38, %v5045_v37 }
 0x405   :  { %v795_v49 = vpop.permute.xlu0 %794  ;;  %3947 = vst.msk [vmem:[#allocation3 + $0x170] sm:$0xff] %vm3900_vm13, %v3812_v24 }
 0x406   :  { %1313 = vst.msk [vmem:[#allocation2 + $0x1d0] sm:$0xff] %vm1254_vm6, %v1179_v48  ;;  %4377 = vrot.lane.b32.xlu1 %v4344_v52, %s6989_s0  ;;  %6914 = vmatprep.subr.bf16.mxu1 %v6913_v50 }
 0x407   :  { %928 = vst.msk [vmem:[#allocation2 + $0x1d8] sm:$0xff] %vm868_vm2, %v795_v49  ;;  %4375 = vrot.lane.b32.xlu0 %v4343_v44, %s6989_s0  ;;  %6916 = vmatpush3.bf16.msra.mxu1 %v6913_v50  ;;  %v5047_v49 = vld [vmem:[%s10337_s3 + $0x40] sm:$0xff] }
 0x408   :  { %v1913_v55 = vpop.permute.xlu1 %1912  ;;  %v3283_v29 = vld [vmem:[#allocation2 + $0x130] sm:$0xff]  ;;  %6869 = vmatprep.subr.mxu1 %v5047_v49 }
 0x409   :  { %v1530_v53 = vpop.permute.xlu0 %1529  ;;  %2065 = vst.msk [vmem:[#allocation2 + $0x140] sm:$0xff] %vm2024_vm8, %v1913_v55  ;;  %6814 = vmatprep.mubr.msk.f32.mxu0 %vm3318_vm12, %v3283_v29 }
 0x40a   :  { %1681 = vst.msk [vmem:[#allocation2 + $0x148] sm:$0xff] %vm1639_vm7, %v1530_v53  ;;  %4474 = vrot.lane.b32.xlu1 %v8790_v8, %s6990_s24 }
 0x40b   :  { %4472 = vrot.lane.b32.xlu0 %v8691_v13, %s6990_s24  ;;  %6870 = vmatpush3.msra.mxu1 %v5047_v49  ;;  %v4254_v49 = vld [vmem:[#allocation4 + $0xa1] sm:$0xff] }
 0x40c   :  { %v4051_v27 = vld [vmem:[#allocation3 + $0x170] ss:$2 sm:$0xff]  ;;  %v4083_v57 = vld [vmem:[#allocation3 + $0x171] ss:$2 sm:$0xff]  ;;  %v2716_v60 = vpop.permute.xlu1 %2715 }
 0x40d   :  { %v2333_v61 = vpop.permute.xlu0 %2332  ;;  %v4119_v1 = vmax.f32 %v4051_v27, %v4083_v57  ;;  %2852 = vst.msk [vmem:[#allocation2 + $0x1c0] sm:$0xff] %vm2795_vm10, %v2716_v60 }
 0x40e   :  { %2468 = vst.msk [vmem:[#allocation2 + $0x1c8] sm:$0xff] %vm2410_vm9, %v2333_v61  ;;  %4282 = vrot.lane.b32.xlu1 %v4248_v3, %s6987_s13  ;;  %v4251_v61 = vld [vmem:[#allocation4 + $0x51] sm:$0xff] }
 0x40f   :  { %4569 = vrot.lane.b32.xlu0 %v4247_v39, %s6991_s14  ;;  %v4135_v13 = vmax.f32 %v4103_v26, %v4119_v1  ;;  %v4347_v26 = vld [vmem:[#allocation4 + $0x42] sm:$0xff] }
 0x410   :  { %v1181_v0 = vpop.permute.xlu1 %1180 }
 0x411   :  { %v3067_v16 = vpop.permute.xlu0 %3066  ;;  %v4151_v59 = vmax.f32 %v4135_v13, 0.0  ;;  %1314 = vst.msk [vmem:[#allocation2 + $0x1d8] sm:$0xff] %vm1254_vm6, %v1181_v0 }
 0x412   :  { %3220 = vst.msk [vmem:[#allocation2 + $0x138] sm:$0xff] %vm3180_vm11, %v3067_v16  ;;  %4666 = vrot.lane.b32.xlu1 %v4344_v52, %s6992_s15 }
 0x413   :  { %4571 = vrot.lane.b32.xlu0 %v4248_v3, %s6991_s14  ;;  %4209 = vst.msk [vmem:[#allocation4 + $0xe1] sm:$0xff] %vm3900_vm13, %v4151_v59 }
 0x414   :  { %v1915_v43 = vpop.permute.xlu1 %1914 }
 0x415   :  { %v1564_v58 = vpop.permute.xlu0 %1563  ;;  %2066 = vst.msk [vmem:[#allocation2 + $0x148] sm:$0xff] %vm2024_vm8, %v1915_v43 }
 0x416   :  { %1698 = vst.msk [vmem:[#allocation2 + $0x1d0] sm:$0xff] %vm1639_vm7, %v1564_v58  ;;  %4379 = vrot.lane.b32.xlu1 %v9531_v19, %s6989_s0 }
 0x417   :  { %4284 = vrot.lane.b32.xlu0 %v9529_v42, %s6987_s13 }
 0x418   :  { %v2718_v11 = vpop.permute.xlu1 %2717 }
 0x419   :  { %v2299_v6 = vpop.permute.xlu0 %2298  ;;  %v3284_v7 = vld [vmem:[#allocation2 + $0x138] sm:$0xff]  ;;  %2853 = vst.msk [vmem:[#allocation2 + $0x1c8] sm:$0xff] %vm2795_vm10, %v2718_v11 }
 0x41a   :  { %2451 = vst.msk [vmem:[#allocation2 + $0x140] sm:$0xff] %vm2410_vm9, %v2299_v6  ;;  %6815 = vmatmul.mubr.msk.f32.gmra.mrb[38].mxu0 %vm3318_vm12, %v3284_v7  ;;  %4764 = vrot.lane.b32.xlu1 %v8790_v8, %s6993_s30  ;;  %v9550_v10 = vld [vmem:[#allocation4 + $0xe0] sm:$0xff] }
 0x41b   :  { %4668 = vrot.lane.b32.xlu0 %v9531_v19, %s6992_s15  ;;  %4242 = vst.msk [vmem:[#allocation5 + $0x60] sm:$0xff] %vm3900_vm13, %v9550_v10 }
 0x41c   :  { %v1566_v4 = vpop.permute.xlu1 %1565 }
 0x41d   :  { %v3101_v5 = vpop.permute.xlu0 %3100  ;;  %1699 = vst.msk [vmem:[#allocation2 + $0x1d8] sm:$0xff] %vm1639_vm7, %v1566_v4  ;;  %v6804_v8 = vpop.f32.mrb[30].mxu0 }
 0x41e   :  { %3237 = vst.msk [vmem:[#allocation2 + $0x1c0] sm:$0xff] %vm3180_vm11, %v3101_v5  ;;  %v3737_v15 = vadd.f32 %v9561_v14, %v6804_v8  ;;  %v3731_v47 = vpop.f32.mrb[31].mxu0  ;;  %4476 = vrot.lane.b32.xlu1 %v8899_v30, %s6990_s24  ;;  %v4252_v8 = vld [vmem:[#allocation4 + $0x61] sm:$0xff] }
 0x41f   :  { %4381 = vrot.lane.b32.xlu0 %v9556_v62, %s6989_s0  ;;  %v3732_v46 = vadd.f32 %v9561_v14, %v3731_v47 }
 0x420   :  { %3932 = vst.msk [vmem:[#allocation3 + $0xf8] sm:$0xff] %vm3900_vm13, %v3737_v15  ;;  %v2301_v22 = vpop.permute.xlu1 %2300 }
 0x421   :  { %v1949_v28 = vpop.permute.xlu0 %1948  ;;  %3931 = vst.msk [vmem:[#allocation3 + $0xf0] sm:$0xff] %vm3900_vm13, %v3732_v46 }
 0x422   :  { %2452 = vst.msk [vmem:[#allocation2 + $0x148] sm:$0xff] %vm2410_vm9, %v2301_v22  ;;  %4861 = vrot.lane.b32.xlu1 %v4248_v3, %s6994_s28 }
 0x423   :  { %2083 = vst.msk [vmem:[#allocation2 + $0x1d0] sm:$0xff] %vm2024_vm8, %v1949_v28  ;;  %4766 = vrot.lane.b32.xlu0 %v8899_v30, %s6993_s30  ;;  %v4011_v30 = vld [vmem:[#allocation3 + $0xe1] ss:$2 sm:$0xff] }
 0x424   :  { %v3103_v34 = vpop.permute.xlu1 %3102  ;;  %v4099_v24 = vmax.f32 %v3979_v51, %v4011_v30  ;;  %v4350_v51 = vld [vmem:[#allocation4 + $0x72] sm:$0xff] }
 0x425   :  { %v2684_v35 = vpop.permute.xlu0 %2683  ;;  %v3301_v36 = vld [vmem:[#allocation2 + $0x1c0] sm:$0xff]  ;;  %3238 = vst.msk [vmem:[#allocation2 + $0x1c8] sm:$0xff] %vm3180_vm11, %v3103_v34 }
 0x426   :  { %2836 = vst.msk [vmem:[#allocation2 + $0x140] sm:$0xff] %vm2795_vm10, %v2684_v35  ;;  %6841 = vmatprep.mubr.msk.f32.mxu1 %vm3318_vm12, %v3301_v36  ;;  %4573 = vrot.lane.b32.xlu1 %v9529_v42, %s6991_s14 }
 0x427   :  { %4478 = vrot.lane.b32.xlu0 %v9000_v31, %s6990_s24 }
 0x428   :  { %v4043_v25 = vld [vmem:[#allocation3 + $0xf0] ss:$2 sm:$0xff]  ;;  %v4075_v39 = vld [vmem:[#allocation3 + $0xf1] ss:$2 sm:$0xff]  ;;  %v1951_v40 = vpop.permute.xlu1 %1950 }
 0x429   :  { %v797_v41 = vpop.permute.xlu0 %796  ;;  %v4115_v44 = vmax.f32 %v4043_v25, %v4075_v39  ;;  %2084 = vst.msk [vmem:[#allocation2 + $0x1d8] sm:$0xff] %vm2024_vm8, %v1951_v40 }
 0x42a   :  { %929 = vst.msk [vmem:[#allocation2 + $0x1e0] sm:$0xff] %vm868_vm2, %v797_v41  ;;  %4958 = vrot.lane.b32.xlu1 %v9531_v19, %s6995_s18  ;;  %v4348_v19 = vld [vmem:[#allocation4 + $0x52] sm:$0xff] }
 0x42b   :  { %4863 = vrot.lane.b32.xlu0 %v9529_v42, %s6994_s28  ;;  %v4131_v48 = vmax.f32 %v4099_v24, %v4115_v44 }
 0x42c   :  { %v2686_v52 = vpop.permute.xlu1 %2685  ;;  %v3302_v53 = vld [vmem:[#allocation2 + $0x1c8] sm:$0xff] }
 0x42d   :  { %v2335_v55 = vpop.permute.xlu0 %2334  ;;  %v4147_v29 = vmax.f32 %v4131_v48, 0.0  ;;  %2837 = vst.msk [vmem:[#allocation2 + $0x148] sm:$0xff] %vm2795_vm10, %v2686_v52  ;;  %6842 = vmatmul.mubr.msk.f32.gmra.mrb[14].mxu1 %vm3318_vm12, %v3302_v53 }
 0x42e   :  { %2469 = vst.msk [vmem:[#allocation2 + $0x1d0] sm:$0xff] %vm2410_vm9, %v2335_v55  ;;  %4575 = vrot.lane.b32.xlu1 %v4250_v56, %s6991_s14 }
 0x42f   :  { %4286 = vrot.lane.b32.xlu0 %v4250_v56, %s6987_s13  ;;  %4205 = vst.msk [vmem:[#allocation4 + $0x81] sm:$0xff] %vm3900_vm13, %v4147_v29 }
 0x430   :  { %v799_v54 = vpop.permute.xlu1 %798 }
 0x431   :  { %v3069_v27 = vpop.permute.xlu0 %3068  ;;  %930 = vst.msk [vmem:[#allocation2 + $0x1e8] sm:$0xff] %vm868_vm2, %v799_v54 }
 0x432   :  { %3221 = vst.msk [vmem:[#allocation2 + $0x140] sm:$0xff] %vm3180_vm11, %v3069_v27  ;;  %4960 = vrot.lane.b32.xlu1 %v9556_v62, %s6995_s18 }
 0x433   :  { %4670 = vrot.lane.b32.xlu0 %v9556_v62, %s6992_s15 }
 0x434   :  { %v2337_v57 = vpop.permute.xlu1 %2336 }
 0x435   :  { %v1183_v60 = vpop.permute.xlu0 %1182  ;;  %2470 = vst.msk [vmem:[#allocation2 + $0x1d8] sm:$0xff] %vm2410_vm9, %v2337_v57  ;;  %v6831_v1 = vpop.f32.mrb[6].mxu1 }
 0x436   :  { %1315 = vst.msk [vmem:[#allocation2 + $0x1e0] sm:$0xff] %vm1254_vm6, %v1183_v60  ;;  %4383 = vrot.lane.b32.xlu1 %v4347_v26, %s6989_s0  ;;  %v3827_v3 = vadd.f32 %v9561_v14, %v6831_v1  ;;  %v3821_v13 = vpop.f32.mrb[7].mxu1  ;;  %v4447_v39 = vld [vmem:[#allocation4 + $0x80] sm:$0xff] }
 0x437   :  { %4288 = vrot.lane.b32.xlu0 %v4251_v61, %s6987_s13  ;;  %v3822_v0 = vadd.f32 %v9561_v14, %v3821_v13  ;;  %v9705_v29 = vld [vmem:[#allocation4 + $0x81] sm:$0xff] }
 0x438   :  { %v3071_v16 = vpop.permute.xlu1 %3070  ;;  %3950 = vst.msk [vmem:[#allocation3 + $0x188] sm:$0xff] %vm3900_vm13, %v3827_v3  ;;  %v4351_v60 = vld [vmem:[#allocation4 + $0xa2] sm:$0xff] }
 0x439   :  { %v2720_v59 = vpop.permute.xlu0 %2719  ;;  %v3285_v43 = vld [vmem:[#allocation2 + $0x140] sm:$0xff]  ;;  %3222 = vst.msk [vmem:[#allocation2 + $0x148] sm:$0xff] %vm3180_vm11, %v3071_v16 }
 0x43a   :  { %2854 = vst.msk [vmem:[#allocation2 + $0x1d0] sm:$0xff] %vm2795_vm10, %v2720_v59  ;;  %6817 = vmatprep.mubr.msk.f32.mxu0 %vm3318_vm12, %v3285_v43  ;;  %4768 = vrot.lane.b32.xlu1 %v9000_v31, %s6993_s30 }
 0x43b   :  { %3949 = vst.msk [vmem:[#allocation3 + $0x180] sm:$0xff] %vm3900_vm13, %v3822_v0  ;;  %4672 = vrot.lane.b32.xlu0 %v4347_v26, %s6992_s15 }
 0x43c   :  { %v1568_v58 = vpop.permute.xlu1 %1567 }
 0x43d   :  { %v1185_v42 = vpop.permute.xlu0 %1184  ;;  %1700 = vst.msk [vmem:[#allocation2 + $0x1e0] sm:$0xff] %vm1639_vm7, %v1568_v58 }
 0x43e   :  { %1316 = vst.msk [vmem:[#allocation2 + $0x1e8] sm:$0xff] %vm1254_vm6, %v1185_v42  ;;  %4480 = vrot.lane.b32.xlu1 %v9107_v2, %s6990_s24 }
 0x43f   :  { %4385 = vrot.lane.b32.xlu0 %v4348_v19, %s6989_s0 }
 0x440   :  { %v3105_v11 = vpop.permute.xlu1 %3104  ;;  %v3286_v7 = vld [vmem:[#allocation2 + $0x148] sm:$0xff] }
 0x441   :  { %v2722_v6 = vpop.permute.xlu0 %2721  ;;  %3239 = vst.msk [vmem:[#allocation2 + $0x1d0] sm:$0xff] %vm3180_vm11, %v3105_v11  ;;  %6818 = vmatmul.mubr.msk.f32.gmra.mrb[40].mxu0 %vm3318_vm12, %v3286_v7 }
 0x442   :  { %2855 = vst.msk [vmem:[#allocation2 + $0x1d8] sm:$0xff] %vm2795_vm10, %v2722_v6  ;;  %4865 = vrot.lane.b32.xlu1 %v4250_v56, %s6994_s28  ;;  %v3989_v27 = vld [vmem:[#allocation3 + $0x180] ss:$2 sm:$0xff]  ;;  %v4021_v57 = vld [vmem:[#allocation3 + $0x181] ss:$2 sm:$0xff] }
 0x443   :  { %4770 = vrot.lane.b32.xlu0 %v9107_v2, %s6993_s30  ;;  %v4104_v13 = vmax.f32 %v3989_v27, %v4021_v57 }
 0x444   :  { %v1953_v31 = vpop.permute.xlu1 %1952 }
 0x445   :  { %v1570_v18 = vpop.permute.xlu0 %1569  ;;  %2085 = vst.msk [vmem:[#allocation2 + $0x1e0] sm:$0xff] %vm2024_vm8, %v1953_v31 }
 0x446   :  { %1701 = vst.msk [vmem:[#allocation2 + $0x1e8] sm:$0xff] %vm1639_vm7, %v1570_v18  ;;  %4577 = vrot.lane.b32.xlu1 %v4251_v61, %s6991_s14 }
 0x447   :  { %4482 = vrot.lane.b32.xlu0 %v9207_v12, %s6990_s24 }
 0x448   :  { %v801_v9 = vpop.permute.xlu1 %800  ;;  %v3303_v4 = vld [vmem:[#allocation2 + $0x1d0] sm:$0xff] }
 0x449   :  { %v3107_v63 = vpop.permute.xlu0 %3106  ;;  %931 = vst.msk [vmem:[#allocation2 + $0x1f0] sm:$0xff] %vm868_vm2, %v801_v9  ;;  %6844 = vmatprep.mubr.msk.f32.mxu1 %vm3318_vm12, %v3303_v4 }
 0x44a   :  { %3240 = vst.msk [vmem:[#allocation2 + $0x1d8] sm:$0xff] %vm3180_vm11, %v3107_v63  ;;  %4962 = vrot.lane.b32.xlu1 %v4347_v26, %s6995_s18 }
 0x44b   :  { %4867 = vrot.lane.b32.xlu0 %v4251_v61, %s6994_s28 }
 0x44c   :  { %v2339_v2 = vpop.permute.xlu1 %2338 }
 0x44d   :  { %v1955_v5 = vpop.permute.xlu0 %1954  ;;  %2471 = vst.msk [vmem:[#allocation2 + $0x1e0] sm:$0xff] %vm2410_vm9, %v2339_v2 }
 0x44e   :  { %2086 = vst.msk [vmem:[#allocation2 + $0x1e8] sm:$0xff] %vm2024_vm8, %v1955_v5  ;;  %4579 = vrot.lane.b32.xlu1 %v4252_v8, %s6991_s14 }
 0x44f   :  { %4290 = vrot.lane.b32.xlu0 %v4252_v8, %s6987_s13 }
 0x450   :  { %v1187_v62 = vpop.permute.xlu1 %1186 }
 0x451   :  { %v803_v15 = vpop.permute.xlu0 %802  ;;  %v3304_v47 = vld [vmem:[#allocation2 + $0x1d8] sm:$0xff]  ;;  %1317 = vst.msk [vmem:[#allocation2 + $0x1f0] sm:$0xff] %vm1254_vm6, %v1187_v62  ;;  %v6807_v17 = vpop.f32.mrb[32].mxu0 }
 0x452   :  { %932 = vst.msk [vmem:[#allocation2 + $0x1f8] sm:$0xff] %vm868_vm2, %v803_v15  ;;  %6845 = vmatmul.mubr.msk.f32.gmra.mrb[16].mxu1 %vm3318_vm12, %v3304_v47  ;;  %4964 = vrot.lane.b32.xlu1 %v4348_v19, %s6995_s18  ;;  %v3747_v21 = vadd.f32 %v9561_v14, %v6807_v17  ;;  %v3741_v46 = vpop.f32.mrb[33].mxu0  ;;  %vm4617_vm2 = vcmask 326912  }
 0x453   :  { %4674 = vrot.lane.b32.xlu0 %v4348_v19, %s6992_s15  ;;  %v3742_v23 = vadd.f32 %v9561_v14, %v3741_v46 }
 0x454   :  { %v2724_v22 = vpop.permute.xlu1 %2723  ;;  %3934 = vst.msk [vmem:[#allocation3 + $0x108] sm:$0xff] %vm3900_vm13, %v3747_v21 }
 0x455   :  { %v2341_v28 = vpop.permute.xlu0 %2340  ;;  %2856 = vst.msk [vmem:[#allocation2 + $0x1e0] sm:$0xff] %vm2795_vm10, %v2724_v22 }
 0x456   :  { %2472 = vst.msk [vmem:[#allocation2 + $0x1e8] sm:$0xff] %vm2410_vm9, %v2341_v28  ;;  %4387 = vrot.lane.b32.xlu1 %v4349_v32, %s6989_s0 }
 0x457   :  { %3933 = vst.msk [vmem:[#allocation3 + $0x100] sm:$0xff] %vm3900_vm13, %v3742_v23  ;;  %4292 = vrot.lane.b32.xlu0 %v4253_v20, %s6987_s13 }
 0x458   :  { %v1572_v33 = vpop.permute.xlu1 %1571 }
 0x459   :  { %v1189_v34 = vpop.permute.xlu0 %1188  ;;  %1702 = vst.msk [vmem:[#allocation2 + $0x1f0] sm:$0xff] %vm1639_vm7, %v1572_v33 }
 0x45a   :  { %1318 = vst.msk [vmem:[#allocation2 + $0x1f8] sm:$0xff] %vm1254_vm6, %v1189_v34  ;;  %4772 = vrot.lane.b32.xlu1 %v9207_v12, %s6993_s30  ;;  %v4222_v12 = vld [vmem:[#allocation4 + $0xa0] sm:$0xff]  ;;  %vm5006_vm6 = vcmask 589312  }
 0x45b   :  { %4676 = vrot.lane.b32.xlu0 %v4349_v32, %s6992_s15  ;;  %4238 = vst.msk [vmem:[#allocation5 + $0x40] sm:$0xff] %vm3900_vm13, %v4222_v12 }
 0x45c   :  { %v3109_v35 = vpop.permute.xlu1 %3108 }
 0x45d   :  { %v2726_v36 = vpop.permute.xlu0 %2725  ;;  %3241 = vst.msk [vmem:[#allocation2 + $0x1e0] sm:$0xff] %vm3180_vm11, %v3109_v35 }
 0x45e   :  { %2857 = vst.msk [vmem:[#allocation2 + $0x1e8] sm:$0xff] %vm2795_vm10, %v2726_v36  ;;  %4484 = vrot.lane.b32.xlu1 %v9396_v45, %s6990_s24  ;;  %v3981_v17 = vld [vmem:[#allocation3 + $0x100] ss:$2 sm:$0xff]  ;;  %v4013_v21 = vld [vmem:[#allocation3 + $0x101] ss:$2 sm:$0xff] }
 0x45f   :  { %4389 = vrot.lane.b32.xlu0 %v4350_v51, %s6989_s0  ;;  %v4100_v28 = vmax.f32 %v3981_v17, %v4013_v21 }
 0x460   :  { %v1957_v30 = vpop.permute.xlu1 %1956 }
 0x461   :  { %v1574_v37 = vpop.permute.xlu0 %1573  ;;  %2087 = vst.msk [vmem:[#allocation2 + $0x1f0] sm:$0xff] %vm2024_vm8, %v1957_v30 }
 0x462   :  { %1703 = vst.msk [vmem:[#allocation2 + $0x1f8] sm:$0xff] %vm1639_vm7, %v1574_v37  ;;  %4869 = vrot.lane.b32.xlu1 %v4252_v8, %s6994_s28  ;;  %vm5055_vm7 = vcmask 588800  }
 0x463   :  { %4774 = vrot.lane.b32.xlu0 %v9396_v45, %s6993_s30 }
 0x464   :  { %v1959_v38 = vpop.permute.xlu1 %1958  ;;  %v3305_v25 = vld [vmem:[#allocation2 + $0x1e0] sm:$0xff] }
 0x465   :  { %v3111_v50 = vpop.permute.xlu0 %3110  ;;  %2088 = vst.msk [vmem:[#allocation2 + $0x1f8] sm:$0xff] %vm2024_vm8, %v1959_v38  ;;  %6847 = vmatprep.mubr.msk.f32.mxu1 %vm3318_vm12, %v3305_v25  ;;  %vm5249_vm8 = vcmask 130048  }
 0x466   :  { %3242 = vst.msk [vmem:[#allocation2 + $0x1e8] sm:$0xff] %vm3180_vm11, %v3111_v50  ;;  %4581 = vrot.lane.b32.xlu1 %v4253_v20, %s6991_s14 }
 0x467   :  { %4486 = vrot.lane.b32.xlu0 %v4447_v39, %s6990_s24 }
 0x468   :  { %v2345_v45 = vpop.permute.xlu1 %2344 }
 0x469   :  { %v2343_v40 = vpop.permute.xlu0 %2342  ;;  %2474 = vst.msk [vmem:[#allocation2 + $0x1f8] sm:$0xff] %vm2410_vm9, %v2345_v45  ;;  %v6834_v41 = vpop.f32.mrb[8].mxu1 }
 0x46a   :  { %2473 = vst.msk [vmem:[#allocation2 + $0x1f0] sm:$0xff] %vm2410_vm9, %v2343_v40  ;;  %v3837_v24 = vadd.f32 %v9561_v14, %v6834_v41  ;;  %v3831_v44 = vpop.f32.mrb[9].mxu1  ;;  %4966 = vrot.lane.b32.xlu1 %v4349_v32, %s6995_s18  ;;  %vm5304_vm9 = vcmask 1041409  }
 0x46b   :  { %4871 = vrot.lane.b32.xlu0 %v4253_v20, %s6994_s28  ;;  %v3832_v48 = vadd.f32 %v9561_v14, %v3831_v44 }
 0x46c   :  { %3952 = vst.msk [vmem:[#allocation3 + $0x198] sm:$0xff] %vm3900_vm13, %v3837_v24  ;;  %v2730_v52 = vpop.permute.xlu1 %2729 }
 0x46d   :  { %v2728_v55 = vpop.permute.xlu0 %2727  ;;  %v3306_v53 = vld [vmem:[#allocation2 + $0x1e8] sm:$0xff]  ;;  %3951 = vst.msk [vmem:[#allocation3 + $0x190] sm:$0xff] %vm3900_vm13, %v3832_v48 }
 0x46e   :  { %2859 = vst.msk [vmem:[#allocation2 + $0x1f8] sm:$0xff] %vm2795_vm10, %v2730_v52  ;;  %2858 = vst.msk [vmem:[#allocation2 + $0x1f0] sm:$0xff] %vm2795_vm10, %v2728_v55  ;;  %6848 = vmatmul.mubr.msk.f32.gmra.mrb[18].mxu1 %vm3318_vm12, %v3306_v53  ;;  %4583 = vrot.lane.b32.xlu1 %v9705_v29, %s6991_s14  ;;  %v4641_v48 = vld [vmem:[#allocation4 + $0x82] sm:$0xff]  ;;  %vm5306_vm10 = vcmask 1043459  }
 0x46f   :  { %4294 = vrot.lane.b32.xlu0 %v4254_v49, %s6987_s13 }
 0x470   :  { %v3115_v56 = vpop.permute.xlu1 %3114 }
 0x471   :  { %v3113_v54 = vpop.permute.xlu0 %3112  ;;  %3244 = vst.msk [vmem:[#allocation2 + $0x1f8] sm:$0xff] %vm3180_vm11, %v3115_v56  ;;  %v4739_v56 = vld [vmem:[#allocation4 + $0x90] sm:$0xff] }
 0x472   :  { %3243 = vst.msk [vmem:[#allocation2 + $0x1f0] sm:$0xff] %vm3180_vm11, %v3113_v54  ;;  %4968 = vrot.lane.b32.xlu1 %v4350_v51, %s6995_s18  ;;  %vm5308_vm11 = vcmask 1045509  }
 0x473   :  { %4678 = vrot.lane.b32.xlu0 %v4350_v51, %s6992_s15 }
 0x474   :  { %v4053_v61 = vld [vmem:[#allocation3 + $0x190] ss:$2 sm:$0xff]  ;;  %v4085_v26 = vld [vmem:[#allocation3 + $0x191] ss:$2 sm:$0xff]  ;;  %v4281_v3 = vpop.permute.xlu1 %4280 }
 0x475   :  { %v4279_v1 = vpop.permute.xlu0 %4278  ;;  %v4120_v0 = vmax.f32 %v4053_v61, %v4085_v26  ;;  %4328 = vst.msk [vmem:[#allocation5 + $0x8] sm:$0xff] %vm4326_vm15, %v4281_v3 }
 0x476   :  { %4327 = vst.msk [vmem:[#allocation5] sm:$0xff] %vm4326_vm15, %v4279_v1  ;;  %4391 = vrot.lane.b32.xlu1 %v4351_v60, %s6989_s0 }
 0x477   :  { %v4136_v16 = vmax.f32 %v4104_v13, %v4120_v0 }
 0x478   :  { %v4378_v43 = vpop.permute.xlu1 %4377  ;;  %v3308_v42 = vld [vmem:[#allocation2 + $0x1f8] sm:$0xff] }
 0x479   :  { %v4376_v59 = vpop.permute.xlu0 %4375  ;;  %v3307_v58 = vld [vmem:[#allocation2 + $0x1f0] sm:$0xff]  ;;  %v4152_v19 = vmax.f32 %v4136_v16, 0.0  ;;  %4425 = vst.msk [vmem:[#allocation5 + $0x8] sm:$0xff] %vm4423_vm0, %v4378_v43 }
 0x47a   :  { %4424 = vst.msk [vmem:[#allocation5] sm:$0xff] %vm4423_vm0, %v4376_v59  ;;  %6850 = vmatprep.mubr.msk.f32.mxu1 %vm3318_vm12, %v3307_v58  ;;  %4776 = vrot.lane.b32.xlu1 %v4447_v39, %s6993_s30 }
 0x47b   :  { %6851 = vmatmul.mubr.msk.f32.gmra.mrb[20].mxu1 %vm3318_vm12, %v3308_v42  ;;  %4210 = vst.msk [vmem:[#allocation4 + $0xf1] sm:$0xff] %vm3900_vm13, %v4152_v19  ;;  %vm5310_vm12 = vcmask 1047559  }
 0x47c   :  { %v4475_v6 = vpop.permute.xlu1 %4474 }
 0x47d   :  { %v4473_v11 = vpop.permute.xlu0 %4472  ;;  %4522 = vst.msk [vmem:[#allocation5 + $0x8] sm:$0xff] %vm4520_vm1, %v4475_v6 }
 0x47e   :  { %4521 = vst.msk [vmem:[#allocation5] sm:$0xff] %vm4520_vm1, %v4473_v11 }
 0x480   :  { %v4283_v31 = vpop.permute.xlu1 %4282 }
 0x481   :  { %v4570_v7 = vpop.permute.xlu0 %4569  ;;  %4329 = vst.msk [vmem:[#allocation5 + $0x10] sm:$0xff] %vm4326_vm15, %v4283_v31 }
 0x482   :  { %4618 = vst.msk [vmem:[#allocation5] sm:$0xff] %vm4617_vm2, %v4570_v7  ;;  %v9728_v18 = vld [vmem:[#allocation4 + $0xf0] sm:$0xff] }
 0x483   :  { %4243 = vst.msk [vmem:[#allocation5 + $0x68] sm:$0xff] %vm3900_vm13, %v9728_v18 }
 0x484   :  { %v4667_v2 = vpop.permute.xlu1 %4666 }
 0x485   :  { %v6810_v9 = vpop.f32.mrb[34].mxu0  ;;  %v4572_v63 = vpop.permute.xlu0 %4571  ;;  %4715 = vst.msk [vmem:[#allocation5] sm:$0xff] %vm4714_vm3, %v4667_v2 }
 0x486   :  { %v3757_v4 = vadd.f32 %v9561_v14, %v6810_v9  ;;  %4619 = vst.msk [vmem:[#allocation5 + $0x8] sm:$0xff] %vm4617_vm2, %v4572_v63  ;;  %v3751_v5 = vpop.f32.mrb[35].mxu0 }
 0x487   :  { %v3752_v8 = vadd.f32 %v9561_v14, %v3751_v5 }
 0x488   :  { %3936 = vst.msk [vmem:[#allocation3 + $0x118] sm:$0xff] %vm3900_vm13, %v3757_v4  ;;  %v4380_v15 = vpop.permute.xlu1 %4379 }
 0x489   :  { %3935 = vst.msk [vmem:[#allocation3 + $0x110] sm:$0xff] %vm3900_vm13, %v3752_v8  ;;  %v4285_v62 = vpop.permute.xlu0 %4284 }
 0x48a   :  { %4330 = vst.msk [vmem:[#allocation5 + $0x18] sm:$0xff] %vm4326_vm15, %v4285_v62 }
 0x48b   :  { %4426 = vst.msk [vmem:[#allocation5 + $0x10] sm:$0xff] %vm4423_vm0, %v4380_v15 }
 0x48c   :  { %v4765_v46 = vpop.permute.xlu1 %4764 }
 0x48d   :  { %v4669_v47 = vpop.permute.xlu0 %4668  ;;  %4813 = vst.msk [vmem:[#allocation5] sm:$0xff] %vm4812_vm4, %v4765_v46 }
 0x48e   :  { %4716 = vst.msk [vmem:[#allocation5 + $0x8] sm:$0xff] %vm4714_vm3, %v4669_v47 }
 0x490   :  { %v4045_v23 = vld [vmem:[#allocation3 + $0x110] ss:$2 sm:$0xff]  ;;  %v4077_v22 = vld [vmem:[#allocation3 + $0x111] ss:$2 sm:$0xff]  ;;  %v4477_v33 = vpop.permute.xlu1 %4476 }
 0x491   :  { %v4116_v20 = vmax.f32 %v4045_v23, %v4077_v22  ;;  %v4382_v32 = vpop.permute.xlu0 %4381  ;;  %4523 = vst.msk [vmem:[#allocation5 + $0x10] sm:$0xff] %vm4520_vm1, %v4477_v33 }
 0x492   :  { %4427 = vst.msk [vmem:[#allocation5 + $0x18] sm:$0xff] %vm4423_vm0, %v4382_v32 }
 0x493   :  { %v4132_v34 = vmax.f32 %v4100_v28, %v4116_v20 }
 0x494   :  { %v4862_v51 = vpop.permute.xlu1 %4861 }
 0x495   :  { %v4148_v35 = vmax.f32 %v4132_v34, 0.0  ;;  %v4767_v36 = vpop.permute.xlu0 %4766  ;;  %4910 = vst.msk [vmem:[#allocation5] sm:$0xff] %vm4909_vm5, %v4862_v51 }
 0x496   :  { %4814 = vst.msk [vmem:[#allocation5 + $0x8] sm:$0xff] %vm4812_vm4, %v4767_v36 }
 0x497   :  { %4206 = vst.msk [vmem:[#allocation4 + $0xb1] sm:$0xff] %vm3900_vm13, %v4148_v35 }
 0x498   :  { %v4574_v37 = vpop.permute.xlu1 %4573 }
 0x499   :  { %v4479_v30 = vpop.permute.xlu0 %4478  ;;  %4620 = vst.msk [vmem:[#allocation5 + $0x10] sm:$0xff] %vm4617_vm2, %v4574_v37 }
 0x49a   :  { %4524 = vst.msk [vmem:[#allocation5 + $0x18] sm:$0xff] %vm4520_vm1, %v4479_v30 }
 0x49c   :  { %v4959_v50 = vpop.permute.xlu1 %4958 }
 0x49d   :  { %v4864_v12 = vpop.permute.xlu0 %4863  ;;  %v6837_v38 = vpop.f32.mrb[10].mxu1  ;;  %5007 = vst.msk [vmem:[#allocation5] sm:$0xff] %vm5006_vm6, %v4959_v50 }
 0x49e   :  { %4911 = vst.msk [vmem:[#allocation5 + $0x8] sm:$0xff] %vm4909_vm5, %v4864_v12  ;;  %v4255_v25 = vld [vmem:[#allocation4 + $0xb1] sm:$0xff]  ;;  %v3847_v45 = vadd.f32 %v9561_v14, %v6837_v38  ;;  %v3841_v40 = vpop.f32.mrb[11].mxu1 }
 0x49f   :  { %v4448_v39 = vld [vmem:[#allocation4 + $0xb0] sm:$0xff]  ;;  %4296 = vrot.lane.b32.xlu0 %v4255_v25, %s6987_s13  ;;  %v3842_v41 = vadd.f32 %v9561_v14, %v3841_v40 }
 0x4a0   :  { %4488 = vrot.lane.b32.xlu1 %v4448_v39, %s6990_s24  ;;  %4239 = vst.msk [vmem:[#allocation5 + $0x48] sm:$0xff] %vm3900_vm13, %v4448_v39  ;;  %3954 = vst.msk [vmem:[#allocation3 + $0x1a8] sm:$0xff] %vm3900_vm13, %v3847_v45  ;;  %v4576_v44 = vpop.permute.xlu1 %4575  ;;  %v9764_v53 = vld [vmem:[#allocation4 + $0xb2] sm:$0xff] }
 0x4a1   :  { %v4287_v24 = vpop.permute.xlu0 %4286  ;;  %3953 = vst.msk [vmem:[#allocation3 + $0x1a0] sm:$0xff] %vm3900_vm13, %v3842_v41 }
 0x4a2   :  { %4331 = vst.msk [vmem:[#allocation5 + $0x20] sm:$0xff] %vm4326_vm15, %v4287_v24 }
 0x4a3   :  { %4621 = vst.msk [vmem:[#allocation5 + $0x18] sm:$0xff] %vm4617_vm2, %v4576_v44  ;;  %4680 = vrot.lane.b32.xlu0 %v4641_v48, %s6992_s15 }
 0x4a4   :  { %4873 = vrot.lane.b32.xlu1 %v9705_v29, %s6994_s28  ;;  %v4961_v52 = vpop.permute.xlu1 %4960  ;;  %v5023_v55 = vld [vmem:[#allocation5] sm:$0xff] }
 0x4a5   :  { %v4671_v49 = vpop.permute.xlu0 %4670  ;;  %5008 = vst.msk [vmem:[#allocation5 + $0x8] sm:$0xff] %vm5006_vm6, %v4961_v52  ;;  %6871 = vmatprep.mubr.msk.f32.mxu1 %vm5055_vm7, %v5023_v55 }
 0x4a6   :  { %4717 = vst.msk [vmem:[#allocation5 + $0x10] sm:$0xff] %vm4714_vm3, %v4671_v49 }
 0x4a7   :  { %4393 = vrot.lane.b32.xlu0 %v9764_v53, %s6989_s0 }
 0x4a8   :  { %4585 = vrot.lane.b32.xlu1 %v4255_v25, %s6991_s14  ;;  %v4384_v29 = vpop.permute.xlu1 %4383  ;;  %v3991_v20 = vld [vmem:[#allocation3 + $0x1a0] ss:$2 sm:$0xff]  ;;  %v4023_v32 = vld [vmem:[#allocation3 + $0x1a1] ss:$2 sm:$0xff] }
 0x4a9   :  { %v4289_v54 = vpop.permute.xlu0 %4288  ;;  %4428 = vst.msk [vmem:[#allocation5 + $0x20] sm:$0xff] %vm4423_vm0, %v4384_v29  ;;  %v4105_v36 = vmax.f32 %v3991_v20, %v4023_v32 }
 0x4aa   :  { %4332 = vst.msk [vmem:[#allocation5 + $0x28] sm:$0xff] %vm4326_vm15, %v4289_v54 }
 0x4ab   :  { %4778 = vrot.lane.b32.xlu0 %v4739_v56, %s6993_s30 }
 0x4ac   :  { %4970 = vrot.lane.b32.xlu1 %v4641_v48, %s6995_s18  ;;  %v4769_v57 = vpop.permute.xlu1 %4768  ;;  %v5024_v60 = vld [vmem:[#allocation5 + $0x8] sm:$0xff] }
 0x4ad   :  { %v4673_v27 = vpop.permute.xlu0 %4672  ;;  %4815 = vst.msk [vmem:[#allocation5 + $0x10] sm:$0xff] %vm4812_vm4, %v4769_v57  ;;  %6872 = vmatmul.mubr.msk.f32.vlgmr.msra.gmra.mrb[22].mxu1 %vm5055_vm7, %v5024_v60 }
 0x4ae   :  { %4718 = vst.msk [vmem:[#allocation5 + $0x18] sm:$0xff] %vm4714_vm3, %v4673_v27 }
 0x4b0   :  { %v4481_v26 = vpop.permute.xlu1 %4480 }
 0x4b1   :  { %v4386_v61 = vpop.permute.xlu0 %4385  ;;  %4525 = vst.msk [vmem:[#allocation5 + $0x20] sm:$0xff] %vm4520_vm1, %v4481_v26 }
 0x4b2   :  { %4429 = vst.msk [vmem:[#allocation5 + $0x28] sm:$0xff] %vm4423_vm0, %v4386_v61 }
 0x4b4   :  { %v4866_v3 = vpop.permute.xlu1 %4865 }
 0x4b5   :  { %v4771_v1 = vpop.permute.xlu0 %4770  ;;  %4912 = vst.msk [vmem:[#allocation5 + $0x10] sm:$0xff] %vm4909_vm5, %v4866_v3 }
 0x4b6   :  { %4816 = vst.msk [vmem:[#allocation5 + $0x18] sm:$0xff] %vm4812_vm4, %v4771_v1 }
 0x4b8   :  { %v4578_v16 = vpop.permute.xlu1 %4577 }
 0x4b9   :  { %v4483_v13 = vpop.permute.xlu0 %4482  ;;  %v6813_v0 = vpop.f32.mrb[36].mxu0  ;;  %4622 = vst.msk [vmem:[#allocation5 + $0x20] sm:$0xff] %vm4617_vm2, %v4578_v16 }
 0x4ba   :  { %4526 = vst.msk [vmem:[#allocation5 + $0x28] sm:$0xff] %vm4520_vm1, %v4483_v13  ;;  %v3767_v59 = vadd.f32 %v9561_v14, %v6813_v0  ;;  %v3761_v43 = vpop.f32.mrb[37].mxu0 }
 0x4bb   :  { %v3762_v58 = vadd.f32 %v9561_v14, %v3761_v43 }
 0x4bc   :  { %3938 = vst.msk [vmem:[#allocation3 + $0x128] sm:$0xff] %vm3900_vm13, %v3767_v59  ;;  %v4963_v19 = vpop.permute.xlu1 %4962 }
 0x4bd   :  { %v4868_v42 = vpop.permute.xlu0 %4867  ;;  %3937 = vst.msk [vmem:[#allocation3 + $0x120] sm:$0xff] %vm3900_vm13, %v3762_v58  ;;  %v4836_v58 = vld [vmem:[#allocation4 + $0x91] sm:$0xff] }
 0x4be   :  { %4913 = vst.msk [vmem:[#allocation5 + $0x18] sm:$0xff] %vm4909_vm5, %v4868_v42  ;;  %v4933_v42 = vld [vmem:[#allocation4 + $0x92] sm:$0xff] }
 0x4bf   :  { %5009 = vst.msk [vmem:[#allocation5 + $0x10] sm:$0xff] %vm5006_vm6, %v4963_v19 }
 0x4c0   :  { %v4580_v6 = vpop.permute.xlu1 %4579 }
 0x4c1   :  { %v4291_v11 = vpop.permute.xlu0 %4290  ;;  %4623 = vst.msk [vmem:[#allocation5 + $0x28] sm:$0xff] %vm4617_vm2, %v4580_v6 }
 0x4c2   :  { %4333 = vst.msk [vmem:[#allocation5 + $0x30] sm:$0xff] %vm4326_vm15, %v4291_v11 }
 0x4c4   :  { %v4965_v31 = vpop.permute.xlu1 %4964  ;;  %v3983_v54 = vld [vmem:[#allocation3 + $0x120] ss:$2 sm:$0xff]  ;;  %v4015_v29 = vld [vmem:[#allocation3 + $0x121] ss:$2 sm:$0xff] }
 0x4c5   :  { %v4675_v7 = vpop.permute.xlu0 %4674  ;;  %5010 = vst.msk [vmem:[#allocation5 + $0x18] sm:$0xff] %vm5006_vm6, %v4965_v31  ;;  %v4101_v60 = vmax.f32 %v3983_v54, %v4015_v29  ;;  %v4259_v54 = vld [vmem:[#allocation4 + $0xf1] sm:$0xff] }
 0x4c6   :  { %4719 = vst.msk [vmem:[#allocation5 + $0x20] sm:$0xff] %vm4714_vm3, %v4675_v7  ;;  %v5025_v9 = vld [vmem:[#allocation5 + $0x10] sm:$0xff] }
 0x4c7   :  { %6874 = vmatprep.mubr.msk.f32.mxu1 %vm5055_vm7, %v5025_v9 }
 0x4c8   :  { %v4388_v4 = vpop.permute.xlu1 %4387 }
 0x4c9   :  { %v4293_v63 = vpop.permute.xlu0 %4292  ;;  %4430 = vst.msk [vmem:[#allocation5 + $0x30] sm:$0xff] %vm4423_vm0, %v4388_v4 }
 0x4ca   :  { %4334 = vst.msk [vmem:[#allocation5 + $0x38] sm:$0xff] %vm4326_vm15, %v4293_v63 }
 0x4cc   :  { %v4773_v5 = vpop.permute.xlu1 %4772  ;;  %v5026_v8 = vld [vmem:[#allocation5 + $0x18] sm:$0xff] }
 0x4cd   :  { %v4677_v2 = vpop.permute.xlu0 %4676  ;;  %4817 = vst.msk [vmem:[#allocation5 + $0x20] sm:$0xff] %vm4812_vm4, %v4773_v5  ;;  %6875 = vmatmul.mubr.msk.f32.gmra.mrb[24].mxu1 %vm5055_vm7, %v5026_v8 }
 0x4ce   :  { %4720 = vst.msk [vmem:[#allocation5 + $0x28] sm:$0xff] %vm4714_vm3, %v4677_v2 }
 0x4d0   :  { %v4485_v17 = vpop.permute.xlu1 %4484 }
 0x4d1   :  { %v6840_v62 = vpop.f32.mrb[12].mxu1  ;;  %v4390_v15 = vpop.permute.xlu0 %4389  ;;  %4527 = vst.msk [vmem:[#allocation5 + $0x30] sm:$0xff] %vm4520_vm1, %v4485_v17 }
 0x4d2   :  { %v3857_v47 = vadd.f32 %v9561_v14, %v6840_v62  ;;  %4431 = vst.msk [vmem:[#allocation5 + $0x38] sm:$0xff] %vm4423_vm0, %v4390_v15  ;;  %v3851_v21 = vpop.f32.mrb[13].mxu1  ;;  %v4049_v62 = vld [vmem:[#allocation3 + $0x150] ss:$2 sm:$0xff]  ;;  %v4081_v15 = vld [vmem:[#allocation3 + $0x151] ss:$2 sm:$0xff] }
 0x4d3   :  { %v3852_v46 = vadd.f32 %v9561_v14, %v3851_v21 }
 0x4d4   :  { %3956 = vst.msk [vmem:[#allocation3 + $0x1b8] sm:$0xff] %vm3900_vm13, %v3857_v47  ;;  %v4870_v22 = vpop.permute.xlu1 %4869 }
 0x4d5   :  { %3955 = vst.msk [vmem:[#allocation3 + $0x1b0] sm:$0xff] %vm3900_vm13, %v3852_v46  ;;  %v4775_v23 = vpop.permute.xlu0 %4774  ;;  %v4118_v46 = vmax.f32 %v4049_v62, %v4081_v15  ;;  %v4747_v62 = vld [vmem:[#allocation4 + $0x130] sm:$0xff] }
 0x4d6   :  { %4818 = vst.msk [vmem:[#allocation5 + $0x28] sm:$0xff] %vm4812_vm4, %v4775_v23 }
 0x4d7   :  { %4914 = vst.msk [vmem:[#allocation5 + $0x20] sm:$0xff] %vm4909_vm5, %v4870_v22 }
 0x4d8   :  { %v4582_v33 = vpop.permute.xlu1 %4581 }
 0x4d9   :  { %v4487_v28 = vpop.permute.xlu0 %4486  ;;  %4624 = vst.msk [vmem:[#allocation5 + $0x30] sm:$0xff] %vm4617_vm2, %v4582_v33 }
 0x4da   :  { %4528 = vst.msk [vmem:[#allocation5 + $0x38] sm:$0xff] %vm4520_vm1, %v4487_v28 }
 0x4dc   :  { %v4055_v34 = vld [vmem:[#allocation3 + $0x1b0] ss:$2 sm:$0xff]  ;;  %v4087_v35 = vld [vmem:[#allocation3 + $0x1b1] ss:$2 sm:$0xff]  ;;  %v4967_v37 = vpop.permute.xlu1 %4966 }
 0x4dd   :  { %v4121_v51 = vmax.f32 %v4055_v34, %v4087_v35  ;;  %v4872_v30 = vpop.permute.xlu0 %4871  ;;  %5011 = vst.msk [vmem:[#allocation5 + $0x20] sm:$0xff] %vm5006_vm6, %v4967_v37 }
 0x4de   :  { %4915 = vst.msk [vmem:[#allocation5 + $0x28] sm:$0xff] %vm4909_vm5, %v4872_v30 }
 0x4df   :  { %v4137_v12 = vmax.f32 %v4105_v36, %v4121_v51 }
 0x4e0   :  { %v4584_v25 = vpop.permute.xlu1 %4583 }
 0x4e1   :  { %v4153_v38 = vmax.f32 %v4137_v12, 0.0  ;;  %v4295_v50 = vpop.permute.xlu0 %4294  ;;  %4625 = vst.msk [vmem:[#allocation5 + $0x38] sm:$0xff] %vm4617_vm2, %v4584_v25 }
 0x4e2   :  { %4335 = vst.msk [vmem:[#allocation5 + $0x40] sm:$0xff] %vm4326_vm15, %v4295_v50 }
 0x4e3   :  { %4211 = vst.msk [vmem:[#allocation4 + $0x101] sm:$0xff] %vm3900_vm13, %v4153_v38 }
 0x4e4   :  { %v4969_v45 = vpop.permute.xlu1 %4968  ;;  %v5027_v40 = vld [vmem:[#allocation5 + $0x20] sm:$0xff] }
 0x4e5   :  { %v4679_v39 = vpop.permute.xlu0 %4678  ;;  %5012 = vst.msk [vmem:[#allocation5 + $0x28] sm:$0xff] %vm5006_vm6, %v4969_v45  ;;  %6877 = vmatprep.mubr.msk.f32.mxu1 %vm5055_vm7, %v5027_v40  ;;  %v4548_v40 = vld [vmem:[#allocation4 + $0xe1] sm:$0xff] }
 0x4e6   :  { %4721 = vst.msk [vmem:[#allocation5 + $0x30] sm:$0xff] %vm4714_vm3, %v4679_v39 }
 0x4e8   :  { %v4392_v41 = vpop.permute.xlu1 %4391 }
 0x4e9   :  { %4432 = vst.msk [vmem:[#allocation5 + $0x40] sm:$0xff] %vm4423_vm0, %v4392_v41 }
 0x4ea   :  { %v9818_v24 = vld [vmem:[#allocation4 + $0x100] sm:$0xff] }
 0x4eb   :  { %4244 = vst.msk [vmem:[#allocation5 + $0x70] sm:$0xff] %vm3900_vm13, %v9818_v24 }
 0x4ec   :  { %v4777_v49 = vpop.permute.xlu1 %4776  ;;  %v5028_v55 = vld [vmem:[#allocation5 + $0x28] sm:$0xff] }
 0x4ed   :  { %v6816_v44 = vpop.f32.mrb[38].mxu0  ;;  %4819 = vst.msk [vmem:[#allocation5 + $0x30] sm:$0xff] %vm4812_vm4, %v4777_v49  ;;  %6878 = vmatmul.mubr.msk.f32.gmra.mrb[26].mxu1 %vm5055_vm7, %v5028_v55 }
 0x4ee   :  { %v3777_v48 = vadd.f32 %v9561_v14, %v6816_v44  ;;  %v3771_v52 = vpop.f32.mrb[39].mxu0 }
 0x4ef   :  { %v3772_v56 = vadd.f32 %v9561_v14, %v3771_v52 }
 0x4f0   :  { %3940 = vst.msk [vmem:[#allocation3 + $0x138] sm:$0xff] %vm3900_vm13, %v3777_v48  ;;  %v6978_v48 = vld [vmem:[%s10336_s2] ss:$0 sm:$0xff] }
 0x4f1   :  { %3939 = vst.msk [vmem:[#allocation3 + $0x130] sm:$0xff] %vm3900_vm13, %v3772_v56  ;;  %v4355_v56 = vld [vmem:[#allocation4 + $0xe2] sm:$0xff] }
 0x4f8   :  { %v4047_v27 = vld [vmem:[#allocation3 + $0x130] ss:$2 sm:$0xff]  ;;  %v4079_v57 = vld [vmem:[#allocation3 + $0x131] ss:$2 sm:$0xff] }
 0x4f9   :  { %v4117_v61 = vmax.f32 %v4047_v27, %v4079_v57 }
 0x4fb   :  { %v4133_v26 = vmax.f32 %v4101_v60, %v4117_v61 }
 0x4fd   :  { %v4149_v1 = vmax.f32 %v4133_v26, 0.0  ;;  %v4356_v26 = vld [vmem:[#allocation4 + $0xf2] sm:$0xff] }
 0x4ff   :  { %4207 = vst.msk [vmem:[#allocation4 + $0xc1] sm:$0xff] %vm3900_vm13, %v4149_v1 }
 0x500   :  { %v6843_v3 = vpop.f32.mrb[14].mxu1 }
 0x501   :  { %v3867_v13 = vadd.f32 %v9561_v14, %v6843_v3  ;;  %v3861_v0 = vpop.f32.mrb[15].mxu1 }
 0x502   :  { %v3862_v16 = vadd.f32 %v9561_v14, %v3861_v0 }
 0x503   :  { %3958 = vst.msk [vmem:[#allocation3 + $0x1c8] sm:$0xff] %vm3900_vm13, %v3867_v13 }
 0x504   :  { %3957 = vst.msk [vmem:[#allocation3 + $0x1c0] sm:$0xff] %vm3900_vm13, %v3862_v16 }
 0x506   :  { %v4449_v59 = vld [vmem:[#allocation4 + $0xc0] sm:$0xff] }
 0x507   :  { %v9834_v43 = vld [vmem:[#allocation4 + $0xc1] sm:$0xff]  ;;  %4490 = vrot.lane.b32.xlu0 %v4449_v59, %s6990_s24  ;;  %4240 = vst.msk [vmem:[#allocation5 + $0x50] sm:$0xff] %vm3900_vm13, %v4449_v59 }
 0x508   :  { %4587 = vrot.lane.b32.xlu1 %v9834_v43, %s6991_s14  ;;  %v9842_v19 = vld [vmem:[#allocation4 + $0xc2] sm:$0xff] }
 0x50b   :  { %4875 = vrot.lane.b32.xlu0 %v4836_v58, %s6994_s28  ;;  %v3993_v36 = vld [vmem:[#allocation3 + $0x1c0] ss:$2 sm:$0xff]  ;;  %v4025_v51 = vld [vmem:[#allocation3 + $0x1c1] ss:$2 sm:$0xff] }
 0x50c   :  { %4972 = vrot.lane.b32.xlu1 %v4933_v42, %s6995_s18  ;;  %v4106_v50 = vmax.f32 %v3993_v36, %v4025_v51  ;;  %v4357_v58 = vld [vmem:[#allocation4 + $0x102] sm:$0xff] }
 0x50f   :  { %4298 = vrot.lane.b32.xlu0 %v9834_v43, %s6987_s13 }
 0x510   :  { %4395 = vrot.lane.b32.xlu1 %v9842_v19, %s6989_s0 }
 0x511   :  { %v4297_v11 = vpop.permute.xlu0 %4296 }
 0x512   :  { %v4489_v6 = vpop.permute.xlu1 %4488  ;;  %4336 = vst.msk [vmem:[#allocation5 + $0x48] sm:$0xff] %vm4326_vm15, %v4297_v11 }
 0x513   :  { %4529 = vst.msk [vmem:[#allocation5 + $0x40] sm:$0xff] %vm4520_vm1, %v4489_v6  ;;  %4682 = vrot.lane.b32.xlu0 %v9764_v53, %s6992_s15 }
 0x514   :  { %4780 = vrot.lane.b32.xlu1 %v4449_v59, %s6993_s30  ;;  %v6819_v7 = vpop.f32.mrb[40].mxu0 }
 0x515   :  { %v4681_v31 = vpop.permute.xlu0 %4680  ;;  %v3787_v9 = vadd.f32 %v9561_v14, %v6819_v7  ;;  %v3781_v4 = vpop.f32.mrb[41].mxu0 }
 0x516   :  { %4722 = vst.msk [vmem:[#allocation5 + $0x38] sm:$0xff] %vm4714_vm3, %v4681_v31  ;;  %v4874_v63 = vpop.permute.xlu1 %4873  ;;  %v3782_v2 = vadd.f32 %v9561_v14, %v3781_v4  ;;  %v9943_v31 = vld [vmem:[%s10338_s4] ss:$0 sm:$0xff]  ;;  %s6997_s4 = smov 80  }
 0x517   :  { %4916 = vst.msk [vmem:[#allocation5 + $0x30] sm:$0xff] %vm4909_vm5, %v4874_v63 }
 0x518   :  { %3942 = vst.msk [vmem:[#allocation3 + $0x148] sm:$0xff] %vm3900_vm13, %v3787_v9  ;;  %3941 = vst.msk [vmem:[#allocation3 + $0x140] sm:$0xff] %vm3900_vm13, %v3782_v2 }
 0x519   :  { %v4394_v5 = vpop.permute.xlu0 %4393 }
 0x51a   :  { %4433 = vst.msk [vmem:[#allocation5 + $0x48] sm:$0xff] %vm4423_vm0, %v4394_v5  ;;  %v4586_v53 = vpop.permute.xlu1 %4585 }
 0x51b   :  { %4626 = vst.msk [vmem:[#allocation5 + $0x40] sm:$0xff] %vm4617_vm2, %v4586_v53 }
 0x51d   :  { %v4779_v8 = vpop.permute.xlu0 %4778 }
 0x51e   :  { %v4971_v47 = vpop.permute.xlu1 %4970  ;;  %4820 = vst.msk [vmem:[#allocation5 + $0x38] sm:$0xff] %vm4812_vm4, %v4779_v8 }
 0x51f   :  { %5013 = vst.msk [vmem:[#allocation5 + $0x30] sm:$0xff] %vm5006_vm6, %v4971_v47  ;;  %v3985_v17 = vld [vmem:[#allocation3 + $0x140] ss:$2 sm:$0xff]  ;;  %v4017_v21 = vld [vmem:[#allocation3 + $0x141] ss:$2 sm:$0xff] }
 0x520   :  { %v4102_v23 = vmax.f32 %v3985_v17, %v4017_v21 }
 0x522   :  { %v4134_v22 = vmax.f32 %v4102_v23, %v4118_v46  ;;  %v4844_v46 = vld [vmem:[#allocation4 + $0x131] sm:$0xff] }
 0x523   :  { %v4941_v23 = vld [vmem:[#allocation4 + $0x132] sm:$0xff] }
 0x524   :  { %v4150_v28 = vmax.f32 %v4134_v22, 0.0 }
 0x525   :  { %v6846_v20 = vpop.f32.mrb[16].mxu1 }
 0x526   :  { %v3877_v32 = vadd.f32 %v9561_v14, %v6846_v20  ;;  %v3871_v33 = vpop.f32.mrb[17].mxu1  ;;  %v5029_v34 = vld [vmem:[#allocation5 + $0x30] sm:$0xff]  ;;  %4208 = vst.msk [vmem:[#allocation4 + $0xd1] sm:$0xff] %vm3900_vm13, %v4150_v28 }
 0x527   :  { %v3872_v35 = vadd.f32 %v9561_v14, %v3871_v33  ;;  %6880 = vmatprep.mubr.msk.f32.mxu1 %vm5055_vm7, %v5029_v34 }
 0x528   :  { %3960 = vst.msk [vmem:[#allocation3 + $0x1d8] sm:$0xff] %vm3900_vm13, %v3877_v32 }
 0x529   :  { %3959 = vst.msk [vmem:[#allocation3 + $0x1d0] sm:$0xff] %vm3900_vm13, %v3872_v35 }
 0x52d   :  { %v4257_v30 = vld [vmem:[#allocation4 + $0xd1] sm:$0xff] }
 0x52e   :  { %v4450_v37 = vld [vmem:[#allocation4 + $0xd0] sm:$0xff]  ;;  %4300 = vrot.lane.b32.xlu0 %v4257_v30, %s6987_s13 }
 0x52f   :  { %4492 = vrot.lane.b32.xlu1 %v4450_v37, %s6990_s24  ;;  %4241 = vst.msk [vmem:[#allocation5 + $0x58] sm:$0xff] %vm3900_vm13, %v4450_v37  ;;  %v4354_v45 = vld [vmem:[#allocation4 + $0xd2] sm:$0xff] }
 0x530   :  { %v4057_v12 = vld [vmem:[#allocation3 + $0x1d0] ss:$2 sm:$0xff]  ;;  %v4089_v38 = vld [vmem:[#allocation3 + $0x1d1] ss:$2 sm:$0xff] }
 0x531   :  { %v4122_v14 = vmax.f32 %v4057_v12, %v4089_v38 }
 0x532   :  { %4684 = vrot.lane.b32.xlu0 %v9842_v19, %s6992_s15 }
 0x533   :  { %v4138_v25 = vmax.f32 %v4106_v50, %v4122_v14  ;;  %4877 = vrot.lane.b32.xlu1 %v9834_v43, %s6994_s28  ;;  %v4550_v43 = vld [vmem:[#allocation4 + $0x101] sm:$0xff] }
 0x535   :  { %v4154_v39 = vmax.f32 %v4138_v25, 0.0 }
 0x536   :  { %4397 = vrot.lane.b32.xlu0 %v4354_v45, %s6989_s0 }
 0x537   :  { %4212 = vst.msk [vmem:[#allocation4 + $0x111] sm:$0xff] %vm3900_vm13, %v4154_v39  ;;  %4589 = vrot.lane.b32.xlu1 %v4257_v30, %s6991_s14 }
 0x53a   :  { %4782 = vrot.lane.b32.xlu0 %v4450_v37, %s6993_s30 }
 0x53b   :  { %4974 = vrot.lane.b32.xlu1 %v9842_v19, %s6995_s18 }
 0x53e   :  { %v9882_v41 = vld [vmem:[#allocation4 + $0x110] sm:$0xff]  ;;  %4494 = vrot.lane.b32.xlu0 %v9550_v10, %s6990_s24 }
 0x53f   :  { %4591 = vrot.lane.b32.xlu1 %v4548_v40, %s6991_s14  ;;  %4245 = vst.msk [vmem:[#allocation5 + $0x78] sm:$0xff] %vm3900_vm13, %v9882_v41  ;;  %v4358_v42 = vld [vmem:[#allocation4 + $0x112] sm:$0xff] }
 0x541   :  { %v6849_v44 = vpop.f32.mrb[18].mxu1 }
 0x542   :  { %v3887_v49 = vadd.f32 %v6978_v48, %v6849_v44  ;;  %v3881_v52 = vpop.f32.mrb[19].mxu1  ;;  %4879 = vrot.lane.b32.xlu0 %v4257_v30, %s6994_s28 }
 0x543   :  { %4976 = vrot.lane.b32.xlu1 %v4354_v45, %s6995_s18  ;;  %v3882_v55 = vadd.f32 %v6978_v48, %v3881_v52 }
 0x544   :  { %3962 = vst.msk [vmem:[#allocation3 + $0x1e8] sm:$0xff] %vm3900_vm13, %v3887_v49 }
 0x545   :  { %3961 = vst.msk [vmem:[#allocation3 + $0x1e0] sm:$0xff] %vm3900_vm13, %v3882_v55 }
 0x546   :  { %4302 = vrot.lane.b32.xlu0 %v4548_v40, %s6987_s13 }
 0x547   :  { %4399 = vrot.lane.b32.xlu1 %v4355_v56, %s6989_s0 }
 0x54a   :  { %4686 = vrot.lane.b32.xlu0 %v4354_v45, %s6992_s15 }
 0x54b   :  { %4784 = vrot.lane.b32.xlu1 %v9550_v10, %s6993_s30 }
 0x54c   :  { %v3995_v61 = vld [vmem:[#allocation3 + $0x1e0] ss:$2 sm:$0xff]  ;;  %v4027_v10 = vld [vmem:[#allocation3 + $0x1e1] ss:$2 sm:$0xff] }
 0x54d   :  { %v4107_v1 = vmax.f32 %v3995_v61, %v4027_v10 }
 0x54e   :  { %v6852_v29 = vpop.f32.mrb[20].mxu1  ;;  %4304 = vrot.lane.b32.xlu0 %v4259_v54, %s6987_s13 }
 0x54f   :  { %4496 = vrot.lane.b32.xlu1 %v9728_v18, %s6990_s24  ;;  %v3897_v27 = vadd.f32 %v6978_v48, %v6852_v29  ;;  %v3891_v57 = vpop.f32.mrb[21].mxu1 }
 0x550   :  { %v3892_v60 = vadd.f32 %v6978_v48, %v3891_v57 }
 0x551   :  { %3964 = vst.msk [vmem:[#allocation3 + $0x1f8] sm:$0xff] %vm3900_vm13, %v3897_v27 }
 0x552   :  { %3963 = vst.msk [vmem:[#allocation3 + $0x1f0] sm:$0xff] %vm3900_vm13, %v3892_v60  ;;  %4688 = vrot.lane.b32.xlu0 %v4355_v56, %s6992_s15 }
 0x553   :  { %4881 = vrot.lane.b32.xlu1 %v4548_v40, %s6994_s28 }
 0x556   :  { %4401 = vrot.lane.b32.xlu0 %v4356_v26, %s6989_s0 }
 0x557   :  { %4593 = vrot.lane.b32.xlu1 %v4259_v54, %s6991_s14 }
 0x559   :  { %v4059_v3 = vld [vmem:[#allocation3 + $0x1f0] ss:$2 sm:$0xff]  ;;  %v4091_v13 = vld [vmem:[#allocation3 + $0x1f1] ss:$2 sm:$0xff] }
 0x55a   :  { %v4123_v0 = vmax.f32 %v4059_v3, %v4091_v13  ;;  %4786 = vrot.lane.b32.xlu0 %v9728_v18, %s6993_s30  ;;  %v4261_v18 = vld [vmem:[#allocation4 + $0x111] sm:$0xff] }
 0x55b   :  { %4978 = vrot.lane.b32.xlu1 %v4355_v56, %s6995_s18 }
 0x55c   :  { %v4139_v16 = vmax.f32 %v4107_v1, %v4123_v0 }
 0x55e   :  { %v4155_v59 = vmax.f32 %v4139_v16, 0.0  ;;  %4498 = vrot.lane.b32.xlu0 %v9818_v24, %s6990_s24 }
 0x55f   :  { %4595 = vrot.lane.b32.xlu1 %v4550_v43, %s6991_s14 }
 0x560   :  { %4213 = vst.msk [vmem:[#allocation4 + $0x121] sm:$0xff] %vm3900_vm13, %v4155_v59  ;;  %vm5313_vm13 = vcmask 123904  }
 0x562   :  { %4883 = vrot.lane.b32.xlu0 %v4259_v54, %s6994_s28 }
 0x563   :  { %4980 = vrot.lane.b32.xlu1 %v4356_v26, %s6995_s18 }
 0x566   :  { %4306 = vrot.lane.b32.xlu0 %v4550_v43, %s6987_s13 }
 0x567   :  { %4403 = vrot.lane.b32.xlu1 %v4357_v58, %s6989_s0  ;;  %v4455_v7 = vld [vmem:[#allocation4 + $0x120] sm:$0xff] }
 0x568   :  { %v4649_v2 = vld [vmem:[#allocation4 + $0x122] sm:$0xff] }
 0x569   :  { %v4552_v17 = vld [vmem:[#allocation4 + $0x121] sm:$0xff] }
 0x56a   :  { %4690 = vrot.lane.b32.xlu0 %v4356_v26, %s6992_s15 }
 0x56b   :  { %4788 = vrot.lane.b32.xlu1 %v9818_v24, %s6993_s30 }
 0x56e   :  { %4308 = vrot.lane.b32.xlu0 %v4261_v18, %s6987_s13 }
 0x56f   :  { %4500 = vrot.lane.b32.xlu1 %v9882_v41, %s6990_s24 }
 0x572   :  { %4692 = vrot.lane.b32.xlu0 %v4357_v58, %s6992_s15 }
 0x573   :  { %4885 = vrot.lane.b32.xlu1 %v4550_v43, %s6994_s28 }
 0x576   :  { %4405 = vrot.lane.b32.xlu0 %v4358_v42, %s6989_s0 }
 0x577   :  { %4597 = vrot.lane.b32.xlu1 %v4261_v18, %s6991_s14 }
 0x579   :  { %v4491_v19 = vpop.permute.xlu0 %4490 }
 0x57a   :  { %v4588_v11 = vpop.permute.xlu1 %4587  ;;  %4530 = vst.msk [vmem:[#allocation5 + $0x48] sm:$0xff] %vm4520_vm1, %v4491_v19  ;;  %4790 = vrot.lane.b32.xlu0 %v9882_v41, %s6993_s30 }
 0x57b   :  { %4627 = vst.msk [vmem:[#allocation5 + $0x48] sm:$0xff] %vm4617_vm2, %v4588_v11  ;;  %4982 = vrot.lane.b32.xlu1 %v4357_v58, %s6995_s18 }
 0x57d   :  { %v4876_v24 = vpop.permute.xlu0 %4875 }
 0x57e   :  { %v4973_v6 = vpop.permute.xlu1 %4972  ;;  %4917 = vst.msk [vmem:[#allocation5 + $0x38] sm:$0xff] %vm4909_vm5, %v4876_v24  ;;  %4502 = vrot.lane.b32.xlu0 %v4455_v7, %s6990_s24  ;;  %s6998_s24 = smov 96  }
 0x57f   :  { %5014 = vst.msk [vmem:[#allocation5 + $0x38] sm:$0xff] %vm5006_vm6, %v4973_v6  ;;  %4694 = vrot.lane.b32.xlu1 %v4358_v42, %s6992_s15 }
 0x580   :  { %v6873_v4 = vpop.f32.mrb[22].mxu1 }
 0x581   :  { %v4299_v9 = vpop.permute.xlu0 %4298  ;;  %v5176_v5 = vadd.f32 %v6873_v4, %v9943_v31  ;;  %v5170_v53 = vpop.f32.mrb[23].mxu1 }
 0x582   :  { %v4396_v63 = vpop.permute.xlu1 %4395  ;;  %4337 = vst.msk [vmem:[#allocation5 + $0x50] sm:$0xff] %vm4326_vm15, %v4299_v9  ;;  %4887 = vrot.lane.b32.xlu0 %v4261_v18, %s6994_s28  ;;  %v5171_v8 = vadd.f32 %v9943_v31, %v5170_v53 }
 0x583   :  { %4434 = vst.msk [vmem:[#allocation5 + $0x50] sm:$0xff] %vm4423_vm0, %v4396_v63  ;;  %4696 = vrot.lane.b32.xlu1 %v4649_v2, %s6992_s15  ;;  %s6999_s15 = smov 112  }
 0x584   :  { %5251 = vst.msk [vmem:[#allocation6 + $0x8] sm:$0xff] %vm5249_vm8, %v5176_v5  ;;  %5250 = vst.msk [vmem:[#allocation6] sm:$0xff] %vm5249_vm8, %v5171_v8 }
 0x585   :  { %v4683_v15 = vpop.permute.xlu0 %4682 }
 0x586   :  { %v4781_v47 = vpop.permute.xlu1 %4780  ;;  %4723 = vst.msk [vmem:[#allocation5 + $0x40] sm:$0xff] %vm4714_vm3, %v4683_v15  ;;  %v5030_v21 = vld [vmem:[#allocation5 + $0x38] sm:$0xff]  ;;  %4599 = vrot.lane.b32.xlu0 %v4552_v17, %s6991_s14 }
 0x587   :  { %4821 = vst.msk [vmem:[#allocation5 + $0x40] sm:$0xff] %vm4812_vm4, %v4781_v47  ;;  %4794 = vrot.lane.b32.xlu1 %v4747_v62, %s6993_s30  ;;  %6881 = vmatmul.mubr.msk.f32.gmra.mrb[28].mxu1 %vm5055_vm7, %v5030_v21 }
 0x58a   :  { %4984 = vrot.lane.b32.xlu0 %v4358_v42, %s6995_s18 }
 0x58b   :  { %4891 = vrot.lane.b32.xlu1 %v4844_v46, %s6994_s28 }
 0x58e   :  { %4792 = vrot.lane.b32.xlu0 %v4455_v7, %s6993_s30 }
 0x58f   :  { %4988 = vrot.lane.b32.xlu1 %v4941_v23, %s6995_s18 }
 0x592   :  { %4889 = vrot.lane.b32.xlu0 %v4552_v17, %s6994_s28 }
 0x596   :  { %4986 = vrot.lane.b32.xlu0 %v4649_v2, %s6995_s18 }
 0x5a0   :  { %v4301_v22 = vpop.permute.xlu0 %4300  ;;  %v6876_v20 = vpop.f32.mrb[24].mxu1 }
 0x5a1   :  { %v4493_v28 = vpop.permute.xlu1 %4492  ;;  %4338 = vst.msk [vmem:[#allocation5 + $0x58] sm:$0xff] %vm4326_vm15, %v4301_v22  ;;  %v5186_v32 = vadd.f32 %v6876_v20, %v9943_v31  ;;  %v5180_v33 = vpop.f32.mrb[25].mxu1 }
 0x5a2   :  { %4531 = vst.msk [vmem:[#allocation5 + $0x50] sm:$0xff] %vm4520_vm1, %v4493_v28  ;;  %v5181_v34 = vadd.f32 %v9943_v31, %v5180_v33 }
 0x5a3   :  { %5253 = vst.msk [vmem:[#allocation6 + $0x18] sm:$0xff] %vm5249_vm8, %v5186_v32 }
 0x5a4   :  { %v4685_v35 = vpop.permute.xlu0 %4684  ;;  %5252 = vst.msk [vmem:[#allocation6 + $0x10] sm:$0xff] %vm5249_vm8, %v5181_v34 }
 0x5a5   :  { %v4878_v36 = vpop.permute.xlu1 %4877  ;;  %4724 = vst.msk [vmem:[#allocation5 + $0x48] sm:$0xff] %vm4714_vm3, %v4685_v35 }
 0x5a6   :  { %4918 = vst.msk [vmem:[#allocation5 + $0x40] sm:$0xff] %vm4909_vm5, %v4878_v36 }
 0x5a8   :  { %v4398_v51 = vpop.permute.xlu0 %4397 }
 0x5a9   :  { %v4590_v30 = vpop.permute.xlu1 %4589  ;;  %4435 = vst.msk [vmem:[#allocation5 + $0x58] sm:$0xff] %vm4423_vm0, %v4398_v51 }
 0x5aa   :  { %4628 = vst.msk [vmem:[#allocation5 + $0x50] sm:$0xff] %vm4617_vm2, %v4590_v30 }
 0x5ac   :  { %v4783_v37 = vpop.permute.xlu0 %4782 }
 0x5ad   :  { %v4975_v12 = vpop.permute.xlu1 %4974  ;;  %4822 = vst.msk [vmem:[#allocation5 + $0x48] sm:$0xff] %vm4812_vm4, %v4783_v37 }
 0x5ae   :  { %5015 = vst.msk [vmem:[#allocation5 + $0x40] sm:$0xff] %vm5006_vm6, %v4975_v12 }
 0x5b0   :  { %v4495_v38 = vpop.permute.xlu0 %4494 }
 0x5b1   :  { %v4592_v50 = vpop.permute.xlu1 %4591  ;;  %4532 = vst.msk [vmem:[#allocation5 + $0x58] sm:$0xff] %vm4520_vm1, %v4495_v38 }
 0x5b2   :  { %4629 = vst.msk [vmem:[#allocation5 + $0x58] sm:$0xff] %vm4617_vm2, %v4592_v50  ;;  %v5288_v50 = vlaneseq }
 0x5b4   :  { %v4880_v14 = vpop.permute.xlu0 %4879 }
 0x5b5   :  { %v4977_v25 = vpop.permute.xlu1 %4976  ;;  %v5031_v39 = vld [vmem:[#allocation5 + $0x40] sm:$0xff]  ;;  %4919 = vst.msk [vmem:[#allocation5 + $0x48] sm:$0xff] %vm4909_vm5, %v4880_v14  ;;  %v5321_v14 = vld [vmem:[#allocation6 + $0xa] sm:$0x1] }
 0x5b6   :  { %6883 = vmatprep.mubr.msk.f32.mxu1 %vm5055_vm7, %v5031_v39  ;;  %5016 = vst.msk [vmem:[#allocation5 + $0x48] sm:$0xff] %vm5006_vm6, %v4977_v25  ;;  %v5323_v25 = vld [vmem:[#allocation6 + $0xb] sm:$0x1]  ;;  %v5315_v39 = vld [vmem:[#allocation6 + $0x2] sm:$0x1] }
 0x5b8   :  { %v4303_v45 = vpop.permute.xlu0 %4302 }
 0x5b9   :  { %v4400_v40 = vpop.permute.xlu1 %4399  ;;  %4339 = vst.msk [vmem:[#allocation5 + $0x60] sm:$0xff] %vm4326_vm15, %v4303_v45  ;;  %v5317_v45 = vld [vmem:[#allocation6 + $0x3] sm:$0x1] }
 0x5ba   :  { %4436 = vst.msk [vmem:[#allocation5 + $0x60] sm:$0xff] %vm4423_vm0, %v4400_v40  ;;  %v5359_v40 = vld [vmem:[#allocation6 + $0x4] sm:$0x1] }
 0x5bc   :  { %v4687_v41 = vpop.permute.xlu0 %4686 }
 0x5bd   :  { %v4785_v44 = vpop.permute.xlu1 %4784  ;;  %4725 = vst.msk [vmem:[#allocation5 + $0x50] sm:$0xff] %vm4714_vm3, %v4687_v41  ;;  %v5032_v48 = vld [vmem:[#allocation5 + $0x48] sm:$0xff] }
 0x5be   :  { %4823 = vst.msk [vmem:[#allocation5 + $0x50] sm:$0xff] %vm4812_vm4, %v4785_v44  ;;  %6884 = vmatmul.mubr.msk.f32.gmra.mrb[30].mxu1 %vm5055_vm7, %v5032_v48  ;;  %v5365_v41 = vld [vmem:[#allocation6 + $0xc] sm:$0x1]  ;;  %v5361_v44 = vld [vmem:[#allocation6 + $0x5] sm:$0x1] }
 0x5bf   :  { %v5367_v48 = vld [vmem:[#allocation6 + $0xd] sm:$0x1] }
 0x5c0   :  { %v4305_v49 = vpop.permute.xlu0 %4304  ;;  %v6879_v55 = vpop.f32.mrb[26].mxu1 }
 0x5c1   :  { %v4497_v52 = vpop.permute.xlu1 %4496  ;;  %4340 = vst.msk [vmem:[#allocation5 + $0x68] sm:$0xff] %vm4326_vm15, %v4305_v49  ;;  %v5196_v56 = vadd.f32 %v6879_v55, %v9943_v31  ;;  %v5190_v54 = vpop.f32.mrb[27].mxu1  ;;  %v5403_v49 = vld [vmem:[#allocation6 + $0x6] sm:$0x1] }
 0x5c2   :  { %4533 = vst.msk [vmem:[#allocation5 + $0x60] sm:$0xff] %vm4520_vm1, %v4497_v52  ;;  %v5191_v29 = vadd.f32 %v9943_v31, %v5190_v54  ;;  %v6996_v52 = vmov 1983009808   ;;  %v5409_v54 = vld [vmem:[#allocation6 + $0xe] sm:$0x1] }
 0x5c3   :  { %5255 = vst.msk [vmem:[#allocation6 + $0x28] sm:$0xff] %vm5249_vm8, %v5196_v56  ;;  %v5286_v55 = vunpack.c.l.s4 %v6996_v52  ;;  %v5405_v56 = vld [vmem:[#allocation6 + $0x7] sm:$0x1] }
 0x5c4   :  { %v4689_v27 = vpop.permute.xlu0 %4688  ;;  %5254 = vst.msk [vmem:[#allocation6 + $0x20] sm:$0xff] %vm5249_vm8, %v5191_v29  ;;  %v5411_v29 = vld [vmem:[#allocation6 + $0xf] sm:$0x1] }
 0x5c5   :  { %v4882_v57 = vpop.permute.xlu1 %4881  ;;  %4726 = vst.msk [vmem:[#allocation5 + $0x58] sm:$0xff] %vm4714_vm3, %v4689_v27  ;;  %v5289_v27 = vshrl.u32 %v5288_v50, 7 }
 0x5c6   :  { %4920 = vst.msk [vmem:[#allocation5 + $0x50] sm:$0xff] %vm4909_vm5, %v4882_v57  ;;  %v5319_v57 = vmax.f32 %v5315_v39, %v5317_v45 }
 0x5c8   :  { %v4402_v60 = vpop.permute.xlu0 %4401 }
 0x5c9   :  { %v4594_v61 = vpop.permute.xlu1 %4593  ;;  %4437 = vst.msk [vmem:[#allocation5 + $0x68] sm:$0xff] %vm4423_vm0, %v4402_v60  ;;  %v5325_v60 = vmax.f32 %v5321_v14, %v5323_v25 }
 0x5ca   :  { %4630 = vst.msk [vmem:[#allocation5 + $0x60] sm:$0xff] %vm4617_vm2, %v4594_v61  ;;  %v5273_v61 = vld [vmem:[#allocation6 + $0x8] sm:$0x1] }
 0x5cc   :  { %v4787_v10 = vpop.permute.xlu0 %4786 }
 0x5cd   :  { %v4979_v26 = vpop.permute.xlu1 %4978  ;;  %4824 = vst.msk [vmem:[#allocation5 + $0x58] sm:$0xff] %vm4812_vm4, %v4787_v10  ;;  %v5275_v10 = vld [vmem:[#allocation6 + $0x9] sm:$0x1] }
 0x5ce   :  { %5017 = vst.msk [vmem:[#allocation5 + $0x50] sm:$0xff] %vm5006_vm6, %v4979_v26  ;;  %v5266_v26 = vld [vmem:[#allocation6] sm:$0x1] }
 0x5d0   :  { %v4499_v1 = vpop.permute.xlu0 %4498 }
 0x5d1   :  { %v4596_v3 = vpop.permute.xlu1 %4595  ;;  %4534 = vst.msk [vmem:[#allocation5 + $0x68] sm:$0xff] %vm4520_vm1, %v4499_v1  ;;  %v5268_v1 = vld [vmem:[#allocation6 + $0x1] sm:$0x1] }
 0x5d2   :  { %4631 = vst.msk [vmem:[#allocation5 + $0x68] sm:$0xff] %vm4617_vm2, %v4596_v3  ;;  %v5363_v3 = vmax.f32 %v5359_v40, %v5361_v44 }
 0x5d4   :  { %v4884_v13 = vpop.permute.xlu0 %4883 }
 0x5d5   :  { %v4981_v0 = vpop.permute.xlu1 %4980  ;;  %v5033_v16 = vld [vmem:[#allocation5 + $0x50] sm:$0xff]  ;;  %4921 = vst.msk [vmem:[#allocation5 + $0x58] sm:$0xff] %vm4909_vm5, %v4884_v13  ;;  %v5369_v13 = vmax.f32 %v5365_v41, %v5367_v48 }
 0x5d6   :  { %6886 = vmatprep.mubr.msk.f32.mxu1 %vm5055_vm7, %v5033_v16  ;;  %5018 = vst.msk [vmem:[#allocation5 + $0x58] sm:$0xff] %vm5006_vm6, %v4981_v0  ;;  %v5407_v0 = vmax.f32 %v5403_v49, %v5405_v56  ;;  %v5413_v16 = vmax.f32 %v5409_v54, %v5411_v29 }
 0x5d8   :  { %v4307_v59 = vpop.permute.xlu0 %4306 }
 0x5d9   :  { %v4404_v43 = vpop.permute.xlu1 %4403  ;;  %4341 = vst.msk [vmem:[#allocation5 + $0x70] sm:$0xff] %vm4326_vm15, %v4307_v59  ;;  %v5287_v59 = vunpack.c.0.s8 %v5286_v55 }
 0x5da   :  { %4438 = vst.msk [vmem:[#allocation5 + $0x70] sm:$0xff] %vm4423_vm0, %v4404_v43 }
 0x5dc   :  { %v4691_v58 = vpop.permute.xlu0 %4690 }
 0x5dd   :  { %v4789_v18 = vpop.permute.xlu1 %4788  ;;  %4727 = vst.msk [vmem:[#allocation5 + $0x60] sm:$0xff] %vm4714_vm3, %v4691_v58  ;;  %v5034_v42 = vld [vmem:[#allocation5 + $0x58] sm:$0xff] }
 0x5de   :  { %4825 = vst.msk [vmem:[#allocation5 + $0x60] sm:$0xff] %vm4812_vm4, %v4789_v18  ;;  %6887 = vmatmul.mubr.msk.f32.gmra.mrb[32].mxu1 %vm5055_vm7, %v5034_v42 }
 0x5e0   :  { %v4309_v19 = vpop.permute.xlu0 %4308 }
 0x5e1   :  { %v4501_v11 = vpop.permute.xlu1 %4500  ;;  %4342 = vst.msk [vmem:[#allocation5 + $0x78] sm:$0xff] %vm4326_vm15, %v4309_v19  ;;  %vm5401_vm15 = vcmask 386304  }
 0x5e2   :  { %4535 = vst.msk [vmem:[#allocation5 + $0x70] sm:$0xff] %vm4520_vm1, %v4501_v11 }
 0x5e4   :  { %v4693_v24 = vpop.permute.xlu0 %4692 }
 0x5e5   :  { %v4886_v6 = vpop.permute.xlu1 %4885  ;;  %4728 = vst.msk [vmem:[#allocation5 + $0x68] sm:$0xff] %vm4714_vm3, %v4693_v24  ;;  %v5327_v24 = vmax.f32 %v5319_v57, %v5325_v60 }
 0x5e6   :  { %4922 = vst.msk [vmem:[#allocation5 + $0x60] sm:$0xff] %vm4909_vm5, %v4886_v6 }
 0x5e8   :  { %v4406_v7 = vpop.permute.xlu0 %4405 }
 0x5e9   :  { %v4598_v9 = vpop.permute.xlu1 %4597  ;;  %4439 = vst.msk [vmem:[#allocation5 + $0x78] sm:$0xff] %vm4423_vm0, %v4406_v7  ;;  %v5277_v7 = vmax.f32 %v5273_v61, %v5275_v10  ;;  %vm5445_vm0 = vcmask 517504  }
 0x5ea   :  { %4632 = vst.msk [vmem:[#allocation5 + $0x70] sm:$0xff] %vm4617_vm2, %v4598_v9  ;;  %v5270_v9 = vmax.f32 %v5266_v26, %v5268_v1 }
 0x5ec   :  { %v4791_v63 = vpop.permute.xlu0 %4790 }
 0x5ed   :  { %v4983_v4 = vpop.permute.xlu1 %4982  ;;  %4826 = vst.msk [vmem:[#allocation5 + $0x68] sm:$0xff] %vm4812_vm4, %v4791_v63 }
 0x5ee   :  { %5019 = vst.msk [vmem:[#allocation5 + $0x60] sm:$0xff] %vm5006_vm6, %v4983_v4 }
 0x5f0   :  { %v4503_v2 = vpop.permute.xlu0 %4502 }
 0x5f1   :  { %v4695_v5 = vpop.permute.xlu1 %4694  ;;  %4536 = vst.msk [vmem:[#allocation5 + $0x78] sm:$0xff] %vm4520_vm1, %v4503_v2  ;;  %vm5491_vm1 = vcmask 648704  }
 0x5f2   :  { %4729 = vst.msk [vmem:[#allocation5 + $0x70] sm:$0xff] %vm4714_vm3, %v4695_v5 }
 0x5f4   :  { %v4888_v53 = vpop.permute.xlu0 %4887 }
 0x5f5   :  { %v4697_v8 = vpop.permute.xlu1 %4696  ;;  %v5035_v62 = vld [vmem:[#allocation5 + $0x60] sm:$0xff]  ;;  %4923 = vst.msk [vmem:[#allocation5 + $0x68] sm:$0xff] %vm4909_vm5, %v4888_v53 }
 0x5f6   :  { %6889 = vmatprep.mubr.msk.f32.mxu1 %vm5055_vm7, %v5035_v62  ;;  %v5371_v62 = vmax.f32 %v5363_v3, %v5369_v13 }
 0x5f8   :  { %v4600_v15 = vpop.permute.xlu0 %4599  ;;  %v5373_v50 = vmax.f32 %v5371_v62, 0.0  ;;  %v5450_v62 = vld [vmem:[#allocation6 + $0x11] sm:$0x1] }
 0x5f9   :  { %v4795_v47 = vpop.permute.xlu1 %4794  ;;  %4633 = vst.msk [vmem:[#allocation5 + $0x78] sm:$0xff] %vm4617_vm2, %v4600_v15  ;;  %vm5535_vm2 = vcmask 779904  }
 0x5fa   :  { %4730 = vst.msk [vmem:[#allocation5 + $0x78] sm:$0xff] %vm4714_vm3, %v4697_v8  ;;  %vm5579_vm3 = vcmask 911104  }
 0x5fb   :  { %4828 = vst.msk [vmem:[#allocation5 + $0x78] sm:$0xff] %vm4812_vm4, %v4795_v47 }
 0x5fc   :  { %v4985_v17 = vpop.permute.xlu0 %4984 }
 0x5fd   :  { %v4892_v21 = vpop.permute.xlu1 %4891  ;;  %5020 = vst.msk [vmem:[#allocation5 + $0x68] sm:$0xff] %vm5006_vm6, %v4985_v17 }
 0x5fe   :  { %4925 = vst.msk [vmem:[#allocation5 + $0x78] sm:$0xff] %vm4909_vm5, %v4892_v21  ;;  %v5415_v21 = vmax.f32 %v5407_v0, %v5413_v16 }
 0x600   :  { %v4793_v46 = vpop.permute.xlu0 %4792  ;;  %v5417_v25 = vmax.f32 %v5415_v21, 0.0  ;;  %v5537_v21 = vld [vmem:[#allocation6 + $0x14] sm:$0x1] }
 0x601   :  { %v4989_v23 = vpop.permute.xlu1 %4988  ;;  %4827 = vst.msk [vmem:[#allocation5 + $0x70] sm:$0xff] %vm4812_vm4, %v4793_v46  ;;  %v10040_v46 = vsub.s32 %v5287_v59, %v5289_v27  ;;  %vm5623_vm4 = vcmask 1042304  }
 0x602   :  { %5022 = vst.msk [vmem:[#allocation5 + $0x78] sm:$0xff] %vm5006_vm6, %v4989_v23 }
 0x603   :  { %v5383_v56 = vrot.slane %v5373_v50, %v10040_v46  ;;  %v5427_v29 = vrot.slane %v5417_v25, %v10040_v46 }
 0x604   :  { %v4890_v22 = vpop.permute.xlu0 %4889  ;;  %v5036_v28 = vld [vmem:[#allocation5 + $0x68] sm:$0xff] }
 0x605   :  { %4924 = vst.msk [vmem:[#allocation5 + $0x70] sm:$0xff] %vm4909_vm5, %v4890_v22  ;;  %6890 = vmatmul.mubr.msk.f32.gmra.mrb[34].mxu1 %vm5055_vm7, %v5036_v28  ;;  %vm6101_vm5 = vcmask 254976  }
 0x608   :  { %v4987_v20 = vpop.permute.xlu0 %4986 }
 0x609   :  { %5021 = vst.msk [vmem:[#allocation5 + $0x70] sm:$0xff] %vm5006_vm6, %v4987_v20  ;;  %v5038_v32 = vld [vmem:[#allocation5 + $0x78] sm:$0xff]  ;;  %vm6119_vm6 = vcmask 1024  }
 0x610   :  { %v5037_v33 = vld [vmem:[#allocation5 + $0x70] sm:$0xff] }
 0x611   :  { %6892 = vmatprep.mubr.msk.f32.mxu1 %vm5055_vm7, %v5037_v33 }
 0x612   :  { %6893 = vmatmul.mubr.msk.f32.gmra.mrb[36].mxu1 %vm5055_vm7, %v5038_v32 }
 0x65a   :  { %v6882_v34 = vpop.f32.mrb[28].mxu1 }
 0x65b   :  { %v5206_v35 = vadd.f32 %v6882_v34, %v9943_v31  ;;  %v5200_v36 = vpop.f32.mrb[29].mxu1  ;;  %v5329_v34 = vmax.f32 %v5327_v24, 0.0 }
 0x65c   :  { %v5201_v51 = vadd.f32 %v9943_v31, %v5200_v36 }
 0x65d   :  { %5257 = vst.msk [vmem:[#allocation6 + $0x38] sm:$0xff] %vm5249_vm8, %v5206_v35  ;;  %v5339_v41 = vrot.slane %v5329_v34, %v10040_v46 }
 0x65e   :  { %5256 = vst.msk [vmem:[#allocation6 + $0x30] sm:$0xff] %vm5249_vm8, %v5201_v51 }
 0x691   :  { %v6885_v30 = vpop.f32.mrb[30].mxu1 }
 0x692   :  { %v5216_v37 = vadd.f32 %v6885_v30, %v9943_v31  ;;  %v5210_v12 = vpop.f32.mrb[31].mxu1  ;;  %v5279_v30 = vmax.f32 %v5270_v9, %v5277_v7 }
 0x693   :  { %v5211_v38 = vadd.f32 %v9943_v31, %v5210_v12 }
 0x694   :  { %5259 = vst.msk [vmem:[#allocation6 + $0x48] sm:$0xff] %vm5249_vm8, %v5216_v37  ;;  %v5281_v48 = vmax.f32 %v5279_v30, 0.0  ;;  %v5583_v30 = vld [vmem:[#allocation6 + $0x17] sm:$0x1] }
 0x695   :  { %5258 = vst.msk [vmem:[#allocation6 + $0x40] sm:$0xff] %vm5249_vm8, %v5211_v38 }
 0x696   :  { %v5291_v26 = vrot.slane %v5281_v48, %v10040_v46 }
 0x69b   :  { %v5322_v43 = vld [vmem:[#allocation6 + $0x4a] sm:$0x1]  ;;  %v5324_v58 = vld [vmem:[#allocation6 + $0x4b] sm:$0x1]  ;;  %v5366_v18 = vld [vmem:[#allocation6 + $0x4c] sm:$0x1] }
 0x69c   :  { %v5316_v42 = vld [vmem:[#allocation6 + $0x42] sm:$0x1]  ;;  %v5318_v19 = vld [vmem:[#allocation6 + $0x43] sm:$0x1]  ;;  %v5326_v11 = vmax.f32 %v5322_v43, %v5324_v58  ;;  %v5360_v6 = vld [vmem:[#allocation6 + $0x44] sm:$0x1] }
 0x69d   :  { %v5320_v63 = vmax.f32 %v5316_v42, %v5318_v19  ;;  %v5362_v4 = vld [vmem:[#allocation6 + $0x45] sm:$0x1]  ;;  %v5368_v2 = vld [vmem:[#allocation6 + $0x4d] sm:$0x1]  ;;  %v5404_v5 = vld [vmem:[#allocation6 + $0x46] sm:$0x1] }
 0x69e   :  { %v5364_v53 = vmax.f32 %v5360_v6, %v5362_v4  ;;  %v5370_v8 = vmax.f32 %v5366_v18, %v5368_v2  ;;  %v5406_v15 = vld [vmem:[#allocation6 + $0x47] sm:$0x1]  ;;  %v5410_v47 = vld [vmem:[#allocation6 + $0x4e] sm:$0x1]  ;;  %v5412_v17 = vld [vmem:[#allocation6 + $0x4f] sm:$0x1] }
 0x69f   :  { %v5328_v23 = vmax.f32 %v5320_v63, %v5326_v11  ;;  %v5408_v22 = vmax.f32 %v5404_v5, %v5406_v15  ;;  %v5414_v28 = vmax.f32 %v5410_v47, %v5412_v17  ;;  %v5267_v20 = vld [vmem:[#allocation6 + $0x40] sm:$0x1]  ;;  %v5269_v32 = vld [vmem:[#allocation6 + $0x41] sm:$0x1]  ;;  %v5274_v33 = vld [vmem:[#allocation6 + $0x48] sm:$0x1] }
 0x6a0   :  { %v5372_v35 = vmax.f32 %v5364_v53, %v5370_v8  ;;  %v5271_v36 = vmax.f32 %v5267_v20, %v5269_v32  ;;  %v5276_v51 = vld [vmem:[#allocation6 + $0x49] sm:$0x1]  ;;  %v5455_v2 = vld [vmem:[#allocation6 + $0x18] sm:$0x1]  ;;  %v5457_v5 = vld [vmem:[#allocation6 + $0x19] sm:$0x1] }
 0x6a1   :  { %v5330_v37 = vmax.f32 %v5328_v23, 0.0  ;;  %v5416_v12 = vmax.f32 %v5408_v22, %v5414_v28  ;;  %v5278_v38 = vmax.f32 %v5274_v33, %v5276_v51  ;;  %v5499_v53 = vld [vmem:[#allocation6 + $0x1a] sm:$0x1]  ;;  %v5448_v8 = vld [vmem:[#allocation6 + $0x10] sm:$0x1]  ;;  %v5459_v32 = vmax.f32 %v5455_v2, %v5457_v5 }
 0x6a2   :  { %v5374_v14 = vmax.f32 %v5372_v35, 0.0  ;;  %v5493_v15 = vld [vmem:[#allocation6 + $0x12] sm:$0x1]  ;;  %v5495_v47 = vld [vmem:[#allocation6 + $0x13] sm:$0x1]  ;;  %v5452_v20 = vmax.f32 %v5448_v8, %v5450_v62 }
 0x6a3   :  { %v5346_v39 = vrot.slane %v5330_v37, %v10040_v46  ;;  %v5418_v45 = vmax.f32 %v5416_v12, 0.0  ;;  %v5280_v40 = vmax.f32 %v5271_v36, %v5278_v38  ;;  %v5501_v17 = vld [vmem:[#allocation6 + $0x1b] sm:$0x1]  ;;  %v5539_v23 = vld [vmem:[#allocation6 + $0x15] sm:$0x1]  ;;  %v5497_v33 = vmax.f32 %v5493_v15, %v5495_v47 }
 0x6a4   :  { %v5390_v44 = vrot.slane %v5374_v14, %v10040_v46  ;;  %v5543_v22 = vld [vmem:[#allocation6 + $0x1c] sm:$0x1]  ;;  %v5545_v28 = vld [vmem:[#allocation6 + $0x1d] sm:$0x1]  ;;  %v5503_v34 = vmax.f32 %v5499_v53, %v5501_v17  ;;  %v5581_v35 = vld [vmem:[#allocation6 + $0x16] sm:$0x1]  ;;  %v5541_v36 = vmax.f32 %v5537_v21, %v5539_v23 }
 0x6a5   :  { %v5349_v49 = vrot.slane %v5346_v39, 7  ;;  %v5434_v52 = vrot.slane %v5418_v45, %v10040_v46  ;;  %v5282_v55 = vmax.f32 %v5280_v40, 0.0  ;;  %v5547_v51 = vmax.f32 %v5543_v22, %v5545_v28  ;;  %v5587_v37 = vld [vmem:[#allocation6 + $0x1e] sm:$0x1]  ;;  %v5589_v12 = vld [vmem:[#allocation6 + $0x1f] sm:$0x1] }
 0x6a6   :  { %v5393_v54 = vrot.slane %v5390_v44, 7  ;;  %v5461_v44 = vmax.f32 %v5452_v20, %v5459_v32 }
 0x6a7   :  { %v5350_v27 = vsel %vm5304_vm9, %v5349_v49, %v5339_v41  ;;  %v5437_v57 = vrot.slane %v5434_v52, 7  ;;  %v5298_v60 = vrot.slane %v5282_v55, %v10040_v46  ;;  %v5505_v52 = vmax.f32 %v5497_v33, %v5503_v34 }
 0x6a8   :  { %v5351_v61 = vsel %vm5306_vm10, %v5349_v49, %v5350_v27  ;;  %v5394_v10 = vsel %vm5304_vm9, %v5393_v54, %v5383_v56 }
 0x6a9   :  { %v5352_v1 = vsel %vm5308_vm11, %v5349_v49, %v5351_v61  ;;  %v5395_v3 = vsel %vm5306_vm10, %v5393_v54, %v5394_v10  ;;  %v5438_v13 = vsel %vm5304_vm9, %v5437_v57, %v5427_v29  ;;  %v5303_v0 = vrot.slane %v5298_v60, 7 }
 0x6aa   :  { %v5353_v16 = vsel %vm5310_vm12, %v5349_v49, %v5352_v1  ;;  %v5396_v59 = vsel %vm5308_vm11, %v5393_v54, %v5395_v3  ;;  %v5439_v58 = vsel %vm5306_vm10, %v5437_v57, %v5438_v13  ;;  %v5549_v60 = vmax.f32 %v5541_v36, %v5547_v51 }
 0x6ab   :  { %5354 = vrot.lane.b32.xlu0 %v5353_v16, %s6989_s0  ;;  %v5305_v43 = vsel %vm5304_vm9, %v5303_v0, %v5291_v26  ;;  %v5397_v19 = vsel %vm5310_vm12, %v5393_v54, %v5396_v59  ;;  %v5440_v24 = vsel %vm5308_vm11, %v5437_v57, %v5439_v58  ;;  %v5585_v61 = vmax.f32 %v5581_v35, %v5583_v30 }
 0x6ac   :  { %v5307_v18 = vsel %vm5306_vm10, %v5303_v0, %v5305_v43  ;;  %v5441_v63 = vsel %vm5310_vm12, %v5437_v57, %v5440_v24  ;;  %v5591_v16 = vmax.f32 %v5587_v37, %v5589_v12  ;;  %v5507_v24 = vmax.f32 %v5505_v52, 0.0 }
 0x6ad   :  { %v5309_v42 = vsel %vm5308_vm11, %v5303_v0, %v5307_v18  ;;  %v5463_v18 = vmax.f32 %v5461_v44, 0.0  ;;  %v5670_v44 = vld [vmem:[#allocation6 + $0x23] sm:$0x1] }
 0x6ae   :  { %v5311_v11 = vsel %vm5310_vm12, %v5303_v0, %v5309_v42  ;;  %v5517_v47 = vrot.slane %v5507_v24, %v10040_v46  ;;  %v5635_v24 = vld [vmem:[#allocation6 + $0x29] sm:$0x1] }
 0x6af   :  { %5398 = vrot.lane.b32.xlu0 %v5397_v19, %s6991_s14  ;;  %5314 = vst.msk [vmem:[#allocation7] sm:$0x3] %vm5313_vm13, %v5311_v11  ;;  %v5473_v53 = vrot.slane %v5463_v18, %v10040_v46 }
 0x6b1   :  { %v6888_v6 = vpop.f32.mrb[32].mxu1 }
 0x6b2   :  { %v5226_v7 = vadd.f32 %v6888_v6, %v9943_v31  ;;  %v5220_v9 = vpop.f32.mrb[33].mxu1 }
 0x6b3   :  { %v5221_v4 = vadd.f32 %v9943_v31, %v5220_v9  ;;  %5442 = vrot.lane.b32.xlu0 %v5441_v63, %s6993_s30 }
 0x6b4   :  { %5261 = vst.msk [vmem:[#allocation6 + $0x58] sm:$0xff] %vm5249_vm8, %v5226_v7  ;;  %v5551_v7 = vmax.f32 %v5549_v60, 0.0  ;;  %v5762_v60 = vld [vmem:[#allocation6 + $0x2f] sm:$0x1] }
 0x6b5   :  { %5260 = vst.msk [vmem:[#allocation6 + $0x50] sm:$0xff] %vm5249_vm8, %v5221_v4  ;;  %v5593_v4 = vmax.f32 %v5585_v61, %v5591_v16 }
 0x6b6   :  { %v5561_v21 = vrot.slane %v5551_v7, %v10040_v46  ;;  %v5628_v7 = vld [vmem:[#allocation6 + $0x21] sm:$0x1] }
 0x6b7   :  { %v5595_v28 = vmax.f32 %v5593_v4, 0.0 }
 0x6b9   :  { %v5605_v12 = vrot.slane %v5595_v28, %v10040_v46  ;;  %v5887_v28 = vld [vmem:[#allocation6 + $0x35] sm:$0x1] }
 0x6bb   :  { %v5456_v38 = vld [vmem:[#allocation6 + $0x58] sm:$0x1]  ;;  %v5458_v50 = vld [vmem:[#allocation6 + $0x59] sm:$0x1]  ;;  %v5500_v14 = vld [vmem:[#allocation6 + $0x5a] sm:$0x1] }
 0x6bc   :  { %v5449_v25 = vld [vmem:[#allocation6 + $0x50] sm:$0x1]  ;;  %v5451_v39 = vld [vmem:[#allocation6 + $0x51] sm:$0x1]  ;;  %v5460_v45 = vmax.f32 %v5456_v38, %v5458_v50  ;;  %v5494_v40 = vld [vmem:[#allocation6 + $0x52] sm:$0x1] }
 0x6bd   :  { %v5453_v41 = vmax.f32 %v5449_v25, %v5451_v39  ;;  %v5496_v48 = vld [vmem:[#allocation6 + $0x53] sm:$0x1]  ;;  %v5502_v49 = vld [vmem:[#allocation6 + $0x5b] sm:$0x1]  ;;  %v5538_v55 = vld [vmem:[#allocation6 + $0x54] sm:$0x1] }
 0x6be   :  { %v5498_v56 = vmax.f32 %v5494_v40, %v5496_v48  ;;  %v5504_v54 = vmax.f32 %v5500_v14, %v5502_v49  ;;  %v5540_v29 = vld [vmem:[#allocation6 + $0x55] sm:$0x1]  ;;  %v5544_v27 = vld [vmem:[#allocation6 + $0x5c] sm:$0x1]  ;;  %v5546_v57 = vld [vmem:[#allocation6 + $0x5d] sm:$0x1] }
 0x6bf   :  { %v5462_v10 = vmax.f32 %v5453_v41, %v5460_v45  ;;  %v5542_v26 = vmax.f32 %v5538_v55, %v5540_v29  ;;  %v5548_v1 = vmax.f32 %v5544_v27, %v5546_v57  ;;  %v5582_v3 = vld [vmem:[#allocation6 + $0x56] sm:$0x1]  ;;  %v5584_v13 = vld [vmem:[#allocation6 + $0x57] sm:$0x1]  ;;  %v5588_v0 = vld [vmem:[#allocation6 + $0x5e] sm:$0x1] }
 0x6c0   :  { %v5506_v59 = vmax.f32 %v5498_v56, %v5504_v54  ;;  %v5586_v43 = vmax.f32 %v5582_v3, %v5584_v13  ;;  %v5590_v58 = vld [vmem:[#allocation6 + $0x5f] sm:$0x1]  ;;  %v5674_v45 = vld [vmem:[#allocation6 + $0x2a] sm:$0x1]  ;;  %v5676_v40 = vld [vmem:[#allocation6 + $0x2b] sm:$0x1] }
 0x6c1   :  { %v5464_v42 = vmax.f32 %v5462_v10, 0.0  ;;  %v5550_v19 = vmax.f32 %v5542_v26, %v5548_v1  ;;  %v5592_v11 = vmax.f32 %v5588_v0, %v5590_v58  ;;  %v5668_v41 = vld [vmem:[#allocation6 + $0x22] sm:$0x1]  ;;  %v5711_v48 = vld [vmem:[#allocation6 + $0x24] sm:$0x1]  ;;  %v5678_v10 = vmax.f32 %v5674_v45, %v5676_v40 }
 0x6c2   :  { %v5508_v6 = vmax.f32 %v5506_v59, 0.0  ;;  %v5717_v49 = vld [vmem:[#allocation6 + $0x2c] sm:$0x1]  ;;  %v5713_v55 = vld [vmem:[#allocation6 + $0x25] sm:$0x1]  ;;  %v5672_v61 = vmax.f32 %v5668_v41, %v5670_v44 }
 0x6c3   :  { %v5480_v9 = vrot.slane %v5464_v42, %v10040_v46  ;;  %v5552_v63 = vmax.f32 %v5550_v19, 0.0  ;;  %v5594_v2 = vmax.f32 %v5586_v43, %v5592_v11  ;;  %v5719_v56 = vld [vmem:[#allocation6 + $0x2d] sm:$0x1]  ;;  %v5754_v54 = vld [vmem:[#allocation6 + $0x26] sm:$0x1]  ;;  %v5715_v26 = vmax.f32 %v5711_v48, %v5713_v55 }
 0x6c4   :  { %v5524_v5 = vrot.slane %v5508_v6, %v10040_v46  ;;  %v5756_v27 = vld [vmem:[#allocation6 + $0x27] sm:$0x1]  ;;  %v5760_v57 = vld [vmem:[#allocation6 + $0x2e] sm:$0x1]  ;;  %v5721_v3 = vmax.f32 %v5717_v49, %v5719_v56  ;;  %v5680_v18 = vmax.f32 %v5672_v61, %v5678_v10  ;;  %v5633_v11 = vld [vmem:[#allocation6 + $0x28] sm:$0x1] }
 0x6c5   :  { %v5483_v8 = vrot.slane %v5480_v9, 7  ;;  %v5568_v62 = vrot.slane %v5552_v63, %v10040_v46  ;;  %v5596_v15 = vmax.f32 %v5594_v2, 0.0  ;;  %v5758_v13 = vmax.f32 %v5754_v54, %v5756_v27  ;;  %v5626_v6 = vld [vmem:[#allocation6 + $0x20] sm:$0x1]  ;;  %v5798_v2 = vld [vmem:[#allocation6 + $0x30] sm:$0x1] }
 0x6c6   :  { %v5527_v17 = vrot.slane %v5524_v5, 7  ;;  %v5764_v0 = vmax.f32 %v5760_v57, %v5762_v60  ;;  %v5723_v42 = vmax.f32 %v5715_v26, %v5721_v3  ;;  %v5682_v9 = vmax.f32 %v5680_v18, 0.0  ;;  %v5800_v5 = vld [vmem:[#allocation6 + $0x31] sm:$0x1]  ;;  %v5988_v3 = vld [vmem:[%s10339_s5 + $0x80] sm:$0xff] }
 0x6c7   :  { %v5484_v23 = vsel %vm5304_vm9, %v5483_v8, %v5473_v53  ;;  %v5571_v22 = vrot.slane %v5568_v62, 7  ;;  %v5612_v20 = vrot.slane %v5596_v15, %v10040_v46  ;;  %v5805_v53 = vld [vmem:[#allocation6 + $0x38] sm:$0x1]  ;;  %v5842_v62 = vld [vmem:[#allocation6 + $0x32] sm:$0x1]  ;;  %v5637_v15 = vmax.f32 %v5633_v11, %v5635_v24 }
 0x6c8   :  { %v5485_v32 = vsel %vm5306_vm10, %v5483_v8, %v5484_v23  ;;  %v5528_v33 = vsel %vm5304_vm9, %v5527_v17, %v5517_v47  ;;  %v5766_v19 = vmax.f32 %v5758_v13, %v5764_v0  ;;  %v5725_v63 = vmax.f32 %v5723_v42, 0.0  ;;  %v5850_v23 = vld [vmem:[#allocation6 + $0x3b] sm:$0x1]  ;;  %v10125_v11 = vld [vmem:[#allocation6 + $0x36] sm:$0x1] }
 0x6c9   :  { %v5486_v34 = vsel %vm5308_vm11, %v5483_v8, %v5485_v32  ;;  %v5529_v35 = vsel %vm5306_vm10, %v5527_v17, %v5528_v33  ;;  %v5572_v36 = vsel %vm5304_vm9, %v5571_v22, %v5561_v21  ;;  %v5615_v51 = vrot.slane %v5612_v20, 7  ;;  %v5848_v21 = vld [vmem:[#allocation6 + $0x3a] sm:$0x1]  ;;  %v5891_v20 = vld [vmem:[#allocation6 + $0x3c] sm:$0x1] }
 0x6ca   :  { %v5487_v30 = vsel %vm5310_vm12, %v5483_v8, %v5486_v34  ;;  %v5530_v37 = vsel %vm5308_vm11, %v5527_v17, %v5529_v35  ;;  %v5573_v38 = vsel %vm5306_vm10, %v5571_v22, %v5572_v36  ;;  %v5768_v4 = vmax.f32 %v5766_v19, 0.0  ;;  %v5807_v8 = vld [vmem:[#allocation6 + $0x39] sm:$0x1]  ;;  %v5893_v32 = vld [vmem:[#allocation6 + $0x3d] sm:$0x1] }
 0x6cb   :  { %5488 = vrot.lane.b32.xlu0 %v5487_v30, %s6995_s18  ;;  %v5616_v50 = vsel %vm5304_vm9, %v5615_v51, %v5605_v12  ;;  %v5531_v14 = vsel %vm5310_vm12, %v5527_v17, %v5530_v37  ;;  %v5574_v25 = vsel %vm5308_vm11, %v5571_v22, %v5573_v38  ;;  %v5630_v47 = vmax.f32 %v5626_v6, %v5628_v7  ;;  %v5844_v17 = vld [vmem:[#allocation6 + $0x33] sm:$0x1]  ;;  %v10127_v24 = vld [vmem:[#allocation6 + $0x37] sm:$0x1] }
 0x6cc   :  { %v5617_v39 = vsel %vm5306_vm10, %v5615_v51, %v5616_v50  ;;  %v5575_v52 = vsel %vm5310_vm12, %v5571_v22, %v5574_v25  ;;  %v5885_v22 = vld [vmem:[#allocation6 + $0x34] sm:$0x1]  ;;  %v10107_v37 = vrot.slane %v5682_v9, %v10040_v46  ;;  %v10110_v38 = vrot.slane %v5725_v63, %v10040_v46 }
 0x6cd   :  { %v5618_v29 = vsel %vm5308_vm11, %v5615_v51, %v5617_v39  ;;  %v10112_v50 = vmax.f32 %v5630_v47, %v5637_v15  ;;  %v5802_v40 = vmax.f32 %v5798_v2, %v5800_v5  ;;  %v5809_v41 = vmax.f32 %v5805_v53, %v5807_v8  ;;  %v5972_v5 = vld [vmem:[%s10339_s5] sm:$0xff]  ;;  %v5973_v53 = vld [vmem:[%s10339_s5 + $0x8] sm:$0xff]  ;;  %v5990_v8 = vld [vmem:[%s10339_s5 + $0x90] sm:$0xff] }
 0x6ce   :  { %v5619_v1 = vsel %vm5310_vm12, %v5615_v51, %v5618_v29  ;;  %v5846_v44 = vmax.f32 %v5842_v62, %v5844_v17  ;;  %v5852_v54 = vmax.f32 %v5848_v21, %v5850_v23  ;;  %v5889_v29 = vmax.f32 %v5885_v22, %v5887_v28  ;;  %v10147_v47 = vld [vmem:[#allocation6 + $0x3e] sm:$0x1]  ;;  %v10149_v17 = vld [vmem:[#allocation6 + $0x3f] sm:$0x1] }
 0x6cf   :  { %5532 = vrot.lane.b32.xlu0 %v5531_v14, %s6997_s4  ;;  %v5895_v26 = vmax.f32 %v5891_v20, %v5893_v32  ;;  %v10123_v19 = vmax.f32 %v5802_v40, %v5809_v41  ;;  %v6919_v23 = vpack.c.bf16 %v5973_v53, %v5972_v5  ;;  %v5991_v22 = vld [vmem:[%s10339_s5 + $0x98] sm:$0xff]  ;;  %v5641_v32 = vmax.f32 %v10112_v50, 0.0  ;;  %v5974_v50 = vld [vmem:[%s10339_s5 + $0x10] sm:$0xff] }
 0x6d1   :  { %v10145_v15 = vmax.f32 %v5889_v29, %v5895_v26 }
 0x6d3   :  { %5576 = vrot.lane.b32.xlu0 %v5575_v52, %s6998_s24  ;;  %v5899_v41 = vmax.f32 %v10145_v15, 0.0  ;;  %v6001_v15 = vld [vmem:[%s10339_s5 + $0xe8] sm:$0xff] }
 0x6d7   :  { %5620 = vrot.lane.b32.xlu0 %v5619_v1, %s6999_s15 }
 0x6d8   :  { %v6891_v16 = vpop.f32.mrb[34].mxu1 }
 0x6d9   :  { %v5236_v59 = vadd.f32 %v6891_v16, %v9943_v31  ;;  %v5230_v43 = vpop.f32.mrb[35].mxu1 }
 0x6da   :  { %v5231_v58 = vadd.f32 %v9943_v31, %v5230_v43 }
 0x6db   :  { %5263 = vst.msk [vmem:[#allocation6 + $0x68] sm:$0xff] %vm5249_vm8, %v5236_v59  ;;  %v10120_v59 = vrot.slane %v5768_v4, %v10040_v46  ;;  %v10133_v4 = vmax.f32 %v5846_v44, %v5852_v54 }
 0x6dc   :  { %5262 = vst.msk [vmem:[#allocation6 + $0x60] sm:$0xff] %vm5249_vm8, %v5231_v58 }
 0x6e2   :  { %v5675_v33 = vld [vmem:[#allocation6 + $0x6a] sm:$0x1]  ;;  %v5677_v34 = vld [vmem:[#allocation6 + $0x6b] sm:$0x1]  ;;  %v5718_v35 = vld [vmem:[#allocation6 + $0x6c] sm:$0x1] }
 0x6e3   :  { %v5669_v36 = vld [vmem:[#allocation6 + $0x62] sm:$0x1]  ;;  %v5671_v51 = vld [vmem:[#allocation6 + $0x63] sm:$0x1]  ;;  %v5679_v30 = vmax.f32 %v5675_v33, %v5677_v34  ;;  %v5712_v12 = vld [vmem:[#allocation6 + $0x64] sm:$0x1]  ;;  %v6921_v33 = vpack.c.bf16 %v5991_v22, %v5990_v8 }
 0x6e4   :  { %v5673_v14 = vmax.f32 %v5669_v36, %v5671_v51  ;;  %v5714_v25 = vld [vmem:[#allocation6 + $0x65] sm:$0x1]  ;;  %v5720_v39 = vld [vmem:[#allocation6 + $0x6d] sm:$0x1]  ;;  %v5755_v45 = vld [vmem:[#allocation6 + $0x66] sm:$0x1]  ;;  %v5932_v36 = vmax.f32 %v10125_v11, %v10127_v24 }
 0x6e5   :  { %v6894_v48 = vpop.f32.mrb[36].mxu1  ;;  %v5716_v49 = vmax.f32 %v5712_v12, %v5714_v25  ;;  %v5722_v52 = vmax.f32 %v5718_v35, %v5720_v39  ;;  %v5757_v55 = vld [vmem:[#allocation6 + $0x67] sm:$0x1]  ;;  %v5761_v56 = vld [vmem:[#allocation6 + $0x6e] sm:$0x1]  ;;  %v5813_v35 = vmax.f32 %v10123_v19, 0.0  ;;  %v5938_v25 = vmax.f32 %v10147_v47, %v10149_v17 }
 0x6e6   :  { %v5246_v27 = vadd.f32 %v6894_v48, %v9943_v31  ;;  %v5240_v57 = vpop.f32.mrb[37].mxu1  ;;  %v5681_v60 = vmax.f32 %v5673_v14, %v5679_v30  ;;  %v5759_v61 = vmax.f32 %v5755_v45, %v5757_v55  ;;  %v5763_v10 = vld [vmem:[#allocation6 + $0x6f] sm:$0x1]  ;;  %v5627_v1 = vld [vmem:[#allocation6 + $0x60] sm:$0x1]  ;;  %v5856_v14 = vmax.f32 %v10133_v4, 0.0 }
 0x6e7   :  { %v5241_v13 = vadd.f32 %v9943_v31, %v5240_v57  ;;  %v5724_v0 = vmax.f32 %v5716_v49, %v5722_v52  ;;  %v5765_v16 = vmax.f32 %v5761_v56, %v5763_v10  ;;  %v5629_v43 = vld [vmem:[#allocation6 + $0x61] sm:$0x1]  ;;  %v5634_v58 = vld [vmem:[#allocation6 + $0x68] sm:$0x1]  ;;  %v5636_v18 = vld [vmem:[#allocation6 + $0x69] sm:$0x1] }
 0x6e8   :  { %5265 = vst.msk [vmem:[#allocation6 + $0x78] sm:$0xff] %vm5249_vm8, %v5246_v27  ;;  %v5683_v42 = vmax.f32 %v5681_v60, 0.0  ;;  %v5631_v6 = vmax.f32 %v5627_v1, %v5629_v43  ;;  %v5638_v7 = vmax.f32 %v5634_v58, %v5636_v18  ;;  %v5989_v31 = vld [vmem:[%s10339_s5 + $0x88] sm:$0xff]  ;;  %v5975_v39 = vld [vmem:[%s10339_s5 + $0x18] sm:$0xff]  ;;  %v5992_v45 = vld [vmem:[%s10339_s5 + $0xa0] sm:$0xff] }
 0x6e9   :  { %5264 = vst.msk [vmem:[#allocation6 + $0x70] sm:$0xff] %vm5249_vm8, %v5241_v13  ;;  %v5726_v9 = vmax.f32 %v5724_v0, 0.0  ;;  %v5767_v63 = vmax.f32 %v5759_v61, %v5765_v16  ;;  %v6917_v2 = vpack.c.bf16 %v5989_v31, %v5988_v3  ;;  %v6923_v48 = vpack.c.bf16 %v5975_v39, %v5974_v50  ;;  %v5993_v49 = vld [vmem:[%s10339_s5 + $0xa8] sm:$0xff]  ;;  %v5976_v52 = vld [vmem:[%s10339_s5 + $0x20] sm:$0xff] }
 0x6ea   :  { %v5699_v62 = vrot.slane %v5683_v42, %v10040_v46  ;;  %v5640_v21 = vmax.f32 %v5631_v6, %v5638_v7  ;;  %v5977_v55 = vld [vmem:[%s10339_s5 + $0x28] sm:$0xff]  ;;  %v6925_v57 = vpack.c.bf16 %v5993_v49, %v5992_v45  ;;  %v5996_v45 = vld [vmem:[%s10339_s5 + $0xc0] sm:$0xff] }
 0x6eb   :  { %v5742_v28 = vrot.slane %v5726_v9, %v10040_v46  ;;  %v5769_v20 = vmax.f32 %v5767_v63, 0.0  ;;  %6918 = vmatprep.subr.bf16.mxu1 %v6917_v2  ;;  %v6927_v13 = vpack.c.bf16 %v5977_v55, %v5976_v52  ;;  %v5651_v9 = vrot.slane %v5641_v32, %v10040_v46 }
 0x6ec   :  { %v5702_v34 = vrot.slane %v5699_v62, 7  ;;  %v5642_v51 = vmax.f32 %v5640_v21, 0.0  ;;  %6920 = vmatpush3.bf16.msra.mxu1 %v6919_v23  ;;  %v10202_v62 = vmax.f32 %v5932_v36, %v5938_v25  ;;  %v5995_v36 = vld [vmem:[%s10339_s5 + $0xb8] sm:$0xff] }
 0x6ed   :  { %v5745_v30 = vrot.slane %v5742_v28, 7  ;;  %v5785_v12 = vrot.slane %v5769_v20, %v10040_v46  ;;  %6922 = vmatprep.subr.bf16.mxu1 %v6921_v33  ;;  %v5994_v20 = vld [vmem:[%s10339_s5 + $0xb0] sm:$0xff] }
 0x6ee   :  { %v5703_v40 = vsel %vm5304_vm9, %v5702_v34, %v10107_v37  ;;  %v5658_v44 = vrot.slane %v5642_v51, %v10040_v46  ;;  %v5978_v51 = vld [vmem:[%s10339_s5 + $0x30] sm:$0xff]  ;;  %v6929_v50 = vpack.c.bf16 %v5995_v36, %v5994_v20 }
 0x6ef   :  { %v5704_v56 = vsel %vm5306_vm10, %v5702_v34, %v5703_v40  ;;  %v5746_v37 = vsel %vm5304_vm9, %v5745_v30, %v10110_v38  ;;  %v10188_v54 = vrot.slane %v5785_v12, 7  ;;  %v5806_v29 = vld [vmem:[#allocation6 + $0x78] sm:$0x1]  ;;  %v5808_v27 = vld [vmem:[#allocation6 + $0x79] sm:$0x1]  ;;  %v5997_v40 = vld [vmem:[%s10339_s5 + $0xc8] sm:$0xff] }
 0x6f0   :  { %v5705_v60 = vsel %vm5308_vm11, %v5702_v34, %v5704_v56  ;;  %v5747_v61 = vsel %vm5306_vm10, %v5745_v30, %v5746_v37  ;;  %v5799_v10 = vld [vmem:[#allocation6 + $0x70] sm:$0x1]  ;;  %v5801_v26 = vld [vmem:[#allocation6 + $0x71] sm:$0x1]  ;;  %v5810_v1 = vmax.f32 %v5806_v29, %v5808_v27  ;;  %v5843_v3 = vld [vmem:[#allocation6 + $0x72] sm:$0x1]  ;;  %6924 = vmatpush3.bf16.msra.mxu1 %v6923_v48  ;;  %v6933_v55 = vpack.c.bf16 %v5997_v40, %v5996_v45 }
 0x6f1   :  { %v5706_v0 = vsel %vm5310_vm12, %v5702_v34, %v5705_v60  ;;  %v5748_v16 = vsel %vm5308_vm11, %v5745_v30, %v5747_v61  ;;  %v5789_v38 = vsel %vm5304_vm9, %v10188_v54, %v10120_v59  ;;  %v5803_v43 = vmax.f32 %v5799_v10, %v5801_v26  ;;  %v5845_v58 = vld [vmem:[#allocation6 + $0x73] sm:$0x1]  ;;  %v5849_v18 = vld [vmem:[#allocation6 + $0x7a] sm:$0x1]  ;;  %v5851_v42 = vld [vmem:[#allocation6 + $0x7b] sm:$0x1]  ;;  %6926 = vmatprep.subr.bf16.mxu1 %v6925_v57 }
 0x6f2   :  { %5707 = vrot.lane.b32.xlu1 %v5706_v0, %s6989_s0  ;;  %v5790_v19 = vsel %vm5306_vm10, %v10188_v54, %v5789_v38  ;;  %v5847_v11 = vmax.f32 %v5843_v3, %v5845_v58  ;;  %v5853_v24 = vmax.f32 %v5849_v18, %v5851_v42  ;;  %v5886_v6 = vld [vmem:[#allocation6 + $0x74] sm:$0x1]  ;;  %v5888_v7 = vld [vmem:[#allocation6 + $0x75] sm:$0x1]  ;;  %v5892_v31 = vld [vmem:[#allocation6 + $0x7c] sm:$0x1]  ;;  %v5823_v59 = vrot.slane %v5813_v35, %v10040_v46 }
 0x6f3   :  { %v5812_v63 = vmax.f32 %v5803_v43, %v5810_v1  ;;  %v5890_v2 = vmax.f32 %v5886_v6, %v5888_v7  ;;  %v5894_v5 = vld [vmem:[#allocation6 + $0x7d] sm:$0x1]  ;;  %v5929_v53 = vld [vmem:[#allocation6 + $0x76] sm:$0x1]  ;;  %v5931_v8 = vld [vmem:[#allocation6 + $0x77] sm:$0x1]  ;;  %v5749_v47 = vsel %vm5310_vm12, %v5745_v30, %v5748_v16  ;;  %v5791_v32 = vsel %vm5308_vm11, %v10188_v54, %v5790_v19 }
 0x6f4   :  { %v5855_v17 = vmax.f32 %v5847_v11, %v5853_v24  ;;  %v5896_v21 = vmax.f32 %v5892_v31, %v5894_v5  ;;  %v5933_v23 = vmax.f32 %v5929_v53, %v5931_v8  ;;  %v5935_v22 = vld [vmem:[#allocation6 + $0x7e] sm:$0x1]  ;;  %v5937_v28 = vld [vmem:[#allocation6 + $0x7f] sm:$0x1]  ;;  %6928 = vmatpush3.bf16.msra.mxu1 %v6927_v13  ;;  %v5661_v35 = vrot.slane %v5658_v44, 7  ;;  %v5980_v44 = vld [vmem:[%s10339_s5 + $0x40] sm:$0xff] }
 0x6f5   :  { %v5814_v33 = vmax.f32 %v5812_v63, 0.0  ;;  %v5939_v34 = vmax.f32 %v5935_v22, %v5937_v28  ;;  %v5979_v30 = vld [vmem:[%s10339_s5 + $0x38] sm:$0xff]  ;;  %v5981_v56 = vld [vmem:[%s10339_s5 + $0x48] sm:$0xff]  ;;  %v5792_v37 = vsel %vm5310_vm12, %v10188_v54, %v5791_v32  ;;  %6930 = vmatprep.subr.bf16.mxu1 %v6929_v50  ;;  %v5866_v1 = vrot.slane %v5856_v14, %v10040_v46  ;;  %v5998_v0 = vld [vmem:[%s10339_s5 + $0xd0] sm:$0xff] }
 0x6f6   :  { %5750 = vrot.lane.b32.xlu1 %v5749_v47, %s6991_s14  ;;  %v5857_v12 = vmax.f32 %v5855_v17, 0.0  ;;  %v5898_v25 = vmax.f32 %v5890_v2, %v5896_v21  ;;  %v6931_v39 = vpack.c.bf16 %v5979_v30, %v5978_v51  ;;  %v5662_v52 = vsel %vm5304_vm9, %v5661_v35, %v5651_v9  ;;  %v5999_v16 = vld [vmem:[%s10339_s5 + $0xd8] sm:$0xff]  ;;  %v5982_v38 = vld [vmem:[%s10339_s5 + $0x50] sm:$0xff]  ;;  %v6000_v2 = vld [vmem:[%s10339_s5 + $0xe0] sm:$0xff] }
 0x6f7   :  { %v5830_v48 = vrot.slane %v5814_v33, %v10040_v46  ;;  %v5941_v49 = vmax.f32 %v5933_v23, %v5939_v34  ;;  %v5663_v57 = vsel %vm5306_vm10, %v5661_v35, %v5662_v52  ;;  %v6935_v26 = vpack.c.bf16 %v5981_v56, %v5980_v44  ;;  %v5983_v18 = vld [vmem:[%s10339_s5 + $0x58] sm:$0xff]  ;;  %v6002_v47 = vld [vmem:[%s10339_s5 + $0xf0] sm:$0xff] }
 0x6f8   :  { %v5873_v29 = vrot.slane %v5857_v12, %v10040_v46  ;;  %v5900_v27 = vmax.f32 %v5898_v25, 0.0  ;;  %v5664_v10 = vsel %vm5308_vm11, %v5661_v35, %v5663_v57  ;;  %6932 = vmatpush3.bf16.msra.mxu1 %v6931_v39  ;;  %v5942_v14 = vmax.f32 %v10202_v62, 0.0  ;;  %v5985_v62 = vld [vmem:[%s10339_s5 + $0x68] sm:$0xff]  ;;  %v6003_v17 = vld [vmem:[%s10339_s5 + $0xf8] sm:$0xff]  ;;  %v5986_v20 = vld [vmem:[%s10339_s5 + $0x70] sm:$0xff] }
 0x6f9   :  { %v5833_v60 = vrot.slane %v5830_v48, 7  ;;  %v5943_v61 = vmax.f32 %v5941_v49, 0.0  ;;  %v5665_v13 = vsel %vm5310_vm12, %v5661_v35, %v5664_v10  ;;  %6934 = vmatprep.subr.bf16.mxu1 %v6933_v55  ;;  %v6937_v58 = vpack.c.bf16 %v5999_v16, %v5998_v0  ;;  %v5987_v32 = vld [vmem:[%s10339_s5 + $0x78] sm:$0xff]  ;;  %v6623_v10 = vld [vmem:[%s10341_s6] ss:$0 sm:$0xff] }
 0x6fa   :  { %5793 = vrot.lane.b32.xlu1 %v5792_v37, %s6993_s30  ;;  %v5876_v3 = vrot.slane %v5873_v29, 7  ;;  %v5916_v54 = vrot.slane %v5900_v27, %v10040_v46  ;;  %5667 = vst.msk [vmem:[#allocation7 + $0x2] sm:$0x3] %vm5313_vm13, %v5665_v13  ;;  %v5909_v11 = vrot.slane %v5899_v41, %v10040_v46  ;;  %v6939_v9 = vpack.c.bf16 %v5983_v18, %v5982_v38  ;;  %v5984_v41 = vld [vmem:[%s10339_s5 + $0x60] sm:$0xff] }
 0x6fb   :  { %v5834_v4 = vsel %vm5304_vm9, %v5833_v60, %v5823_v59  ;;  %v5959_v43 = vrot.slane %v5943_v61, %v10040_v46  ;;  %v5952_v53 = vrot.slane %v5942_v14, %v10040_v46  ;;  %v6941_v8 = vpack.c.bf16 %v6001_v15, %v6000_v2 }
 0x6fc   :  { %v5835_v42 = vsel %vm5306_vm10, %v5833_v60, %v5834_v4  ;;  %v5877_v19 = vsel %vm5304_vm9, %v5876_v3, %v5866_v1  ;;  %v5919_v24 = vrot.slane %v5916_v54, 7  ;;  %6936 = vmatpush3.bf16.msra.mxu1 %v6935_v26  ;;  %v6943_v22 = vpack.c.bf16 %v5985_v62, %v5984_v41  ;;  %v6625_v54 = vld [vmem:[%s10342_s7] ss:$0 sm:$0xff] }
 0x6fd   :  { %v5836_v6 = vsel %vm5308_vm11, %v5833_v60, %v5835_v42  ;;  %v5878_v7 = vsel %vm5306_vm10, %v5876_v3, %v5877_v19  ;;  %v5962_v31 = vrot.slane %v5959_v43, 7  ;;  %6938 = vmatprep.subr.bf16.mxu1 %v6937_v58  ;;  %v6945_v28 = vpack.c.bf16 %v6003_v17, %v6002_v47 }
 0x6fe   :  { %v5837_v63 = vsel %vm5310_vm12, %v5833_v60, %v5836_v6  ;;  %v5920_v59 = vsel %vm5304_vm9, %v5919_v24, %v5909_v11  ;;  %v5879_v5 = vsel %vm5308_vm11, %v5876_v3, %v5878_v7  ;;  %v6947_v35 = vpack.c.bf16 %v5987_v32, %v5986_v20 }
 0x6ff   :  { %5838 = vrot.lane.b32.xlu1 %v5837_v63, %s6995_s18  ;;  %v5921_v21 = vsel %vm5306_vm10, %v5919_v24, %v5920_v59  ;;  %v5963_v23 = vsel %vm5304_vm9, %v5962_v31, %v5952_v53  ;;  %v5880_v46 = vsel %vm5310_vm12, %v5876_v3, %v5879_v5  ;;  %v14_v60 = vstv %s10340_s8 }
 0x700   :  { %6940 = vmatpush3.bf16.msra.mxu1 %v6939_v9  ;;  %v5922_v33 = vsel %vm5308_vm11, %v5919_v24, %v5921_v21  ;;  %v5964_v34 = vsel %vm5306_vm10, %v5962_v31, %v5963_v23  ;;  %15 = vst [vmem:[#allocation8] sm:$0x1] %v14_v60 }
 0x701   :  { %6942 = vmatprep.subr.bf16.mxu1 %v6941_v8  ;;  %v5923_v36 = vsel %vm5310_vm12, %v5919_v24, %v5922_v33  ;;  %v5965_v51 = vsel %vm5308_vm11, %v5962_v31, %v5964_v34 }
 0x702   :  { %v5966_v30 = vsel %vm5310_vm12, %v5962_v31, %v5965_v51 }
 0x703   :  { %5881 = vrot.lane.b32.xlu1 %v5880_v46, %s6997_s4 }
 0x704   :  { %6944 = vmatpush3.bf16.msra.mxu1 %v6943_v22 }
 0x705   :  { %6946 = vmatprep.subr.bf16.mxu1 %v6945_v28 }
 0x707   :  { %5924 = vrot.lane.b32.xlu1 %v5923_v36, %s6998_s24  ;;  %v6626_v38 = vld [vmem:[#allocation8] ss:$0 sm:$0xff] }
 0x708   :  { %6948 = vmatpush3.bf16.msra.mxu1 %v6947_v35 }
 0x70b   :  { %5967 = vrot.lane.b32.xlu1 %v5966_v30, %s6999_s15 }
 0x71d   :  { %v5355_v12 = vpop.permute.xlu0 %5354 }
 0x71e   :  { %5358 = vst.msk [vmem:[#allocation7] sm:$0x3] %vm5357_vm14, %v5355_v12 }
 0x721   :  { %v5399_v25 = vpop.permute.xlu0 %5398 }
 0x722   :  { %5402 = vst.msk [vmem:[#allocation7] sm:$0x3] %vm5401_vm15, %v5399_v25 }
 0x725   :  { %v5443_v50 = vpop.permute.xlu0 %5442 }
 0x726   :  { %5446 = vst.msk [vmem:[#allocation7] sm:$0x3] %vm5445_vm0, %v5443_v50 }
 0x73d   :  { %v5489_v39 = vpop.permute.xlu0 %5488 }
 0x73e   :  { %5492 = vst.msk [vmem:[#allocation7] sm:$0x3] %vm5491_vm1, %v5489_v39 }
 0x741   :  { %v5533_v45 = vpop.permute.xlu0 %5532 }
 0x742   :  { %5536 = vst.msk [vmem:[#allocation7] sm:$0x3] %vm5535_vm2, %v5533_v45 }
 0x745   :  { %v5577_v40 = vpop.permute.xlu0 %5576 }
 0x746   :  { %5580 = vst.msk [vmem:[#allocation7] sm:$0x3] %vm5579_vm3, %v5577_v40 }
 0x749   :  { %v5621_v44 = vpop.permute.xlu0 %5620 }
 0x74a   :  { %5624 = vst.msk [vmem:[#allocation7] sm:$0x3] %vm5623_vm4, %v5621_v44 }
 0x764   :  { %v5708_v48 = vpop.permute.xlu1 %5707 }
 0x765   :  { %5710 = vst.msk [vmem:[#allocation7 + $0x2] sm:$0x3] %vm5357_vm14, %v5708_v48 }
 0x768   :  { %v5751_v49 = vpop.permute.xlu1 %5750 }
 0x769   :  { %5753 = vst.msk [vmem:[#allocation7 + $0x2] sm:$0x3] %vm5401_vm15, %v5751_v49 }
 0x76c   :  { %v5794_v52 = vpop.permute.xlu1 %5793 }
 0x76d   :  { %5796 = vst.msk [vmem:[#allocation7 + $0x2] sm:$0x3] %vm5445_vm0, %v5794_v52 }
 0x771   :  { %v5839_v55 = vpop.permute.xlu1 %5838 }
 0x772   :  { %5841 = vst.msk [vmem:[#allocation7 + $0x2] sm:$0x3] %vm5491_vm1, %v5839_v55 }
 0x775   :  { %v5882_v56 = vpop.permute.xlu1 %5881 }
 0x776   :  { %5884 = vst.msk [vmem:[#allocation7 + $0x2] sm:$0x3] %vm5535_vm2, %v5882_v56 }
 0x779   :  { %v5925_v37 = vpop.permute.xlu1 %5924 }
 0x77a   :  { %5927 = vst.msk [vmem:[#allocation7 + $0x2] sm:$0x3] %vm5579_vm3, %v5925_v37 }
 0x77d   :  { %v5968_v29 = vpop.permute.xlu1 %5967 }
 0x77e   :  { %5970 = vst.msk [vmem:[#allocation7 + $0x2] sm:$0x3] %vm5623_vm4, %v5968_v29 }
 0x785   :  { %v6624_v27 = vld.sshfl [vmem:[#allocation7] sm:$0x33 pattern:$0x76325410] }
 0x786   :  { %v6019_v57 = vcombine.high %v6624_v27, %v6624_v27 }
 0x788   :  { %6086 = vmatprep.mubr.f32.mxu1 %v6019_v57 }
 0x789   :  { %6087 = vmatmul.mubr.f32.vlgmr.msra.gmra.mrb[38].mxu1 %v6624_v27 }
 0x85c   :  { %v6750_v61 = vpop.f32.mrb[38].mxu1 }
 0x85d   :  { %v6751_v26 = vpop.f32.mrb[39].mxu1 }
 0x85e   :  { %v6752_v1 = vadd.f32 %v6751_v26, %v6750_v61 }
 0x860   :  { %v6089_v3 = vadd.f32 %v6752_v1, %v6623_v10 }
 0x862   :  { %v6092_v13 = vmax.f32 %v6089_v3, 0.0 }
 0x864   :  { %v6100_v0 = vmul.f32 %v6625_v54, %v6092_v13 }
 0x866   :  { %v6102_v16 = vsel %vm6101_vm5, %v6100_v0, 0.0 }
 0x867   :  { %6103 = vadd.xlane.f32.xlu0 %v6102_v16 }
 0x8f4   :  { %v6104_v4 = vpop.xlane.xlu0 %6103 }
 0x8f5   :  { %v6112_v14 = vadd.f32 %v6626_v38, %v6104_v4 }
 0x8f7   :  { %v6113_v43 = vsub.f32 0.0, %v6112_v14 }
 0x8f9   :  { %v6114_v58 = vmul.f32 1.442695, %v6113_v43 }
 0x8fb   :  { %6972 = vpow2.f32 %v6114_v58 }
 0x905   :  { %v6973_v18 = vpop.eup %6972 }
 0x906   :  { %v6116_v42 = vadd.f32 1.0, %v6973_v18 }
 0x908   :  { %6974 = vrcp.f32 %v6116_v42 }
 0x912   :  { %v6975_v19 = vpop.eup %6974 }
 0x913   :  { %6120 = vst.msk [vmem:[%s10343_s9] sm:$0x3] %vm6119_vm6, %v6975_v19 }

</bundles_post_ra>
